<compile_context>
chip_gen: v6e
topology: v6e:2x2x1
jax: 0.10.0
libtpu: 0.0.40
codegen_flags: <defaults>
</compile_context>

<pallas_src>
import math
import functools

import jax
import jax.numpy as jnp
from jax.experimental import pallas as pl
from jax.experimental.pallas import tpu as pltpu

NEG_MASK = -1e9    # matches PyTorch masked_fill value
NEG_PAD = -1e30    # padded / cross-block keys vanish from the softmax entirely


# ------------------------------ Pallas kernel ------------------------------- #

def _fused_kernel(fuseb_ref, rel_ref, abs_ref, scene_ref, other_ref,
                  rtime_ref, ktime_ref, rped_ref, kped_ref,
                  e1w_ref, e1b_ref, e2w_ref, e2b_ref,
                  wi_ref, bi_ref, wo_ref, bo_ref, wg_ref, bg_ref,
                  *rest, peds, T, D):
    (md_w0, md_b0, md_w1, md_b1, md_w2, md_b2,
     md_w3, md_b3, md_w4, md_b4) = rest[0:10]
    (go_w0, go_b0, go_w1, go_b1, go_w2, go_b2,
     go_w3, go_b3, go_w4, go_b4) = rest[10:20]
    multi_ref, others_ref, pmap_ref, nmap_ref = rest[20:24]
    temp_scr, sr_scr, fin_scr = rest[24:27]

    f32 = jnp.float32
    t = pl.program_id(0)
    scale = f32(1.0 / math.sqrt(D))
    neg_mask = f32(NEG_MASK)
    neg_pad = f32(NEG_PAD)

    rtime = rtime_ref[...]        # (N,1) int32 : query time index
    ktime = ktime_ref[...]        # (1,N) int32 : key time index

    def mlp_tail(h, w1, b1, w2, b2, w3, b3, w4, b4):
        h = jnp.maximum(jnp.dot(h, w1[...], preferred_element_type=f32) + b1[...], 0.0)
        h = jnp.maximum(jnp.dot(h, w2[...], preferred_element_type=f32) + b2[...], 0.0)
        h = jnp.dot(h, w3[...], preferred_element_type=f32) + b3[...]      # MLP out layer
        return jnp.dot(h, w4[...], preferred_element_type=f32) + b4[...]   # trailing Linear

    def com_attention(feat, wi, bi, wo, bo, wg, bg, b_fuse, dmask, add_bias):
        # packed input projections: one (M,32)x(32,256) GEMM
        proj = jnp.dot(feat, wi, preferred_element_type=f32) + bi
        q_c, k_c = proj[:, 0:D], proj[:, D:2 * D]
        q_p, k_p, v_p = proj[:, 2 * D:3 * D], proj[:, 3 * D:4 * D], proj[:, 4 * D:5 * D]
        q_n, k_n, v_n = proj[:, 5 * D:6 * D], proj[:, 6 * D:7 * D], proj[:, 7 * D:8 * D]

        # fusion conv stack (head==1) == sigmoid(A*s + B); A folded into q_liner.
        s_c = jnp.einsum("md,nd->mn", q_c, k_c, preferred_element_type=f32) * scale
        sc = jax.nn.sigmoid(s_c + b_fuse)
        p_mask = jnp.where(sc > 0.5, sc, 0.0) * dmask
        n_mask = jnp.where(sc <= 0.5, sc, 0.0) * dmask

        def mattn(q, k, v, m):
            s = jnp.einsum("md,nd->mn", q, k, preferred_element_type=f32) * scale
            s = jnp.where(m == 0.0, neg_mask, s) + add_bias
            s = s - jnp.max(s, axis=-1, keepdims=True)
            e = jnp.exp(s)
            p = e * pl.reciprocal(jnp.sum(e, axis=-1, keepdims=True), approx=True)
            return jnp.dot(p, v, preferred_element_type=f32), p

        p_ctx, p_prob = mattn(q_p, k_p, v_p, p_mask)
        n_ctx, n_prob = mattn(q_n, k_n, v_n, n_mask)

        # packed tail: [p|n] @ blockdiag(Wo_p,Wo_n) ; @ blockdiag([Wvp|Wgp],[Wvn|Wgp])
        pn = jnp.concatenate([p_ctx, n_ctx], axis=-1)
        o = jnp.dot(pn, wo, preferred_element_type=f32) + bo
        g = jnp.dot(o, wg, preferred_element_type=f32) + bg
        vp, ep = g[:, 0:D], g[:, D:2 * D]
        vn, en = g[:, 2 * D:3 * D], g[:, 3 * D:4 * D]
        mx = jnp.maximum(ep, en)
        ea = jnp.exp(ep - mx)
        eb = jnp.exp(en - mx)
        out = (vp * ea + vn * eb) * pl.reciprocal(ea + eb, approx=True)
        return out, p_prob, n_prob

    # ---- one-time work (grid step 0): embeddings, batched SR, gen_others ---- #
    @pl.when(t == 0)
    def _init():
        temporal = jnp.dot(rel_ref[...], e1w_ref[...],
                           preferred_element_type=f32) + e1b_ref[...]
        spatio = jnp.dot(abs_ref[...], e2w_ref[...],
                         preferred_element_type=f32) + e2b_ref[...]
        feature = temporal + spatio              # (N,32) time-major
        temp_scr[...] = temporal
        fin_scr[...] = jnp.zeros_like(fin_scr)

        # all 8 SR ComAttention calls as ONE same-time block-diagonal attention
        same_t = rtime == ktime
        sr_bias = jnp.where(same_t, 0.0, neg_pad)
        sr_out, p_prob, n_prob = com_attention(
            feature, wi_ref[0], bi_ref[0], wo_ref[0], bo_ref[0],
            wg_ref[0], bg_ref[0], fuseb_ref[:, 0:1], scene_ref[...], sr_bias)
        sr_scr[...] = sr_out
        pmap_ref[...] = p_prob
        nmap_ref[...] = n_prob

        # gen_others MLP (independent of the TR recurrence)
        h = jnp.maximum(jnp.dot(other_ref[...], go_w0[...],
                                preferred_element_type=f32) + go_b0[...], 0.0)
        others_ref[...] = mlp_tail(h, go_w1, go_b1, go_w2, go_b2,
                                   go_w3, go_b3, go_w4, go_b4)

    # ---- TR step t: same-ped block-diagonal attention, state in fin_scr ---- #
    same_p = rped_ref[...] == kped_ref[...]
    tr_dmask = jnp.where(jnp.logical_and(same_p, ktime <= rtime), 1.0, 0.0)
    tr_bias = (jnp.where(same_p, 0.0, neg_pad)
               + jnp.where(ktime > t, neg_pad, 0.0))
    tr_in = jnp.where(rtime == t, sr_scr[...], fin_scr[...])
    tr_out, _, _ = com_attention(
        tr_in, wi_ref[1], bi_ref[1], wo_ref[1], bo_ref[1],
        wg_ref[1], bg_ref[1], fuseb_ref[:, 1:2], tr_dmask, tr_bias)
    fin_scr[...] = jnp.where(rtime <= t, tr_out, fin_scr[...])

    # ---- final step: gen_multi_dest on (final_feature + temporal_feature) ---- #
    @pl.when(t == T - 1)
    def _finalize():
        past = fin_scr[...] + temp_scr[...]      # (N,32) time-major
        # Linear(256,128) as sum of 8 per-time (peds,32)x(32,128) dots
        h = jnp.dot(past[0:peds, :], md_w0[0], preferred_element_type=f32)
        for s in range(1, T):
            h = h + jnp.dot(past[s * peds:(s + 1) * peds, :], md_w0[s],
                            preferred_element_type=f32)
        h = jnp.maximum(h + md_b0[...], 0.0)
        multi_ref[...] = mlp_tail(h, md_w1, md_b1, md_w2, md_b2,
                                  md_w3, md_b3, md_w4, md_b4)


def _full_spec(a):
    nd = a.ndim
    return pl.BlockSpec(a.shape, lambda t, _n=nd: (0,) * _n)


def fused_forward_call(packed, rel_tm, abs_tm, scene_full, other_in,
                       rtime, ktime, rped, kped, *, peds, T, D):
    N = peds * T
    args = ([packed["fuse_b"], rel_tm, abs_tm, scene_full, other_in,
             rtime, ktime, rped, kped,
             packed["emb1_w"], packed["emb1_b"], packed["emb2_w"], packed["emb2_b"],
             packed["w_in"], packed["b_in"], packed["w_o"], packed["b_o"],
             packed["w_g"], packed["b_g"]]
            + list(packed["md"]) + list(packed["go"]))
    kernel = functools.partial(_fused_kernel, peds=peds, T=T, D=D)
    out_shape = (jax.ShapeDtypeStruct((peds, 100), jnp.float32),
                 jax.ShapeDtypeStruct((peds, 22), jnp.float32),
                 jax.ShapeDtypeStruct((N, N), jnp.float32),
                 jax.ShapeDtypeStruct((N, N), jnp.float32))
    out_specs = (pl.BlockSpec((peds, 100), lambda t: (0, 0)),
                 pl.BlockSpec((peds, 22), lambda t: (0, 0)),
                 pl.BlockSpec((N, N), lambda t: (0, 0)),
                 pl.BlockSpec((N, N), lambda t: (0, 0)))
    scratch_shapes = [pltpu.VMEM((N, D), jnp.float32),
                      pltpu.VMEM((N, D), jnp.float32),
                      pltpu.VMEM((N, D), jnp.float32)]
    return pl.pallas_call(
        kernel,
        out_shape=out_shape,
        grid=(T,),
        in_specs=[_full_spec(a) for a in args],
        out_specs=out_specs,
        scratch_shapes=scratch_shapes,
        compiler_params=pltpu.CompilerParams(dimension_semantics=("arbitrary",)),
    )(*args)


# --------------------------- parameter construction ------------------------- #

def init_linear(key, in_dim, out_dim):
    k1, k2 = jax.random.split(key)
    bound = 1.0 / math.sqrt(in_dim)
    return {
        "w": jax.random.uniform(k1, (in_dim, out_dim), jnp.float32, -bound, bound),
        "b": jax.random.uniform(k2, (1, out_dim), jnp.float32, -bound, bound),
    }


def init_mha(key, d_model):
    ks = jax.random.split(key, 4)
    return {"q": init_linear(ks[0], d_model, d_model),
            "k": init_linear(ks[1], d_model, d_model),
            "v": init_linear(ks[2], d_model, d_model),
            "o": init_linear(ks[3], d_model, d_model)}


def init_com_attention(key, head, d_model):
    ks = jax.random.split(key, 11)
    return {
        "head": head, "d_model": d_model,
        "q_liner": init_linear(ks[0], d_model, d_model),
        "k_liner": init_linear(ks[1], d_model, d_model),
        "f1": init_linear(ks[2], head, 2 * head),   # Conv2d(head, 2*head, 1)
        "f2": init_linear(ks[3], 2 * head, head),   # Conv2d(2*head, head, 1)
        "f3": init_linear(ks[4], head, 1),          # Conv2d(head, 1, 1)
        "p_attn": init_mha(ks[5], d_model),
        "n_attn": init_mha(ks[6], d_model),
        "gate_n": init_linear(ks[7], d_model, d_model),  # dead in original forward
        "gate_p": init_linear(ks[8], d_model, d_model),
        "v_n": init_linear(ks[9], d_model, d_model),
        "v_p": init_linear(ks[10], d_model, d_model),
    }


def init_mlp_seq(key, dims):
    ks = jax.random.split(key, len(dims) - 1)
    return [init_linear(ks[i], dims[i], dims[i + 1]) for i in range(len(dims) - 1)]


def init_model(key):
    ks = jax.random.split(key, 6)
    return {
        "embed": init_linear(ks[0], 2, 32),
        "embed2": init_linear(ks[1], 2, 32),
        "TRmodel": init_com_attention(ks[2], 1, 32),
        "SRmodel": init_com_attention(ks[3], 1, 32),
        # MLP(18, 64, [128,256,128]) + Linear(64, 22)
        "gen_others": init_mlp_seq(ks[4], [18, 128, 256, 128, 64, 22]),
        # MLP(256, 64, [128,256,128]) + Linear(64, 100)
        "gen_multi_dest": init_mlp_seq(ks[5], [256, 128, 256, 128, 64, 100]),
    }


def pack_com_params(p):
    """Pack one ComAttention (head==1) for the fused kernel."""
    assert p["head"] == 1
    D = p["d_model"]
    f1w, f1b = p["f1"]["w"], p["f1"]["b"]
    f2w, f2b = p["f2"]["w"], p["f2"]["b"]
    f3w, f3b = p["f3"]["w"], p["f3"]["b"]
    A = (f1w @ f2w @ f3w)[0, 0]                          # collapse 1x1-conv stack
    B = ((f1b @ f2w + f2b) @ f3w + f3b)[0, 0]
    # A folded into the q_liner block -> in-kernel sigmoid(score + B)
    w_in = jnp.concatenate(
        [A * p["q_liner"]["w"], p["k_liner"]["w"],
         p["p_attn"]["q"]["w"], p["p_attn"]["k"]["w"], p["p_attn"]["v"]["w"],
         p["n_attn"]["q"]["w"], p["n_attn"]["k"]["w"], p["n_attn"]["v"]["w"]], axis=1)
    b_in = jnp.concatenate(
        [A * p["q_liner"]["b"], p["k_liner"]["b"],
         p["p_attn"]["q"]["b"], p["p_attn"]["k"]["b"], p["p_attn"]["v"]["b"],
         p["n_attn"]["q"]["b"], p["n_attn"]["k"]["b"], p["n_attn"]["v"]["b"]], axis=1)
    w_o = jnp.zeros((2 * D, 2 * D), jnp.float32)
    w_o = w_o.at[:D, :D].set(p["p_attn"]["o"]["w"]).at[D:, D:].set(p["n_attn"]["o"]["w"])
    b_o = jnp.concatenate([p["p_attn"]["o"]["b"], p["n_attn"]["o"]["b"]], axis=1)
    # [v_p | gate_p] on the p branch, [v_n | gate_p] on the n branch (gate_p twice,
    # matching the original forward)
    w_g = jnp.zeros((2 * D, 4 * D), jnp.float32)
    w_g = (w_g.at[:D, 0:D].set(p["v_p"]["w"])
               .at[:D, D:2 * D].set(p["gate_p"]["w"])
               .at[D:, 2 * D:3 * D].set(p["v_n"]["w"])
               .at[D:, 3 * D:4 * D].set(p["gate_p"]["w"]))
    b_g = jnp.concatenate([p["v_p"]["b"], p["gate_p"]["b"],
                           p["v_n"]["b"], p["gate_p"]["b"]], axis=1)
    return {"w_in": w_in, "b_in": b_in, "w_o": w_o, "b_o": b_o,
            "w_g": w_g, "b_g": b_g, "B": B}


def pack_model_params(params, T=8, D=32):
    sr = pack_com_params(params["SRmodel"])
    tr = pack_com_params(params["TRmodel"])
    md = params["gen_multi_dest"]
    go = params["gen_others"]
    md_flat = [md[0]["w"].reshape(T, D, md[0]["w"].shape[1]), md[0]["b"]]
    for layer in md[1:]:
        md_flat += [layer["w"], layer["b"]]
    go_flat = []
    for layer in go:
        go_flat += [layer["w"], layer["b"]]
    return {
        "emb1_w": params["embed"]["w"], "emb1_b": params["embed"]["b"],
        "emb2_w": params["embed2"]["w"], "emb2_b": params["embed2"]["b"],
        "fuse_b": jnp.stack([sr["B"], tr["B"]]).reshape(1, 2).astype(jnp.float32),
        "w_in": jnp.stack([sr["w_in"], tr["w_in"]]),
        "b_in": jnp.stack([sr["b_in"], tr["b_in"]]),
        "w_o": jnp.stack([sr["w_o"], tr["w_o"]]),
        "b_o": jnp.stack([sr["b_o"], tr["b_o"]]),
        "w_g": jnp.stack([sr["w_g"], tr["w_g"]]),
        "b_g": jnp.stack([sr["b_g"], tr["b_g"]]),
        "md": md_flat,
        "go": go_flat,
    }


# ------------------------------ model forward ------------------------------- #

@functools.partial(jax.jit, static_argnames=("train",))
def model_forward(packed, traj, initial_pos, scene_mask, dest_gt, train=True):
    peds, T, _ = traj.shape            # T == 8
    D = 32
    N = peds * T

    rel = traj - traj[:, -1:, :]
    rel_tm = jnp.transpose(rel, (1, 0, 2)).reshape(N, 2)     # time-major
    abs_tm = jnp.transpose(traj, (1, 0, 2)).reshape(N, 2)
    scene_full = jnp.tile(scene_mask[0], (T, T))             # (N,N)
    other_in = jnp.concatenate([rel, dest_gt], axis=1).reshape(peds, 18)

    ids = jnp.arange(N, dtype=jnp.int32)
    times = ids // peds
    pids = ids % peds
    rtime = times.reshape(N, 1)
    ktime = times.reshape(1, N)
    rped = pids.reshape(N, 1)
    kped = pids.reshape(1, N)

    multi, others, pmap, nmap = fused_forward_call(
        packed, rel_tm, abs_tm, scene_full, other_in,
        rtime, ktime, rped, kped, peds=peds, T=T, D=D)

    multi_dest = multi.reshape(-1, 20, 5)
    if train:
        return multi_dest, others.reshape(-1, 11, 2)

    # visdata: per-step SR attention maps = same-time diagonal blocks
    p4 = pmap.reshape(T, peds, T, peds)
    n4 = nmap.reshape(T, peds, T, peds)
    tt = jnp.arange(T)
    mask_stack = jnp.stack([p4[tt, :, tt, :], n4[tt, :, tt, :]], axis=1)
    return multi_dest, (traj, mask_stack)


# ----------------------------------- main ------------------------------------ #

if __name__ == "__main__":
    key = jax.random.PRNGKey(0)
    k_par, k_traj, k_pos, k_dest = jax.random.split(key, 4)

    peds = 6
    traj = jax.random.normal(k_traj, (peds, 8, 2), jnp.float32)
    initial_pos = jax.random.normal(k_pos, (peds, 2), jnp.float32)
    scene_mask = jnp.ones((1, peds, peds), jnp.float32)
    dest_gt = jax.random.normal(k_dest, (peds, 1, 2), jnp.float32)

    params = init_model(k_par)
    packed = pack_model_params(params)

    multi_dest, others = model_forward(packed, traj, initial_pos, scene_mask,
                                       dest_gt, train=True)
    jax.block_until_ready((multi_dest, others))

    assert multi_dest.shape == (peds, 20, 5)
    assert others.shape == (peds, 11, 2)
    print("KERNEL_OK")
</pallas_src>

<mosaic_0001>
module attributes {stable_mosaic.version = 11 : i64} {
  func.func @_fused_kernel(%arg0: i32, %arg1: memref<1x2xf32, #tpu.memory_space<vmem>>, %arg2: memref<48x2xf32, #tpu.memory_space<vmem>>, %arg3: memref<48x2xf32, #tpu.memory_space<vmem>>, %arg4: memref<48x48xf32, #tpu.memory_space<vmem>>, %arg5: memref<6x18xf32, #tpu.memory_space<vmem>>, %arg6: memref<48x1xi32, #tpu.memory_space<vmem>>, %arg7: memref<1x48xi32, #tpu.memory_space<vmem>>, %arg8: memref<48x1xi32, #tpu.memory_space<vmem>>, %arg9: memref<1x48xi32, #tpu.memory_space<vmem>>, %arg10: memref<2x32xf32, #tpu.memory_space<vmem>>, %arg11: memref<1x32xf32, #tpu.memory_space<vmem>>, %arg12: memref<2x32xf32, #tpu.memory_space<vmem>>, %arg13: memref<1x32xf32, #tpu.memory_space<vmem>>, %arg14: memref<2x32x256xf32, #tpu.memory_space<vmem>>, %arg15: memref<2x1x256xf32, #tpu.memory_space<vmem>>, %arg16: memref<2x64x64xf32, #tpu.memory_space<vmem>>, %arg17: memref<2x1x64xf32, #tpu.memory_space<vmem>>, %arg18: memref<2x64x128xf32, #tpu.memory_space<vmem>>, %arg19: memref<2x1x128xf32, #tpu.memory_space<vmem>>, %arg20: memref<8x32x128xf32, #tpu.memory_space<vmem>>, %arg21: memref<1x128xf32, #tpu.memory_space<vmem>>, %arg22: memref<128x256xf32, #tpu.memory_space<vmem>>, %arg23: memref<1x256xf32, #tpu.memory_space<vmem>>, %arg24: memref<256x128xf32, #tpu.memory_space<vmem>>, %arg25: memref<1x128xf32, #tpu.memory_space<vmem>>, %arg26: memref<128x64xf32, #tpu.memory_space<vmem>>, %arg27: memref<1x64xf32, #tpu.memory_space<vmem>>, %arg28: memref<64x100xf32, #tpu.memory_space<vmem>>, %arg29: memref<1x100xf32, #tpu.memory_space<vmem>>, %arg30: memref<18x128xf32, #tpu.memory_space<vmem>>, %arg31: memref<1x128xf32, #tpu.memory_space<vmem>>, %arg32: memref<128x256xf32, #tpu.memory_space<vmem>>, %arg33: memref<1x256xf32, #tpu.memory_space<vmem>>, %arg34: memref<256x128xf32, #tpu.memory_space<vmem>>, %arg35: memref<1x128xf32, #tpu.memory_space<vmem>>, %arg36: memref<128x64xf32, #tpu.memory_space<vmem>>, %arg37: memref<1x64xf32, #tpu.memory_space<vmem>>, %arg38: memref<64x22xf32, #tpu.memory_space<vmem>>, %arg39: memref<1x22xf32, #tpu.memory_space<vmem>>, %arg40: memref<6x100xf32, #tpu.memory_space<vmem>>, %arg41: memref<6x22xf32, #tpu.memory_space<vmem>>, %arg42: memref<48x48xf32, #tpu.memory_space<vmem>>, %arg43: memref<48x48xf32, #tpu.memory_space<vmem>>, %arg44: memref<48x32xf32, #tpu.memory_space<vmem>>, %arg45: memref<48x32xf32, #tpu.memory_space<vmem>>, %arg46: memref<48x32xf32, #tpu.memory_space<vmem>>) attributes {dimension_semantics = [#tpu.dimension_semantics<arbitrary>], iteration_bounds = array<i64: 8>, scalar_prefetch = 0 : i64, scratch_operands = 3 : i64, tpu.core_type = #tpu.core_type<tc>, window_params = [{pipeline_mode = #tpu.pipeline_mode<synchronous>, transform_indices = @transform_0, window_bounds = array<i64: 1, 2>}, {pipeline_mode = #tpu.pipeline_mode<synchronous>, transform_indices = @transform_1, window_bounds = array<i64: 48, 2>}, {pipeline_mode = #tpu.pipeline_mode<synchronous>, transform_indices = @transform_2, window_bounds = array<i64: 48, 2>}, {pipeline_mode = #tpu.pipeline_mode<synchronous>, transform_indices = @transform_3, window_bounds = array<i64: 48, 48>}, {pipeline_mode = #tpu.pipeline_mode<synchronous>, transform_indices = @transform_4, window_bounds = array<i64: 6, 18>}, {pipeline_mode = #tpu.pipeline_mode<synchronous>, transform_indices = @transform_5, window_bounds = array<i64: 48, 1>}, {pipeline_mode = #tpu.pipeline_mode<synchronous>, transform_indices = @transform_6, window_bounds = array<i64: 1, 48>}, {pipeline_mode = #tpu.pipeline_mode<synchronous>, transform_indices = @transform_7, window_bounds = array<i64: 48, 1>}, {pipeline_mode = #tpu.pipeline_mode<synchronous>, transform_indices = @transform_8, window_bounds = array<i64: 1, 48>}, {pipeline_mode = #tpu.pipeline_mode<synchronous>, transform_indices = @transform_9, window_bounds = array<i64: 2, 32>}, {pipeline_mode = #tpu.pipeline_mode<synchronous>, transform_indices = @transform_10, window_bounds = array<i64: 1, 32>}, {pipeline_mode = #tpu.pipeline_mode<synchronous>, transform_indices = @transform_11, window_bounds = array<i64: 2, 32>}, {pipeline_mode = #tpu.pipeline_mode<synchronous>, transform_indices = @transform_12, window_bounds = array<i64: 1, 32>}, {pipeline_mode = #tpu.pipeline_mode<synchronous>, transform_indices = @transform_13, window_bounds = array<i64: 2, 32, 256>}, {pipeline_mode = #tpu.pipeline_mode<synchronous>, transform_indices = @transform_14, window_bounds = array<i64: 2, 1, 256>}, {pipeline_mode = #tpu.pipeline_mode<synchronous>, transform_indices = @transform_15, window_bounds = array<i64: 2, 64, 64>}, {pipeline_mode = #tpu.pipeline_mode<synchronous>, transform_indices = @transform_16, window_bounds = array<i64: 2, 1, 64>}, {pipeline_mode = #tpu.pipeline_mode<synchronous>, transform_indices = @transform_17, window_bounds = array<i64: 2, 64, 128>}, {pipeline_mode = #tpu.pipeline_mode<synchronous>, transform_indices = @transform_18, window_bounds = array<i64: 2, 1, 128>}, {pipeline_mode = #tpu.pipeline_mode<synchronous>, transform_indices = @transform_19, window_bounds = array<i64: 8, 32, 128>}, {pipeline_mode = #tpu.pipeline_mode<synchronous>, transform_indices = @transform_20, window_bounds = array<i64: 1, 128>}, {pipeline_mode = #tpu.pipeline_mode<synchronous>, transform_indices = @transform_21, window_bounds = array<i64: 128, 256>}, {pipeline_mode = #tpu.pipeline_mode<synchronous>, transform_indices = @transform_22, window_bounds = array<i64: 1, 256>}, {pipeline_mode = #tpu.pipeline_mode<synchronous>, transform_indices = @transform_23, window_bounds = array<i64: 256, 128>}, {pipeline_mode = #tpu.pipeline_mode<synchronous>, transform_indices = @transform_24, window_bounds = array<i64: 1, 128>}, {pipeline_mode = #tpu.pipeline_mode<synchronous>, transform_indices = @transform_25, window_bounds = array<i64: 128, 64>}, {pipeline_mode = #tpu.pipeline_mode<synchronous>, transform_indices = @transform_26, window_bounds = array<i64: 1, 64>}, {pipeline_mode = #tpu.pipeline_mode<synchronous>, transform_indices = @transform_27, window_bounds = array<i64: 64, 100>}, {pipeline_mode = #tpu.pipeline_mode<synchronous>, transform_indices = @transform_28, window_bounds = array<i64: 1, 100>}, {pipeline_mode = #tpu.pipeline_mode<synchronous>, transform_indices = @transform_29, window_bounds = array<i64: 18, 128>}, {pipeline_mode = #tpu.pipeline_mode<synchronous>, transform_indices = @transform_30, window_bounds = array<i64: 1, 128>}, {pipeline_mode = #tpu.pipeline_mode<synchronous>, transform_indices = @transform_31, window_bounds = array<i64: 128, 256>}, {pipeline_mode = #tpu.pipeline_mode<synchronous>, transform_indices = @transform_32, window_bounds = array<i64: 1, 256>}, {pipeline_mode = #tpu.pipeline_mode<synchronous>, transform_indices = @transform_33, window_bounds = array<i64: 256, 128>}, {pipeline_mode = #tpu.pipeline_mode<synchronous>, transform_indices = @transform_34, window_bounds = array<i64: 1, 128>}, {pipeline_mode = #tpu.pipeline_mode<synchronous>, transform_indices = @transform_35, window_bounds = array<i64: 128, 64>}, {pipeline_mode = #tpu.pipeline_mode<synchronous>, transform_indices = @transform_36, window_bounds = array<i64: 1, 64>}, {pipeline_mode = #tpu.pipeline_mode<synchronous>, transform_indices = @transform_37, window_bounds = array<i64: 64, 22>}, {pipeline_mode = #tpu.pipeline_mode<synchronous>, transform_indices = @transform_38, window_bounds = array<i64: 1, 22>}, {pipeline_mode = #tpu.pipeline_mode<synchronous>, transform_indices = @transform_39, window_bounds = array<i64: 6, 100>}, {pipeline_mode = #tpu.pipeline_mode<synchronous>, transform_indices = @transform_40, window_bounds = array<i64: 6, 22>}, {pipeline_mode = #tpu.pipeline_mode<synchronous>, transform_indices = @transform_41, window_bounds = array<i64: 48, 48>}, {pipeline_mode = #tpu.pipeline_mode<synchronous>, transform_indices = @transform_42, window_bounds = array<i64: 48, 48>}]} {
    %c0 = arith.constant 0 : index
    %c0_0 = arith.constant 0 : index
    %0 = vector.load %arg6[%c0, %c0_0] : memref<48x1xi32, #tpu.memory_space<vmem>>, vector<48x1xi32>
    %c0_1 = arith.constant 0 : index
    %c0_2 = arith.constant 0 : index
    %1 = vector.load %arg7[%c0_1, %c0_2] : memref<1x48xi32, #tpu.memory_space<vmem>>, vector<1x48xi32>
    %c0_i32 = arith.constant 0 : i32
    %2 = arith.cmpi eq, %arg0, %c0_i32 : i32
    %3 = arith.extui %2 : i1 to i32
    %cst = arith.constant -1.000000e+30 : f32
    %cst_3 = arith.constant 0.176776692 : f32
    %cst_4 = arith.constant -1.000000e+09 : f32
    %c0_i32_5 = arith.constant 0 : i32
    %4 = arith.cmpi ne, %3, %c0_i32_5 : i32
    scf.if %4 {
      %c0_68 = arith.constant 0 : index
      %c0_69 = arith.constant 0 : index
      %148 = vector.load %arg2[%c0_68, %c0_69] : memref<48x2xf32, #tpu.memory_space<vmem>>, vector<48x2xf32>
      %c0_70 = arith.constant 0 : index
      %c0_71 = arith.constant 0 : index
      %149 = vector.load %arg10[%c0_70, %c0_71] : memref<2x32xf32, #tpu.memory_space<vmem>>, vector<2x32xf32>
      %cst_72 = arith.constant dense<0.000000e+00> : vector<48x32xf32>
      %150 = tpu.matmul %148, %149, %cst_72 {dimension_numbers = #tpu.dot_dimension_numbers<[1], [0], [0], [1], [0, 0, 1, 1], [], []>} : vector<48x2xf32>, vector<2x32xf32>, vector<48x32xf32> -> vector<48x32xf32>
      %c0_73 = arith.constant 0 : index
      %c0_74 = arith.constant 0 : index
      %151 = vector.load %arg11[%c0_73, %c0_74] : memref<1x32xf32, #tpu.memory_space<vmem>>, vector<1x32xf32>
      %152 = vector.broadcast %151 : vector<1x32xf32> to vector<48x32xf32>
      %153 = arith.addf %150, %152 : vector<48x32xf32>
      %c0_75 = arith.constant 0 : index
      %c0_76 = arith.constant 0 : index
      %154 = vector.load %arg3[%c0_75, %c0_76] : memref<48x2xf32, #tpu.memory_space<vmem>>, vector<48x2xf32>
      %c0_77 = arith.constant 0 : index
      %c0_78 = arith.constant 0 : index
      %155 = vector.load %arg12[%c0_77, %c0_78] : memref<2x32xf32, #tpu.memory_space<vmem>>, vector<2x32xf32>
      %cst_79 = arith.constant dense<0.000000e+00> : vector<48x32xf32>
      %156 = tpu.matmul %154, %155, %cst_79 {dimension_numbers = #tpu.dot_dimension_numbers<[1], [0], [0], [1], [0, 0, 1, 1], [], []>} : vector<48x2xf32>, vector<2x32xf32>, vector<48x32xf32> -> vector<48x32xf32>
      %c0_80 = arith.constant 0 : index
      %c0_81 = arith.constant 0 : index
      %157 = vector.load %arg13[%c0_80, %c0_81] : memref<1x32xf32, #tpu.memory_space<vmem>>, vector<1x32xf32>
      %158 = vector.broadcast %157 : vector<1x32xf32> to vector<48x32xf32>
      %159 = arith.addf %156, %158 : vector<48x32xf32>
      %160 = arith.addf %153, %159 : vector<48x32xf32>
      %c0_82 = arith.constant 0 : index
      %c0_83 = arith.constant 0 : index
      %161 = vector.load %arg44[%c0_82, %c0_83] : memref<48x32xf32, #tpu.memory_space<vmem>>, vector<48x32xf32>
      tpu.vector_store %arg44[%c0_82, %c0_83], %153 {strides = array<i32>} : memref<48x32xf32, #tpu.memory_space<vmem>>, vector<48x32xf32>,
      %cst_84 = arith.constant 0.000000e+00 : f32
      %162 = vector.broadcast %cst_84 : f32 to vector<48x32xf32>
      %c0_85 = arith.constant 0 : index
      %c0_86 = arith.constant 0 : index
      %163 = vector.load %arg46[%c0_85, %c0_86] : memref<48x32xf32, #tpu.memory_space<vmem>>, vector<48x32xf32>
      tpu.vector_store %arg46[%c0_85, %c0_86], %162 {strides = array<i32>} : memref<48x32xf32, #tpu.memory_space<vmem>>, vector<48x32xf32>,
      %164 = vector.broadcast %0 : vector<48x1xi32> to vector<48x48xi32>
      %165 = vector.broadcast %1 : vector<1x48xi32> to vector<48x48xi32>
      %166 = arith.cmpi eq, %164, %165 : vector<48x48xi32>
      %cst_87 = arith.constant 0.000000e+00 : f32
      %167 = vector.broadcast %cst_87 : f32 to vector<48x48xf32>
      %168 = vector.broadcast %cst : f32 to vector<48x48xf32>
      %169 = arith.select %166, %167, %168 : vector<48x48xi1>, vector<48x48xf32>
      %c0_88 = arith.constant 0 : index
      %c0_89 = arith.constant 0 : index
      %c0_90 = arith.constant 0 : index
      %170 = vector.load %arg14[%c0_88, %c0_89, %c0_90] : memref<2x32x256xf32, #tpu.memory_space<vmem>>, vector<1x32x256xf32>
      %171 = vector.shape_cast %170 : vector<1x32x256xf32> to vector<32x256xf32>
      %c0_91 = arith.constant 0 : index
      %c0_92 = arith.constant 0 : index
      %c0_93 = arith.constant 0 : index
      %172 = vector.load %arg15[%c0_91, %c0_92, %c0_93] : memref<2x1x256xf32, #tpu.memory_space<vmem>>, vector<1x1x256xf32>
      %173 = vector.shape_cast %172 : vector<1x1x256xf32> to vector<1x256xf32>
      %c0_94 = arith.constant 0 : index
      %c0_95 = arith.constant 0 : index
      %c0_96 = arith.constant 0 : index
      %174 = vector.load %arg16[%c0_94, %c0_95, %c0_96] : memref<2x64x64xf32, #tpu.memory_space<vmem>>, vector<1x64x64xf32>
      %175 = vector.shape_cast %174 : vector<1x64x64xf32> to vector<64x64xf32>
      %c0_97 = arith.constant 0 : index
      %c0_98 = arith.constant 0 : index
      %c0_99 = arith.constant 0 : index
      %176 = vector.load %arg17[%c0_97, %c0_98, %c0_99] : memref<2x1x64xf32, #tpu.memory_space<vmem>>, vector<1x1x64xf32>
      %177 = vector.shape_cast %176 : vector<1x1x64xf32> to vector<1x64xf32>
      %c0_100 = arith.constant 0 : index
      %c0_101 = arith.constant 0 : index
      %c0_102 = arith.constant 0 : index
      %178 = vector.load %arg18[%c0_100, %c0_101, %c0_102] : memref<2x64x128xf32, #tpu.memory_space<vmem>>, vector<1x64x128xf32>
      %179 = vector.shape_cast %178 : vector<1x64x128xf32> to vector<64x128xf32>
      %c0_103 = arith.constant 0 : index
      %c0_104 = arith.constant 0 : index
      %c0_105 = arith.constant 0 : index
      %180 = vector.load %arg19[%c0_103, %c0_104, %c0_105] : memref<2x1x128xf32, #tpu.memory_space<vmem>>, vector<1x1x128xf32>
      %181 = vector.shape_cast %180 : vector<1x1x128xf32> to vector<1x128xf32>
      %c0_106 = arith.constant 0 : index
      %c0_107 = arith.constant 0 : index
      %182 = vector.load %arg1[%c0_106, %c0_107] : memref<1x2xf32, #tpu.memory_space<vmem>>, vector<1x1xf32>
      %c0_108 = arith.constant 0 : index
      %c0_109 = arith.constant 0 : index
      %183 = vector.load %arg4[%c0_108, %c0_109] : memref<48x48xf32, #tpu.memory_space<vmem>>, vector<48x48xf32>
      %cst_110 = arith.constant dense<0.000000e+00> : vector<48x256xf32>
      %184 = tpu.matmul %160, %171, %cst_110 {dimension_numbers = #tpu.dot_dimension_numbers<[1], [0], [0], [1], [0, 0, 1, 1], [], []>} : vector<48x32xf32>, vector<32x256xf32>, vector<48x256xf32> -> vector<48x256xf32>
      %185 = vector.broadcast %173 : vector<1x256xf32> to vector<48x256xf32>
      %186 = arith.addf %184, %185 : vector<48x256xf32>
      %187 = vector.extract_strided_slice %186 {offsets = [0, 0], sizes = [48, 32], strides = [1, 1]} : vector<48x256xf32> to vector<48x32xf32>
      %188 = vector.extract_strided_slice %186 {offsets = [0, 32], sizes = [48, 32], strides = [1, 1]} : vector<48x256xf32> to vector<48x32xf32>
      %189 = vector.extract_strided_slice %186 {offsets = [0, 64], sizes = [48, 32], strides = [1, 1]} : vector<48x256xf32> to vector<48x32xf32>
      %190 = vector.extract_strided_slice %186 {offsets = [0, 96], sizes = [48, 32], strides = [1, 1]} : vector<48x256xf32> to vector<48x32xf32>
      %191 = vector.extract_strided_slice %186 {offsets = [0, 128], sizes = [48, 32], strides = [1, 1]} : vector<48x256xf32> to vector<48x32xf32>
      %192 = vector.extract_strided_slice %186 {offsets = [0, 160], sizes = [48, 32], strides = [1, 1]} : vector<48x256xf32> to vector<48x32xf32>
      %193 = vector.extract_strided_slice %186 {offsets = [0, 192], sizes = [48, 32], strides = [1, 1]} : vector<48x256xf32> to vector<48x32xf32>
      %194 = vector.extract_strided_slice %186 {offsets = [0, 224], sizes = [48, 32], strides = [1, 1]} : vector<48x256xf32> to vector<48x32xf32>
      "tpu.trace_start"() <{level = 10 : i32, message = "md,nd->mn"}> : () -> ()
      %cst_111 = arith.constant dense<0.000000e+00> : vector<48x48xf32>
      %195 = tpu.matmul %187, %188, %cst_111 {dimension_numbers = #tpu.dot_dimension_numbers<[1], [1], [0], [0], [0, 0, 1, 0], [], []>} : vector<48x32xf32>, vector<48x32xf32>, vector<48x48xf32> -> vector<48x48xf32>
      "tpu.trace_stop"() : () -> ()
      %196 = vector.broadcast %cst_3 : f32 to vector<48x48xf32>
      %197 = arith.mulf %195, %196 : vector<48x48xf32>
      %198 = vector.broadcast %182 : vector<1x1xf32> to vector<48x48xf32>
      %199 = arith.addf %197, %198 : vector<48x48xf32>
      %200 = arith.negf %199 : vector<48x48xf32>
      %201 = math.exp %200 : vector<48x48xf32>
      %cst_112 = arith.constant 1.000000e+00 : f32
      %202 = vector.broadcast %cst_112 : f32 to vector<48x48xf32>
      %203 = arith.addf %202, %201 : vector<48x48xf32>
      %204 = arith.divf %202, %203 : vector<48x48xf32>
      %cst_113 = arith.constant 5.000000e-01 : f32
      %205 = vector.broadcast %cst_113 : f32 to vector<48x48xf32>
      %206 = arith.cmpf ogt, %204, %205 : vector<48x48xf32>
      %cst_114 = arith.constant 0.000000e+00 : f32
      %207 = vector.broadcast %cst_114 : f32 to vector<48x48xf32>
      %208 = arith.select %206, %204, %207 : vector<48x48xi1>, vector<48x48xf32>
      %209 = arith.mulf %208, %183 : vector<48x48xf32>
      %cst_115 = arith.constant 5.000000e-01 : f32
      %210 = vector.broadcast %cst_115 : f32 to vector<48x48xf32>
      %211 = arith.cmpf ole, %204, %210 : vector<48x48xf32>
      %cst_116 = arith.constant 0.000000e+00 : f32
      %212 = vector.broadcast %cst_116 : f32 to vector<48x48xf32>
      %213 = arith.select %211, %204, %212 : vector<48x48xi1>, vector<48x48xf32>
      %214 = arith.mulf %213, %183 : vector<48x48xf32>
      "tpu.trace_start"() <{level = 10 : i32, message = "md,nd->mn"}> : () -> ()
      %cst_117 = arith.constant dense<0.000000e+00> : vector<48x48xf32>
      %215 = tpu.matmul %189, %190, %cst_117 {dimension_numbers = #tpu.dot_dimension_numbers<[1], [1], [0], [0], [0, 0, 1, 0], [], []>} : vector<48x32xf32>, vector<48x32xf32>, vector<48x48xf32> -> vector<48x48xf32>
      "tpu.trace_stop"() : () -> ()
      %216 = vector.broadcast %cst_3 : f32 to vector<48x48xf32>
      %217 = arith.mulf %215, %216 : vector<48x48xf32>
      %cst_118 = arith.constant 0.000000e+00 : f32
      %218 = vector.broadcast %cst_118 : f32 to vector<48x48xf32>
      %219 = arith.cmpf oeq, %209, %218 : vector<48x48xf32>
      %220 = vector.broadcast %cst_4 : f32 to vector<48x48xf32>
      %221 = arith.select %219, %220, %217 : vector<48x48xi1>, vector<48x48xf32>
      %222 = arith.addf %221, %169 : vector<48x48xf32>
      %cst_119 = arith.constant dense<0xFF800000> : vector<48xf32>
      %223 = vector.multi_reduction <maximumf>, %222, %cst_119 [1] : vector<48x48xf32> to vector<48xf32>
      %224 = vector.shape_cast %223 : vector<48xf32> to vector<48x1xf32>
      %225 = vector.broadcast %224 : vector<48x1xf32> to vector<48x48xf32>
      %226 = arith.subf %222, %225 : vector<48x48xf32>
      %227 = math.exp %226 : vector<48x48xf32>
      %cst_120 = arith.constant dense<0.000000e+00> : vector<48xf32>
      %228 = vector.multi_reduction <add>, %227, %cst_120 [1] : vector<48x48xf32> to vector<48xf32>
      %229 = vector.shape_cast %228 : vector<48xf32> to vector<48x1xf32>
      %230 = tpu.reciprocal %229 {approx = true} : vector<48x1xf32> -> vector<48x1xf32>
      %231 = vector.broadcast %230 : vector<48x1xf32> to vector<48x48xf32>
      %232 = arith.mulf %227, %231 : vector<48x48xf32>
      %cst_121 = arith.constant dense<0.000000e+00> : vector<48x32xf32>
      %233 = tpu.matmul %232, %191, %cst_121 {dimension_numbers = #tpu.dot_dimension_numbers<[1], [0], [0], [1], [0, 0, 1, 1], [], []>} : vector<48x48xf32>, vector<48x32xf32>, vector<48x32xf32> -> vector<48x32xf32>
      "tpu.trace_start"() <{level = 10 : i32, message = "md,nd->mn"}> : () -> ()
      %cst_122 = arith.constant dense<0.000000e+00> : vector<48x48xf32>
      %234 = tpu.matmul %192, %193, %cst_122 {dimension_numbers = #tpu.dot_dimension_numbers<[1], [1], [0], [0], [0, 0, 1, 0], [], []>} : vector<48x32xf32>, vector<48x32xf32>, vector<48x48xf32> -> vector<48x48xf32>
      "tpu.trace_stop"() : () -> ()
      %235 = vector.broadcast %cst_3 : f32 to vector<48x48xf32>
      %236 = arith.mulf %234, %235 : vector<48x48xf32>
      %cst_123 = arith.constant 0.000000e+00 : f32
      %237 = vector.broadcast %cst_123 : f32 to vector<48x48xf32>
      %238 = arith.cmpf oeq, %214, %237 : vector<48x48xf32>
      %239 = vector.broadcast %cst_4 : f32 to vector<48x48xf32>
      %240 = arith.select %238, %239, %236 : vector<48x48xi1>, vector<48x48xf32>
      %241 = arith.addf %240, %169 : vector<48x48xf32>
      %cst_124 = arith.constant dense<0xFF800000> : vector<48xf32>
      %242 = vector.multi_reduction <maximumf>, %241, %cst_124 [1] : vector<48x48xf32> to vector<48xf32>
      %243 = vector.shape_cast %242 : vector<48xf32> to vector<48x1xf32>
      %244 = vector.broadcast %243 : vector<48x1xf32> to vector<48x48xf32>
      %245 = arith.subf %241, %244 : vector<48x48xf32>
      %246 = math.exp %245 : vector<48x48xf32>
      %cst_125 = arith.constant dense<0.000000e+00> : vector<48xf32>
      %247 = vector.multi_reduction <add>, %246, %cst_125 [1] : vector<48x48xf32> to vector<48xf32>
      %248 = vector.shape_cast %247 : vector<48xf32> to vector<48x1xf32>
      %249 = tpu.reciprocal %248 {approx = true} : vector<48x1xf32> -> vector<48x1xf32>
      %250 = vector.broadcast %249 : vector<48x1xf32> to vector<48x48xf32>
      %251 = arith.mulf %246, %250 : vector<48x48xf32>
      %cst_126 = arith.constant dense<0.000000e+00> : vector<48x32xf32>
      %252 = tpu.matmul %251, %194, %cst_126 {dimension_numbers = #tpu.dot_dimension_numbers<[1], [0], [0], [1], [0, 0, 1, 1], [], []>} : vector<48x48xf32>, vector<48x32xf32>, vector<48x32xf32> -> vector<48x32xf32>
      %253 = tpu.concatenate %233, %252 in 1 : vector<48x32xf32>, vector<48x32xf32> -> vector<48x64xf32>
      %cst_127 = arith.constant dense<0.000000e+00> : vector<48x64xf32>
      %254 = tpu.matmul %253, %175, %cst_127 {dimension_numbers = #tpu.dot_dimension_numbers<[1], [0], [0], [1], [0, 0, 1, 1], [], []>} : vector<48x64xf32>, vector<64x64xf32>, vector<48x64xf32> -> vector<48x64xf32>
      %255 = vector.broadcast %177 : vector<1x64xf32> to vector<48x64xf32>
      %256 = arith.addf %254, %255 : vector<48x64xf32>
      %cst_128 = arith.constant dense<0.000000e+00> : vector<48x128xf32>
      %257 = tpu.matmul %256, %179, %cst_128 {dimension_numbers = #tpu.dot_dimension_numbers<[1], [0], [0], [1], [0, 0, 1, 1], [], []>} : vector<48x64xf32>, vector<64x128xf32>, vector<48x128xf32> -> vector<48x128xf32>
      %258 = vector.broadcast %181 : vector<1x128xf32> to vector<48x128xf32>
      %259 = arith.addf %257, %258 : vector<48x128xf32>
      %260 = vector.extract_strided_slice %259 {offsets = [0, 0], sizes = [48, 32], strides = [1, 1]} : vector<48x128xf32> to vector<48x32xf32>
      %261 = vector.extract_strided_slice %259 {offsets = [0, 32], sizes = [48, 32], strides = [1, 1]} : vector<48x128xf32> to vector<48x32xf32>
      %262 = vector.extract_strided_slice %259 {offsets = [0, 64], sizes = [48, 32], strides = [1, 1]} : vector<48x128xf32> to vector<48x32xf32>
      %263 = vector.extract_strided_slice %259 {offsets = [0, 96], sizes = [48, 32], strides = [1, 1]} : vector<48x128xf32> to vector<48x32xf32>
      %264 = arith.maximumf %261, %263 : vector<48x32xf32>
      %265 = arith.subf %261, %264 : vector<48x32xf32>
      %266 = math.exp %265 : vector<48x32xf32>
      %267 = arith.subf %263, %264 : vector<48x32xf32>
      %268 = math.exp %267 : vector<48x32xf32>
      %269 = arith.mulf %260, %266 : vector<48x32xf32>
      %270 = arith.mulf %262, %268 : vector<48x32xf32>
      %271 = arith.addf %269, %270 : vector<48x32xf32>
      %272 = arith.addf %266, %268 : vector<48x32xf32>
      %273 = tpu.reciprocal %272 {approx = true} : vector<48x32xf32> -> vector<48x32xf32>
      %274 = arith.mulf %271, %273 : vector<48x32xf32>
      %c0_129 = arith.constant 0 : index
      %c0_130 = arith.constant 0 : index
      %275 = vector.load %arg45[%c0_129, %c0_130] : memref<48x32xf32, #tpu.memory_space<vmem>>, vector<48x32xf32>
      tpu.vector_store %arg45[%c0_129, %c0_130], %274 {strides = array<i32>} : memref<48x32xf32, #tpu.memory_space<vmem>>, vector<48x32xf32>,
      %c0_131 = arith.constant 0 : index
      %c0_132 = arith.constant 0 : index
      %276 = vector.load %arg42[%c0_131, %c0_132] : memref<48x48xf32, #tpu.memory_space<vmem>>, vector<48x48xf32>
      tpu.vector_store %arg42[%c0_131, %c0_132], %232 {strides = array<i32>} : memref<48x48xf32, #tpu.memory_space<vmem>>, vector<48x48xf32>,
      %c0_133 = arith.constant 0 : index
      %c0_134 = arith.constant 0 : index
      %277 = vector.load %arg43[%c0_133, %c0_134] : memref<48x48xf32, #tpu.memory_space<vmem>>, vector<48x48xf32>
      tpu.vector_store %arg43[%c0_133, %c0_134], %251 {strides = array<i32>} : memref<48x48xf32, #tpu.memory_space<vmem>>, vector<48x48xf32>,
      %c0_135 = arith.constant 0 : index
      %c0_136 = arith.constant 0 : index
      %278 = vector.load %arg5[%c0_135, %c0_136] : memref<6x18xf32, #tpu.memory_space<vmem>>, vector<6x18xf32>
      %c0_137 = arith.constant 0 : index
      %c0_138 = arith.constant 0 : index
      %279 = vector.load %arg30[%c0_137, %c0_138] : memref<18x128xf32, #tpu.memory_space<vmem>>, vector<18x128xf32>
      %cst_139 = arith.constant dense<0.000000e+00> : vector<6x128xf32>
      %280 = tpu.matmul %278, %279, %cst_139 {dimension_numbers = #tpu.dot_dimension_numbers<[1], [0], [0], [1], [0, 0, 1, 1], [], []>} : vector<6x18xf32>, vector<18x128xf32>, vector<6x128xf32> -> vector<6x128xf32>
      %c0_140 = arith.constant 0 : index
      %c0_141 = arith.constant 0 : index
      %281 = vector.load %arg31[%c0_140, %c0_141] : memref<1x128xf32, #tpu.memory_space<vmem>>, vector<1x128xf32>
      %282 = vector.broadcast %281 : vector<1x128xf32> to vector<6x128xf32>
      %283 = arith.addf %280, %282 : vector<6x128xf32>
      %cst_142 = arith.constant 0.000000e+00 : f32
      %284 = vector.broadcast %cst_142 : f32 to vector<6x128xf32>
      %285 = arith.maximumf %283, %284 : vector<6x128xf32>
      %c0_143 = arith.constant 0 : index
      %c0_144 = arith.constant 0 : index
      %286 = vector.load %arg32[%c0_143, %c0_144] : memref<128x256xf32, #tpu.memory_space<vmem>>, vector<128x256xf32>
      %cst_145 = arith.constant dense<0.000000e+00> : vector<6x256xf32>
      %287 = tpu.matmul %285, %286, %cst_145 {dimension_numbers = #tpu.dot_dimension_numbers<[1], [0], [0], [1], [0, 0, 1, 1], [], []>} : vector<6x128xf32>, vector<128x256xf32>, vector<6x256xf32> -> vector<6x256xf32>
      %c0_146 = arith.constant 0 : index
      %c0_147 = arith.constant 0 : index
      %288 = vector.load %arg33[%c0_146, %c0_147] : memref<1x256xf32, #tpu.memory_space<vmem>>, vector<1x256xf32>
      %289 = vector.broadcast %288 : vector<1x256xf32> to vector<6x256xf32>
      %290 = arith.addf %287, %289 : vector<6x256xf32>
      %cst_148 = arith.constant 0.000000e+00 : f32
      %291 = vector.broadcast %cst_148 : f32 to vector<6x256xf32>
      %292 = arith.maximumf %290, %291 : vector<6x256xf32>
      %c0_149 = arith.constant 0 : index
      %c0_150 = arith.constant 0 : index
      %293 = vector.load %arg34[%c0_149, %c0_150] : memref<256x128xf32, #tpu.memory_space<vmem>>, vector<256x128xf32>
      %cst_151 = arith.constant dense<0.000000e+00> : vector<6x128xf32>
      %294 = tpu.matmul %292, %293, %cst_151 {dimension_numbers = #tpu.dot_dimension_numbers<[1], [0], [0], [1], [0, 0, 1, 1], [], []>} : vector<6x256xf32>, vector<256x128xf32>, vector<6x128xf32> -> vector<6x128xf32>
      %c0_152 = arith.constant 0 : index
      %c0_153 = arith.constant 0 : index
      %295 = vector.load %arg35[%c0_152, %c0_153] : memref<1x128xf32, #tpu.memory_space<vmem>>, vector<1x128xf32>
      %296 = vector.broadcast %295 : vector<1x128xf32> to vector<6x128xf32>
      %297 = arith.addf %294, %296 : vector<6x128xf32>
      %cst_154 = arith.constant 0.000000e+00 : f32
      %298 = vector.broadcast %cst_154 : f32 to vector<6x128xf32>
      %299 = arith.maximumf %297, %298 : vector<6x128xf32>
      %c0_155 = arith.constant 0 : index
      %c0_156 = arith.constant 0 : index
      %300 = vector.load %arg36[%c0_155, %c0_156] : memref<128x64xf32, #tpu.memory_space<vmem>>, vector<128x64xf32>
      %cst_157 = arith.constant dense<0.000000e+00> : vector<6x64xf32>
      %301 = tpu.matmul %299, %300, %cst_157 {dimension_numbers = #tpu.dot_dimension_numbers<[1], [0], [0], [1], [0, 0, 1, 1], [], []>} : vector<6x128xf32>, vector<128x64xf32>, vector<6x64xf32> -> vector<6x64xf32>
      %c0_158 = arith.constant 0 : index
      %c0_159 = arith.constant 0 : index
      %302 = vector.load %arg37[%c0_158, %c0_159] : memref<1x64xf32, #tpu.memory_space<vmem>>, vector<1x64xf32>
      %303 = vector.broadcast %302 : vector<1x64xf32> to vector<6x64xf32>
      %304 = arith.addf %301, %303 : vector<6x64xf32>
      %c0_160 = arith.constant 0 : index
      %c0_161 = arith.constant 0 : index
      %305 = vector.load %arg38[%c0_160, %c0_161] : memref<64x22xf32, #tpu.memory_space<vmem>>, vector<64x22xf32>
      %cst_162 = arith.constant dense<0.000000e+00> : vector<6x22xf32>
      %306 = tpu.matmul %304, %305, %cst_162 {dimension_numbers = #tpu.dot_dimension_numbers<[1], [0], [0], [1], [0, 0, 1, 1], [], []>} : vector<6x64xf32>, vector<64x22xf32>, vector<6x22xf32> -> vector<6x22xf32>
      %c0_163 = arith.constant 0 : index
      %c0_164 = arith.constant 0 : index
      %307 = vector.load %arg39[%c0_163, %c0_164] : memref<1x22xf32, #tpu.memory_space<vmem>>, vector<1x22xf32>
      %308 = vector.broadcast %307 : vector<1x22xf32> to vector<6x22xf32>
      %309 = arith.addf %306, %308 : vector<6x22xf32>
      %c0_165 = arith.constant 0 : index
      %c0_166 = arith.constant 0 : index
      %310 = vector.load %arg41[%c0_165, %c0_166] : memref<6x22xf32, #tpu.memory_space<vmem>>, vector<6x22xf32>
      tpu.vector_store %arg41[%c0_165, %c0_166], %309 {strides = array<i32>} : memref<6x22xf32, #tpu.memory_space<vmem>>, vector<6x22xf32>,
    } else {
    }
    %c0_6 = arith.constant 0 : index
    %c0_7 = arith.constant 0 : index
    %5 = vector.load %arg8[%c0_6, %c0_7] : memref<48x1xi32, #tpu.memory_space<vmem>>, vector<48x1xi32>
    %c0_8 = arith.constant 0 : index
    %c0_9 = arith.constant 0 : index
    %6 = vector.load %arg9[%c0_8, %c0_9] : memref<1x48xi32, #tpu.memory_space<vmem>>, vector<1x48xi32>
    %7 = vector.broadcast %5 : vector<48x1xi32> to vector<48x48xi32>
    %8 = vector.broadcast %6 : vector<1x48xi32> to vector<48x48xi32>
    %9 = arith.cmpi eq, %7, %8 : vector<48x48xi32>
    %10 = vector.broadcast %1 : vector<1x48xi32> to vector<48x48xi32>
    %11 = vector.broadcast %0 : vector<48x1xi32> to vector<48x48xi32>
    %12 = arith.cmpi sle, %10, %11 : vector<48x48xi32>
    %13 = arith.andi %9, %12 : vector<48x48xi1>
    %cst_10 = arith.constant 1.000000e+00 : f32
    %cst_11 = arith.constant 0.000000e+00 : f32
    %14 = vector.broadcast %cst_10 : f32 to vector<48x48xf32>
    %15 = vector.broadcast %cst_11 : f32 to vector<48x48xf32>
    %16 = arith.select %13, %14, %15 : vector<48x48xi1>, vector<48x48xf32>
    %cst_12 = arith.constant 0.000000e+00 : f32
    %cst_13 = arith.constant -1.000000e+30 : f32
    %17 = vector.broadcast %cst_12 : f32 to vector<48x48xf32>
    %18 = vector.broadcast %cst_13 : f32 to vector<48x48xf32>
    %19 = arith.select %9, %17, %18 : vector<48x48xi1>, vector<48x48xf32>
    %20 = vector.broadcast %arg0 : i32 to vector<1x48xi32>
    %21 = arith.cmpi sgt, %1, %20 : vector<1x48xi32>
    %cst_14 = arith.constant -1.000000e+30 : f32
    %cst_15 = arith.constant 0.000000e+00 : f32
    %22 = vector.broadcast %cst_14 : f32 to vector<1x48xf32>
    %23 = vector.broadcast %cst_15 : f32 to vector<1x48xf32>
    %24 = arith.select %21, %22, %23 : vector<1x48xi1>, vector<1x48xf32>
    %25 = vector.broadcast %24 : vector<1x48xf32> to vector<48x48xf32>
    %26 = arith.addf %19, %25 : vector<48x48xf32>
    %27 = vector.broadcast %arg0 : i32 to vector<48x1xi32>
    %28 = arith.cmpi eq, %0, %27 : vector<48x1xi32>
    %c0_16 = arith.constant 0 : index
    %c0_17 = arith.constant 0 : index
    %29 = vector.load %arg45[%c0_16, %c0_17] : memref<48x32xf32, #tpu.memory_space<vmem>>, vector<48x32xf32>
    %c0_18 = arith.constant 0 : index
    %c0_19 = arith.constant 0 : index
    %30 = vector.load %arg46[%c0_18, %c0_19] : memref<48x32xf32, #tpu.memory_space<vmem>>, vector<48x32xf32>
    %31 = vector.shape_cast %28 : vector<48x1xi1> to vector<48x1xi1>
    %32 = vector.broadcast %31 : vector<48x1xi1> to vector<48x32xi1>
    %33 = arith.select %32, %29, %30 : vector<48x32xi1>, vector<48x32xf32>
    %c1 = arith.constant 1 : index
    %c0_20 = arith.constant 0 : index
    %c0_21 = arith.constant 0 : index
    %34 = vector.load %arg14[%c1, %c0_20, %c0_21] : memref<2x32x256xf32, #tpu.memory_space<vmem>>, vector<1x32x256xf32>
    %35 = vector.shape_cast %34 : vector<1x32x256xf32> to vector<32x256xf32>
    %c1_22 = arith.constant 1 : index
    %c0_23 = arith.constant 0 : index
    %c0_24 = arith.constant 0 : index
    %36 = vector.load %arg15[%c1_22, %c0_23, %c0_24] : memref<2x1x256xf32, #tpu.memory_space<vmem>>, vector<1x1x256xf32>
    %37 = vector.shape_cast %36 : vector<1x1x256xf32> to vector<1x256xf32>
    %c1_25 = arith.constant 1 : index
    %c0_26 = arith.constant 0 : index
    %c0_27 = arith.constant 0 : index
    %38 = vector.load %arg16[%c1_25, %c0_26, %c0_27] : memref<2x64x64xf32, #tpu.memory_space<vmem>>, vector<1x64x64xf32>
    %39 = vector.shape_cast %38 : vector<1x64x64xf32> to vector<64x64xf32>
    %c1_28 = arith.constant 1 : index
    %c0_29 = arith.constant 0 : index
    %c0_30 = arith.constant 0 : index
    %40 = vector.load %arg17[%c1_28, %c0_29, %c0_30] : memref<2x1x64xf32, #tpu.memory_space<vmem>>, vector<1x1x64xf32>
    %41 = vector.shape_cast %40 : vector<1x1x64xf32> to vector<1x64xf32>
    %c1_31 = arith.constant 1 : index
    %c0_32 = arith.constant 0 : index
    %c0_33 = arith.constant 0 : index
    %42 = vector.load %arg18[%c1_31, %c0_32, %c0_33] : memref<2x64x128xf32, #tpu.memory_space<vmem>>, vector<1x64x128xf32>
    %43 = vector.shape_cast %42 : vector<1x64x128xf32> to vector<64x128xf32>
    %c1_34 = arith.constant 1 : index
    %c0_35 = arith.constant 0 : index
    %c0_36 = arith.constant 0 : index
    %44 = vector.load %arg19[%c1_34, %c0_35, %c0_36] : memref<2x1x128xf32, #tpu.memory_space<vmem>>, vector<1x1x128xf32>
    %45 = vector.shape_cast %44 : vector<1x1x128xf32> to vector<1x128xf32>
    %c0_37 = arith.constant 0 : index
    %c1_38 = arith.constant 1 : index
    %46 = vector.load %arg1[%c0_37, %c1_38] : memref<1x2xf32, #tpu.memory_space<vmem>>, vector<1x1xf32>
    %cst_39 = arith.constant dense<0.000000e+00> : vector<48x256xf32>
    %47 = tpu.matmul %33, %35, %cst_39 {dimension_numbers = #tpu.dot_dimension_numbers<[1], [0], [0], [1], [0, 0, 1, 1], [], []>} : vector<48x32xf32>, vector<32x256xf32>, vector<48x256xf32> -> vector<48x256xf32>
    %48 = vector.broadcast %37 : vector<1x256xf32> to vector<48x256xf32>
    %49 = arith.addf %47, %48 : vector<48x256xf32>
    %50 = vector.extract_strided_slice %49 {offsets = [0, 0], sizes = [48, 32], strides = [1, 1]} : vector<48x256xf32> to vector<48x32xf32>
    %51 = vector.extract_strided_slice %49 {offsets = [0, 32], sizes = [48, 32], strides = [1, 1]} : vector<48x256xf32> to vector<48x32xf32>
    %52 = vector.extract_strided_slice %49 {offsets = [0, 64], sizes = [48, 32], strides = [1, 1]} : vector<48x256xf32> to vector<48x32xf32>
    %53 = vector.extract_strided_slice %49 {offsets = [0, 96], sizes = [48, 32], strides = [1, 1]} : vector<48x256xf32> to vector<48x32xf32>
    %54 = vector.extract_strided_slice %49 {offsets = [0, 128], sizes = [48, 32], strides = [1, 1]} : vector<48x256xf32> to vector<48x32xf32>
    %55 = vector.extract_strided_slice %49 {offsets = [0, 160], sizes = [48, 32], strides = [1, 1]} : vector<48x256xf32> to vector<48x32xf32>
    %56 = vector.extract_strided_slice %49 {offsets = [0, 192], sizes = [48, 32], strides = [1, 1]} : vector<48x256xf32> to vector<48x32xf32>
    %57 = vector.extract_strided_slice %49 {offsets = [0, 224], sizes = [48, 32], strides = [1, 1]} : vector<48x256xf32> to vector<48x32xf32>
    "tpu.trace_start"() <{level = 10 : i32, message = "md,nd->mn"}> : () -> ()
    %cst_40 = arith.constant dense<0.000000e+00> : vector<48x48xf32>
    %58 = tpu.matmul %50, %51, %cst_40 {dimension_numbers = #tpu.dot_dimension_numbers<[1], [1], [0], [0], [0, 0, 1, 0], [], []>} : vector<48x32xf32>, vector<48x32xf32>, vector<48x48xf32> -> vector<48x48xf32>
    "tpu.trace_stop"() : () -> ()
    %cst_41 = arith.constant 0.176776692 : f32
    %59 = vector.broadcast %cst_41 : f32 to vector<48x48xf32>
    %60 = arith.mulf %58, %59 : vector<48x48xf32>
    %61 = vector.broadcast %46 : vector<1x1xf32> to vector<48x48xf32>
    %62 = arith.addf %60, %61 : vector<48x48xf32>
    %63 = arith.negf %62 : vector<48x48xf32>
    %64 = math.exp %63 : vector<48x48xf32>
    %cst_42 = arith.constant 1.000000e+00 : f32
    %65 = vector.broadcast %cst_42 : f32 to vector<48x48xf32>
    %66 = arith.addf %65, %64 : vector<48x48xf32>
    %67 = arith.divf %65, %66 : vector<48x48xf32>
    %cst_43 = arith.constant 5.000000e-01 : f32
    %68 = vector.broadcast %cst_43 : f32 to vector<48x48xf32>
    %69 = arith.cmpf ogt, %67, %68 : vector<48x48xf32>
    %cst_44 = arith.constant 0.000000e+00 : f32
    %70 = vector.broadcast %cst_44 : f32 to vector<48x48xf32>
    %71 = arith.select %69, %67, %70 : vector<48x48xi1>, vector<48x48xf32>
    %72 = arith.mulf %71, %16 : vector<48x48xf32>
    %cst_45 = arith.constant 5.000000e-01 : f32
    %73 = vector.broadcast %cst_45 : f32 to vector<48x48xf32>
    %74 = arith.cmpf ole, %67, %73 : vector<48x48xf32>
    %cst_46 = arith.constant 0.000000e+00 : f32
    %75 = vector.broadcast %cst_46 : f32 to vector<48x48xf32>
    %76 = arith.select %74, %67, %75 : vector<48x48xi1>, vector<48x48xf32>
    %77 = arith.mulf %76, %16 : vector<48x48xf32>
    "tpu.trace_start"() <{level = 10 : i32, message = "md,nd->mn"}> : () -> ()
    %cst_47 = arith.constant dense<0.000000e+00> : vector<48x48xf32>
    %78 = tpu.matmul %52, %53, %cst_47 {dimension_numbers = #tpu.dot_dimension_numbers<[1], [1], [0], [0], [0, 0, 1, 0], [], []>} : vector<48x32xf32>, vector<48x32xf32>, vector<48x48xf32> -> vector<48x48xf32>
    "tpu.trace_stop"() : () -> ()
    %cst_48 = arith.constant 0.176776692 : f32
    %79 = vector.broadcast %cst_48 : f32 to vector<48x48xf32>
    %80 = arith.mulf %78, %79 : vector<48x48xf32>
    %cst_49 = arith.constant 0.000000e+00 : f32
    %81 = vector.broadcast %cst_49 : f32 to vector<48x48xf32>
    %82 = arith.cmpf oeq, %72, %81 : vector<48x48xf32>
    %cst_50 = arith.constant -1.000000e+09 : f32
    %83 = vector.broadcast %cst_50 : f32 to vector<48x48xf32>
    %84 = arith.select %82, %83, %80 : vector<48x48xi1>, vector<48x48xf32>
    %85 = arith.addf %84, %26 : vector<48x48xf32>
    %cst_51 = arith.constant dense<0xFF800000> : vector<48xf32>
    %86 = vector.multi_reduction <maximumf>, %85, %cst_51 [1] : vector<48x48xf32> to vector<48xf32>
    %87 = vector.shape_cast %86 : vector<48xf32> to vector<48x1xf32>
    %88 = vector.broadcast %87 : vector<48x1xf32> to vector<48x48xf32>
    %89 = arith.subf %85, %88 : vector<48x48xf32>
    %90 = math.exp %89 : vector<48x48xf32>
    %cst_52 = arith.constant dense<0.000000e+00> : vector<48xf32>
    %91 = vector.multi_reduction <add>, %90, %cst_52 [1] : vector<48x48xf32> to vector<48xf32>
    %92 = vector.shape_cast %91 : vector<48xf32> to vector<48x1xf32>
    %93 = tpu.reciprocal %92 {approx = true} : vector<48x1xf32> -> vector<48x1xf32>
    %94 = vector.broadcast %93 : vector<48x1xf32> to vector<48x48xf32>
    %95 = arith.mulf %90, %94 : vector<48x48xf32>
    %cst_53 = arith.constant dense<0.000000e+00> : vector<48x32xf32>
    %96 = tpu.matmul %95, %54, %cst_53 {dimension_numbers = #tpu.dot_dimension_numbers<[1], [0], [0], [1], [0, 0, 1, 1], [], []>} : vector<48x48xf32>, vector<48x32xf32>, vector<48x32xf32> -> vector<48x32xf32>
    "tpu.trace_start"() <{level = 10 : i32, message = "md,nd->mn"}> : () -> ()
    %cst_54 = arith.constant dense<0.000000e+00> : vector<48x48xf32>
    %97 = tpu.matmul %55, %56, %cst_54 {dimension_numbers = #tpu.dot_dimension_numbers<[1], [1], [0], [0], [0, 0, 1, 0], [], []>} : vector<48x32xf32>, vector<48x32xf32>, vector<48x48xf32> -> vector<48x48xf32>
    "tpu.trace_stop"() : () -> ()
    %cst_55 = arith.constant 0.176776692 : f32
    %98 = vector.broadcast %cst_55 : f32 to vector<48x48xf32>
    %99 = arith.mulf %97, %98 : vector<48x48xf32>
    %cst_56 = arith.constant 0.000000e+00 : f32
    %100 = vector.broadcast %cst_56 : f32 to vector<48x48xf32>
    %101 = arith.cmpf oeq, %77, %100 : vector<48x48xf32>
    %cst_57 = arith.constant -1.000000e+09 : f32
    %102 = vector.broadcast %cst_57 : f32 to vector<48x48xf32>
    %103 = arith.select %101, %102, %99 : vector<48x48xi1>, vector<48x48xf32>
    %104 = arith.addf %103, %26 : vector<48x48xf32>
    %cst_58 = arith.constant dense<0xFF800000> : vector<48xf32>
    %105 = vector.multi_reduction <maximumf>, %104, %cst_58 [1] : vector<48x48xf32> to vector<48xf32>
    %106 = vector.shape_cast %105 : vector<48xf32> to vector<48x1xf32>
    %107 = vector.broadcast %106 : vector<48x1xf32> to vector<48x48xf32>
    %108 = arith.subf %104, %107 : vector<48x48xf32>
    %109 = math.exp %108 : vector<48x48xf32>
    %cst_59 = arith.constant dense<0.000000e+00> : vector<48xf32>
    %110 = vector.multi_reduction <add>, %109, %cst_59 [1] : vector<48x48xf32> to vector<48xf32>
    %111 = vector.shape_cast %110 : vector<48xf32> to vector<48x1xf32>
    %112 = tpu.reciprocal %111 {approx = true} : vector<48x1xf32> -> vector<48x1xf32>
    %113 = vector.broadcast %112 : vector<48x1xf32> to vector<48x48xf32>
    %114 = arith.mulf %109, %113 : vector<48x48xf32>
    %cst_60 = arith.constant dense<0.000000e+00> : vector<48x32xf32>
    %115 = tpu.matmul %114, %57, %cst_60 {dimension_numbers = #tpu.dot_dimension_numbers<[1], [0], [0], [1], [0, 0, 1, 1], [], []>} : vector<48x48xf32>, vector<48x32xf32>, vector<48x32xf32> -> vector<48x32xf32>
    %116 = tpu.concatenate %96, %115 in 1 : vector<48x32xf32>, vector<48x32xf32> -> vector<48x64xf32>
    %cst_61 = arith.constant dense<0.000000e+00> : vector<48x64xf32>
    %117 = tpu.matmul %116, %39, %cst_61 {dimension_numbers = #tpu.dot_dimension_numbers<[1], [0], [0], [1], [0, 0, 1, 1], [], []>} : vector<48x64xf32>, vector<64x64xf32>, vector<48x64xf32> -> vector<48x64xf32>
    %118 = vector.broadcast %41 : vector<1x64xf32> to vector<48x64xf32>
    %119 = arith.addf %117, %118 : vector<48x64xf32>
    %cst_62 = arith.constant dense<0.000000e+00> : vector<48x128xf32>
    %120 = tpu.matmul %119, %43, %cst_62 {dimension_numbers = #tpu.dot_dimension_numbers<[1], [0], [0], [1], [0, 0, 1, 1], [], []>} : vector<48x64xf32>, vector<64x128xf32>, vector<48x128xf32> -> vector<48x128xf32>
    %121 = vector.broadcast %45 : vector<1x128xf32> to vector<48x128xf32>
    %122 = arith.addf %120, %121 : vector<48x128xf32>
    %123 = vector.extract_strided_slice %122 {offsets = [0, 0], sizes = [48, 32], strides = [1, 1]} : vector<48x128xf32> to vector<48x32xf32>
    %124 = vector.extract_strided_slice %122 {offsets = [0, 32], sizes = [48, 32], strides = [1, 1]} : vector<48x128xf32> to vector<48x32xf32>
    %125 = vector.extract_strided_slice %122 {offsets = [0, 64], sizes = [48, 32], strides = [1, 1]} : vector<48x128xf32> to vector<48x32xf32>
    %126 = vector.extract_strided_slice %122 {offsets = [0, 96], sizes = [48, 32], strides = [1, 1]} : vector<48x128xf32> to vector<48x32xf32>
    %127 = arith.maximumf %124, %126 : vector<48x32xf32>
    %128 = arith.subf %124, %127 : vector<48x32xf32>
    %129 = math.exp %128 : vector<48x32xf32>
    %130 = arith.subf %126, %127 : vector<48x32xf32>
    %131 = math.exp %130 : vector<48x32xf32>
    %132 = arith.mulf %123, %129 : vector<48x32xf32>
    %133 = arith.mulf %125, %131 : vector<48x32xf32>
    %134 = arith.addf %132, %133 : vector<48x32xf32>
    %135 = arith.addf %129, %131 : vector<48x32xf32>
    %136 = tpu.reciprocal %135 {approx = true} : vector<48x32xf32> -> vector<48x32xf32>
    %137 = arith.mulf %134, %136 : vector<48x32xf32>
    %138 = vector.broadcast %arg0 : i32 to vector<48x1xi32>
    %139 = arith.cmpi sle, %0, %138 : vector<48x1xi32>
    %c0_63 = arith.constant 0 : index
    %c0_64 = arith.constant 0 : index
    %140 = vector.load %arg46[%c0_63, %c0_64] : memref<48x32xf32, #tpu.memory_space<vmem>>, vector<48x32xf32>
    %141 = vector.shape_cast %139 : vector<48x1xi1> to vector<48x1xi1>
    %142 = vector.broadcast %141 : vector<48x1xi1> to vector<48x32xi1>
    %143 = arith.select %142, %137, %140 : vector<48x32xi1>, vector<48x32xf32>
    %c0_65 = arith.constant 0 : index
    %c0_66 = arith.constant 0 : index
    %144 = vector.load %arg46[%c0_65, %c0_66] : memref<48x32xf32, #tpu.memory_space<vmem>>, vector<48x32xf32>
    tpu.vector_store %arg46[%c0_65, %c0_66], %143 {strides = array<i32>} : memref<48x32xf32, #tpu.memory_space<vmem>>, vector<48x32xf32>,
    %c7_i32 = arith.constant 7 : i32
    %145 = arith.cmpi eq, %arg0, %c7_i32 : i32
    %146 = arith.extui %145 : i1 to i32
    %c0_i32_67 = arith.constant 0 : i32
    %147 = arith.cmpi ne, %146, %c0_i32_67 : i32
    scf.if %147 {
      %c0_68 = arith.constant 0 : index
      %c0_69 = arith.constant 0 : index
      %148 = vector.load %arg46[%c0_68, %c0_69] : memref<48x32xf32, #tpu.memory_space<vmem>>, vector<48x32xf32>
      %c0_70 = arith.constant 0 : index
      %c0_71 = arith.constant 0 : index
      %149 = vector.load %arg44[%c0_70, %c0_71] : memref<48x32xf32, #tpu.memory_space<vmem>>, vector<48x32xf32>
      %150 = arith.addf %148, %149 : vector<48x32xf32>
      %151 = vector.extract_strided_slice %150 {offsets = [0, 0], sizes = [6, 32], strides = [1, 1]} : vector<48x32xf32> to vector<6x32xf32>
      %c0_72 = arith.constant 0 : index
      %c0_73 = arith.constant 0 : index
      %c0_74 = arith.constant 0 : index
      %152 = vector.load %arg20[%c0_72, %c0_73, %c0_74] : memref<8x32x128xf32, #tpu.memory_space<vmem>>, vector<1x32x128xf32>
      %153 = vector.shape_cast %152 : vector<1x32x128xf32> to vector<32x128xf32>
      %cst_75 = arith.constant dense<0.000000e+00> : vector<6x128xf32>
      %154 = tpu.matmul %151, %153, %cst_75 {dimension_numbers = #tpu.dot_dimension_numbers<[1], [0], [0], [1], [0, 0, 1, 1], [], []>} : vector<6x32xf32>, vector<32x128xf32>, vector<6x128xf32> -> vector<6x128xf32>
      %155 = vector.extract_strided_slice %150 {offsets = [6, 0], sizes = [6, 32], strides = [1, 1]} : vector<48x32xf32> to vector<6x32xf32>
      %c1_76 = arith.constant 1 : index
      %c0_77 = arith.constant 0 : index
      %c0_78 = arith.constant 0 : index
      %156 = vector.load %arg20[%c1_76, %c0_77, %c0_78] : memref<8x32x128xf32, #tpu.memory_space<vmem>>, vector<1x32x128xf32>
      %157 = vector.shape_cast %156 : vector<1x32x128xf32> to vector<32x128xf32>
      %cst_79 = arith.constant dense<0.000000e+00> : vector<6x128xf32>
      %158 = tpu.matmul %155, %157, %cst_79 {dimension_numbers = #tpu.dot_dimension_numbers<[1], [0], [0], [1], [0, 0, 1, 1], [], []>} : vector<6x32xf32>, vector<32x128xf32>, vector<6x128xf32> -> vector<6x128xf32>
      %159 = arith.addf %154, %158 : vector<6x128xf32>
      %160 = vector.extract_strided_slice %150 {offsets = [12, 0], sizes = [6, 32], strides = [1, 1]} : vector<48x32xf32> to vector<6x32xf32>
      %c2 = arith.constant 2 : index
      %c0_80 = arith.constant 0 : index
      %c0_81 = arith.constant 0 : index
      %161 = vector.load %arg20[%c2, %c0_80, %c0_81] : memref<8x32x128xf32, #tpu.memory_space<vmem>>, vector<1x32x128xf32>
      %162 = vector.shape_cast %161 : vector<1x32x128xf32> to vector<32x128xf32>
      %cst_82 = arith.constant dense<0.000000e+00> : vector<6x128xf32>
      %163 = tpu.matmul %160, %162, %cst_82 {dimension_numbers = #tpu.dot_dimension_numbers<[1], [0], [0], [1], [0, 0, 1, 1], [], []>} : vector<6x32xf32>, vector<32x128xf32>, vector<6x128xf32> -> vector<6x128xf32>
      %164 = arith.addf %159, %163 : vector<6x128xf32>
      %165 = vector.extract_strided_slice %150 {offsets = [18, 0], sizes = [6, 32], strides = [1, 1]} : vector<48x32xf32> to vector<6x32xf32>
      %c3 = arith.constant 3 : index
      %c0_83 = arith.constant 0 : index
      %c0_84 = arith.constant 0 : index
      %166 = vector.load %arg20[%c3, %c0_83, %c0_84] : memref<8x32x128xf32, #tpu.memory_space<vmem>>, vector<1x32x128xf32>
      %167 = vector.shape_cast %166 : vector<1x32x128xf32> to vector<32x128xf32>
      %cst_85 = arith.constant dense<0.000000e+00> : vector<6x128xf32>
      %168 = tpu.matmul %165, %167, %cst_85 {dimension_numbers = #tpu.dot_dimension_numbers<[1], [0], [0], [1], [0, 0, 1, 1], [], []>} : vector<6x32xf32>, vector<32x128xf32>, vector<6x128xf32> -> vector<6x128xf32>
      %169 = arith.addf %164, %168 : vector<6x128xf32>
      %170 = vector.extract_strided_slice %150 {offsets = [24, 0], sizes = [6, 32], strides = [1, 1]} : vector<48x32xf32> to vector<6x32xf32>
      %c4 = arith.constant 4 : index
      %c0_86 = arith.constant 0 : index
      %c0_87 = arith.constant 0 : index
      %171 = vector.load %arg20[%c4, %c0_86, %c0_87] : memref<8x32x128xf32, #tpu.memory_space<vmem>>, vector<1x32x128xf32>
      %172 = vector.shape_cast %171 : vector<1x32x128xf32> to vector<32x128xf32>
      %cst_88 = arith.constant dense<0.000000e+00> : vector<6x128xf32>
      %173 = tpu.matmul %170, %172, %cst_88 {dimension_numbers = #tpu.dot_dimension_numbers<[1], [0], [0], [1], [0, 0, 1, 1], [], []>} : vector<6x32xf32>, vector<32x128xf32>, vector<6x128xf32> -> vector<6x128xf32>
      %174 = arith.addf %169, %173 : vector<6x128xf32>
      %175 = vector.extract_strided_slice %150 {offsets = [30, 0], sizes = [6, 32], strides = [1, 1]} : vector<48x32xf32> to vector<6x32xf32>
      %c5 = arith.constant 5 : index
      %c0_89 = arith.constant 0 : index
      %c0_90 = arith.constant 0 : index
      %176 = vector.load %arg20[%c5, %c0_89, %c0_90] : memref<8x32x128xf32, #tpu.memory_space<vmem>>, vector<1x32x128xf32>
      %177 = vector.shape_cast %176 : vector<1x32x128xf32> to vector<32x128xf32>
      %cst_91 = arith.constant dense<0.000000e+00> : vector<6x128xf32>
      %178 = tpu.matmul %175, %177, %cst_91 {dimension_numbers = #tpu.dot_dimension_numbers<[1], [0], [0], [1], [0, 0, 1, 1], [], []>} : vector<6x32xf32>, vector<32x128xf32>, vector<6x128xf32> -> vector<6x128xf32>
      %179 = arith.addf %174, %178 : vector<6x128xf32>
      %180 = vector.extract_strided_slice %150 {offsets = [36, 0], sizes = [6, 32], strides = [1, 1]} : vector<48x32xf32> to vector<6x32xf32>
      %c6 = arith.constant 6 : index
      %c0_92 = arith.constant 0 : index
      %c0_93 = arith.constant 0 : index
      %181 = vector.load %arg20[%c6, %c0_92, %c0_93] : memref<8x32x128xf32, #tpu.memory_space<vmem>>, vector<1x32x128xf32>
      %182 = vector.shape_cast %181 : vector<1x32x128xf32> to vector<32x128xf32>
      %cst_94 = arith.constant dense<0.000000e+00> : vector<6x128xf32>
      %183 = tpu.matmul %180, %182, %cst_94 {dimension_numbers = #tpu.dot_dimension_numbers<[1], [0], [0], [1], [0, 0, 1, 1], [], []>} : vector<6x32xf32>, vector<32x128xf32>, vector<6x128xf32> -> vector<6x128xf32>
      %184 = arith.addf %179, %183 : vector<6x128xf32>
      %185 = vector.extract_strided_slice %150 {offsets = [42, 0], sizes = [6, 32], strides = [1, 1]} : vector<48x32xf32> to vector<6x32xf32>
      %c7 = arith.constant 7 : index
      %c0_95 = arith.constant 0 : index
      %c0_96 = arith.constant 0 : index
      %186 = vector.load %arg20[%c7, %c0_95, %c0_96] : memref<8x32x128xf32, #tpu.memory_space<vmem>>, vector<1x32x128xf32>
      %187 = vector.shape_cast %186 : vector<1x32x128xf32> to vector<32x128xf32>
      %cst_97 = arith.constant dense<0.000000e+00> : vector<6x128xf32>
      %188 = tpu.matmul %185, %187, %cst_97 {dimension_numbers = #tpu.dot_dimension_numbers<[1], [0], [0], [1], [0, 0, 1, 1], [], []>} : vector<6x32xf32>, vector<32x128xf32>, vector<6x128xf32> -> vector<6x128xf32>
      %189 = arith.addf %184, %188 : vector<6x128xf32>
      %c0_98 = arith.constant 0 : index
      %c0_99 = arith.constant 0 : index
      %190 = vector.load %arg21[%c0_98, %c0_99] : memref<1x128xf32, #tpu.memory_space<vmem>>, vector<1x128xf32>
      %191 = vector.broadcast %190 : vector<1x128xf32> to vector<6x128xf32>
      %192 = arith.addf %189, %191 : vector<6x128xf32>
      %cst_100 = arith.constant 0.000000e+00 : f32
      %193 = vector.broadcast %cst_100 : f32 to vector<6x128xf32>
      %194 = arith.maximumf %192, %193 : vector<6x128xf32>
      %c0_101 = arith.constant 0 : index
      %c0_102 = arith.constant 0 : index
      %195 = vector.load %arg22[%c0_101, %c0_102] : memref<128x256xf32, #tpu.memory_space<vmem>>, vector<128x256xf32>
      %cst_103 = arith.constant dense<0.000000e+00> : vector<6x256xf32>
      %196 = tpu.matmul %194, %195, %cst_103 {dimension_numbers = #tpu.dot_dimension_numbers<[1], [0], [0], [1], [0, 0, 1, 1], [], []>} : vector<6x128xf32>, vector<128x256xf32>, vector<6x256xf32> -> vector<6x256xf32>
      %c0_104 = arith.constant 0 : index
      %c0_105 = arith.constant 0 : index
      %197 = vector.load %arg23[%c0_104, %c0_105] : memref<1x256xf32, #tpu.memory_space<vmem>>, vector<1x256xf32>
      %198 = vector.broadcast %197 : vector<1x256xf32> to vector<6x256xf32>
      %199 = arith.addf %196, %198 : vector<6x256xf32>
      %cst_106 = arith.constant 0.000000e+00 : f32
      %200 = vector.broadcast %cst_106 : f32 to vector<6x256xf32>
      %201 = arith.maximumf %199, %200 : vector<6x256xf32>
      %c0_107 = arith.constant 0 : index
      %c0_108 = arith.constant 0 : index
      %202 = vector.load %arg24[%c0_107, %c0_108] : memref<256x128xf32, #tpu.memory_space<vmem>>, vector<256x128xf32>
      %cst_109 = arith.constant dense<0.000000e+00> : vector<6x128xf32>
      %203 = tpu.matmul %201, %202, %cst_109 {dimension_numbers = #tpu.dot_dimension_numbers<[1], [0], [0], [1], [0, 0, 1, 1], [], []>} : vector<6x256xf32>, vector<256x128xf32>, vector<6x128xf32> -> vector<6x128xf32>
      %c0_110 = arith.constant 0 : index
      %c0_111 = arith.constant 0 : index
      %204 = vector.load %arg25[%c0_110, %c0_111] : memref<1x128xf32, #tpu.memory_space<vmem>>, vector<1x128xf32>
      %205 = vector.broadcast %204 : vector<1x128xf32> to vector<6x128xf32>
      %206 = arith.addf %203, %205 : vector<6x128xf32>
      %cst_112 = arith.constant 0.000000e+00 : f32
      %207 = vector.broadcast %cst_112 : f32 to vector<6x128xf32>
      %208 = arith.maximumf %206, %207 : vector<6x128xf32>
      %c0_113 = arith.constant 0 : index
      %c0_114 = arith.constant 0 : index
      %209 = vector.load %arg26[%c0_113, %c0_114] : memref<128x64xf32, #tpu.memory_space<vmem>>, vector<128x64xf32>
      %cst_115 = arith.constant dense<0.000000e+00> : vector<6x64xf32>
      %210 = tpu.matmul %208, %209, %cst_115 {dimension_numbers = #tpu.dot_dimension_numbers<[1], [0], [0], [1], [0, 0, 1, 1], [], []>} : vector<6x128xf32>, vector<128x64xf32>, vector<6x64xf32> -> vector<6x64xf32>
      %c0_116 = arith.constant 0 : index
      %c0_117 = arith.constant 0 : index
      %211 = vector.load %arg27[%c0_116, %c0_117] : memref<1x64xf32, #tpu.memory_space<vmem>>, vector<1x64xf32>
      %212 = vector.broadcast %211 : vector<1x64xf32> to vector<6x64xf32>
      %213 = arith.addf %210, %212 : vector<6x64xf32>
      %c0_118 = arith.constant 0 : index
      %c0_119 = arith.constant 0 : index
      %214 = vector.load %arg28[%c0_118, %c0_119] : memref<64x100xf32, #tpu.memory_space<vmem>>, vector<64x100xf32>
      %cst_120 = arith.constant dense<0.000000e+00> : vector<6x100xf32>
      %215 = tpu.matmul %213, %214, %cst_120 {dimension_numbers = #tpu.dot_dimension_numbers<[1], [0], [0], [1], [0, 0, 1, 1], [], []>} : vector<6x64xf32>, vector<64x100xf32>, vector<6x100xf32> -> vector<6x100xf32>
      %c0_121 = arith.constant 0 : index
      %c0_122 = arith.constant 0 : index
      %216 = vector.load %arg29[%c0_121, %c0_122] : memref<1x100xf32, #tpu.memory_space<vmem>>, vector<1x100xf32>
      %217 = vector.broadcast %216 : vector<1x100xf32> to vector<6x100xf32>
      %218 = arith.addf %215, %217 : vector<6x100xf32>
      %c0_123 = arith.constant 0 : index
      %c0_124 = arith.constant 0 : index
      %219 = vector.load %arg40[%c0_123, %c0_124] : memref<6x100xf32, #tpu.memory_space<vmem>>, vector<6x100xf32>
      tpu.vector_store %arg40[%c0_123, %c0_124], %218 {strides = array<i32>} : memref<6x100xf32, #tpu.memory_space<vmem>>, vector<6x100xf32>,
    } else {
    }
    return
  }
  func.func @transform_0(%arg0: i32) -> (i32, i32) {
    %c0_i32 = arith.constant 0 : i32
    %c0_i32_0 = arith.constant 0 : i32
    %c0_i32_1 = arith.constant 0 : i32
    return %c0_i32, %c0_i32_0 : i32, i32
  }
  func.func @transform_1(%arg0: i32) -> (i32, i32) {
    %c0_i32 = arith.constant 0 : i32
    %c0_i32_0 = arith.constant 0 : i32
    %c0_i32_1 = arith.constant 0 : i32
    return %c0_i32, %c0_i32_0 : i32, i32
  }
  func.func @transform_2(%arg0: i32) -> (i32, i32) {
    %c0_i32 = arith.constant 0 : i32
    %c0_i32_0 = arith.constant 0 : i32
    %c0_i32_1 = arith.constant 0 : i32
    return %c0_i32, %c0_i32_0 : i32, i32
  }
  func.func @transform_3(%arg0: i32) -> (i32, i32) {
    %c0_i32 = arith.constant 0 : i32
    %c0_i32_0 = arith.constant 0 : i32
    %c0_i32_1 = arith.constant 0 : i32
    return %c0_i32, %c0_i32_0 : i32, i32
  }
  func.func @transform_4(%arg0: i32) -> (i32, i32) {
    %c0_i32 = arith.constant 0 : i32
    %c0_i32_0 = arith.constant 0 : i32
    %c0_i32_1 = arith.constant 0 : i32
    return %c0_i32, %c0_i32_0 : i32, i32
  }
  func.func @transform_5(%arg0: i32) -> (i32, i32) {
    %c0_i32 = arith.constant 0 : i32
    %c0_i32_0 = arith.constant 0 : i32
    %c0_i32_1 = arith.constant 0 : i32
    return %c0_i32, %c0_i32_0 : i32, i32
  }
  func.func @transform_6(%arg0: i32) -> (i32, i32) {
    %c0_i32 = arith.constant 0 : i32
    %c0_i32_0 = arith.constant 0 : i32
    %c0_i32_1 = arith.constant 0 : i32
    return %c0_i32, %c0_i32_0 : i32, i32
  }
  func.func @transform_7(%arg0: i32) -> (i32, i32) {
    %c0_i32 = arith.constant 0 : i32
    %c0_i32_0 = arith.constant 0 : i32
    %c0_i32_1 = arith.constant 0 : i32
    return %c0_i32, %c0_i32_0 : i32, i32
  }
  func.func @transform_8(%arg0: i32) -> (i32, i32) {
    %c0_i32 = arith.constant 0 : i32
    %c0_i32_0 = arith.constant 0 : i32
    %c0_i32_1 = arith.constant 0 : i32
    return %c0_i32, %c0_i32_0 : i32, i32
  }
  func.func @transform_9(%arg0: i32) -> (i32, i32) {
    %c0_i32 = arith.constant 0 : i32
    %c0_i32_0 = arith.constant 0 : i32
    %c0_i32_1 = arith.constant 0 : i32
    return %c0_i32, %c0_i32_0 : i32, i32
  }
  func.func @transform_10(%arg0: i32) -> (i32, i32) {
    %c0_i32 = arith.constant 0 : i32
    %c0_i32_0 = arith.constant 0 : i32
    %c0_i32_1 = arith.constant 0 : i32
    return %c0_i32, %c0_i32_0 : i32, i32
  }
  func.func @transform_11(%arg0: i32) -> (i32, i32) {
    %c0_i32 = arith.constant 0 : i32
    %c0_i32_0 = arith.constant 0 : i32
    %c0_i32_1 = arith.constant 0 : i32
    return %c0_i32, %c0_i32_0 : i32, i32
  }
  func.func @transform_12(%arg0: i32) -> (i32, i32) {
    %c0_i32 = arith.constant 0 : i32
    %c0_i32_0 = arith.constant 0 : i32
    %c0_i32_1 = arith.constant 0 : i32
    return %c0_i32, %c0_i32_0 : i32, i32
  }
  func.func @transform_13(%arg0: i32) -> (i32, i32, i32) {
    %c0_i32 = arith.constant 0 : i32
    %c0_i32_0 = arith.constant 0 : i32
    %c0_i32_1 = arith.constant 0 : i32
    %c0_i32_2 = arith.constant 0 : i32
    return %c0_i32, %c0_i32_0, %c0_i32_1 : i32, i32, i32
  }
  func.func @transform_14(%arg0: i32) -> (i32, i32, i32) {
    %c0_i32 = arith.constant 0 : i32
    %c0_i32_0 = arith.constant 0 : i32
    %c0_i32_1 = arith.constant 0 : i32
    %c0_i32_2 = arith.constant 0 : i32
    return %c0_i32, %c0_i32_0, %c0_i32_1 : i32, i32, i32
  }
  func.func @transform_15(%arg0: i32) -> (i32, i32, i32) {
    %c0_i32 = arith.constant 0 : i32
    %c0_i32_0 = arith.constant 0 : i32
    %c0_i32_1 = arith.constant 0 : i32
    %c0_i32_2 = arith.constant 0 : i32
    return %c0_i32, %c0_i32_0, %c0_i32_1 : i32, i32, i32
  }
  func.func @transform_16(%arg0: i32) -> (i32, i32, i32) {
    %c0_i32 = arith.constant 0 : i32
    %c0_i32_0 = arith.constant 0 : i32
    %c0_i32_1 = arith.constant 0 : i32
    %c0_i32_2 = arith.constant 0 : i32
    return %c0_i32, %c0_i32_0, %c0_i32_1 : i32, i32, i32
  }
  func.func @transform_17(%arg0: i32) -> (i32, i32, i32) {
    %c0_i32 = arith.constant 0 : i32
    %c0_i32_0 = arith.constant 0 : i32
    %c0_i32_1 = arith.constant 0 : i32
    %c0_i32_2 = arith.constant 0 : i32
    return %c0_i32, %c0_i32_0, %c0_i32_1 : i32, i32, i32
  }
  func.func @transform_18(%arg0: i32) -> (i32, i32, i32) {
    %c0_i32 = arith.constant 0 : i32
    %c0_i32_0 = arith.constant 0 : i32
    %c0_i32_1 = arith.constant 0 : i32
    %c0_i32_2 = arith.constant 0 : i32
    return %c0_i32, %c0_i32_0, %c0_i32_1 : i32, i32, i32
  }
  func.func @transform_19(%arg0: i32) -> (i32, i32, i32) {
    %c0_i32 = arith.constant 0 : i32
    %c0_i32_0 = arith.constant 0 : i32
    %c0_i32_1 = arith.constant 0 : i32
    %c0_i32_2 = arith.constant 0 : i32
    return %c0_i32, %c0_i32_0, %c0_i32_1 : i32, i32, i32
  }
  func.func @transform_20(%arg0: i32) -> (i32, i32) {
    %c0_i32 = arith.constant 0 : i32
    %c0_i32_0 = arith.constant 0 : i32
    %c0_i32_1 = arith.constant 0 : i32
    return %c0_i32, %c0_i32_0 : i32, i32
  }
  func.func @transform_21(%arg0: i32) -> (i32, i32) {
    %c0_i32 = arith.constant 0 : i32
    %c0_i32_0 = arith.constant 0 : i32
    %c0_i32_1 = arith.constant 0 : i32
    return %c0_i32, %c0_i32_0 : i32, i32
  }
  func.func @transform_22(%arg0: i32) -> (i32, i32) {
    %c0_i32 = arith.constant 0 : i32
    %c0_i32_0 = arith.constant 0 : i32
    %c0_i32_1 = arith.constant 0 : i32
    return %c0_i32, %c0_i32_0 : i32, i32
  }
  func.func @transform_23(%arg0: i32) -> (i32, i32) {
    %c0_i32 = arith.constant 0 : i32
    %c0_i32_0 = arith.constant 0 : i32
    %c0_i32_1 = arith.constant 0 : i32
    return %c0_i32, %c0_i32_0 : i32, i32
  }
  func.func @transform_24(%arg0: i32) -> (i32, i32) {
    %c0_i32 = arith.constant 0 : i32
    %c0_i32_0 = arith.constant 0 : i32
    %c0_i32_1 = arith.constant 0 : i32
    return %c0_i32, %c0_i32_0 : i32, i32
  }
  func.func @transform_25(%arg0: i32) -> (i32, i32) {
    %c0_i32 = arith.constant 0 : i32
    %c0_i32_0 = arith.constant 0 : i32
    %c0_i32_1 = arith.constant 0 : i32
    return %c0_i32, %c0_i32_0 : i32, i32
  }
  func.func @transform_26(%arg0: i32) -> (i32, i32) {
    %c0_i32 = arith.constant 0 : i32
    %c0_i32_0 = arith.constant 0 : i32
    %c0_i32_1 = arith.constant 0 : i32
    return %c0_i32, %c0_i32_0 : i32, i32
  }
  func.func @transform_27(%arg0: i32) -> (i32, i32) {
    %c0_i32 = arith.constant 0 : i32
    %c0_i32_0 = arith.constant 0 : i32
    %c0_i32_1 = arith.constant 0 : i32
    return %c0_i32, %c0_i32_0 : i32, i32
  }
  func.func @transform_28(%arg0: i32) -> (i32, i32) {
    %c0_i32 = arith.constant 0 : i32
    %c0_i32_0 = arith.constant 0 : i32
    %c0_i32_1 = arith.constant 0 : i32
    return %c0_i32, %c0_i32_0 : i32, i32
  }
  func.func @transform_29(%arg0: i32) -> (i32, i32) {
    %c0_i32 = arith.constant 0 : i32
    %c0_i32_0 = arith.constant 0 : i32
    %c0_i32_1 = arith.constant 0 : i32
    return %c0_i32, %c0_i32_0 : i32, i32
  }
  func.func @transform_30(%arg0: i32) -> (i32, i32) {
    %c0_i32 = arith.constant 0 : i32
    %c0_i32_0 = arith.constant 0 : i32
    %c0_i32_1 = arith.constant 0 : i32
    return %c0_i32, %c0_i32_0 : i32, i32
  }
  func.func @transform_31(%arg0: i32) -> (i32, i32) {
    %c0_i32 = arith.constant 0 : i32
    %c0_i32_0 = arith.constant 0 : i32
    %c0_i32_1 = arith.constant 0 : i32
    return %c0_i32, %c0_i32_0 : i32, i32
  }
  func.func @transform_32(%arg0: i32) -> (i32, i32) {
    %c0_i32 = arith.constant 0 : i32
    %c0_i32_0 = arith.constant 0 : i32
    %c0_i32_1 = arith.constant 0 : i32
    return %c0_i32, %c0_i32_0 : i32, i32
  }
  func.func @transform_33(%arg0: i32) -> (i32, i32) {
    %c0_i32 = arith.constant 0 : i32
    %c0_i32_0 = arith.constant 0 : i32
    %c0_i32_1 = arith.constant 0 : i32
    return %c0_i32, %c0_i32_0 : i32, i32
  }
  func.func @transform_34(%arg0: i32) -> (i32, i32) {
    %c0_i32 = arith.constant 0 : i32
    %c0_i32_0 = arith.constant 0 : i32
    %c0_i32_1 = arith.constant 0 : i32
    return %c0_i32, %c0_i32_0 : i32, i32
  }
  func.func @transform_35(%arg0: i32) -> (i32, i32) {
    %c0_i32 = arith.constant 0 : i32
    %c0_i32_0 = arith.constant 0 : i32
    %c0_i32_1 = arith.constant 0 : i32
    return %c0_i32, %c0_i32_0 : i32, i32
  }
  func.func @transform_36(%arg0: i32) -> (i32, i32) {
    %c0_i32 = arith.constant 0 : i32
    %c0_i32_0 = arith.constant 0 : i32
    %c0_i32_1 = arith.constant 0 : i32
    return %c0_i32, %c0_i32_0 : i32, i32
  }
  func.func @transform_37(%arg0: i32) -> (i32, i32) {
    %c0_i32 = arith.constant 0 : i32
    %c0_i32_0 = arith.constant 0 : i32
    %c0_i32_1 = arith.constant 0 : i32
    return %c0_i32, %c0_i32_0 : i32, i32
  }
  func.func @transform_38(%arg0: i32) -> (i32, i32) {
    %c0_i32 = arith.constant 0 : i32
    %c0_i32_0 = arith.constant 0 : i32
    %c0_i32_1 = arith.constant 0 : i32
    return %c0_i32, %c0_i32_0 : i32, i32
  }
  func.func @transform_39(%arg0: i32) -> (i32, i32) {
    %c0_i32 = arith.constant 0 : i32
    %c0_i32_0 = arith.constant 0 : i32
    %c0_i32_1 = arith.constant 0 : i32
    return %c0_i32, %c0_i32_0 : i32, i32
  }
  func.func @transform_40(%arg0: i32) -> (i32, i32) {
    %c0_i32 = arith.constant 0 : i32
    %c0_i32_0 = arith.constant 0 : i32
    %c0_i32_1 = arith.constant 0 : i32
    return %c0_i32, %c0_i32_0 : i32, i32
  }
  func.func @transform_41(%arg0: i32) -> (i32, i32) {
    %c0_i32 = arith.constant 0 : i32
    %c0_i32_0 = arith.constant 0 : i32
    %c0_i32_1 = arith.constant 0 : i32
    return %c0_i32, %c0_i32_0 : i32, i32
  }
  func.func @transform_42(%arg0: i32) -> (i32, i32) {
    %c0_i32 = arith.constant 0 : i32
    %c0_i32_0 = arith.constant 0 : i32
    %c0_i32_1 = arith.constant 0 : i32
    return %c0_i32, %c0_i32_0 : i32, i32
  }
}

</mosaic_0001>

<bundles_post_ra>
// kernel: tile.6
= control target key start
LH: loop header
LB: loop body
LE: loop exit
PB: predicated region body
PF: predicated region fallthrough
CT: control target
= control target key end

     0   :  { %s334_s0 = inlined_call_operand.vmem [shape: f32[6,6], index: 0, kind: input, shape index: {}]   ;;  %s335_s1 = inlined_call_operand.vmem [shape: f32[8,6,8,6], index: 1, kind: output, shape index: {}]  }
   0x1   :  { %v4_v0 = vld [vmem:[%s334_s0] ss:$0 sm:$0xff]  ;;  %v117_v1 = vld [vmem:[%s334_s0 + $0x1] ss:$0 sm:$0xff]  ;;  %v126_v2 = vld [vmem:[%s334_s0 + $0x2] ss:$0 sm:$0xff] }
   0x2   :  { %5 = vst [vmem:[%s335_s1] sm:$0xff] %v4_v0  ;;  %110 = vst [vmem:[%s335_s1 + $0x30] sm:$0xff] %v4_v0  ;;  %v135_v3 = vld [vmem:[%s334_s0 + $0x3] ss:$0 sm:$0xff]  ;;  %v144_v4 = vld [vmem:[%s334_s0 + $0x4] ss:$0 sm:$0xff] }
   0x3   :  { %111 = vst [vmem:[%s335_s1 + $0x60] sm:$0xff] %v4_v0  ;;  %112 = vst [vmem:[%s335_s1 + $0x90] sm:$0xff] %v4_v0  ;;  %v153_v5 = vld [vmem:[%s334_s0 + $0x5] ss:$0 sm:$0xff] }
   0x4   :  { %113 = vst [vmem:[%s335_s1 + $0xc0] sm:$0xff] %v4_v0  ;;  %114 = vst [vmem:[%s335_s1 + $0xf0] sm:$0xff] %v4_v0 }
   0x5   :  { %115 = vst [vmem:[%s335_s1 + $0x120] sm:$0xff] %v4_v0  ;;  %116 = vst [vmem:[%s335_s1 + $0x150] sm:$0xff] %v4_v0 }
   0x6   :  { %118 = vst [vmem:[%s335_s1 + $0x8] sm:$0xff] %v117_v1  ;;  %119 = vst [vmem:[%s335_s1 + $0x38] sm:$0xff] %v117_v1 }
   0x7   :  { %120 = vst [vmem:[%s335_s1 + $0x68] sm:$0xff] %v117_v1  ;;  %121 = vst [vmem:[%s335_s1 + $0x98] sm:$0xff] %v117_v1 }
   0x8   :  { %122 = vst [vmem:[%s335_s1 + $0xc8] sm:$0xff] %v117_v1  ;;  %123 = vst [vmem:[%s335_s1 + $0xf8] sm:$0xff] %v117_v1 }
   0x9   :  { %124 = vst [vmem:[%s335_s1 + $0x128] sm:$0xff] %v117_v1  ;;  %125 = vst [vmem:[%s335_s1 + $0x158] sm:$0xff] %v117_v1 }
   0xa   :  { %127 = vst [vmem:[%s335_s1 + $0x10] sm:$0xff] %v126_v2  ;;  %128 = vst [vmem:[%s335_s1 + $0x40] sm:$0xff] %v126_v2 }
   0xb   :  { %129 = vst [vmem:[%s335_s1 + $0x70] sm:$0xff] %v126_v2  ;;  %130 = vst [vmem:[%s335_s1 + $0xa0] sm:$0xff] %v126_v2 }
   0xc   :  { %131 = vst [vmem:[%s335_s1 + $0xd0] sm:$0xff] %v126_v2  ;;  %132 = vst [vmem:[%s335_s1 + $0x100] sm:$0xff] %v126_v2 }
   0xd   :  { %133 = vst [vmem:[%s335_s1 + $0x130] sm:$0xff] %v126_v2  ;;  %134 = vst [vmem:[%s335_s1 + $0x160] sm:$0xff] %v126_v2 }
   0xe   :  { %136 = vst [vmem:[%s335_s1 + $0x18] sm:$0xff] %v135_v3  ;;  %137 = vst [vmem:[%s335_s1 + $0x48] sm:$0xff] %v135_v3 }
   0xf   :  { %138 = vst [vmem:[%s335_s1 + $0x78] sm:$0xff] %v135_v3  ;;  %139 = vst [vmem:[%s335_s1 + $0xa8] sm:$0xff] %v135_v3 }
  0x10   :  { %140 = vst [vmem:[%s335_s1 + $0xd8] sm:$0xff] %v135_v3  ;;  %141 = vst [vmem:[%s335_s1 + $0x108] sm:$0xff] %v135_v3 }
  0x11   :  { %142 = vst [vmem:[%s335_s1 + $0x138] sm:$0xff] %v135_v3  ;;  %143 = vst [vmem:[%s335_s1 + $0x168] sm:$0xff] %v135_v3 }
  0x12   :  { %145 = vst [vmem:[%s335_s1 + $0x20] sm:$0xff] %v144_v4  ;;  %146 = vst [vmem:[%s335_s1 + $0x50] sm:$0xff] %v144_v4 }
  0x13   :  { %147 = vst [vmem:[%s335_s1 + $0x80] sm:$0xff] %v144_v4  ;;  %148 = vst [vmem:[%s335_s1 + $0xb0] sm:$0xff] %v144_v4 }
  0x14   :  { %149 = vst [vmem:[%s335_s1 + $0xe0] sm:$0xff] %v144_v4  ;;  %150 = vst [vmem:[%s335_s1 + $0x110] sm:$0xff] %v144_v4 }
  0x15   :  { %151 = vst [vmem:[%s335_s1 + $0x140] sm:$0xff] %v144_v4  ;;  %152 = vst [vmem:[%s335_s1 + $0x170] sm:$0xff] %v144_v4 }
  0x16   :  { %154 = vst [vmem:[%s335_s1 + $0x28] sm:$0xff] %v153_v5  ;;  %155 = vst [vmem:[%s335_s1 + $0x58] sm:$0xff] %v153_v5 }
  0x17   :  { %156 = vst [vmem:[%s335_s1 + $0x88] sm:$0xff] %v153_v5  ;;  %157 = vst [vmem:[%s335_s1 + $0xb8] sm:$0xff] %v153_v5 }
  0x18   :  { %158 = vst [vmem:[%s335_s1 + $0xe8] sm:$0xff] %v153_v5  ;;  %159 = vst [vmem:[%s335_s1 + $0x118] sm:$0xff] %v153_v5 }
  0x19   :  { %160 = vst [vmem:[%s335_s1 + $0x148] sm:$0xff] %v153_v5  ;;  %161 = vst [vmem:[%s335_s1 + $0x178] sm:$0xff] %v153_v5 }

// kernel: tile.7
= control target key start
LH: loop header
LB: loop body
LE: loop exit
PB: predicated region body
PF: predicated region fallthrough
CT: control target
= control target key end

     0   :  { %vm4_vm0 = vcmask 1047556   ;;  %s649_s14 = smov 42   ;;  %s650_s18 = smov 36   ;;  %vm6_vm1 = vcmask 48128   ;;  %vm61_vm2 = vcmask 392528   ;;  %vm126_vm3 = vcmask 343328   ;;  %s1188_s0 = inlined_call_operand.vmem [shape: f32[8,6,8,6], index: 0, kind: input, shape index: {}]   ;;  %s1189_s1 = inlined_call_operand.vmem [shape: f32[48,48], index: 1, kind: output, shape index: {}]  }
   0x1   :  { %v528_v0 = vld [vmem:[%s1188_s0 + $0x47] ss:$8 sm:$0xf]   ;;  %v542_v18 = vld [vmem:[%s1188_s0 + $0x106] ss:$8 sm:$0xf]  }
   0x2   :  { %v529_v1 = vld [vmem:[%s1188_s0 + $0x47] ss:$8 sm:$0xf0]   ;;  %v543_v19 = vld [vmem:[%s1188_s0 + $0x106] ss:$8 sm:$0xf0]  }
   0x3   :  { %v79_v2 = vsel %vm4_vm0, %v529_v1, %v528_v0  ;;  %v523_v3 = vld [vmem:[%s1188_s0 + $0x7] ss:$8 sm:$0xf]   ;;  %v540_v20 = vld [vmem:[%s1188_s0 + $0x6] ss:$8 sm:$0xf]   ;;  %v133_v22 = vsel %vm4_vm0, %v543_v19, %v542_v18 }
   0x4   :  { %v524_v4 = vld [vmem:[%s1188_s0 + $0x7] ss:$8 sm:$0xf0]   ;;  %80 = vrot.lane.b32.xlu1 %v79_v2, %s649_s14  ;;  %v541_v21 = vld [vmem:[%s1188_s0 + $0x6] ss:$8 sm:$0xf0]  }
   0x5   :  { %v58_v5 = vsel %vm4_vm0, %v524_v4, %v523_v3  ;;  %v531_v6 = vld [vmem:[%s1188_s0 + $0x147] ss:$8 sm:$0xf]   ;;  %v123_v23 = vsel %vm4_vm0, %v541_v21, %v540_v20  ;;  %v548_v24 = vld [vmem:[%s1188_s0 + $0x146] ss:$8 sm:$0xf]  }
   0x6   :  { %v532_v7 = vld [vmem:[%s1188_s0 + $0x147] ss:$8 sm:$0xf0]   ;;  %59 = vrot.lane.b32.xlu0 %v58_v5, %s649_s14  ;;  %v549_v25 = vld [vmem:[%s1188_s0 + $0x146] ss:$8 sm:$0xf0]  }
   0x7   :  { %v90_v8 = vsel %vm4_vm0, %v532_v7, %v531_v6  ;;  %v525_v9 = vld [vmem:[%s1188_s0 + $0x107] ss:$8 sm:$0xf]   ;;  %v545_v26 = vld [vmem:[%s1188_s0 + $0x46] ss:$8 sm:$0xf]   ;;  %v155_v28 = vsel %vm4_vm0, %v549_v25, %v548_v24 }
   0x8   :  { %v526_v10 = vld [vmem:[%s1188_s0 + $0x107] ss:$8 sm:$0xf0]   ;;  %91 = vrot.lane.b32.xlu1 %v90_v8, %s649_s14  ;;  %v546_v27 = vld [vmem:[%s1188_s0 + $0x46] ss:$8 sm:$0xf0]  }
   0x9   :  { %v68_v11 = vsel %vm4_vm0, %v526_v10, %v525_v9  ;;  %v537_v12 = vld [vmem:[%s1188_s0 + $0xc7] ss:$8 sm:$0xf]   ;;  %v144_v29 = vsel %vm4_vm0, %v546_v27, %v545_v26  ;;  %v554_v30 = vld [vmem:[%s1188_s0 + $0xc6] ss:$8 sm:$0xf]  }
   0xa   :  { %v538_v13 = vld [vmem:[%s1188_s0 + $0xc7] ss:$8 sm:$0xf0]   ;;  %69 = vrot.lane.b32.xlu0 %v68_v11, %s649_s14  ;;  %v555_v31 = vld [vmem:[%s1188_s0 + $0xc6] ss:$8 sm:$0xf0]  }
   0xb   :  { %v534_v14 = vld [vmem:[%s1188_s0 + $0x87] ss:$8 sm:$0xf]   ;;  %v112_v16 = vsel %vm4_vm0, %v538_v13, %v537_v12  ;;  %v551_v32 = vld [vmem:[%s1188_s0 + $0x86] ss:$8 sm:$0xf]   ;;  %v177_v34 = vsel %vm4_vm0, %v555_v31, %v554_v30 }
   0xc   :  { %v535_v15 = vld [vmem:[%s1188_s0 + $0x87] ss:$8 sm:$0xf0]   ;;  %113 = vrot.lane.b32.xlu1 %v112_v16, %s649_s14  ;;  %v552_v33 = vld [vmem:[%s1188_s0 + $0x86] ss:$8 sm:$0xf0]  }
   0xd   :  { %v101_v17 = vsel %vm4_vm0, %v535_v15, %v534_v14  ;;  %v166_v35 = vsel %vm4_vm0, %v552_v33, %v551_v32  ;;  %v559_v36 = vld [vmem:[%s1188_s0 + $0x105] ss:$8 sm:$0xf]   ;;  %v576_v53 = vld [vmem:[%s1188_s0 + $0x104] ss:$8 sm:$0xf]  }
   0xe   :  { %102 = vrot.lane.b32.xlu0 %v101_v17, %s649_s14  ;;  %v560_v37 = vld [vmem:[%s1188_s0 + $0x105] ss:$8 sm:$0xf0]   ;;  %s651_s14 = smov 30   ;;  %s652_s28 = smov 24   ;;  %vm191_vm4 = vcmask 294128  }
   0xf   :  { %v557_v38 = vld [vmem:[%s1188_s0 + $0x5] ss:$8 sm:$0xf]   ;;  %v198_v40 = vsel %vm4_vm0, %v560_v37, %v559_v36  ;;  %v577_v54 = vld [vmem:[%s1188_s0 + $0x104] ss:$8 sm:$0xf0]  }
  0x10   :  { %134 = vrot.lane.b32.xlu1 %v133_v22, %s650_s18  ;;  %v558_v39 = vld [vmem:[%s1188_s0 + $0x5] ss:$8 sm:$0xf0]   ;;  %v574_v56 = vld [vmem:[%s1188_s0 + $0x4] ss:$8 sm:$0xf]   ;;  %v263_v1 = vsel %vm4_vm0, %v577_v54, %v576_v53 }
  0x11   :  { %v188_v41 = vsel %vm4_vm0, %v558_v39, %v557_v38  ;;  %v565_v42 = vld [vmem:[%s1188_s0 + $0x145] ss:$8 sm:$0xf]   ;;  %v575_v57 = vld [vmem:[%s1188_s0 + $0x4] ss:$8 sm:$0xf0]  }
  0x12   :  { %124 = vrot.lane.b32.xlu0 %v123_v23, %s650_s18  ;;  %v566_v43 = vld [vmem:[%s1188_s0 + $0x145] ss:$8 sm:$0xf0]   ;;  %v616_v58 = vld [vmem:[%s1188_s0 + $0x142] ss:$8 sm:$0xf]   ;;  %v253_v7 = vsel %vm4_vm0, %v575_v57, %v574_v56 }
  0x13   :  { %v562_v44 = vld [vmem:[%s1188_s0 + $0x45] ss:$8 sm:$0xf]   ;;  %v220_v46 = vsel %vm4_vm0, %v566_v43, %v565_v42  ;;  %v617_v59 = vld [vmem:[%s1188_s0 + $0x142] ss:$8 sm:$0xf0]  }
  0x14   :  { %156 = vrot.lane.b32.xlu1 %v155_v28, %s650_s18  ;;  %v563_v45 = vld [vmem:[%s1188_s0 + $0x45] ss:$8 sm:$0xf0]   ;;  %v582_v60 = vld [vmem:[%s1188_s0 + $0x144] ss:$8 sm:$0xf]   ;;  %v817_v62 = vsel %vm4_vm0, %v617_v59, %v616_v58 }
  0x15   :  { %v209_v47 = vsel %vm4_vm0, %v563_v45, %v562_v44  ;;  %v571_v48 = vld [vmem:[%s1188_s0 + $0xc5] ss:$8 sm:$0xf]   ;;  %v583_v61 = vld [vmem:[%s1188_s0 + $0x144] ss:$8 sm:$0xf0]  }
  0x16   :  { %145 = vrot.lane.b32.xlu0 %v144_v29, %s650_s18  ;;  %v572_v49 = vld [vmem:[%s1188_s0 + $0xc5] ss:$8 sm:$0xf0]   ;;  %v613_v63 = vld [vmem:[%s1188_s0 + $0x42] ss:$8 sm:$0xf]   ;;  %v285_v17 = vsel %vm4_vm0, %v583_v61, %v582_v60 }
  0x17   :  { %v568_v50 = vld [vmem:[%s1188_s0 + $0x85] ss:$8 sm:$0xf]   ;;  %v242_v52 = vsel %vm4_vm0, %v572_v49, %v571_v48  ;;  %v614_v0 = vld [vmem:[%s1188_s0 + $0x42] ss:$8 sm:$0xf0]  }
  0x18   :  { %178 = vrot.lane.b32.xlu1 %v177_v34, %s650_s18  ;;  %v569_v51 = vld [vmem:[%s1188_s0 + $0x85] ss:$8 sm:$0xf0]   ;;  %v579_v2 = vld [vmem:[%s1188_s0 + $0x44] ss:$8 sm:$0xf]   ;;  %v833_v4 = vsel %vm4_vm0, %v614_v0, %v613_v63 }
  0x19   :  { %v231_v55 = vsel %vm4_vm0, %v569_v51, %v568_v50  ;;  %v580_v3 = vld [vmem:[%s1188_s0 + $0x44] ss:$8 sm:$0xf0]   ;;  %v622_v5 = vld [vmem:[%s1188_s0 + $0xc2] ss:$8 sm:$0xf]  }
  0x1a   :  { %167 = vrot.lane.b32.xlu0 %v166_v35, %s650_s18  ;;  %v623_v6 = vld [vmem:[%s1188_s0 + $0xc2] ss:$8 sm:$0xf0]   ;;  %v627_v12 = vld [vmem:[%s1188_s0 + $0x101] ss:$8 sm:$0xf]   ;;  %v274_v23 = vsel %vm4_vm0, %v580_v3, %v579_v2 }
  0x1b   :  { %v843_v8 = vsel %vm4_vm0, %v623_v6, %v622_v5  ;;  %v619_v9 = vld [vmem:[%s1188_s0 + $0x82] ss:$8 sm:$0xf]   ;;  %v588_v13 = vld [vmem:[%s1188_s0 + $0xc4] ss:$8 sm:$0xf]  }
  0x1c   :  { %199 = vrot.lane.b32.xlu1 %v198_v40, %s651_s14  ;;  %v620_v10 = vld [vmem:[%s1188_s0 + $0x82] ss:$8 sm:$0xf0]   ;;  %v589_v14 = vld [vmem:[%s1188_s0 + $0xc4] ss:$8 sm:$0xf0]  }
  0x1d   :  { %v852_v11 = vsel %vm4_vm0, %v620_v10, %v619_v9  ;;  %v628_v15 = vld [vmem:[%s1188_s0 + $0x101] ss:$8 sm:$0xf0]   ;;  %v585_v18 = vld [vmem:[%s1188_s0 + $0x84] ss:$8 sm:$0xf]   ;;  %v307_v35 = vsel %vm4_vm0, %v589_v14, %v588_v13 }
  0x1e   :  { %189 = vrot.lane.b32.xlu0 %v188_v41, %s651_s14  ;;  %v625_v16 = vld [vmem:[%s1188_s0 + $0x1] ss:$8 sm:$0xf]   ;;  %v586_v19 = vld [vmem:[%s1188_s0 + $0x84] ss:$8 sm:$0xf0]   ;;  %v879_v20 = vsel %vm4_vm0, %v628_v15, %v627_v12 }
  0x1f   :  { %v626_v21 = vld [vmem:[%s1188_s0 + $0x1] ss:$8 sm:$0xf0]   ;;  %v593_v30 = vld [vmem:[%s1188_s0 + $0x103] ss:$8 sm:$0xf]   ;;  %v296_v41 = vsel %vm4_vm0, %v586_v19, %v585_v18 }
  0x20   :  { %221 = vrot.lane.b32.xlu1 %v220_v46, %s651_s14  ;;  %v633_v22 = vld [vmem:[%s1188_s0 + $0x141] ss:$8 sm:$0xf]   ;;  %v889_v24 = vsel %vm4_vm0, %v626_v21, %v625_v16  ;;  %v594_v31 = vld [vmem:[%s1188_s0 + $0x103] ss:$8 sm:$0xf0]  }
  0x21   :  { %v634_v25 = vld [vmem:[%s1188_s0 + $0x141] ss:$8 sm:$0xf0]   ;;  %v591_v36 = vld [vmem:[%s1188_s0 + $0x3] ss:$8 sm:$0xf]   ;;  %v328_v53 = vsel %vm4_vm0, %v594_v31, %v593_v30 }
  0x22   :  { %210 = vrot.lane.b32.xlu0 %v209_v47, %s651_s14  ;;  %v630_v26 = vld [vmem:[%s1188_s0 + $0x41] ss:$8 sm:$0xf]   ;;  %v898_v27 = vsel %vm4_vm0, %v634_v25, %v633_v22  ;;  %v592_v37 = vld [vmem:[%s1188_s0 + $0x3] ss:$8 sm:$0xf0]  }
  0x23   :  { %v631_v28 = vld [vmem:[%s1188_s0 + $0x41] ss:$8 sm:$0xf0]   ;;  %v508_v40 = vld [vmem:[%s1188_s0 + $0x40] ss:$8 sm:$0xf]   ;;  %v318_v58 = vsel %vm4_vm0, %v592_v37, %v591_v36 }
  0x24   :  { %243 = vrot.lane.b32.xlu1 %v242_v52, %s651_s14  ;;  %v639_v29 = vld [vmem:[%s1188_s0 + $0xc1] ss:$8 sm:$0xf]   ;;  %v914_v32 = vsel %vm4_vm0, %v631_v28, %v630_v26  ;;  %v509_v43 = vld [vmem:[%s1188_s0 + $0x40] ss:$8 sm:$0xf0]  }
  0x25   :  { %v640_v33 = vld [vmem:[%s1188_s0 + $0xc1] ss:$8 sm:$0xf0]   ;;  %v2_v44 = vld [vmem:[%s1188_s0] ss:$8 sm:$0xf]   ;;  %v13_v45 = vsel %vm4_vm0, %v509_v43, %v508_v40 }
  0x26   :  { %232 = vrot.lane.b32.xlu0 %v231_v55, %s651_s14  ;;  %v636_v34 = vld [vmem:[%s1188_s0 + $0x81] ss:$8 sm:$0xf]   ;;  %v931_v38 = vsel %vm4_vm0, %v640_v33, %v639_v29  ;;  %v3_v46 = vld [vmem:[%s1188_s0] ss:$8 sm:$0xf0]  }
  0x27   :  { %v637_v39 = vld [vmem:[%s1188_s0 + $0x81] ss:$8 sm:$0xf0]   ;;  %v520_v47 = vld [vmem:[%s1188_s0 + $0x140] ss:$8 sm:$0xf]   ;;  %v5_v50 = vsel %vm4_vm0, %v3_v46, %v2_v44 }
  0x28   :  { %264 = vrot.lane.b32.xlu1 %v263_v1, %s652_s28  ;;  %v941_v42 = vsel %vm4_vm0, %v637_v39, %v636_v34  ;;  %v599_v48 = vld [vmem:[%s1188_s0 + $0x143] ss:$8 sm:$0xf]   ;;  %510 = vst.msk [vmem:[%s1189_s1 + $0x8] sm:$0xff] %vm6_vm1, %v13_v45   ;;  %7 = vst.msk [vmem:[%s1189_s1] sm:$0xff] %vm6_vm1, %v5_v50   ;;  %s653_s21 = smov 18  }
  0x29   :  { %v600_v49 = vld [vmem:[%s1188_s0 + $0x143] ss:$8 sm:$0xf0]   ;;  %v521_v51 = vld [vmem:[%s1188_s0 + $0x140] ss:$8 sm:$0xf0]  }
  0x2a   :  { %254 = vrot.lane.b32.xlu0 %v253_v7, %s652_s28  ;;  %v517_v52 = vld [vmem:[%s1188_s0 + $0x100] ss:$8 sm:$0xf]   ;;  %v596_v54 = vld [vmem:[%s1188_s0 + $0x43] ss:$8 sm:$0xf]   ;;  %v49_v55 = vsel %vm4_vm0, %v521_v51, %v520_v47  ;;  %v350_v3 = vsel %vm4_vm0, %v600_v49, %v599_v48 }
  0x2b   :  { %v518_v56 = vld [vmem:[%s1188_s0 + $0x100] ss:$8 sm:$0xf0]   ;;  %522 = vst.msk [vmem:[%s1189_s1 + $0x28] sm:$0xff] %vm6_vm1, %v49_v55   ;;  %s655_s13 = smov 6   ;;  %vm256_vm5 = vcmask 244928  }
  0x2c   :  { %286 = vrot.lane.b32.xlu1 %v285_v17, %s652_s28  ;;  %v514_v57 = vld [vmem:[%s1188_s0 + $0xc0] ss:$8 sm:$0xf]   ;;  %v40_v59 = vsel %vm4_vm0, %v518_v56, %v517_v52  ;;  %v597_v63 = vld [vmem:[%s1188_s0 + $0x43] ss:$8 sm:$0xf0]  }
  0x2d   :  { %v515_v60 = vld [vmem:[%s1188_s0 + $0xc0] ss:$8 sm:$0xf0]   ;;  %519 = vst.msk [vmem:[%s1189_s1 + $0x20] sm:$0xff] %vm6_vm1, %v40_v59   ;;  %v339_v5 = vsel %vm4_vm0, %v597_v63, %v596_v54  ;;  %vm321_vm6 = vcmask 195728   ;;  %vm386_vm7 = vcmask 146528  }
  0x2e   :  { %275 = vrot.lane.b32.xlu0 %v274_v23, %s652_s28  ;;  %v511_v61 = vld [vmem:[%s1188_s0 + $0x80] ss:$8 sm:$0xf]   ;;  %v31_v0 = vsel %vm4_vm0, %v515_v60, %v514_v57  ;;  %v605_v6 = vld [vmem:[%s1188_s0 + $0xc3] ss:$8 sm:$0xf]  }
  0x2f   :  { %v512_v1 = vld [vmem:[%s1188_s0 + $0x80] ss:$8 sm:$0xf0]   ;;  %516 = vst.msk [vmem:[%s1189_s1 + $0x18] sm:$0xff] %vm6_vm1, %v31_v0   ;;  %vm451_vm8 = vcmask 97328  }
  0x30   :  { %308 = vrot.lane.b32.xlu1 %v307_v35, %s652_s28  ;;  %v22_v2 = vsel %vm4_vm0, %v512_v1, %v511_v61  ;;  %v606_v7 = vld [vmem:[%s1188_s0 + $0xc3] ss:$8 sm:$0xf0]   ;;  %v610_v14 = vld [vmem:[%s1188_s0 + $0x102] ss:$8 sm:$0xf]  }
  0x31   :  { %513 = vst.msk [vmem:[%s1189_s1 + $0x10] sm:$0xff] %vm6_vm1, %v22_v2   ;;  %v602_v9 = vld [vmem:[%s1188_s0 + $0x83] ss:$8 sm:$0xf]   ;;  %v372_v12 = vsel %vm4_vm0, %v606_v7, %v605_v6 }
  0x32   :  { %297 = vrot.lane.b32.xlu0 %v296_v41, %s652_s28  ;;  %v603_v10 = vld [vmem:[%s1188_s0 + $0x83] ss:$8 sm:$0xf0]   ;;  %v611_v15 = vld [vmem:[%s1188_s0 + $0x102] ss:$8 sm:$0xf0]  }
  0x33   :  { %v361_v13 = vsel %vm4_vm0, %v603_v10, %v602_v9  ;;  %v608_v16 = vld [vmem:[%s1188_s0 + $0x2] ss:$8 sm:$0xf]   ;;  %v393_v18 = vsel %vm4_vm0, %v611_v15, %v610_v14 }
  0x34   :  { %329 = vrot.lane.b32.xlu1 %v328_v53, %s653_s21  ;;  %v609_v17 = vld [vmem:[%s1188_s0 + $0x2] ss:$8 sm:$0xf0]   ;;  %s654_s0 = smov 12  }
  0x35   :  { %v383_v19 = vsel %vm4_vm0, %v609_v17, %v608_v16 }
  0x36   :  { %319 = vrot.lane.b32.xlu0 %v318_v58, %s653_s21 }
  0x38   :  { %351 = vrot.lane.b32.xlu1 %v350_v3, %s653_s21 }
  0x3a   :  { %340 = vrot.lane.b32.xlu0 %v339_v5, %s653_s21 }
  0x3c   :  { %373 = vrot.lane.b32.xlu1 %v372_v12, %s653_s21 }
  0x3e   :  { %362 = vrot.lane.b32.xlu0 %v361_v13, %s653_s21 }
  0x40   :  { %394 = vrot.lane.b32.xlu1 %v393_v18, %s654_s0 }
  0x42   :  { %384 = vrot.lane.b32.xlu0 %v383_v19, %s654_s0 }
  0x44   :  { %416 = vrot.lane.b32.xlu1 %v817_v62, %s654_s0 }
  0x46   :  { %405 = vrot.lane.b32.xlu0 %v833_v4, %s654_s0 }
  0x48   :  { %438 = vrot.lane.b32.xlu1 %v843_v8, %s654_s0 }
  0x4a   :  { %427 = vrot.lane.b32.xlu0 %v852_v11, %s654_s0 }
  0x4c   :  { %459 = vrot.lane.b32.xlu1 %v879_v20, %s655_s13 }
  0x4e   :  { %449 = vrot.lane.b32.xlu0 %v889_v24, %s655_s13 }
  0x50   :  { %481 = vrot.lane.b32.xlu1 %v898_v27, %s655_s13 }
  0x52   :  { %470 = vrot.lane.b32.xlu0 %v914_v32, %s655_s13 }
  0x54   :  { %503 = vrot.lane.b32.xlu1 %v931_v38, %s655_s13 }
  0x56   :  { %492 = vrot.lane.b32.xlu0 %v941_v42, %s655_s13 }
  0x76   :  { %v81_v62 = vpop.permute.xlu1 %80  }
  0x77   :  { %530 = vst.msk [vmem:[%s1189_s1 + $0x8] sm:$0xff] %vm61_vm2, %v81_v62  }
  0x78   :  { %v60_v4 = vpop.permute.xlu0 %59  }
  0x79   :  { %62 = vst.msk [vmem:[%s1189_s1] sm:$0xff] %vm61_vm2, %v60_v4  }
  0x7a   :  { %v92_v8 = vpop.permute.xlu1 %91  }
  0x7b   :  { %533 = vst.msk [vmem:[%s1189_s1 + $0x28] sm:$0xff] %vm61_vm2, %v92_v8  }
  0x7c   :  { %v70_v11 = vpop.permute.xlu0 %69  }
  0x7d   :  { %527 = vst.msk [vmem:[%s1189_s1 + $0x20] sm:$0xff] %vm61_vm2, %v70_v11  }
  0x7e   :  { %v114_v20 = vpop.permute.xlu1 %113  }
  0x7f   :  { %539 = vst.msk [vmem:[%s1189_s1 + $0x18] sm:$0xff] %vm61_vm2, %v114_v20  }
  0x80   :  { %v103_v21 = vpop.permute.xlu0 %102  }
  0x81   :  { %536 = vst.msk [vmem:[%s1189_s1 + $0x10] sm:$0xff] %vm61_vm2, %v103_v21  }
  0x82   :  { %v135_v22 = vpop.permute.xlu1 %134  }
  0x83   :  { %544 = vst.msk [vmem:[%s1189_s1 + $0x20] sm:$0xff] %vm126_vm3, %v135_v22  }
  0x84   :  { %v125_v23 = vpop.permute.xlu0 %124  }
  0x85   :  { %127 = vst.msk [vmem:[%s1189_s1] sm:$0xff] %vm126_vm3, %v125_v23  }
  0x86   :  { %v157_v24 = vpop.permute.xlu1 %156  }
  0x87   :  { %550 = vst.msk [vmem:[%s1189_s1 + $0x28] sm:$0xff] %vm126_vm3, %v157_v24  }
  0x88   :  { %v146_v25 = vpop.permute.xlu0 %145  }
  0x89   :  { %547 = vst.msk [vmem:[%s1189_s1 + $0x8] sm:$0xff] %vm126_vm3, %v146_v25  }
  0x8a   :  { %v179_v26 = vpop.permute.xlu1 %178  }
  0x8b   :  { %556 = vst.msk [vmem:[%s1189_s1 + $0x18] sm:$0xff] %vm126_vm3, %v179_v26  }
  0x8c   :  { %v168_v27 = vpop.permute.xlu0 %167  }
  0x8d   :  { %553 = vst.msk [vmem:[%s1189_s1 + $0x10] sm:$0xff] %vm126_vm3, %v168_v27  }
  0x8e   :  { %v200_v28 = vpop.permute.xlu1 %199  }
  0x8f   :  { %561 = vst.msk [vmem:[%s1189_s1 + $0x20] sm:$0xff] %vm191_vm4, %v200_v28  }
  0x90   :  { %v190_v29 = vpop.permute.xlu0 %189  }
  0x91   :  { %192 = vst.msk [vmem:[%s1189_s1] sm:$0xff] %vm191_vm4, %v190_v29  }
  0x92   :  { %v222_v30 = vpop.permute.xlu1 %221  }
  0x93   :  { %567 = vst.msk [vmem:[%s1189_s1 + $0x28] sm:$0xff] %vm191_vm4, %v222_v30  }
  0x94   :  { %v211_v31 = vpop.permute.xlu0 %210  }
  0x95   :  { %564 = vst.msk [vmem:[%s1189_s1 + $0x8] sm:$0xff] %vm191_vm4, %v211_v31  }
  0x96   :  { %v244_v32 = vpop.permute.xlu1 %243  }
  0x97   :  { %573 = vst.msk [vmem:[%s1189_s1 + $0x18] sm:$0xff] %vm191_vm4, %v244_v32  }
  0x98   :  { %v233_v33 = vpop.permute.xlu0 %232  }
  0x99   :  { %570 = vst.msk [vmem:[%s1189_s1 + $0x10] sm:$0xff] %vm191_vm4, %v233_v33  }
  0x9a   :  { %v265_v34 = vpop.permute.xlu1 %264  }
  0x9b   :  { %578 = vst.msk [vmem:[%s1189_s1 + $0x20] sm:$0xff] %vm256_vm5, %v265_v34  }
  0x9c   :  { %v255_v35 = vpop.permute.xlu0 %254  }
  0x9d   :  { %257 = vst.msk [vmem:[%s1189_s1] sm:$0xff] %vm256_vm5, %v255_v35  }
  0x9e   :  { %v287_v36 = vpop.permute.xlu1 %286  }
  0x9f   :  { %584 = vst.msk [vmem:[%s1189_s1 + $0x28] sm:$0xff] %vm256_vm5, %v287_v36  }
  0xa0   :  { %v276_v37 = vpop.permute.xlu0 %275  }
  0xa1   :  { %581 = vst.msk [vmem:[%s1189_s1 + $0x8] sm:$0xff] %vm256_vm5, %v276_v37  }
  0xa2   :  { %v309_v38 = vpop.permute.xlu1 %308  }
  0xa3   :  { %590 = vst.msk [vmem:[%s1189_s1 + $0x18] sm:$0xff] %vm256_vm5, %v309_v38  }
  0xa4   :  { %v298_v39 = vpop.permute.xlu0 %297  }
  0xa5   :  { %587 = vst.msk [vmem:[%s1189_s1 + $0x10] sm:$0xff] %vm256_vm5, %v298_v39  }
  0xa6   :  { %v330_v40 = vpop.permute.xlu1 %329  }
  0xa7   :  { %595 = vst.msk [vmem:[%s1189_s1 + $0x20] sm:$0xff] %vm321_vm6, %v330_v40  }
  0xa8   :  { %v320_v41 = vpop.permute.xlu0 %319  }
  0xa9   :  { %322 = vst.msk [vmem:[%s1189_s1] sm:$0xff] %vm321_vm6, %v320_v41  }
  0xaa   :  { %v352_v42 = vpop.permute.xlu1 %351  }
  0xab   :  { %601 = vst.msk [vmem:[%s1189_s1 + $0x28] sm:$0xff] %vm321_vm6, %v352_v42  }
  0xac   :  { %v341_v43 = vpop.permute.xlu0 %340  }
  0xad   :  { %598 = vst.msk [vmem:[%s1189_s1 + $0x8] sm:$0xff] %vm321_vm6, %v341_v43  }
  0xae   :  { %v374_v44 = vpop.permute.xlu1 %373  }
  0xaf   :  { %607 = vst.msk [vmem:[%s1189_s1 + $0x18] sm:$0xff] %vm321_vm6, %v374_v44  }
  0xb0   :  { %v363_v45 = vpop.permute.xlu0 %362  }
  0xb1   :  { %604 = vst.msk [vmem:[%s1189_s1 + $0x10] sm:$0xff] %vm321_vm6, %v363_v45  }
  0xb2   :  { %v395_v46 = vpop.permute.xlu1 %394  }
  0xb3   :  { %612 = vst.msk [vmem:[%s1189_s1 + $0x20] sm:$0xff] %vm386_vm7, %v395_v46  }
  0xb4   :  { %v385_v47 = vpop.permute.xlu0 %384  }
  0xb5   :  { %387 = vst.msk [vmem:[%s1189_s1] sm:$0xff] %vm386_vm7, %v385_v47  }
  0xb6   :  { %v417_v48 = vpop.permute.xlu1 %416  }
  0xb7   :  { %618 = vst.msk [vmem:[%s1189_s1 + $0x28] sm:$0xff] %vm386_vm7, %v417_v48  }
  0xb8   :  { %v406_v49 = vpop.permute.xlu0 %405  }
  0xb9   :  { %615 = vst.msk [vmem:[%s1189_s1 + $0x8] sm:$0xff] %vm386_vm7, %v406_v49  }
  0xba   :  { %v439_v50 = vpop.permute.xlu1 %438  }
  0xbb   :  { %624 = vst.msk [vmem:[%s1189_s1 + $0x18] sm:$0xff] %vm386_vm7, %v439_v50  }
  0xbc   :  { %v428_v51 = vpop.permute.xlu0 %427  }
  0xbd   :  { %621 = vst.msk [vmem:[%s1189_s1 + $0x10] sm:$0xff] %vm386_vm7, %v428_v51  }
  0xbe   :  { %v460_v52 = vpop.permute.xlu1 %459  }
  0xbf   :  { %629 = vst.msk [vmem:[%s1189_s1 + $0x20] sm:$0xff] %vm451_vm8, %v460_v52  }
  0xc0   :  { %v450_v53 = vpop.permute.xlu0 %449  }
  0xc1   :  { %452 = vst.msk [vmem:[%s1189_s1] sm:$0xff] %vm451_vm8, %v450_v53  }
  0xc2   :  { %v482_v54 = vpop.permute.xlu1 %481  }
  0xc3   :  { %635 = vst.msk [vmem:[%s1189_s1 + $0x28] sm:$0xff] %vm451_vm8, %v482_v54  }
  0xc4   :  { %v471_v55 = vpop.permute.xlu0 %470  }
  0xc5   :  { %632 = vst.msk [vmem:[%s1189_s1 + $0x8] sm:$0xff] %vm451_vm8, %v471_v55  }
  0xc6   :  { %v504_v56 = vpop.permute.xlu1 %503  }
  0xc7   :  { %641 = vst.msk [vmem:[%s1189_s1 + $0x18] sm:$0xff] %vm451_vm8, %v504_v56  }
  0xc8   :  { %v493_v57 = vpop.permute.xlu0 %492  }
  0xc9   :  { %638 = vst.msk [vmem:[%s1189_s1 + $0x10] sm:$0xff] %vm451_vm8, %v493_v57  }

// kernel: model_forward.1
= control target key start
LH: loop header
LB: loop body
LE: loop exit
PB: predicated region body
PF: predicated region fallthrough
CT: control target
= control target key end

     0   :  { %s9358_s6 = smov 1   ;;  %s9359_s10 = smov 2   ;;  %s11466_s0 = inlined_call_operand.smem [shape: u32[43], index: -1, kind: input, shape index: {}] }
   0x1   :  { %s9450_s5 = sld [smem:[%s11466_s0]]   ;;  %s9360_s14 = smov 3  }
   0x2   :  { %s9455_s9 = sld [smem:[%s11466_s0 + %s9358_s6]]   ;;  %s9361_s18 = smov 4  }
   0x3   :  { %s9460_s13 = sld [smem:[%s11466_s0 + %s9359_s10]]   ;;  %s9362_s22 = smov 5  }
   0x4   :  { %s9465_s17 = sld [smem:[%s11466_s0 + %s9360_s14]]   ;;  %s9363_s26 = smov 6  }
   0x5   :  { %s9470_s21 = sld [smem:[%s11466_s0 + %s9361_s18]]   ;;  %s9364_s30 = smov 7  }
   0x6   :  { %s9475_s25 = sld [smem:[%s11466_s0 + %s9362_s22]]   ;;  %s9365_s4 = smov 8  }
   0x7   :  { %11504 = sst [smem:[#allocation49_spill]] %s9450_s5  ;;  %s9366_s10 = smov 9  }
   0x8   :  { %11505 = sst [smem:[#allocation50_spill]] %s9455_s9  ;;  %s9367_s15 = smov 10  }
   0x9   :  { %11506 = sst [smem:[#allocation51_spill]] %s9460_s13  ;;  %s9368_s20 = smov 11  }
   0xa   :  { %11507 = sst [smem:[#allocation52_spill]] %s9465_s17  ;;  %s9370_s1 = smov 13  }
   0xb   :  { %11508 = sst [smem:[#allocation53_spill]] %s9470_s21  ;;  %s9371_s7 = smov 14  }
   0xc   :  { %11509 = sst [smem:[#allocation54_spill]] %s9475_s25  ;;  %s9373_s22 = smov 16  }
   0xd   :  { %s9480_s29 = sld [smem:[%s11466_s0 + %s9363_s26]]   ;;  %s9369_s26 = smov 12  }
   0xe   :  { %s9485_s3 = sld [smem:[%s11466_s0 + %s9364_s30]]   ;;  %s9374_s28 = smov 17  }
   0xf   :  { %s9490_s8 = sld [smem:[%s11466_s0 + %s9365_s4]]  }
  0x10   :  { %s9495_s14 = sld [smem:[%s11466_s0 + %s9366_s10]]  }
  0x11   :  { %s9500_s19 = sld [smem:[%s11466_s0 + %s9367_s15]]   ;;  %s9372_s15 = smov 15  }
  0x12   :  { %s9505_s24 = sld [smem:[%s11466_s0 + %s9368_s20]]  }
  0x13   :  { %11510 = sst [smem:[#allocation55_spill]] %s9480_s29 }
  0x14   :  { %11511 = sst [smem:[#allocation56_spill]] %s9485_s3 }
  0x15   :  { %11512 = sst [smem:[#allocation57_spill]] %s9490_s8 }
  0x16   :  { %11513 = sst [smem:[#allocation58_spill]] %s9495_s14 }
  0x17   :  { %s9510_s30 = sld [smem:[%s11466_s0 + %s9369_s26]]  }
  0x18   :  { %s9515_s6 = sld [smem:[%s11466_s0 + %s9370_s1]]  }
  0x19   :  { %s9520_s12 = sld [smem:[%s11466_s0 + %s9371_s7]]   ;;  %s9375_s7 = smov 18  }
  0x1a   :  { %s9525_s20 = sld [smem:[%s11466_s0 + %s9372_s15]]   ;;  %s9376_s15 = smov 19  }
  0x1b   :  { %s9530_s27 = sld [smem:[%s11466_s0 + %s9373_s22]]   ;;  %s9377_s22 = smov 20  }
  0x1c   :  { %s9535_s4 = sld [smem:[%s11466_s0 + %s9374_s28]]   ;;  %s9378_s28 = smov 21  }
  0x1d   :  { %s9540_s8 = sld [smem:[%s11466_s0 + %s9375_s7]]   ;;  %s9379_s7 = smov 22  }
  0x1e   :  { %11514 = sst [smem:[#allocation59_spill]] %s9515_s6 }
  0x1f   :  { %s9545_s3 = sld [smem:[%s11466_s0 + %s9376_s15]]   ;;  %s9380_s15 = smov 23  }
  0x20   :  { %11515 = sst [smem:[#allocation60_spill]] %s9525_s20 }
  0x21   :  { %s9550_s21 = sld [smem:[%s11466_s0 + %s9377_s22]]   ;;  %s9381_s22 = smov 24  }
  0x22   :  { %11516 = sst [smem:[#allocation61_spill]] %s9535_s4 }
  0x23   :  { %s9555_s4 = sld [smem:[%s11466_s0 + %s9378_s28]]   ;;  %s9382_s28 = smov 25  }
  0x24   :  { %s9560_s20 = sld [smem:[%s11466_s0 + %s9379_s7]]   ;;  %s9383_s7 = smov 26  }
  0x25   :  { %11517 = sst [smem:[#allocation62_spill]] %s9545_s3 }
  0x26   :  { %s9565_s3 = sld [smem:[%s11466_s0 + %s9380_s15]]   ;;  %s9384_s15 = smov 27  }
  0x27   :  { %s9570_s17 = sld [smem:[%s11466_s0 + %s9381_s22]]   ;;  %s9385_s22 = smov 28  }
  0x28   :  { %s9580_s6 = sld [smem:[%s11466_s0 + %s9383_s7]]   ;;  %s9387_s7 = smov 30  }
  0x29   :  { %11518 = sst [smem:[#allocation63_spill]] %s9555_s4 }
  0x2a   :  { %s9575_s4 = sld [smem:[%s11466_s0 + %s9382_s28]]   ;;  %s9386_s28 = smov 29  }
  0x2b   :  { %s9590_s13 = sld [smem:[%s11466_s0 + %s9385_s22]]   ;;  %s9389_s22 = smov 32  }
  0x2c   :  { %11519 = sst [smem:[#allocation64_spill]] %s9565_s3 }
  0x2d   :  { %s9585_s3 = sld [smem:[%s11466_s0 + %s9384_s15]]   ;;  %s9388_s15 = smov 31  }
  0x2e   :  { %11521 = sst [smem:[#allocation66_spill]] %s9580_s6 }
  0x2f   :  { %s9600_s9 = sld [smem:[%s11466_s0 + %s9387_s7]]   ;;  %s9391_s7 = smov 34  }
  0x30   :  { %11520 = sst [smem:[#allocation65_spill]] %s9575_s4 }
  0x31   :  { %11523 = sst [smem:[#allocation68_spill]] %s9590_s13 }
  0x32   :  { %s9595_s4 = sld [smem:[%s11466_s0 + %s9386_s28]]   ;;  %s9390_s28 = smov 33  }
  0x33   :  { %11522 = sst [smem:[#allocation67_spill]] %s9585_s3 }
  0x34   :  { %s9605_s3 = sld [smem:[%s11466_s0 + %s9388_s15]]   ;;  %s9392_s15 = smov 35  }
  0x35   :  { %s9610_s29 = sld [smem:[%s11466_s0 + %s9389_s22]]   ;;  %s9393_s22 = smov 36  }
  0x36   :  { %s9620_s25 = sld [smem:[%s11466_s0 + %s9391_s7]]   ;;  %s9395_s7 = smov 38  }
  0x37   :  { %s9640_s13 = sld [smem:[%s11466_s0 + %s9395_s7]]   ;;  %s9399_s7 = smov 42  }
  0x38   :  { %11524 = sst [smem:[#allocation69_spill]] %s9595_s4 }
  0x39   :  { %s9615_s4 = sld [smem:[%s11466_s0 + %s9390_s28]]   ;;  %s9394_s28 = smov 37  }
  0x3a   :  { %11525 = sst [smem:[#allocation70_spill]] %s9605_s3 }
  0x3b   :  { %11526 = sst [smem:[#allocation71_spill]] %s9610_s29 }
  0x3c   :  { %s9625_s3 = sld [smem:[%s11466_s0 + %s9392_s15]]   ;;  %s9396_s15 = smov 39  }
  0x3d   :  { %s9630_s29 = sld [smem:[%s11466_s0 + %s9393_s22]]   ;;  %s9397_s22 = smov 40  }
  0x3e   :  { %11531 = sst [smem:[#allocation76_spill]] %s9640_s13 }
  0x3f   :  { %11527 = sst [smem:[#allocation72_spill]] %s9615_s4 }
  0x40   :  { %s9635_s4 = sld [smem:[%s11466_s0 + %s9394_s28]]   ;;  %s9398_s28 = smov 41  }
  0x41   :  { %s9660_s13 = sld [smem:[%s11466_s0 + %s9399_s7]]  }
  0x42   :  { %11528 = sst [smem:[#allocation73_spill]] %s9625_s3 }
  0x43   :  { %11529 = sst [smem:[#allocation74_spill]] %s9630_s29 }
  0x44   :  { %s9645_s3 = sld [smem:[%s11466_s0 + %s9396_s15]]  }
  0x45   :  { %s9650_s29 = sld [smem:[%s11466_s0 + %s9397_s22]]  }
  0x46   :  { %11530 = sst [smem:[#allocation75_spill]] %s9635_s4 }
  0x47   :  { %s9655_s4 = sld [smem:[%s11466_s0 + %s9398_s28]]  }
  0x4a   :  { %11532 = sst [smem:[#allocation77_spill]] %s9645_s3 }
  0x4b   :  { %91 = vsyncpa [#allocation6], 0 }
  0x4c   :  { %92 = vsyncpa [#allocation9], 0 }
  0x4d   :  { %93 = vsyncpa [#allocation12], 0 }
  0x4e   :  { %94 = vsyncpa [#allocation15], 0 }
  0x4f   :  { %95 = vsyncpa [#allocation18], 0 }
  0x50   :  { %96 = vsyncpa [#allocation21], 0 }
  0x51   :  { %97 = vsyncpa [#allocation24], 0 }
  0x52   :  { %98 = vsyncpa [#allocation27], 0 }
  0x53   :  { %99 = vsyncpa [#allocation30], 0 }
  0x54   :  { %100 = vsyncpa [#allocation33], 0 }
  0x55   :  { %101 = vsyncpa [#allocation7], 0 }
  0x56   :  { %102 = vsyncpa [#allocation36], 0  ;;  %s9662_s15 = smov 0  }
  0x57 LB: > { %s9400_s0 = smov [#allocation8]   ;;  %s9668_s18 = sadd.s32 4294967295, %s9356_s15   ;;  %s9356_s15 = sphi %s9662_s15, %s108_s15  }
  0x58   : > { %s1064_s16 = sshll.u32 %s9400_s0, 4  ;;  %p7119_p0 = scmp.ge.s32.totalorder %s9356_s15, 1  ;;  %s1065_s16 = int_to_ptr.vmem [resolvable:$true] %s1064_s16 }
  0x59   : > { %p1016_p1 = scmp.lt.s32.totalorder %s9356_s15, 9  ;;  %p11488_p3 = scmp.eq.s32.totalorder %s9668_s18, 0 }
  0x5a   : > { %s9401_s23 = smov [#allocation11]   ;;  %s9402_s28 = smov [#allocation14]  }
  0x5b   : > { %p9674_p4 = pnand %p7119_p0, %p1016_p1  ;;  %s1086_s26 = sshll.u32 %s9401_s23, 4  ;;  %s1087_s26 = int_to_ptr.vmem [resolvable:$true] %s1086_s26 }
  0x5c   : > { %s1110_s1 = sshll.u32 %s9402_s28, 4  ;;  %s8797_s10 = scalar_lea.vmem %s1065_s16, 32  ;;  %s9686_s1 = int_to_ptr.vmem [resolvable:$true] %s1110_s1 }
  0x5d   : > { %s11533_s22 = scalar_select %p9674_p4, 1, 0 }
  0x5e   : > { %p8377_p5 = pneg %p9674_p4  ;;  %p8798_p8 = scmp.ne.s32.totalorder %s1065_s16, %s8797_s10 }
  0x5f   : > { %p8805_p11 = scmp.lt.s32.totalorder %s1065_s16, %s1065_s16  ;;  %p8806_p12 = scmp.lt.s32.totalorder %s8797_s10, %s8797_s10 }
  0x60   : > { %p9682_p6 = pnand %p11488_p3, %p8377_p5 }
  0x61   : > { %p8807_p13 = por %p8806_p12, %p8805_p11 }
  0x62   : > { %p9690_p7 = pneg %p9682_p6 }
  0x64   : > { %p8800_p9 = pnand %p8798_p8, %p9690_p7 }
  0x66   : > { %p8801_p10 = pneg %p8800_p9 }
  0x68   : > { %p8808_p0 = pnand %p8807_p13, %p8801_p10 }
  0x6a   : > { %8811 = shalt.err (!%p8808_p0)
}
  0x6b   : > { %s11536_s14 = sld [smem:[#allocation58_spill]]  ;;  %s8823_s11 = scalar_lea.vmem %s1087_s26, 32 }
  0x6c   : > { %p8824_p1 = scmp.ne.s32.totalorder %s1087_s26, %s8823_s11  ;;  %p8831_p3 = scmp.lt.s32.totalorder %s1087_s26, %s1087_s26 }
  0x6d   : > { %p8832_p4 = scmp.lt.s32.totalorder %s8823_s11, %s8823_s11 }
  0x6e   : > { %p8826_p5 = pnand %p8824_p1, %p9690_p7 }
  0x6f   : > { %p8833_p8 = por %p8832_p4, %p8831_p3 }
  0x70   : > { %p8827_p2 = pneg %p8826_p5 }
  0x71   : > { %8383 = dma.hbm_to_vmem [thread:$0]  (!%p9682_p6), %s11536_s14, 32, %s1065_s16, [#allocation9]  }
  0x72   : > { %p8834_p9 = pnand %p8833_p8, %p8827_p2 }
  0x74   : > { %8837 = shalt.err (!%p8834_p9)
}
  0x75   : > { %8389 = dma.hbm_to_vmem [thread:$0]  (!%p9682_p6), %s9505_s24, 32, %s1087_s26, [#allocation12]  }
  0x76   : > { %s8849_s0 = scalar_lea.vmem %s9686_s1, 64  ;;  %p8857_p13 = scmp.lt.s32.totalorder %s9686_s1, %s9686_s1 }
  0x77   : > { %p8850_p10 = scmp.ne.s32.totalorder %s9686_s1, %s8849_s0  ;;  %p8858_p0 = scmp.lt.s32.totalorder %s8849_s0, %s8849_s0 }
  0x79   : > { %p8852_p11 = pnand %p8850_p10, %p9690_p7  ;;  %p8859_p1 = por %p8858_p0, %p8857_p13 }
  0x7b   : > { %p8853_p12 = pneg %p8852_p11 }
  0x7d   : > { %p8860_p3 = pnand %p8859_p1, %p8853_p12 }
  0x7f   : > { %8863 = shalt.err (!%p8860_p3)
}
  0x80   : > { %s9403_s16 = smov 32   ;;  %s9404_s23 = smov 2  }
  0x81   : > { %8395 = dma.hbm_to_vmem [thread:$0]  (!%p9682_p6), %s9520_s12, 64, %s9686_s1, [#allocation15], %s9403_s16, %s9403_s16, %s9404_s23  }
  0x82   : > { %s9405_s26 = smov [#allocation17]   ;;  %s9406_s10 = smov [#allocation20]  }
  0x83   : > { %s1142_s28 = sshll.u32 %s9405_s26, 4  ;;  %s1173_s11 = sshll.u32 %s9406_s10, 4  ;;  %s1143_s28 = int_to_ptr.vmem [resolvable:$true] %s1142_s28  ;;  %s1174_s11 = int_to_ptr.vmem [resolvable:$true] %s1173_s11 }
  0x84   : > { %s8875_s14 = scalar_lea.vmem %s1143_s28, 32  ;;  %p8883_p8 = scmp.lt.s32.totalorder %s1143_s28, %s1143_s28 }
  0x85   : > { %p8876_p2 = scmp.ne.s32.totalorder %s1143_s28, %s8875_s14  ;;  %p8884_p9 = scmp.lt.s32.totalorder %s8875_s14, %s8875_s14 }
  0x87   : > { %p8878_p4 = pnand %p8876_p2, %p9690_p7  ;;  %p8885_p10 = por %p8884_p9, %p8883_p8 }
  0x89   : > { %p8879_p5 = pneg %p8878_p4 }
  0x8b   : > { %p8886_p11 = pnand %p8885_p10, %p8879_p5 }
  0x8d   : > { %8889 = shalt.err (!%p8886_p11)
}
  0x8e   : > { %s11490_s0 = smov 16   ;;  %s9408_s1 = smov 1  }
  0x8f   : > { %8401 = dma.hbm_to_vmem [thread:$0]  (!%p9682_p6), %s9540_s8, 32, %s1143_s28, [#allocation18], %s11490_s0, %s11490_s0, %s9408_s1  }
  0x90   : > { %s8901_s16 = scalar_lea.vmem %s1174_s11, 32  ;;  %p8909_p1 = scmp.lt.s32.totalorder %s1174_s11, %s1174_s11 }
  0x91   : > { %p8902_p12 = scmp.ne.s32.totalorder %s1174_s11, %s8901_s16  ;;  %p8910_p3 = scmp.lt.s32.totalorder %s8901_s16, %s8901_s16 }
  0x93   : > { %p8904_p13 = pnand %p8902_p12, %p9690_p7  ;;  %p8911_p2 = por %p8910_p3, %p8909_p1 }
  0x95   : > { %p8905_p0 = pneg %p8904_p13 }
  0x97   : > { %p8912_p4 = pnand %p8911_p2, %p8905_p0 }
  0x99   : > { %8915 = shalt.err (!%p8912_p4)
}
  0x9a   : > { %8407 = dma.hbm_to_vmem [thread:$0]  (!%p9682_p6), %s9560_s20, 32, %s1174_s11, [#allocation21]  }
  0x9b   : > { %s9409_s14 = smov [#allocation23]   ;;  %s9410_s26 = smov [#allocation26]  }
  0x9c   : > { %s1201_s23 = sshll.u32 %s9409_s14, 4  ;;  %s1229_s10 = sshll.u32 %s9410_s26, 4  ;;  %s1202_s23 = int_to_ptr.vmem [resolvable:$true] %s1201_s23  ;;  %s1230_s10 = int_to_ptr.vmem [resolvable:$true] %s1229_s10 }
  0x9d   : > { %s8927_s28 = scalar_lea.vmem %s1202_s23, 16  ;;  %s8934_s16 = scalar_lea.vmem %s1202_s23, 32 }
  0x9e   : > { %p8928_p5 = scmp.ne.s32.totalorder %s1202_s23, %s8927_s28  ;;  %p8935_p10 = scmp.lt.s32.totalorder %s1202_s23, %s1202_s23 }
  0x9f   : > { %p8936_p11 = scmp.lt.s32.totalorder %s8934_s16, %s8927_s28 }
  0xa0   : > { %p8930_p8 = pnand %p8928_p5, %p9690_p7 }
  0xa1   : > { %p8937_p12 = por %p8936_p11, %p8935_p10 }
  0xa2   : > { %p8931_p9 = pneg %p8930_p8 }
  0xa4   : > { %p8938_p13 = pnand %p8937_p12, %p8931_p9 }
  0xa6   : > { %8941 = shalt.err (!%p8938_p13)
}
  0xa7   : > { %s11537_s6 = sld [smem:[#allocation66_spill]]  ;;  %s8953_s11 = scalar_lea.vmem %s1230_s10, 16 }
  0xa8   : > { %p8954_p0 = scmp.ne.s32.totalorder %s1230_s10, %s8953_s11  ;;  %s8960_s14 = scalar_lea.vmem %s1230_s10, 32 }
  0xa9   : > { %p8961_p2 = scmp.lt.s32.totalorder %s1230_s10, %s1230_s10  ;;  %p8962_p4 = scmp.lt.s32.totalorder %s8960_s14, %s8953_s11 }
  0xaa   : > { %p8956_p1 = pnand %p8954_p0, %p9690_p7 }
  0xab   : > { %p8963_p5 = por %p8962_p4, %p8961_p2 }
  0xac   : > { %p8957_p3 = pneg %p8956_p1 }
  0xad   : > { %8413 = dma.hbm_to_vmem [thread:$0]  (!%p9682_p6), %s11537_s6, 16, %s1202_s23, [#allocation24]  }
  0xae   : > { %p8964_p8 = pnand %p8963_p5, %p8957_p3 }
  0xb0   : > { %8967 = shalt.err (!%p8964_p8)
}
  0xb1   : > { %8419 = dma.hbm_to_vmem [thread:$0]  (!%p9682_p6), %s9600_s9, 16, %s1230_s10, [#allocation27]  }
  0xb2   : > { %s9411_s26 = smov [#allocation29]   ;;  %s9412_s16 = smov [#allocation5]  }
  0xb3   : > { %s1257_s28 = sshll.u32 %s9411_s26, 4  ;;  %s1029_s23 = sshll.u32 %s9412_s16, 4  ;;  %s1258_s28 = int_to_ptr.vmem [resolvable:$true] %s1257_s28  ;;  %s1030_s23 = int_to_ptr.vmem [resolvable:$true] %s1029_s23 }
  0xb4   : > { %s8979_s0 = scalar_lea.vmem %s1258_s28, 16  ;;  %s8986_s11 = scalar_lea.vmem %s1258_s28, 32 }
  0xb5   : > { %p8980_p9 = scmp.ne.s32.totalorder %s1258_s28, %s8979_s0  ;;  %p8987_p12 = scmp.lt.s32.totalorder %s1258_s28, %s1258_s28 }
  0xb6   : > { %p8988_p13 = scmp.lt.s32.totalorder %s8986_s11, %s8979_s0 }
  0xb7   : > { %p8982_p10 = pnand %p8980_p9, %p9690_p7 }
  0xb8   : > { %p8989_p0 = por %p8988_p13, %p8987_p12 }
  0xb9   : > { %p8983_p11 = pneg %p8982_p10 }
  0xbb   : > { %p8990_p1 = pnand %p8989_p0, %p8983_p11 }
  0xbd   : > { %8993 = shalt.err (!%p8990_p1)
}
  0xbe   : > { %8425 = dma.hbm_to_vmem [thread:$0]  (!%p9682_p6), %s9620_s25, 16, %s1258_s28, [#allocation30]  }
  0xbf   : > { %s9005_s10 = scalar_lea.vmem %s1030_s23, 16  ;;  %s9012_s14 = scalar_lea.vmem %s1030_s23, 32 }
  0xc0   : > { %p9006_p3 = scmp.ne.s32.totalorder %s1030_s23, %s9005_s10  ;;  %p9013_p5 = scmp.lt.s32.totalorder %s1030_s23, %s1030_s23 }
  0xc1   : > { %p9014_p8 = scmp.lt.s32.totalorder %s9012_s14, %s9005_s10 }
  0xc2   : > { %p9008_p2 = pnand %p9006_p3, %p9690_p7 }
  0xc3   : > { %p9015_p9 = por %p9014_p8, %p9013_p5 }
  0xc4   : > { %p9009_p4 = pneg %p9008_p2 }
  0xc6   : > { %p9016_p10 = pnand %p9015_p9, %p9009_p4 }
  0xc8   : > { %9019 = shalt.err (!%p9016_p10)
}
  0xc9   : > { %s11538_s5 = sld [smem:[#allocation49_spill]]  ;;  %s9413_s0 = smov [#allocation10]  }
  0xca   : > { %s1075_s26 = sshll.u32 %s9413_s0, 4  ;;  %s9414_s16 = smov [#allocation13]   ;;  %s1076_s26 = int_to_ptr.vmem [resolvable:$true] %s1075_s26 }
  0xcb   : > { %s1097_s28 = sshll.u32 %s9414_s16, 4  ;;  %s9031_s11 = scalar_lea.vmem %s1076_s26, 16  ;;  %s1098_s28 = int_to_ptr.vmem [resolvable:$true] %s1097_s28 }
  0xcc   : > { %p9032_p11 = scmp.ne.s32.totalorder %s1076_s26, %s9031_s11  ;;  %s9038_s10 = scalar_lea.vmem %s1076_s26, 32 }
  0xcd   : > { %p9039_p0 = scmp.lt.s32.totalorder %s1076_s26, %s1076_s26  ;;  %p9040_p1 = scmp.lt.s32.totalorder %s9038_s10, %s9031_s11 }
  0xce   : > { %p9034_p12 = pnand %p9032_p11, %p9690_p7 }
  0xcf   : > { %8380 = dma.hbm_to_vmem [thread:$0]  (!%p9682_p6), %s11538_s5, 16, %s1030_s23, [#allocation6]  }
  0xd0   : > { %p9035_p13 = pneg %p9034_p12  ;;  %p9041_p3 = por %p9040_p1, %p9039_p0 }
  0xd2   : > { %p9042_p2 = pnand %p9041_p3, %p9035_p13 }
  0xd4   : > { %9045 = shalt.err (!%p9042_p2)
}
  0xd5   : > { %8386 = dma.hbm_to_vmem [thread:$0]  (!%p9682_p6), %s9500_s19, 16, %s1076_s26, [#allocation9]  }
  0xd6   : > { %s9057_s23 = scalar_lea.vmem %s1098_s28, 16  ;;  %s9064_s14 = scalar_lea.vmem %s1098_s28, 32 }
  0xd7   : > { %p9058_p4 = scmp.ne.s32.totalorder %s1098_s28, %s9057_s23  ;;  %p9065_p9 = scmp.lt.s32.totalorder %s1098_s28, %s1098_s28 }
  0xd8   : > { %p9066_p10 = scmp.lt.s32.totalorder %s9064_s14, %s9057_s23 }
  0xd9   : > { %p9060_p5 = pnand %p9058_p4, %p9690_p7 }
  0xda   : > { %p9067_p11 = por %p9066_p10, %p9065_p9 }
  0xdb   : > { %p9061_p8 = pneg %p9060_p5 }
  0xdd   : > { %p9068_p12 = pnand %p9067_p11, %p9061_p8 }
  0xdf   : > { %9071 = shalt.err (!%p9068_p12)
}
  0xe0   : > { %8392 = dma.hbm_to_vmem [thread:$0]  (!%p9682_p6), %s9510_s30, 16, %s1098_s28, [#allocation12]  }
  0xe1   : > { %s9415_s0 = smov [#allocation16]   ;;  %s9416_s11 = smov [#allocation19]  }
  0xe2   : > { %s1126_s16 = sshll.u32 %s9415_s0, 4  ;;  %s1159_s26 = sshll.u32 %s9416_s11, 4  ;;  %s1127_s16 = int_to_ptr.vmem [resolvable:$true] %s1126_s16  ;;  %s1160_s26 = int_to_ptr.vmem [resolvable:$true] %s1159_s26 }
  0xe3   : > { %s9083_s10 = scalar_lea.vmem %s1127_s16, 32  ;;  %p9091_p3 = scmp.lt.s32.totalorder %s1127_s16, %s1127_s16 }
  0xe4   : > { %p9084_p13 = scmp.ne.s32.totalorder %s1127_s16, %s9083_s10  ;;  %p9092_p2 = scmp.lt.s32.totalorder %s9083_s10, %s9083_s10 }
  0xe6   : > { %p9086_p0 = pnand %p9084_p13, %p9690_p7  ;;  %p9093_p4 = por %p9092_p2, %p9091_p3 }
  0xe8   : > { %p9087_p1 = pneg %p9086_p0 }
  0xea   : > { %p9094_p5 = pnand %p9093_p4, %p9087_p1 }
  0xec   : > { %9097 = shalt.err (!%p9094_p5)
}
  0xed   : > { %s11539_s28 = smov 16   ;;  %s9109_s23 = scalar_lea.vmem %s1160_s26, 16 }
  0xee   : > { %8398 = dma.hbm_to_vmem [thread:$0]  (!%p9682_p6), %s9530_s27, 32, %s1127_s16, [#allocation15], %s11539_s28, %s11539_s28, %s9408_s1  }
  0xef   : > { %p9110_p8 = scmp.ne.s32.totalorder %s1160_s26, %s9109_s23  ;;  %s9116_s14 = scalar_lea.vmem %s1160_s26, 32 }
  0xf0   : > { %p9117_p11 = scmp.lt.s32.totalorder %s1160_s26, %s1160_s26  ;;  %p9118_p12 = scmp.lt.s32.totalorder %s9116_s14, %s9109_s23 }
  0xf1   : > { %p9112_p9 = pnand %p9110_p8, %p9690_p7 }
  0xf2   : > { %p9119_p13 = por %p9118_p12, %p9117_p11 }
  0xf3   : > { %p9113_p10 = pneg %p9112_p9 }
  0xf5   : > { %p9120_p0 = pnand %p9119_p13, %p9113_p10 }
  0xf7   : > { %9123 = shalt.err (!%p9120_p0)
}
  0xf8   : > { %8404 = dma.hbm_to_vmem [thread:$0]  (!%p9682_p6), %s9550_s21, 16, %s1160_s26, [#allocation18]  }
  0xf9   : > { %s9417_s0 = smov [#allocation22]   ;;  %s9418_s10 = smov [#allocation25]  }
  0xfa   : > { %s1187_s11 = sshll.u32 %s9417_s0, 4  ;;  %s1215_s1 = sshll.u32 %s9418_s10, 4  ;;  %s1188_s11 = int_to_ptr.vmem [resolvable:$true] %s1187_s11  ;;  %s1216_s1 = int_to_ptr.vmem [resolvable:$true] %s1215_s1 }
  0xfb   : > { %s9135_s16 = scalar_lea.vmem %s1188_s11, 16  ;;  %s9142_s28 = scalar_lea.vmem %s1188_s11, 32 }
  0xfc   : > { %p9136_p1 = scmp.ne.s32.totalorder %s1188_s11, %s9135_s16  ;;  %p9143_p4 = scmp.lt.s32.totalorder %s1188_s11, %s1188_s11 }
  0xfd   : > { %p9144_p5 = scmp.lt.s32.totalorder %s9142_s28, %s9135_s16 }
  0xfe   : > { %p9138_p3 = pnand %p9136_p1, %p9690_p7 }
  0xff   : > { %p9145_p8 = por %p9144_p5, %p9143_p4 }
 0x100   : > { %p9139_p2 = pneg %p9138_p3 }
 0x102   : > { %p9146_p9 = pnand %p9145_p8, %p9139_p2 }
 0x104   : > { %9149 = shalt.err (!%p9146_p9)
}
 0x105   : > { %8410 = dma.hbm_to_vmem [thread:$0]  (!%p9682_p6), %s9570_s17, 16, %s1188_s11, [#allocation21]  }
 0x106   : > { %s9161_s26 = scalar_lea.vmem %s1216_s1, 16  ;;  %s9168_s23 = scalar_lea.vmem %s1216_s1, 32 }
 0x107   : > { %p9162_p10 = scmp.ne.s32.totalorder %s1216_s1, %s9161_s26  ;;  %p9169_p13 = scmp.lt.s32.totalorder %s1216_s1, %s1216_s1 }
 0x108   : > { %p9170_p0 = scmp.lt.s32.totalorder %s9168_s23, %s9161_s26 }
 0x109   : > { %p9164_p11 = pnand %p9162_p10, %p9690_p7 }
 0x10a   : > { %p9171_p1 = por %p9170_p0, %p9169_p13 }
 0x10b   : > { %p9165_p12 = pneg %p9164_p11 }
 0x10d   : > { %p9172_p3 = pnand %p9171_p1, %p9165_p12 }
 0x10f   : > { %9175 = shalt.err (!%p9172_p3)
}
 0x110   : > { %s11540_s14 = sld [smem:[#allocation68_spill]]  ;;  %s9419_s0 = smov [#allocation28]  }
 0x111   : > { %s1243_s10 = sshll.u32 %s9419_s0, 4  ;;  %s9420_s16 = smov [#allocation31]   ;;  %s1244_s10 = int_to_ptr.vmem [resolvable:$true] %s1243_s10 }
 0x112   : > { %s1271_s11 = sshll.u32 %s9420_s16, 4  ;;  %s9187_s28 = scalar_lea.vmem %s1244_s10, 32  ;;  %s1272_s11 = int_to_ptr.vmem [resolvable:$true] %s1271_s11 }
 0x113   : > { %p9188_p2 = scmp.ne.s32.totalorder %s1244_s10, %s9187_s28  ;;  %p9195_p8 = scmp.lt.s32.totalorder %s1244_s10, %s1244_s10 }
 0x114   : > { %p9196_p9 = scmp.lt.s32.totalorder %s9187_s28, %s9187_s28 }
 0x115   : > { %p9190_p4 = pnand %p9188_p2, %p9690_p7 }
 0x116   : > { %8416 = dma.hbm_to_vmem [thread:$0]  (!%p9682_p6), %s11540_s14, 16, %s1216_s1, [#allocation24]  }
 0x117   : > { %p9191_p5 = pneg %p9190_p4  ;;  %p9197_p10 = por %p9196_p9, %p9195_p8 }
 0x119   : > { %p9198_p11 = pnand %p9197_p10, %p9191_p5 }
 0x11b   : > { %9201 = shalt.err (!%p9198_p11)
}
 0x11c   : > { %s11541_s26 = sld [smem:[#allocation71_spill]]  ;;  %s9213_s1 = scalar_lea.vmem %s1272_s11, 16 }
 0x11d   : > { %p9214_p12 = scmp.ne.s32.totalorder %s1272_s11, %s9213_s1  ;;  %s9220_s23 = scalar_lea.vmem %s1272_s11, 32 }
 0x11e   : > { %p9221_p1 = scmp.lt.s32.totalorder %s1272_s11, %s1272_s11  ;;  %p9222_p3 = scmp.lt.s32.totalorder %s9220_s23, %s9213_s1 }
 0x11f   : > { %p9216_p13 = pnand %p9214_p12, %p9690_p7 }
 0x120   : > { %p9223_p2 = por %p9222_p3, %p9221_p1 }
 0x121   : > { %p9217_p0 = pneg %p9216_p13 }
 0x122   : > { %8422 = dma.hbm_to_vmem [thread:$0]  (!%p9682_p6), %s11541_s26, 32, %s1244_s10, [#allocation27]  }
 0x123   : > { %p9224_p4 = pnand %p9223_p2, %p9217_p0 }
 0x125   : > { %9227 = shalt.err (!%p9224_p4)
}
 0x126   : > { %s11542_s14 = sld [smem:[#allocation74_spill]]  ;;  %s9421_s0 = smov [#allocation32]  }
 0x127   : > { %s1285_s16 = sshll.u32 %s9421_s0, 4  ;;  %s1286_s16 = int_to_ptr.vmem [resolvable:$true] %s1285_s16 }
 0x128   : > { %s9239_s10 = scalar_lea.vmem %s1286_s16, 16  ;;  %s9246_s28 = scalar_lea.vmem %s1286_s16, 32 }
 0x129   : > { %p9240_p5 = scmp.ne.s32.totalorder %s1286_s16, %s9239_s10  ;;  %p9247_p10 = scmp.lt.s32.totalorder %s1286_s16, %s1286_s16 }
 0x12a   : > { %p9248_p11 = scmp.lt.s32.totalorder %s9246_s28, %s9239_s10 }
 0x12b   : > { %p9242_p8 = pnand %p9240_p5, %p9690_p7 }
 0x12c   : > { %8428 = dma.hbm_to_vmem [thread:$0]  (!%p9682_p6), %s11542_s14, 16, %s1272_s11, [#allocation30]  }
 0x12d   : > { %p9243_p9 = pneg %p9242_p8  ;;  %p9249_p12 = por %p9248_p11, %p9247_p10 }
 0x12f   : > { %p9250_p13 = pnand %p9249_p12, %p9243_p9 }
 0x131   : > { %9253 = shalt.err (!%p9250_p13)
}
 0x132   : > { %s11543_s26 = sld [smem:[#allocation76_spill]]  ;;  %p11544_p0 = scmp.ne.s32.totalorder %s11533_s22, 0 }
 0x133   : > { %p11545_p1 = scmp.eq.s32.totalorder (!%p11544_p0), %s9668_s18, 0 }
 0x134   : > { %1298 = sbr.rel (%p11544_p0) target bundleno = 6215 (0x1847), region = 176 }
 0x138   : > { %8431 = dma.hbm_to_vmem [thread:$0]  (!%p9682_p6), %s11543_s26, 16, %s1286_s16, [#allocation33]  }
 0x139   : > { %9307 = dma.done.wait (%p11545_p1), [#allocation6], 16   ;;  %p11546_p3 = pmov %p11545_p1 }
 0x13a   : > { %p11547_p7 = pmov %p11545_p1 }
 0x13b   : > { %9309 = vsyncadd (%p11546_p3), [#allocation6], 4294967280 }
 0x13c   : > { %9311 = dma.done.wait (%p11547_p7), [#allocation9], 48   ;;  %p11548_p2 = pmov %p11545_p1 }
 0x13d   : > { %p11549_p4 = pmov %p11545_p1 }
 0x13e   : > { %9313 = vsyncadd (%p11548_p2), [#allocation9], 4294967248 }
 0x13f   : > { %9315 = dma.done.wait (%p11549_p4), [#allocation12], 48   ;;  %p11550_p6 = pmov %p11545_p1 }
 0x140   : > { %p11551_p5 = pmov %p11545_p1 }
 0x141   : > { %9317 = vsyncadd (%p11550_p6), [#allocation12], 4294967248 }
 0x142   : > { %9319 = dma.done.wait (%p11551_p5), [#allocation15], 96   ;;  %p11552_p8 = pmov %p11545_p1 }
 0x143   : > { %p11553_p9 = pmov %p11545_p1 }
 0x144   : > { %9321 = vsyncadd (%p11552_p8), [#allocation15], 4294967200 }
 0x145   : > { %9323 = dma.done.wait (%p11553_p9), [#allocation18], 48   ;;  %p11554_p10 = pmov %p11545_p1 }
 0x146   : > { %p11555_p11 = pmov %p11545_p1 }
 0x147   : > { %9325 = vsyncadd (%p11554_p10), [#allocation18], 4294967248 }
 0x148   : > { %9327 = dma.done.wait (%p11555_p11), [#allocation21], 48   ;;  %p11556_p12 = pmov %p11545_p1 }
 0x149   : > { %p11557_p13 = pmov %p11545_p1 }
 0x14a   : > { %9329 = vsyncadd (%p11556_p12), [#allocation21], 4294967248 }
 0x14b   : > { %9331 = dma.done.wait (%p11557_p13), [#allocation24], 32   ;;  %p11558_p0 = pmov %p11545_p1 }
 0x14d   : > { %9333 = vsyncadd (%p11558_p0), [#allocation24], 4294967264  ;;  %p11559_p1 = pmov %p11558_p0 }
 0x14e   : > { %p11560_p3 = pmov %p11558_p0 }
 0x14f   : > { %9335 = dma.done.wait (%p11559_p1), [#allocation27], 48  }
 0x150   : > { %9337 = vsyncadd (%p11560_p3), [#allocation27], 4294967248  ;;  %p11561_p7 = pmov %p11558_p0 }
 0x151   : > { %p11562_p2 = pmov %p11558_p0 }
 0x152   : > { %9339 = dma.done.wait (%p11561_p7), [#allocation30], 32  }
 0x153   : > { %9341 = vsyncadd (%p11562_p2), [#allocation30], 4294967264  ;;  %p11563_p4 = pmov %p11558_p0 }
 0x154   : > { %p11564_p6 = pmov %p11558_p0 }
 0x155   : > { %9343 = dma.done.wait (%p11563_p4), [#allocation33], 16  }
 0x156   : > { %9345 = vsyncadd (%p11564_p6), [#allocation33], 4294967280  ;;  %s11565_s22 = sld [smem:[#allocation54_spill]]  ;;  %p11567_p5 = scmp.ne.s32.totalorder %s9668_s18, 0 }
 0x157   : > { %s11566_s2 = sld [smem:[#allocation55_spill]]  ;;  %s9424_s23 = smov (!%p11567_p5), 96  }
 0x158   : > { %s11568_s7 = sld [smem:[#allocation50_spill]] (!%p11567_p5)  ;;  %s9425_s14 = smov (!%p11567_p5), 32  }
 0x159   : > { %s11569_s11 = sld [smem:[#allocation51_spill]] (!%p11567_p5)  ;;  %s9426_s0 = smov (!%p11567_p5), 64  }
 0x15a   : > { %1468 = sbr.rel (%p11567_p5) target bundleno = 2859 (0xb2b), region = 252  ;;  %s11570_s1 = sld [smem:[#allocation59_spill]] (!%p11567_p5) }
 0x15b   : > { %s11571_s16 = sld [smem:[#allocation52_spill]] (!%p11567_p5) }
 0x15c   : > { %v9838_v0 = vld [vmem:[%s11565_s22] sm:$0xff]  ;;  %v9841_v1 = vld [vmem:[%s11565_s22 + $0x8] sm:$0xff]  ;;  %v9844_v2 = vld [vmem:[%s11565_s22 + $0x10] sm:$0xff]  ;;  %s11572_s10 = sld [smem:[#allocation60_spill]] (!%p11567_p5) }
 0x15d   : > { %v9847_v3 = vld [vmem:[%s11565_s22 + $0x18] sm:$0xff]  ;;  %v9850_v4 = vld [vmem:[%s11565_s22 + $0x20] sm:$0xff]  ;;  %v9853_v5 = vld [vmem:[%s11565_s22 + $0x28] sm:$0xff]  ;;  %s11573_s28 = sld [smem:[#allocation61_spill]] (!%p11567_p5) }
 0x15e   : > { %v9856_v6 = vld [vmem:[%s11566_s2] sm:$0x1]  ;;  %s11574_s26 = sld [smem:[#allocation69_spill]] (!%p11567_p5) }
 0x15f   : > { %v1475_v7 = vld [vmem:[#allocation8] sm:$0x3]  ;;  %vm1502_vm0 = vcmask 1041408   ;;  %v1469_v8 = vld [vmem:[%s11568_s7] sm:$0xff]  ;;  %vm1483_vm1 = vcmask 15360   ;;  %v1470_v9 = vld [vmem:[%s11568_s7 + $0x8] sm:$0xff]  ;;  %v1768_v63 = vlaneseq }
 0x160   : > { %7760 = vmatprep.subr.msk.mxu1 %vm1502_vm0, %v1475_v7  ;;  %7762 = vmatprep.mubr.msk.f32.mxu1 %vm1483_vm1, %v1469_v8  ;;  %v1607_v10 = vld [vmem:[#allocation11] sm:$0x3]  ;;  %v1472_v12 = vld [vmem:[%s11568_s7 + $0x18] sm:$0xff]  ;;  %v1473_v13 = vld [vmem:[%s11568_s7 + $0x20] sm:$0xff]  ;;  %vm1737_vm2 = vcmask 261120   ;;  %v9422_v29 = vmov 0.0  }
 0x161   : > { %v1471_v11 = vld [vmem:[%s11568_s7 + $0x10] sm:$0xff]  ;;  %7761 = vmatpush3.msk.msra.mxu1 %vm1502_vm0, %v1475_v7  ;;  %v1474_v14 = vld [vmem:[%s11568_s7 + $0x28] sm:$0xff]  ;;  %v1601_v15 = vld [vmem:[%s11569_s11] sm:$0xff]  ;;  %1744 = vst.msk [vmem:[#allocation4] sm:$0xff] %vm1737_vm2, %v9422_v29  ;;  %1911 = vmatprep.mubr.f32.mxu0 %v9422_v29  ;;  %v9423_v62 = vmov 0   ;;  %v9926_v7 = vshrl.u32 %v1768_v63, 7 }
 0x162   : > { %7763 = vmatmul.mubr.msk.f32.vlgmr.msra.gmra.mxu1 %vm1483_vm1, %v1470_v9  ;;  %7771 = vmatprep.subr.msk.mxu1 %vm1502_vm0, %v1607_v10  ;;  %v1602_v16 = vld [vmem:[%s11569_s11 + $0x8] sm:$0xff]  ;;  %v1603_v17 = vld [vmem:[%s11569_s11 + $0x10] sm:$0xff]  ;;  %v1604_v18 = vld [vmem:[%s11569_s11 + $0x18] sm:$0xff]  ;;  %1745 = vst.msk [vmem:[#allocation4 + $0x8] sm:$0xff] %vm1737_vm2, %v9422_v29  ;;  %vm2345_vm14 = vcmask 392192   ;;  %s11575_s2 = sld [smem:[#allocation53_spill]] }
 0x163   : > { %7772 = vmatpush3.msk.msra.mxu1 %vm1502_vm0, %v1607_v10  ;;  %7765 = vmatprep.mubr.msk.f32.mxu1 %vm1483_vm1, %v1471_v11  ;;  %v1605_v19 = vld [vmem:[%s11569_s11 + $0x20] sm:$0xff]  ;;  %v1606_v20 = vld [vmem:[%s11569_s11 + $0x28] sm:$0xff]  ;;  %v1791_v21 = vld [vmem:[%s11570_s1 + $0x38] sm:$0xff]  ;;  %1746 = vst.msk [vmem:[#allocation4 + $0x10] sm:$0xff] %vm1737_vm2, %v9422_v29  ;;  %v9929_v8 = vsub.s32 0, %v9926_v7 }
 0x164   : > { %1871 = vmatprep.subr.mxu0 %v1791_v21  ;;  %v1790_v22 = vld [vmem:[%s11570_s1 + $0x30] sm:$0xff]  ;;  %v1789_v23 = vld [vmem:[%s11570_s1 + $0x28] sm:$0xff]  ;;  %v1788_v24 = vld [vmem:[%s11570_s1 + $0x20] sm:$0xff]  ;;  %1747 = vst.msk [vmem:[#allocation4 + $0x18] sm:$0xff] %vm1737_vm2, %v9422_v29  ;;  %8565 = vset.pattern.permute.xlu1 %v9423_v62 }
 0x165   : > { %1872 = vmatpush1.msra.mxu0 %v1790_v22  ;;  %v1787_v25 = vld [vmem:[%s11570_s1 + $0x18] sm:$0xff]  ;;  %v1786_v26 = vld [vmem:[%s11570_s1 + $0x10] sm:$0xff]  ;;  %v1785_v27 = vld [vmem:[%s11570_s1 + $0x8] sm:$0xff]  ;;  %1748 = vst.msk [vmem:[#allocation4 + $0x20] sm:$0xff] %vm1737_vm2, %v9422_v29  ;;  %8564 = vset.pattern.permute.xlu0 %v9423_v62 }
 0x166   : > { %7766 = vmatmul.mubr.msk.f32.gmra.mxu1 %vm1483_vm1, %v1472_v12  ;;  %1873 = vmatprep.subr.mxu0 %v1789_v23  ;;  %v1784_v28 = vld [vmem:[%s11570_s1] sm:$0xff]  ;;  %1749 = vst.msk [vmem:[#allocation4 + $0x28] sm:$0xff] %vm1737_vm2, %v9422_v29  ;;  %v7158_v30 = vld [vmem:[#allocation10] ss:$0 sm:$0xff]  ;;  %v7166_v44 = vld [vmem:[#allocation13] ss:$0 sm:$0xff] }
 0x167   : > { %7768 = vmatprep.mubr.msk.f32.mxu1 %vm1483_vm1, %v1473_v13  ;;  %1874 = vmatpush1.msra.mxu0 %v1788_v24  ;;  %v1792_v9 = vld [vmem:[#allocation14] sm:$0x3]  ;;  %s11576_s1 = sld [smem:[#allocation70_spill]] }
 0x168   : > { %1875 = vmatprep.subr.mxu0 %v1787_v25  ;;  %v1822_v10 = vrot.slane %v1792_v9, %v9929_v8 }
 0x169   : > { %1876 = vmatpush1.msra.mxu0 %v1786_v26 }
 0x16a   : > { %7769 = vmatmul.mubr.msk.f32.gmra.mxu1 %vm1483_vm1, %v1474_v14  ;;  %1877 = vmatprep.subr.mxu0 %v1785_v27 }
 0x16b   : > { %7773 = vmatprep.mubr.msk.f32.mxu1 %vm1483_vm1, %v1601_v15  ;;  %1878 = vmatpush1.msra.mxu0 %v1784_v28  ;;  %v1825_v28 = vsub.s32 1, %v9926_v7 }
 0x16e   : > { %7774 = vmatmul.mubr.msk.f32.vlgmr.msra.gmra.mxu1 %vm1483_vm1, %v1602_v16 }
 0x16f   : > { %7776 = vmatprep.mubr.msk.f32.mxu1 %vm1483_vm1, %v1603_v17 }
 0x172   : > { %7777 = vmatmul.mubr.msk.f32.gmra.mxu1 %vm1483_vm1, %v1604_v18 }
 0x173   : > { %7779 = vmatprep.mubr.msk.f32.mxu1 %vm1483_vm1, %v1605_v19 }
 0x176   : > { %7780 = vmatmul.mubr.msk.f32.gmra.mxu1 %vm1483_vm1, %v1606_v20 }
 0x222   : > { %v7764_v31 = vpop.f32.mrf.mxu1 }
 0x223   : > { %v1578_v32 = vadd.f32 %v7764_v31, %v7158_v30  ;;  %v1826_v31 = vrot.slane %v1792_v9, %v1825_v28 }
 0x224   : > { %v1572_v33 = vpop.f32.mrf.mxu1 }
 0x225   : > { %1739 = vst.msk [vmem:[#allocation2 + $0x8] sm:$0xff] %vm1737_vm2, %v1578_v32  ;;  %v1573_v34 = vadd.f32 %v7158_v30, %v1572_v33 }
 0x226   : > { %v7767_v35 = vpop.f32.mrf.mxu1 }
 0x227   : > { %1738 = vst.msk [vmem:[#allocation2] sm:$0xff] %vm1737_vm2, %v1573_v34  ;;  %v1588_v36 = vadd.f32 %v7767_v35, %v7158_v30 }
 0x228   : > { %v1582_v37 = vpop.f32.mrf.mxu1 }
 0x229   : > { %1741 = vst.msk [vmem:[#allocation2 + $0x18] sm:$0xff] %vm1737_vm2, %v1588_v36  ;;  %v1583_v38 = vadd.f32 %v7158_v30, %v1582_v37 }
 0x22a   : > { %v7770_v39 = vpop.f32.mrf.mxu1 }
 0x22b   : > { %1740 = vst.msk [vmem:[#allocation2 + $0x10] sm:$0xff] %vm1737_vm2, %v1583_v38  ;;  %v1598_v40 = vadd.f32 %v7770_v39, %v7158_v30 }
 0x22c   : > { %v1592_v41 = vpop.f32.mrf.mxu1 }
 0x22d   : > { %1743 = vst.msk [vmem:[#allocation2 + $0x28] sm:$0xff] %vm1737_vm2, %v1598_v40  ;;  %v1593_v42 = vadd.f32 %v7158_v30, %v1592_v41 }
 0x22e   : > { %v7775_v43 = vpop.f32.mrf.mxu1 }
 0x22f   : > { %1742 = vst.msk [vmem:[#allocation2 + $0x20] sm:$0xff] %vm1737_vm2, %v1593_v42  ;;  %v1708_v48 = vadd.f32 %v7775_v43, %v7166_v44 }
 0x230   : > { %v1702_v45 = vpop.f32.mrf.mxu1 }
 0x231   : > { %v1703_v46 = vadd.f32 %v7166_v44, %v1702_v45  ;;  %v1732_v51 = vadd.f32 %v1708_v48, %v1578_v32 }
 0x232   : > { %v7778_v47 = vpop.f32.mrf.mxu1 }
 0x233   : > { %v1731_v49 = vadd.f32 %v1703_v46, %v1573_v34  ;;  %v1718_v54 = vadd.f32 %v7778_v47, %v7166_v44 }
 0x234   : > { %v1712_v50 = vpop.f32.mrf.mxu1 }
 0x235   : > { %7174 = vmatmul.mubr.msk.f32.vlgmr.msra.gmra.mxu0 %vm1737_vm2, %v1731_v49  ;;  %v1713_v52 = vadd.f32 %v7166_v44, %v1712_v50  ;;  %v1734_v57 = vadd.f32 %v1718_v54, %v1588_v36 }
 0x236   : > { %1917 = vmatprep.mubr.f32.mxu0 %v9422_v29  ;;  %v7781_v53 = vpop.f32.mrf.mxu1 }
 0x237   : > { %v1733_v55 = vadd.f32 %v1713_v52, %v1583_v38  ;;  %v1728_v59 = vadd.f32 %v7781_v53, %v7166_v44  ;;  %v7192_v38 = vld [vmem:[#allocation5] ss:$0 sm:$0xff] }
 0x238   : > { %v1722_v56 = vpop.f32.mrf.mxu1 }
 0x239   : > { %7175 = vmatmul.mubr.msk.f32.gmra.mxu0 %vm1737_vm2, %v1732_v51  ;;  %v1723_v58 = vadd.f32 %v7166_v44, %v1722_v56  ;;  %v1736_v61 = vadd.f32 %v1728_v59, %v1598_v40 }
 0x23a   : > { %1923 = vmatprep.mubr.f32.mxu0 %v9422_v29 }
 0x23b   : > { %v1735_v60 = vadd.f32 %v1723_v58, %v1593_v42 }
 0x23d   : > { %7176 = vmatmul.mubr.msk.f32.gmra.mxu0 %vm1737_vm2, %v1733_v55 }
 0x23e   : > { %1929 = vmatprep.mubr.f32.mxu0 %v9422_v29 }
 0x241   : > { %7177 = vmatmul.mubr.msk.f32.gmra.mxu0 %vm1737_vm2, %v1734_v57 }
 0x242   : > { %1935 = vmatprep.mubr.f32.mxu0 %v9422_v29 }
 0x245   : > { %7178 = vmatmul.mubr.msk.f32.gmra.mxu0 %vm1737_vm2, %v1735_v60 }
 0x246   : > { %1941 = vmatprep.mubr.f32.mxu0 %v9422_v29 }
 0x249   : > { %7179 = vmatmul.mubr.msk.f32.gmra.mxu0 %vm1737_vm2, %v1736_v61 }
 0x2f5   : > { %v1913_v11 = vpop.f32.mrf.mxu0 }
 0x2f6   : > { %v1914_v12 = vadd.f32 %v1913_v11, %v1822_v10 }
 0x2f7   : > { %v1915_v13 = vpop.f32.mrf.mxu0 }
 0x2f8   : > { %7794 = vmatprep.mubr.msk.f32.mxu1 %vm1737_vm2, %v1914_v12  ;;  %v9991_v36 = vadd.f32 %v1915_v13, %v1826_v31 }
 0x2f9   : > { %v1919_v14 = vpop.f32.mrf.mxu0 }
 0x2fa   : > { %v9952_v27 = vadd.f32 %v1919_v14, %v1822_v10 }
 0x2fb   : > { %v1921_v15 = vpop.f32.mrf.mxu0 }
 0x2fc   : > { %v9997_v37 = vadd.f32 %v1921_v15, %v1826_v31 }
 0x2fd   : > { %v1925_v16 = vpop.f32.mrf.mxu0 }
 0x2fe   : > { %v9937_v22 = vadd.f32 %v1925_v16, %v1822_v10 }
 0x2ff   : > { %v1927_v17 = vpop.f32.mrf.mxu0 }
 0x300   : > { %v9976_v34 = vadd.f32 %v1927_v17, %v1826_v31 }
 0x301   : > { %v1931_v18 = vpop.f32.mrf.mxu0 }
 0x302   : > { %v9933_v19 = vadd.f32 %v1931_v18, %v1822_v10 }
 0x303   : > { %v1933_v20 = vpop.f32.mrf.mxu0 }
 0x304   : > { %1960 = vrot.lane.b32.xlu1 %v9933_v19, %s9424_s23  ;;  %v9985_v35 = vadd.f32 %v1933_v20, %v1826_v31 }
 0x305   : > { %v1937_v21 = vpop.f32.mrf.mxu0 }
 0x306   : > { %v9946_v26 = vadd.f32 %v1937_v21, %v1822_v10 }
 0x307   : > { %v1939_v23 = vpop.f32.mrf.mxu0 }
 0x308   : > { %1958 = vrot.lane.b32.xlu1 %v9937_v22, %s9424_s23  ;;  %v9970_v33 = vadd.f32 %v1939_v23, %v1826_v31 }
 0x309   : > { %v1943_v24 = vpop.f32.mrf.mxu0 }
 0x30a   : > { %v9941_v25 = vadd.f32 %v1943_v24, %v1822_v10 }
 0x30b   : > { %v1945_v30 = vpop.f32.mrf.mxu0 }
 0x30c   : > { %1964 = vrot.lane.b32.xlu0 %v9941_v25, %s9424_s23  ;;  %1954 = vrot.lane.b32.xlu1 %v1914_v12, %s9424_s23  ;;  %v9964_v32 = vadd.f32 %v1945_v30, %v1826_v31 }
 0x310   : > { %1962 = vrot.lane.b32.xlu0 %v9946_v26, %s9424_s23  ;;  %2198 = vrot.lane.b32.xlu1 %v9946_v26, %s9425_s14 }
 0x314   : > { %1956 = vrot.lane.b32.xlu0 %v9952_v27, %s9424_s23  ;;  %2194 = vrot.lane.b32.xlu1 %v9937_v22, %s9425_s14 }
 0x318   : > { %2200 = vrot.lane.b32.xlu0 %v9941_v25, %s9425_s14  ;;  %2190 = vrot.lane.b32.xlu1 %v1914_v12, %s9425_s14 }
 0x31c   : > { %2196 = vrot.lane.b32.xlu0 %v9933_v19, %s9425_s14  ;;  %2553 = vrot.lane.b32.xlu1 %v9964_v32, %s9426_s0 }
 0x320   : > { %2192 = vrot.lane.b32.xlu0 %v9952_v27, %s9425_s14  ;;  %2551 = vrot.lane.b32.xlu1 %v9970_v33, %s9426_s0 }
 0x324   : > { %2178 = vrot.lane.b32.xlu0 %v1914_v12, %s9426_s0  ;;  %2547 = vrot.lane.b32.xlu1 %v9976_v34, %s9426_s0 }
 0x328   : > { %2180 = vrot.lane.b32.xlu0 %v9952_v27, %s9426_s0  ;;  %2184 = vrot.lane.b32.xlu1 %v9933_v19, %s9426_s0 }
 0x32c   : > { %2549 = vrot.lane.b32.xlu0 %v9985_v35, %s9426_s0  ;;  %2186 = vrot.lane.b32.xlu1 %v9946_v26, %s9426_s0 }
 0x330   : > { %2182 = vrot.lane.b32.xlu0 %v9937_v22, %s9426_s0  ;;  %2543 = vrot.lane.b32.xlu1 %v9991_v36, %s9426_s0 }
 0x334   : > { %2545 = vrot.lane.b32.xlu0 %v9997_v37, %s9426_s0  ;;  %2533 = vrot.lane.b32.xlu1 %v9997_v37, %s9424_s23 }
 0x338   : > { %2188 = vrot.lane.b32.xlu0 %v9941_v25, %s9426_s0  ;;  %2537 = vrot.lane.b32.xlu1 %v9985_v35, %s9424_s23 }
 0x33c   : > { %2531 = vrot.lane.b32.xlu0 %v9991_v36, %s9424_s23  ;;  %2541 = vrot.lane.b32.xlu1 %v9964_v32, %s9424_s23 }
 0x340   : > { %2535 = vrot.lane.b32.xlu0 %v9976_v34, %s9424_s23  ;;  %1751 = vperm.xlu1 %8565, %v9838_v0  }
 0x344   : > { %2539 = vrot.lane.b32.xlu0 %v9970_v33, %s9424_s23  ;;  %1754 = vperm.xlu1 %8565, %v9841_v1  }
 0x348   : > { %1760 = vperm.xlu1 %8565, %v9847_v3   ;;  %2097 = vperm.xlu0 %8564, %v7192_v38  }
 0x34c   : > { %1766 = vperm.xlu1 %8565, %v9853_v5   ;;  %1757 = vperm.xlu0 %8564, %v9844_v2  }
 0x350   : > { %2774 = vrot.lane.b32.xlu1 %v9964_v32, %s9425_s14  ;;  %1763 = vperm.xlu0 %8564, %v9850_v4  }
 0x376   : > { %v1961_v39 = vpop.permute.xlu1 %1960 }
 0x37a   : > { %v1959_v40 = vpop.permute.xlu1 %1958 }
 0x37e   : > { %v1965_v41 = vpop.permute.xlu0 %1964  ;;  %v1955_v42 = vpop.permute.xlu1 %1954 }
 0x37f   : > { %7782 = vmatprep.subr.msk.mxu1 %vm1737_vm2, %v1965_v41 }
 0x380   : > { %7783 = vmatpush3.xpose.msk.msra.mxu1 %vm1737_vm2, %v1965_v41 }
 0x382   : > { %v1963_v43 = vpop.permute.xlu0 %1962  ;;  %v2199_v44 = vpop.permute.xlu1 %2198 }
 0x383   : > { %7784 = vmatprep.subr.msk.mxu1 %vm1737_vm2, %v1963_v43 }
 0x384   : > { %7785 = vmatpush3.xpose.msk.msra.mxu1 %vm1737_vm2, %v1963_v43 }
 0x385   : > { %7786 = vmatprep.subr.msk.mxu1 %vm1737_vm2, %v1961_v39 }
 0x386   : > { %v1957_v45 = vpop.permute.xlu0 %1956  ;;  %v2195_v46 = vpop.permute.xlu1 %2194 }
 0x388   : > { %7787 = vmatpush3.xpose.msk.msra.mxu1 %vm1737_vm2, %v1961_v39 }
 0x389   : > { %7788 = vmatprep.subr.msk.mxu1 %vm1737_vm2, %v1959_v40 }
 0x38a   : > { %v2201_v47 = vpop.permute.xlu0 %2200  ;;  %v2191_v48 = vpop.permute.xlu1 %2190 }
 0x38b   : > { %7803 = vmatprep.subr.msk.mxu0 %vm1737_vm2, %v2201_v47 }
 0x38c   : > { %7789 = vmatpush3.xpose.msk.msra.mxu1 %vm1737_vm2, %v1959_v40  ;;  %7804 = vmatpush3.xpose.msk.msra.mxu0 %vm1737_vm2, %v2201_v47 }
 0x38d   : > { %7790 = vmatprep.subr.msk.mxu1 %vm1737_vm2, %v1957_v45  ;;  %7805 = vmatprep.subr.msk.mxu0 %vm1737_vm2, %v2199_v44 }
 0x38e   : > { %v2197_v49 = vpop.permute.xlu0 %2196  ;;  %v2554_v50 = vpop.permute.xlu1 %2553 }
 0x390   : > { %7791 = vmatpush3.xpose.msk.msra.mxu1 %vm1737_vm2, %v1957_v45  ;;  %7806 = vmatpush3.xpose.msk.msra.mxu0 %vm1737_vm2, %v2199_v44 }
 0x391   : > { %7792 = vmatprep.subr.msk.mxu1 %vm1737_vm2, %v1955_v42  ;;  %7807 = vmatprep.subr.msk.mxu0 %vm1737_vm2, %v2197_v49 }
 0x392   : > { %v2193_v51 = vpop.permute.xlu0 %2192  ;;  %v2552_v52 = vpop.permute.xlu1 %2551 }
 0x394   : > { %7793 = vmatpush3.xpose.msk.msra.mxu1 %vm1737_vm2, %v1955_v42  ;;  %7808 = vmatpush3.xpose.msk.msra.mxu0 %vm1737_vm2, %v2197_v49 }
 0x395   : > { %7809 = vmatprep.subr.msk.mxu0 %vm1737_vm2, %v2195_v46  ;;  %7824 = vmatprep.subr.mxu1 %v9964_v32 }
 0x396   : > { %v2179_v53 = vpop.permute.xlu0 %2178  ;;  %v2548_v54 = vpop.permute.xlu1 %2547 }
 0x397   : > { %7795 = vmatmul.mubr.msk.f32.vlgmr.msra.gmra.mxu1 %vm1737_vm2, %v9952_v27  ;;  %7815 = vmatprep.mubr.msk.f32.mxu0 %vm1737_vm2, %v2179_v53 }
 0x398   : > { %7797 = vmatprep.mubr.msk.f32.mxu1 %vm1737_vm2, %v9937_v22  ;;  %7810 = vmatpush3.xpose.msk.msra.mxu0 %vm1737_vm2, %v2195_v46 }
 0x399   : > { %7825 = vmatpush3.msra.mxu1 %v9964_v32  ;;  %7811 = vmatprep.subr.msk.mxu0 %vm1737_vm2, %v2193_v51 }
 0x39a   : > { %7826 = vmatprep.subr.mxu1 %v9970_v33  ;;  %v2181_v55 = vpop.permute.xlu0 %2180  ;;  %v2185_v56 = vpop.permute.xlu1 %2184 }
 0x39b   : > { %7827 = vmatpush3.msra.mxu1 %v9970_v33 }
 0x39c   : > { %7798 = vmatmul.mubr.msk.f32.gmra.mxu1 %vm1737_vm2, %v9933_v19  ;;  %7828 = vmatprep.subr.mxu1 %v9985_v35 }
 0x39d   : > { %7800 = vmatprep.mubr.msk.f32.mxu1 %vm1737_vm2, %v9946_v26  ;;  %7812 = vmatpush3.xpose.msk.msra.mxu0 %vm1737_vm2, %v2193_v51 }
 0x39e   : > { %7829 = vmatpush3.msra.mxu1 %v9985_v35  ;;  %7813 = vmatprep.subr.msk.mxu0 %vm1737_vm2, %v2191_v48  ;;  %v2550_v57 = vpop.permute.xlu0 %2549  ;;  %v2187_v58 = vpop.permute.xlu1 %2186 }
 0x39f   : > { %7830 = vmatprep.subr.mxu1 %v9976_v34 }
 0x3a0   : > { %7831 = vmatpush3.msra.mxu1 %v9976_v34 }
 0x3a1   : > { %7801 = vmatmul.mubr.msk.f32.gmra.mxu1 %vm1737_vm2, %v9941_v25  ;;  %7832 = vmatprep.subr.mxu1 %v9997_v37 }
 0x3a2   : > { %7814 = vmatpush3.xpose.msk.msra.mxu0 %vm1737_vm2, %v2191_v48  ;;  %7833 = vmatpush3.msra.mxu1 %v9997_v37  ;;  %v2183_v59 = vpop.permute.xlu0 %2182  ;;  %v2544_v60 = vpop.permute.xlu1 %2543 }
 0x3a3   : > { %7834 = vmatprep.subr.mxu1 %v9991_v36  ;;  %7845 = vmatprep.subr.msk.mxu0 %vm1737_vm2, %v2554_v50 }
 0x3a4   : > { %7835 = vmatpush3.msra.mxu1 %v9991_v36 }
 0x3a5   : > { %7816 = vmatmul.mubr.msk.f32.vlgmr.msra.gmra.mxu0 %vm1737_vm2, %v2181_v55 }
 0x3a6   : > { %7818 = vmatprep.mubr.msk.f32.mxu0 %vm1737_vm2, %v2183_v59  ;;  %7846 = vmatpush3.xpose.msk.msra.mxu0 %vm1737_vm2, %v2554_v50  ;;  %v2546_v61 = vpop.permute.xlu0 %2545  ;;  %v2534_v63 = vpop.permute.xlu1 %2533 }
 0x3a7   : > { %7847 = vmatprep.subr.msk.mxu0 %vm1737_vm2, %v2552_v52 }
 0x3a9   : > { %7819 = vmatmul.mubr.msk.f32.gmra.mxu0 %vm1737_vm2, %v2185_v56 }
 0x3aa   : > { %7821 = vmatprep.mubr.msk.f32.mxu0 %vm1737_vm2, %v2187_v58  ;;  %7848 = vmatpush3.xpose.msk.msra.mxu0 %vm1737_vm2, %v2552_v52  ;;  %v2189_v62 = vpop.permute.xlu0 %2188  ;;  %v2538_v10 = vpop.permute.xlu1 %2537 }
 0x3ab   : > { %7849 = vmatprep.subr.msk.mxu0 %vm1737_vm2, %v2550_v57 }
 0x3ad   : > { %7822 = vmatmul.mubr.msk.f32.gmra.mxu0 %vm1737_vm2, %v2189_v62 }
 0x3ae   : > { %7850 = vmatpush3.xpose.msk.msra.mxu0 %vm1737_vm2, %v2550_v57  ;;  %v2532_v9 = vpop.permute.xlu0 %2531  ;;  %v2542_v11 = vpop.permute.xlu1 %2541 }
 0x3af   : > { %7851 = vmatprep.subr.msk.mxu0 %vm1737_vm2, %v2548_v54  ;;  %7857 = vmatprep.mubr.msk.f32.mxu0 %vm1737_vm2, %v2532_v9 }
 0x3b2   : > { %7852 = vmatpush3.xpose.msk.msra.mxu0 %vm1737_vm2, %v2548_v54  ;;  %v2536_v12 = vpop.permute.xlu0 %2535 }
 0x3b3   : > { %7853 = vmatprep.subr.msk.mxu0 %vm1737_vm2, %v2546_v61 }
 0x3b6   : > { %7854 = vmatpush3.xpose.msk.msra.mxu0 %vm1737_vm2, %v2546_v61  ;;  %v2540_v15 = vpop.permute.xlu0 %2539 }
 0x3b7   : > { %7855 = vmatprep.subr.msk.mxu0 %vm1737_vm2, %v2544_v60 }
 0x3ba   : > { %7856 = vmatpush3.xpose.msk.msra.mxu0 %vm1737_vm2, %v2544_v60 }
 0x3bb   : > { %v10088_v13 = vpop.permute.xlu1 %1751 }
 0x3bd   : > { %7858 = vmatmul.mubr.msk.f32.vlgmr.msra.gmra.mxu0 %vm1737_vm2, %v2534_v63 }
 0x3be   : > { %7860 = vmatprep.mubr.msk.f32.mxu0 %vm1737_vm2, %v2536_v12 }
 0x3bf   : > { %v10092_v14 = vpop.permute.xlu1 %1754 }
 0x3c1   : > { %7861 = vmatmul.mubr.msk.f32.gmra.mxu0 %vm1737_vm2, %v2538_v10 }
 0x3c2   : > { %7863 = vmatprep.mubr.msk.f32.mxu0 %vm1737_vm2, %v2540_v15 }
 0x3c3   : > { %v10096_v16 = vpop.permute.xlu1 %1760  ;;  %v2098_v21 = vpop.permute.xlu0 %2097 }
 0x3c5   : > { %7864 = vmatmul.mubr.msk.f32.gmra.mxu0 %vm1737_vm2, %v2542_v11 }
 0x3c7   : > { %v10099_v17 = vpop.permute.xlu1 %1766 }
 0x3cb   : > { %v10101_v18 = vpop.permute.xlu1 %2774 }
 0x3cc   : > { %7866 = vmatprep.subr.mxu1 %v10101_v18 }
 0x457   : > { %v7796_v19 = vpop.f32.mrf.mxu1 }
 0x458   : > { %v2086_v20 = vmul.f32 0.17677669, %v7796_v19 }
 0x459   : > { %v2056_v22 = vpop.f32.mrf.mxu1 }
 0x45a   : > { %v2101_v23 = vadd.f32 %v2098_v21, %v2086_v20  ;;  %v2085_v24 = vmul.f32 0.17677669, %v2056_v22  ;;  %v10114_v20 = vrot.slane %v9856_v6, %v9929_v8  ;;  %v1813_v22 = vld [vmem:[%s11571_s16 + $0x8] sm:$0xff] }
 0x45c   : > { %v7194_v25 = vmul.f32 -1.442695, %v2101_v23  ;;  %v2100_v26 = vadd.f32 %v2098_v21, %v2085_v24  ;;  %v7799_v27 = vpop.f32.mrf.mxu1  ;;  %vm1772_vm5 = vcmp.eq.s32.totalorder %v10088_v13, %v10114_v20  ;;  %vm1773_vm7 = vcmp.eq.s32.totalorder %v10092_v14, %v10114_v20  ;;  %v1814_v14 = vld [vmem:[%s11571_s16 + $0x10] sm:$0xff] }
 0x45d   : > { %v2088_v30 = vmul.f32 0.17677669, %v7799_v27  ;;  %vm1775_vm9 = vcmp.eq.s32.totalorder %v10096_v16, %v10114_v20  ;;  %vm1777_vm10 = vcmp.eq.s32.totalorder %v10099_v17, %v10114_v20 }
 0x45e   : > { %8566 = vpow2.f32 %v7194_v25  ;;  %v7193_v31 = vmul.f32 -1.442695, %v2100_v26  ;;  %v2066_v32 = vpop.f32.mrf.mxu1  ;;  %v1812_v25 = vld [vmem:[%s11571_s16] sm:$0xff] }
 0x45f   : > { %v2103_v38 = vadd.f32 %v2098_v21, %v2088_v30  ;;  %v2087_v39 = vmul.f32 0.17677669, %v2066_v32  ;;  %v1758_v32 = vpop.permute.xlu0 %1757 }
 0x460   : > { %8568 = vpow2.f32 %v7193_v31  ;;  %vm1774_vm11 = vcmp.eq.s32.totalorder %v1758_v32, %v10114_v20 }
 0x461   : > { %v7196_v40 = vmul.f32 -1.442695, %v2103_v38  ;;  %v2102_v41 = vadd.f32 %v2098_v21, %v2087_v39  ;;  %v7802_v42 = vpop.f32.mrf.mxu1 }
 0x462   : > { %v2090_v43 = vmul.f32 0.17677669, %v7802_v42 }
 0x463   : > { %8570 = vpow2.f32 %v7196_v40  ;;  %v7195_v44 = vmul.f32 -1.442695, %v2102_v41  ;;  %v2076_v45 = vpop.f32.mrf.mxu1  ;;  %v9427_v41 = vmov -1e+30  }
 0x464   : > { %v2105_v46 = vadd.f32 %v2098_v21, %v2090_v43  ;;  %v2089_v47 = vmul.f32 0.17677669, %v2076_v45  ;;  %v1778_v42 = vsel %vm1772_vm5, 0.0, %v9427_v41  ;;  %v1779_v16 = vsel %vm1773_vm7, 0.0, %v9427_v41 }
 0x465   : > { %8572 = vpow2.f32 %v7195_v44  ;;  %v10104_v50 = vpop.f32.mrf.mxu0  ;;  %v10138_v45 = vsel %vm1775_vm9, 0.0, %v9427_v41  ;;  %v10145_v13 = vsel %vm1774_vm11, 0.0, %v9427_v41 }
 0x466   : > { %v7198_v48 = vmul.f32 -1.442695, %v2105_v46  ;;  %v2104_v49 = vadd.f32 %v2098_v21, %v2089_v47  ;;  %v10141_v46 = vsel %vm1777_vm10, 0.0, %v9427_v41  ;;  %v1815_v47 = vld [vmem:[%s11571_s16 + $0x18] sm:$0xff] }
 0x467   : > { %v2292_v53 = vpop.f32.mrf.mxu0 }
 0x468   : > { %8574 = vpow2.f32 %v7198_v48  ;;  %v7197_v51 = vmul.f32 -1.442695, %v2104_v49 }
 0x469   : > { %v7820_v57 = vpop.f32.mrf.mxu0 }
 0x46a   : > { %8576 = vpow2.f32 %v7197_v51  ;;  %v2322_v51 = vmul.f32 0.17677669, %v10104_v50  ;;  %v1817_v50 = vld [vmem:[%s11571_s16 + $0x28] sm:$0xff] }
 0x46b   : > { %v8567_v52 = vpop.eup %8566  ;;  %v10106_v62 = vpop.f32.mrf.mxu0 }
 0x46c   : > { %v2125_v54 = vadd.f32 1.0, %v8567_v52  ;;  %v2321_v52 = vmul.f32 0.17677669, %v2292_v53 }
 0x46d   : > { %v8569_v55 = vpop.eup %8568  ;;  %v10108_v11 = vpop.f32.mrf.mxu0 }
 0x46e   : > { %8578 = vrcp.f32 %v2125_v54  ;;  %v2124_v56 = vadd.f32 1.0, %v8569_v55  ;;  %v2324_v54 = vmul.f32 0.17677669, %v7820_v57 }
 0x46f   : > { %v10110_v19 = vpop.f32.mrf.mxu0 }
 0x470   : > { %v8571_v58 = vpop.eup %8570  ;;  %8580 = vrcp.f32 %v2124_v56 }
 0x471   : > { %v2127_v59 = vadd.f32 1.0, %v8571_v58 }
 0x472   : > { %v8573_v60 = vpop.eup %8572 }
 0x473   : > { %8582 = vrcp.f32 %v2127_v59  ;;  %v2126_v61 = vadd.f32 1.0, %v8573_v60 }
 0x475   : > { %v8575_v63 = vpop.eup %8574  ;;  %8584 = vrcp.f32 %v2126_v61 }
 0x476   : > { %v2129_v9 = vadd.f32 1.0, %v8575_v63 }
 0x477   : > { %v8577_v10 = vpop.eup %8576 }
 0x478   : > { %v2128_v12 = vadd.f32 1.0, %v8577_v10  ;;  %8586 = vrcp.f32 %v2129_v9  ;;  %v1816_v9 = vld [vmem:[%s11571_s16 + $0x20] sm:$0xff] }
 0x47a   : > { %8588 = vrcp.f32 %v2128_v12 }
 0x47b   : > { %v8579_v15 = vpop.eup %8578 }
 0x47c   : > { %vm2143_vm3 = vcmp.gt.f32.partialorder %v8579_v15, 0.5  ;;  %vm2161_vm4 = vcmp.le.f32.partialorder %v8579_v15, 0.5 }
 0x47d   : > { %v8581_v21 = vpop.eup %8580  ;;  %v2149_v23 = vsel %vm2143_vm3, %v8579_v15, 0.0  ;;  %v7859_v24 = vpop.f32.mrf.mxu0  ;;  %v2167_v27 = vsel %vm2161_vm4, %v8579_v15, 0.0 }
 0x47e   : > { %vm2142_vm6 = vcmp.gt.f32.partialorder %v8581_v21, 0.5  ;;  %vm2160_vm8 = vcmp.le.f32.partialorder %v8581_v21, 0.5  ;;  %v2155_v38 = vmul.f32 %v2149_v23, %v1813_v22  ;;  %v2173_v43 = vmul.f32 %v2167_v27, %v1813_v22 }
 0x47f   : > { %v2148_v26 = vsel %vm2142_vm6, %v8581_v21, 0.0  ;;  %v2645_v30 = vpop.f32.mrf.mxu0  ;;  %v2166_v39 = vsel %vm2160_vm8, %v8581_v21, 0.0  ;;  %v2675_v63 = vmul.f32 0.17677669, %v7859_v24 }
 0x480   : > { %v8583_v31 = vpop.eup %8582  ;;  %v2154_v17 = vmul.f32 %v2148_v26, %v1812_v25  ;;  %v2172_v49 = vmul.f32 %v2166_v39, %v1812_v25  ;;  %vm2328_vm13 = vcmp.eq.f32.partialorder %v2155_v38, 0.0  ;;  %vm2681_vm4 = vcmp.eq.f32.partialorder %v2173_v43, 0.0  ;;  %v1764_v38 = vpop.permute.xlu0 %1763 }
 0x481   : > { %vm2145_vm12 = vcmp.gt.f32.partialorder %v8583_v31, 0.5  ;;  %v10135_v44 = vpop.f32.mrf.mxu0  ;;  %vm2163_vm15 = vcmp.le.f32.partialorder %v8583_v31, 0.5  ;;  %v2334_v61 = vsel %vm2328_vm13, -1e+09, %v2322_v51  ;;  %v2674_v10 = vmul.f32 0.17677669, %v2645_v30 }
 0x482   : > { %v8585_v40 = vpop.eup %8584  ;;  %v2151_v48 = vsel %vm2145_vm12, %v8583_v31, 0.0  ;;  %vm2327_vm3 = vcmp.eq.f32.partialorder %v2154_v17, 0.0  ;;  %vm2680_vm6 = vcmp.eq.f32.partialorder %v2172_v49, 0.0  ;;  %v2169_v53 = vsel %vm2163_vm15, %v8583_v31, 0.0 }
 0x483   : > { %vm2162_vm1 = vcmp.le.f32.partialorder %v8585_v40, 0.5  ;;  %v2157_v56 = vmul.f32 %v2151_v48, %v1815_v47  ;;  %v2655_v59 = vpop.f32.mrf.mxu0  ;;  %vm2144_vm5 = vcmp.gt.f32.partialorder %v8585_v40, 0.5  ;;  %v2333_v12 = vsel %vm2327_vm3, -1e+09, %v2321_v52 }
 0x484   : > { %v2168_v58 = vsel %vm2162_vm1, %v8585_v40, 0.0  ;;  %v2687_v21 = vsel %vm2681_vm4, -1e+09, %v2675_v63  ;;  %v2150_v22 = vsel %vm2144_vm5, %v8585_v40, 0.0  ;;  %v2686_v23 = vsel %vm2680_vm6, -1e+09, %v2674_v10 }
 0x485   : > { %v8587_v55 = vpop.eup %8586  ;;  %v2174_v57 = vmul.f32 %v2168_v58, %v1814_v14  ;;  %vm2330_vm9 = vcmp.eq.f32.partialorder %v2157_v56, 0.0  ;;  %v7865_v26 = vpop.f32.mrf.mxu0  ;;  %v2175_v24 = vmul.f32 %v2169_v53, %v1815_v47  ;;  %v2676_v27 = vmul.f32 0.17677669, %v2655_v59 }
 0x486   : > { %vm2165_vm8 = vcmp.le.f32.partialorder %v8587_v55, 0.5  ;;  %v10154_v31 = vadd.f32 %v2687_v21, %v1779_v16  ;;  %v10156_v39 = vadd.f32 %v2334_v61, %v1779_v16  ;;  %v2679_v17 = vmul.f32 0.17677669, %v7865_v26 }
 0x487   : > { %v8589_v60 = vpop.eup %8588  ;;  %v2171_v25 = vsel %vm2165_vm8, %v8587_v55, 0.0  ;;  %vm2682_vm11 = vcmp.eq.f32.partialorder %v2174_v57, 0.0  ;;  %v10158_v48 = vadd.f32 %v2686_v23, %v1778_v42  ;;  %vm2147_vm13 = vcmp.gt.f32.partialorder %v8587_v55, 0.5  ;;  %v2665_v10 = vpop.f32.mrf.mxu0 }
 0x488   : > { %vm2146_vm7 = vcmp.gt.f32.partialorder %v8589_v60, 0.5  ;;  %v2177_v32 = vmul.f32 %v2171_v25, %v1817_v50  ;;  %vm2164_vm10 = vcmp.le.f32.partialorder %v8589_v60, 0.5  ;;  %v2701_v40 = vsel %vm2345_vm14, %v10154_v31, -inf }
 0x489   : > { %v2152_v15 = vsel %vm2146_vm7, %v8589_v60, 0.0  ;;  %v2170_v43 = vsel %vm2164_vm10, %v8589_v60, 0.0  ;;  %v2349_v47 = vsel %vm2345_vm14, %v10156_v39, -inf  ;;  %v10164_v49 = vadd.f32 %v2333_v12, %v1778_v42  ;;  %2702 = vmax.xlane.f32.xlu0 %v2701_v40 }
 0x48a   : > { %v2158_v30 = vmul.f32 %v2152_v15, %v1816_v9  ;;  %vm2685_vm12 = vcmp.eq.f32.partialorder %v2177_v32, 0.0  ;;  %vm1776_vm15 = vcmp.eq.s32.totalorder %v1764_v38, %v10114_v20  ;;  %v2336_v51 = vsel %vm2330_vm9, -1e+09, %v2324_v54  ;;  %2350 = vmax.xlane.f32.xlu1 %v2349_v47 }
 0x48b   : > { %v2688_v16 = vsel %vm2682_vm11, -1e+09, %v2676_v27  ;;  %v2691_v52 = vsel %vm2685_vm12, -1e+09, %v2679_v17  ;;  %v2156_v58 = vmul.f32 %v2150_v22, %v1814_v14  ;;  %vm2683_vm3 = vcmp.eq.f32.partialorder %v2175_v24, 0.0 }
 0x48c   : > { %vm2331_vm1 = vcmp.eq.f32.partialorder %v2158_v30, 0.0  ;;  %v2176_v59 = vmul.f32 %v2170_v43, %v1816_v9  ;;  %v2153_v60 = vsel %vm2147_vm13, %v8587_v55, 0.0  ;;  %v2325_v61 = vmul.f32 0.17677669, %v10110_v19 }
 0x48d   : > { %v2677_v63 = vmul.f32 0.17677669, %v10135_v44  ;;  %v2698_v42 = vsel %vm2345_vm14, %v10158_v48, -inf  ;;  %v2346_v54 = vsel %vm2345_vm14, %v10164_v49, -inf  ;;  %v2342_v56 = vadd.f32 %v2336_v51, %v10138_v45 }
 0x48e   : > { %v10176_v53 = vadd.f32 %v2688_v16, %v10145_v13  ;;  %v10179_v14 = vadd.f32 %v2691_v52, %v10141_v46  ;;  %v2337_v55 = vsel %vm2331_vm1, -1e+09, %v2325_v61  ;;  %2699 = vmax.xlane.f32.xlu1 %v2698_v42  ;;  %2347 = vmax.xlane.f32.xlu0 %v2346_v54  ;;  %vm2329_vm4 = vcmp.eq.f32.partialorder %v2156_v58, 0.0 }
 0x48f   : > { %v2689_v9 = vsel %vm2683_vm3, -1e+09, %v2677_v63  ;;  %v2159_v19 = vmul.f32 %v2153_v60, %v1817_v50  ;;  %vm2684_vm5 = vcmp.eq.f32.partialorder %v2176_v59, 0.0  ;;  %v1782_v44 = vsel %vm1776_vm15, 0.0, %v9427_v41 }
 0x490   : > { %v2323_v57 = vmul.f32 0.17677669, %v10106_v62  ;;  %v2678_v12 = vmul.f32 0.17677669, %v2665_v10  ;;  %v2355_v15 = vsel %vm2345_vm14, %v2342_v56, -inf  ;;  %v2704_v21 = vsel %vm2345_vm14, %v10176_v53, -inf }
 0x491   : > { %v2695_v22 = vadd.f32 %v2689_v9, %v10138_v45  ;;  %v10189_v23 = vadd.f32 %v2337_v55, %v1782_v44  ;;  %vm2332_vm6 = vcmp.eq.f32.partialorder %v2159_v19, 0.0  ;;  %v2326_v20 = vmul.f32 0.17677669, %v10108_v11 }
 0x492   : > { %v2335_v25 = vsel %vm2329_vm4, -1e+09, %v2323_v57  ;;  %v2690_v26 = vsel %vm2684_vm5, -1e+09, %v2678_v12  ;;  %2356 = vmax.xlane.f32.xlu0 %v2355_v15  ;;  %2705 = vmax.xlane.f32.xlu1 %v2704_v21  ;;  %vm3433_vm7 = vcmask 146432   ;;  %vm3919_vm8 = vcmask 177152  }
 0x493   : > { %v2707_v41 = vsel %vm2345_vm14, %v2695_v22, -inf  ;;  %v2358_v62 = vsel %vm2345_vm14, %v10189_v23, -inf  ;;  %v2341_v50 = vadd.f32 %v2335_v25, %v10145_v13  ;;  %v2696_v24 = vadd.f32 %v2690_v26, %v1782_v44 }
 0x494   : > { %v2338_v27 = vsel %vm2332_vm6, -1e+09, %v2326_v20  ;;  %v2713_v13 = vsel %vm2345_vm14, %v10179_v14, -inf }
 0x495   : > { %v2352_v45 = vsel %vm2345_vm14, %v2341_v50, -inf  ;;  %v2710_v32 = vsel %vm2345_vm14, %v2696_v24, -inf  ;;  %v2344_v38 = vadd.f32 %v2338_v27, %v10141_v46 }
 0x496   : > { %2708 = vmax.xlane.f32.xlu0 %v2707_v41  ;;  %2359 = vmax.xlane.f32.xlu1 %v2358_v62 }
 0x497   : > { %v2361_v11 = vsel %vm2345_vm14, %v2344_v38, -inf }
 0x49a   : > { %2353 = vmax.xlane.f32.xlu0 %v2352_v45  ;;  %2711 = vmax.xlane.f32.xlu1 %v2710_v32 }
 0x49e   : > { %2362 = vmax.xlane.f32.xlu0 %v2361_v11 }
 0x4ab   : > { %2770 = vrot.lane.b32.xlu1 %v9985_v35, %s9425_s14 }
 0x4b4   : > { %2772 = vrot.lane.b32.xlu0 %v9970_v33, %s9425_s14 }
 0x4d3   : > { %2714 = vmax.xlane.f32.xlu0 %v2713_v13 }
 0x4e9   : > { %2768 = vrot.lane.b32.xlu0 %v9976_v34, %s9425_s14 }
 0x512   : > { %v2703_v30 = vpop.xlane.xlu0 %2702 }
 0x513   : > { %v2351_v46 = vpop.xlane.xlu1 %2350  ;;  %v2717_v17 = vsub.f32 %v10154_v31, %v2703_v30 }
 0x514   : > { %v2365_v43 = vsub.f32 %v10156_v39, %v2351_v46 }
 0x515   : > { %v2724_v47 = vmul.f32 1.442695, %v2717_v17 }
 0x516   : > { %v2372_v40 = vmul.f32 1.442695, %v2365_v43 }
 0x517   : > { %v2700_v51 = vpop.xlane.xlu1 %2699  ;;  %v2348_v35 = vpop.xlane.xlu0 %2347 }
 0x518   : > { %v2716_v16 = vsub.f32 %v10158_v48, %v2700_v51  ;;  %v2364_v33 = vsub.f32 %v10164_v49, %v2348_v35  ;;  %8590 = vpow2.f32 %v2372_v40 }
 0x519   : > { %8592 = vpow2.f32 %v2724_v47 }
 0x51a   : > { %v2370_v52 = vmul.f32 1.442695, %v2364_v33  ;;  %v2722_v58 = vmul.f32 1.442695, %v2716_v16 }
 0x51b   : > { %v2357_v59 = vpop.xlane.xlu0 %2356  ;;  %v2706_v34 = vpop.xlane.xlu1 %2705 }
 0x51c   : > { %v2367_v60 = vsub.f32 %v2342_v56, %v2357_v59  ;;  %8594 = vpow2.f32 %v2370_v52  ;;  %v2718_v42 = vsub.f32 %v10176_v53, %v2706_v34 }
 0x51d   : > { %8596 = vpow2.f32 %v2722_v58 }
 0x51e   : > { %v2376_v61 = vmul.f32 1.442695, %v2367_v60  ;;  %v2726_v19 = vmul.f32 1.442695, %v2718_v42 }
 0x51f   : > { %v2709_v31 = vpop.xlane.xlu0 %2708  ;;  %v2360_v39 = vpop.xlane.xlu1 %2359 }
 0x520   : > { %8598 = vpow2.f32 %v2376_v61  ;;  %v2719_v63 = vsub.f32 %v2695_v22, %v2709_v31  ;;  %v2368_v55 = vsub.f32 %v10189_v23, %v2360_v39 }
 0x522   : > { %v2728_v10 = vmul.f32 1.442695, %v2719_v63  ;;  %v2378_v21 = vmul.f32 1.442695, %v2368_v55 }
 0x523   : > { %v2354_v48 = vpop.xlane.xlu0 %2353  ;;  %v2712_v54 = vpop.xlane.xlu1 %2711 }
 0x524   : > { %8600 = vpow2.f32 %v2728_v10  ;;  %v2366_v49 = vsub.f32 %v2341_v50, %v2354_v48  ;;  %v2720_v44 = vsub.f32 %v2696_v24, %v2712_v54 }
 0x525   : > { %v10214_v9 = vpop.eup %8590 }
 0x526   : > { %v2374_v56 = vmul.f32 1.442695, %v2366_v49  ;;  %v2385_v57 = vsel %vm2345_vm14, %v10214_v9, 0.0  ;;  %v10218_v15 = vpop.eup %8592  ;;  %v2730_v25 = vmul.f32 1.442695, %v2720_v44 }
 0x527   : > { %v2363_v12 = vpop.xlane.xlu0 %2362  ;;  %2386 = vadd.xlane.f32.xlu0 %v2385_v57  ;;  %v2737_v26 = vsel %vm2345_vm14, %v10218_v15, 0.0  ;;  %v2771_v34 = vpop.permute.xlu1 %2770 }
 0x528   : > { %8602 = vpow2.f32 %v2374_v56  ;;  %v2369_v53 = vsub.f32 %v2344_v38, %v2363_v12 }
 0x529   : > { %v10220_v22 = vpop.eup %8594  ;;  %8604 = vpow2.f32 %v2726_v19 }
 0x52a   : > { %v2380_v23 = vmul.f32 1.442695, %v2369_v53  ;;  %v2382_v20 = vsel %vm2345_vm14, %v10220_v22, 0.0  ;;  %v10226_v41 = vpop.eup %8596 }
 0x52b   : > { %2738 = vadd.xlane.f32.xlu0 %v2737_v26  ;;  %2383 = vadd.xlane.f32.xlu1 %v2382_v20  ;;  %v2734_v24 = vsel %vm2345_vm14, %v10226_v41, 0.0  ;;  %v2773_v51 = vpop.permute.xlu0 %2772 }
 0x52c   : > { %8606 = vpow2.f32 %v2380_v23 }
 0x52d   : > { %v10228_v62 = vpop.eup %8598  ;;  %8608 = vpow2.f32 %v2378_v21 }
 0x52e   : > { %8610 = vpow2.f32 %v2730_v25  ;;  %v2391_v50 = vsel %vm2345_vm14, %v10228_v62, 0.0 }
 0x52f   : > { %2392 = vadd.xlane.f32.xlu0 %v2391_v50  ;;  %2735 = vadd.xlane.f32.xlu1 %v2734_v24 }
 0x531   : > { %v10234_v27 = vpop.eup %8600 }
 0x532   : > { %v2743_v45 = vsel %vm2345_vm14, %v10234_v27, 0.0 }
 0x533   : > { %2744 = vadd.xlane.f32.xlu0 %v2743_v45 }
 0x535   : > { %v10238_v32 = vpop.eup %8602 }
 0x536   : > { %v2388_v38 = vsel %vm2345_vm14, %v10238_v32, 0.0  ;;  %v10242_v11 = vpop.eup %8604 }
 0x537   : > { %2389 = vadd.xlane.f32.xlu1 %v2388_v38  ;;  %v2740_v17 = vsel %vm2345_vm14, %v10242_v11, 0.0 }
 0x539   : > { %v10244_v13 = vpop.eup %8606 }
 0x53a   : > { %v10246_v30 = vpop.eup %8608  ;;  %v2397_v46 = vsel %vm2345_vm14, %v10244_v13, 0.0 }
 0x53b   : > { %v10252_v43 = vpop.eup %8610  ;;  %2398 = vadd.xlane.f32.xlu0 %v2397_v46  ;;  %2741 = vadd.xlane.f32.xlu1 %v2740_v17  ;;  %v2394_v40 = vsel %vm2345_vm14, %v10246_v30, 0.0  ;;  %v1798_v46 = vld [vmem:[%s11572_s10 + $0x28] sm:$0xff]  ;;  %v1797_v17 = vld [vmem:[%s11572_s10 + $0x20] sm:$0xff] }
 0x53c   : > { %v2746_v47 = vsel %vm2345_vm14, %v10252_v43, 0.0 }
 0x53f   : > { %2395 = vadd.xlane.f32.xlu1 %v2394_v40  ;;  %2747 = vadd.xlane.f32.xlu0 %v2746_v47  ;;  %v1795_v40 = vld [vmem:[%s11572_s10 + $0x10] sm:$0xff] }
 0x550   : > { %2766 = vrot.lane.b32.xlu1 %v9997_v37, %s9425_s14 }
 0x555   : > { %2764 = vrot.lane.b32.xlu0 %v9991_v36, %s9425_s14 }
 0x55c   : > { %v2715_v35 = vpop.xlane.xlu0 %2714 }
 0x55d   : > { %v2721_v16 = vsub.f32 %v10179_v14, %v2715_v35 }
 0x55f   : > { %v2732_v33 = vmul.f32 1.442695, %v2721_v16  ;;  %v1794_v16 = vld [vmem:[%s11572_s10 + $0x8] sm:$0xff] }
 0x560   : > { %v2769_v59 = vpop.permute.xlu0 %2768 }
 0x561   : > { %8612 = vpow2.f32 %v2732_v33  ;;  %v1793_v33 = vld [vmem:[%s11572_s10] sm:$0xff] }
 0x56e   : > { %v10263_v52 = vpop.eup %8612 }
 0x56f   : > { %v2749_v58 = vsel %vm2345_vm14, %v10263_v52, 0.0 }
 0x574   : > { %2750 = vadd.xlane.f32.xlu1 %v2749_v58 }
 0x5b0   : > { %v2387_v60 = vpop.xlane.xlu0 %2386 }
 0x5b1   : > { %8614 = vrcp.f32 %v2387_v60 }
 0x5b4   : > { %v2739_v37 = vpop.xlane.xlu0 %2738  ;;  %v2384_v61 = vpop.xlane.xlu1 %2383 }
 0x5b5   : > { %8616 = vrcp.f32 %v2739_v37 }
 0x5b6   : > { %8618 = vrcp.f32 %v2384_v61 }
 0x5b8   : > { %v2393_v36 = vpop.xlane.xlu0 %2392  ;;  %v2736_v31 = vpop.xlane.xlu1 %2735 }
 0x5b9   : > { %8620 = vrcp.f32 %v2393_v36  ;;  %v1809_v36 = vld [vmem:[%s11573_s28 + $0x38] sm:$0xff] }
 0x5ba   : > { %8622 = vrcp.f32 %v2736_v31  ;;  %v1808_v31 = vld [vmem:[%s11573_s28 + $0x30] sm:$0xff]  ;;  %7912 = vmatprep.subr.mxu0 %v1809_v36 }
 0x5bb   : > { %7913 = vmatpush3.msra.mxu0 %v1809_v36  ;;  %v3524_v36 = vld [vmem:[%s11576_s1 + $0x68] sm:$0xff] }
 0x5bc   : > { %v2745_v14 = vpop.xlane.xlu0 %2744  ;;  %7914 = vmatprep.subr.mxu0 %v1808_v31 }
 0x5bd   : > { %8624 = vrcp.f32 %v2745_v14  ;;  %7915 = vmatpush3.msra.mxu0 %v1808_v31  ;;  %v3523_v31 = vld [vmem:[%s11576_s1 + $0x60] sm:$0xff] }
 0x5be   : > { %v8615_v39 = vpop.eup %8614 }
 0x5bf   : > { %v2407_v63 = vmul.f32 %v8615_v39, %v10214_v9  ;;  %v1807_v39 = vld [vmem:[%s11573_s28 + $0x28] sm:$0xff] }
 0x5c0   : > { %v2390_v42 = vpop.xlane.xlu1 %2389  ;;  %7916 = vmatprep.subr.mxu0 %v1807_v39 }
 0x5c1   : > { %8626 = vrcp.f32 %v2390_v42  ;;  %3411 = vst.msk [vmem:[#allocation34 + $0x8] sm:$0xff] %vm2345_vm14, %v2407_v63  ;;  %v1806_v42 = vld [vmem:[%s11573_s28 + $0x20] sm:$0xff]  ;;  %7917 = vmatpush3.msra.mxu0 %v1807_v39  ;;  %v3521_v39 = vld [vmem:[%s11576_s1 + $0x50] sm:$0xff] }
 0x5c2   : > { %v8617_v10 = vpop.eup %8616  ;;  %7918 = vmatprep.subr.mxu0 %v1806_v42 }
 0x5c3   : > { %v8619_v48 = vpop.eup %8618  ;;  %v2759_v54 = vmul.f32 %v8617_v10, %v10218_v15  ;;  %v1805_v10 = vld [vmem:[%s11573_s28 + $0x18] sm:$0xff]  ;;  %7919 = vmatpush3.msra.mxu0 %v1806_v42  ;;  %v3519_v42 = vld [vmem:[%s11576_s1 + $0x40] sm:$0xff] }
 0x5c4   : > { %v2399_v49 = vpop.xlane.xlu0 %2398  ;;  %v2742_v55 = vpop.xlane.xlu1 %2741  ;;  %v2406_v19 = vmul.f32 %v8619_v48, %v10220_v22  ;;  %7920 = vmatprep.subr.mxu0 %v1805_v10 }
 0x5c5   : > { %8628 = vrcp.f32 %v2399_v49  ;;  %3417 = vst.msk [vmem:[#allocation35 + $0x8] sm:$0xff] %vm2345_vm14, %v2759_v54  ;;  %7921 = vmatpush3.msra.mxu0 %v1805_v10  ;;  %v3518_v10 = vld [vmem:[%s11576_s1 + $0x38] sm:$0xff] }
 0x5c6   : > { %8630 = vrcp.f32 %v2742_v55  ;;  %v8621_v56 = vpop.eup %8620  ;;  %7836 = vmatprep.mubr.msk.f32.mxu1 %vm2345_vm14, %v2406_v19  ;;  %3410 = vst.msk [vmem:[#allocation34] sm:$0xff] %vm2345_vm14, %v2406_v19  ;;  %v3425_v55 = vld [vmem:[%s11574_s26 + $0x10] sm:$0x3] }
 0x5c7   : > { %v8623_v9 = vpop.eup %8622  ;;  %7837 = vmatmul.mubr.msk.f32.vlgmr.msra.gmra.mxu1 %vm2345_vm14, %v2407_v63  ;;  %v2409_v12 = vmul.f32 %v8621_v56, %v10228_v62  ;;  %v3424_v56 = vld [vmem:[%s11574_s26 + $0x8] sm:$0xff] }
 0x5c8   : > { %v2748_v44 = vpop.xlane.xlu0 %2747  ;;  %v2396_v57 = vpop.xlane.xlu1 %2395  ;;  %7867 = vmatpush3.msra.mxu1 %v10101_v18  ;;  %v2758_v15 = vmul.f32 %v8623_v9, %v10226_v41 }
 0x5c9   : > { %8632 = vrcp.f32 %v2748_v44  ;;  %7868 = vmatprep.subr.mxu1 %v2773_v51  ;;  %3413 = vst.msk [vmem:[#allocation34 + $0x18] sm:$0xff] %vm2345_vm14, %v2409_v12  ;;  %v3423_v44 = vld [vmem:[%s11574_s26] sm:$0xff] }
 0x5ca   : > { %8634 = vrcp.f32 %v2396_v57  ;;  %v8625_v53 = vpop.eup %8624  ;;  %7869 = vmatpush3.msra.mxu1 %v2773_v51  ;;  %3416 = vst.msk [vmem:[#allocation35] sm:$0xff] %vm2345_vm14, %v2758_v15 }
 0x5cb   : > { %7870 = vmatprep.subr.mxu1 %v2771_v34  ;;  %v2761_v21 = vmul.f32 %v8625_v53, %v10234_v27 }
 0x5cc   : > { %7871 = vmatpush3.msra.mxu1 %v2771_v34  ;;  %v2767_v22 = vpop.permute.xlu1 %2766  ;;  %v2765_v23 = vpop.permute.xlu0 %2764 }
 0x5cd   : > { %7872 = vmatprep.subr.mxu1 %v2769_v59  ;;  %3419 = vst.msk [vmem:[#allocation35 + $0x18] sm:$0xff] %vm2345_vm14, %v2761_v21 }
 0x5ce   : > { %v8627_v25 = vpop.eup %8626  ;;  %7873 = vmatpush3.msra.mxu1 %v2769_v59 }
 0x5cf   : > { %v2408_v18 = vmul.f32 %v8627_v25, %v10238_v32  ;;  %7874 = vmatprep.subr.mxu1 %v2767_v22 }
 0x5d0   : > { %7875 = vmatpush3.msra.mxu1 %v2767_v22 }
 0x5d1   : > { %7839 = vmatprep.mubr.msk.f32.mxu1 %vm2345_vm14, %v2408_v18  ;;  %3412 = vst.msk [vmem:[#allocation34 + $0x10] sm:$0xff] %vm2345_vm14, %v2408_v18  ;;  %7876 = vmatprep.subr.mxu1 %v2765_v23  ;;  %v3422_v18 = vld [vmem:[%s11575_s2] sm:$0x3f] }
 0x5d2   : > { %v8629_v26 = vpop.eup %8628  ;;  %7840 = vmatmul.mubr.msk.f32.gmra.mxu1 %vm2345_vm14, %v2409_v12 }
 0x5d3   : > { %v8631_v20 = vpop.eup %8630  ;;  %7877 = vmatpush3.msra.mxu1 %v2765_v23  ;;  %v2411_v41 = vmul.f32 %v8629_v26, %v10244_v13  ;;  %v1800_v13 = vld [vmem:[%s11572_s10 + $0x38] sm:$0xff]  ;;  %v1804_v23 = vld [vmem:[%s11573_s28 + $0x10] sm:$0xff]  ;;  %v1803_v26 = vld [vmem:[%s11573_s28 + $0x8] sm:$0xff] }
 0x5d4   : > { %v2760_v62 = vmul.f32 %v8631_v20, %v10242_v11  ;;  %7887 = vmatprep.subr.mxu1 %v1800_v13  ;;  %7922 = vmatprep.subr.mxu0 %v1804_v23  ;;  %v1802_v20 = vld [vmem:[%s11573_s28] sm:$0xff]  ;;  %s11579_s28 = sld [smem:[#allocation75_spill]] }
 0x5d5   : > { %3415 = vst.msk [vmem:[#allocation34 + $0x28] sm:$0xff] %vm2345_vm14, %v2411_v41  ;;  %7923 = vmatpush3.msra.mxu0 %v1804_v23 }
 0x5d6   : > { %v8633_v50 = vpop.eup %8632  ;;  %3418 = vst.msk [vmem:[#allocation35 + $0x10] sm:$0xff] %vm2345_vm14, %v2760_v62  ;;  %7924 = vmatprep.subr.mxu0 %v1803_v26 }
 0x5d7   : > { %v8635_v24 = vpop.eup %8634  ;;  %v2762_v27 = vmul.f32 %v8633_v50, %v10252_v43  ;;  %v1796_v43 = vld [vmem:[%s11572_s10 + $0x18] sm:$0xff]  ;;  %7925 = vmatpush3.msra.mxu0 %v1803_v26 }
 0x5d8   : > { %v2410_v45 = vmul.f32 %v8635_v24, %v10246_v30  ;;  %v1799_v30 = vld [vmem:[%s11572_s10 + $0x30] sm:$0xff]  ;;  %7926 = vmatprep.subr.mxu0 %v1802_v20  ;;  %v10349_v50 = vld [vmem:[#allocation16] ss:$0 sm:$0xff]  ;;  %s11578_s10 = sld [smem:[#allocation73_spill]] }
 0x5d9   : > { %3420 = vst.msk [vmem:[#allocation35 + $0x20] sm:$0xff] %vm2345_vm14, %v2762_v27  ;;  %7927 = vmatpush3.msra.mxu0 %v1802_v20 }
 0x5da   : > { %7842 = vmatprep.mubr.msk.f32.mxu1 %vm2345_vm14, %v2410_v45  ;;  %3414 = vst.msk [vmem:[#allocation34 + $0x20] sm:$0xff] %vm2345_vm14, %v2410_v45 }
 0x5db   : > { %7843 = vmatmul.mubr.msk.f32.gmra.mxu1 %vm2345_vm14, %v2411_v41  ;;  %v3542_v41 = vld [vmem:[%s11576_s1 + $0xf8] sm:$0xff] }
 0x5dc   : > { %7878 = vmatprep.mubr.msk.f32.mxu1 %vm2345_vm14, %v2758_v15  ;;  %3555 = vmatprep.subr.mxu0 %v3542_v41 }
 0x5df   : > { %7879 = vmatmul.mubr.msk.f32.vlgmr.msra.gmra.mxu1 %vm2345_vm14, %v2759_v54 }
 0x5e0   : > { %7881 = vmatprep.mubr.msk.f32.mxu1 %vm2345_vm14, %v2760_v62  ;;  %7888 = vmatpush3.msra.mxu1 %v1800_v13  ;;  %v3538_v13 = vld [vmem:[%s11576_s1 + $0xd8] sm:$0xff] }
 0x5e1   : > { %7889 = vmatprep.subr.mxu1 %v1799_v30 }
 0x5e2   : > { %7890 = vmatpush3.msra.mxu1 %v1799_v30  ;;  %v3537_v30 = vld [vmem:[%s11576_s1 + $0xd0] sm:$0xff] }
 0x5e3   : > { %7882 = vmatmul.mubr.msk.f32.gmra.mxu1 %vm2345_vm14, %v2761_v21  ;;  %7891 = vmatprep.subr.mxu1 %v1798_v46 }
 0x5e4   : > { %7884 = vmatprep.mubr.msk.f32.mxu1 %vm2345_vm14, %v2762_v27  ;;  %7892 = vmatpush3.msra.mxu1 %v1798_v46 }
 0x5e5   : > { %7893 = vmatprep.subr.mxu1 %v1797_v17 }
 0x5e6   : > { %7894 = vmatpush3.msra.mxu1 %v1797_v17  ;;  %v3536_v17 = vld [vmem:[%s11576_s1 + $0xc8] sm:$0xff] }
 0x5e7   : > { %7895 = vmatprep.subr.mxu1 %v1796_v43 }
 0x5e8   : > { %7896 = vmatpush3.msra.mxu1 %v1796_v43  ;;  %v3535_v43 = vld [vmem:[%s11576_s1 + $0xc0] sm:$0xff] }
 0x5e9   : > { %7897 = vmatprep.subr.mxu1 %v1795_v40 }
 0x5ea   : > { %7898 = vmatpush3.msra.mxu1 %v1795_v40 }
 0x5eb   : > { %7899 = vmatprep.subr.mxu1 %v1794_v16 }
 0x5ec   : > { %7900 = vmatpush3.msra.mxu1 %v1794_v16  ;;  %v3533_v16 = vld [vmem:[%s11576_s1 + $0xb0] sm:$0xff] }
 0x5ed   : > { %7901 = vmatprep.subr.mxu1 %v1793_v33 }
 0x5ee   : > { %7902 = vmatpush3.msra.mxu1 %v1793_v33  ;;  %v3532_v33 = vld [vmem:[%s11576_s1 + $0xa8] sm:$0xff] }
 0x5ef   : > { %7937 = vmatprep.subr.mxu1 %v9422_v29 }
 0x5fd   : > { %v2751_v32 = vpop.xlane.xlu1 %2750 }
 0x5fe   : > { %8636 = vrcp.f32 %v2751_v32  ;;  %v3541_v32 = vld [vmem:[%s11576_s1 + $0xf0] sm:$0xff] }
 0x60b   : > { %v8637_v38 = vpop.eup %8636 }
 0x60c   : > { %v2763_v11 = vmul.f32 %v8637_v38, %v10263_v52  ;;  %v3540_v38 = vld [vmem:[%s11576_s1 + $0xe8] sm:$0xff] }
 0x60e   : > { %7885 = vmatmul.mubr.msk.f32.gmra.mxu1 %vm2345_vm14, %v2763_v11  ;;  %3421 = vst.msk [vmem:[#allocation35 + $0x28] sm:$0xff] %vm2345_vm14, %v2763_v11  ;;  %vm2931_vm14 = vcmask 523264   ;;  %v3539_v11 = vld [vmem:[%s11576_s1 + $0xe0] sm:$0xff] }
 0x687   : > { %v7838_v47 = vpop.f32.mrf.mxu1 }
 0x689   : > { %v2496_v51 = vpop.f32.mrf.mxu1 }
 0x692   : > { %v7841_v35 = vpop.f32.mrf.mxu1 }
 0x694   : > { %v2506_v52 = vpop.f32.mrf.mxu1 }
 0x69b   : > { %v7844_v58 = vpop.f32.mrf.mxu1 }
 0x69d   : > { %v2516_v59 = vpop.f32.mrf.mxu1 }
 0x69f   : > { %v7880_v34 = vpop.f32.mrf.mxu1 }
 0x6a1   : > { %v2866_v60 = vpop.f32.mrf.mxu1 }
 0x6a2   : > { %2901 = vrot.lane.b32.xlu0 %v2866_v60, %s9425_s14  ;;  %v3527_v60 = vld [vmem:[%s11576_s1 + $0x80] sm:$0xff] }
 0x6a3   : > { %v7883_v37 = vpop.f32.mrf.mxu1 }
 0x6a5   : > { %v2876_v61 = vpop.f32.mrf.mxu1 }
 0x6a6   : > { %2903 = vrot.lane.b32.xlu0 %v7880_v34, %s9425_s14  ;;  %v3528_v34 = vld [vmem:[%s11576_s1 + $0x88] sm:$0xff] }
 0x6aa   : > { %2907 = vrot.lane.b32.xlu0 %v7883_v37, %s9425_s14  ;;  %v3526_v37 = vld [vmem:[%s11576_s1 + $0x78] sm:$0xff] }
 0x6ae   : > { %2905 = vrot.lane.b32.xlu0 %v2876_v61, %s9425_s14  ;;  %v3525_v61 = vld [vmem:[%s11576_s1 + $0x70] sm:$0xff] }
 0x6ce   : > { %v7886_v14 = vpop.f32.mrf.mxu1 }
 0x6d0   : > { %v2886_v63 = vpop.f32.mrf.mxu1 }
 0x6d1   : > { %2909 = vrot.lane.b32.xlu0 %v2886_v63, %s9425_s14  ;;  %v3520_v63 = vld [vmem:[%s11576_s1 + $0x48] sm:$0xff] }
 0x6d5   : > { %2911 = vrot.lane.b32.xlu0 %v7886_v14, %s9425_s14  ;;  %v3522_v14 = vld [vmem:[%s11576_s1 + $0x58] sm:$0xff]  ;;  %s11577_s14 = sld [smem:[#allocation72_spill]] }
 0x6db   : > { %v3659_v23 = vld [vmem:[%s11577_s14 + $0xf8] sm:$0xff]  ;;  %v3658_v20 = vld [vmem:[%s11577_s14 + $0xf0] sm:$0xff] }
 0x6dc   : > { %v3643_v26 = vld [vmem:[%s11577_s14 + $0x78] sm:$0xff]  ;;  %v3642_v41 = vld [vmem:[%s11577_s14 + $0x70] sm:$0xff] }
 0x714   : > { %v2902_v48 = vpop.permute.xlu0 %2901 }
 0x715   : > { %v2919_v54 = vsel %vm1737_vm2, %v2496_v51, %v2902_v48  ;;  %v3517_v48 = vld [vmem:[%s11576_s1 + $0x30] sm:$0xff] }
 0x716   : > { %7903 = vmatprep.mubr.msk.f32.mxu1 %vm2931_vm14, %v2919_v54  ;;  %v3516_v54 = vld [vmem:[%s11576_s1 + $0x28] sm:$0xff] }
 0x718   : > { %v2904_v49 = vpop.permute.xlu0 %2903 }
 0x719   : > { %v2920_v19 = vsel %vm1737_vm2, %v7838_v47, %v2904_v49  ;;  %v3534_v47 = vld [vmem:[%s11576_s1 + $0xb8] sm:$0xff]  ;;  %v3515_v49 = vld [vmem:[%s11576_s1 + $0x20] sm:$0xff] }
 0x71a   : > { %7904 = vmatmul.mubr.msk.f32.vlgmr.msra.gmra.mxu1 %vm2931_vm14, %v2920_v19  ;;  %v3513_v19 = vld [vmem:[%s11576_s1 + $0x10] sm:$0xff] }
 0x71b   : > { %7938 = vmatpush3.msk.msra.mxu1 %vm1502_vm0, %v3425_v55  ;;  %vm9428_vm0 = vmmov 0   ;;  %v3514_v55 = vld [vmem:[%s11576_s1 + $0x18] sm:$0xff] }
 0x71c   : > { %v2908_v9 = vpop.permute.xlu0 %2907  ;;  %7939 = vmatprep.subr.mxu1 %v9422_v29 }
 0x71d   : > { %7940 = vmatpush3.msra.mxu1 %v3424_v56  ;;  %v2922_v15 = vsel %vm1737_vm2, %v7841_v35, %v2908_v9  ;;  %v3512_v56 = vld [vmem:[%s11576_s1 + $0x8] sm:$0xff]  ;;  %v3511_v9 = vld [vmem:[%s11576_s1] sm:$0xff] }
 0x71e   : > { %7941 = vmatprep.subr.mxu1 %v9422_v29 }
 0x71f   : > { %7942 = vmatpush3.msra.mxu1 %v3423_v44 }
 0x720   : > { %v2906_v57 = vpop.permute.xlu0 %2905  ;;  %7510 = vmatprep.subr.mxu1 %v3659_v23 }
 0x721   : > { %v2921_v12 = vsel %vm1737_vm2, %v2506_v52, %v2906_v57  ;;  %v3531_v52 = vld [vmem:[%s11576_s1 + $0xa0] sm:$0xff] }
 0x722   : > { %7906 = vmatprep.mubr.msk.f32.mxu1 %vm2931_vm14, %v2921_v12  ;;  %v7249_v12 = vld [vmem:[#allocation26] ss:$0 sm:$0xff] }
 0x723   : > { %7907 = vmatmul.mubr.msk.f32.gmra.mxu1 %vm2931_vm14, %v2922_v15 }
 0x743   : > { %v2910_v53 = vpop.permute.xlu0 %2909 }
 0x744   : > { %v2923_v21 = vsel %vm1737_vm2, %v2516_v59, %v2910_v53  ;;  %v3529_v59 = vld [vmem:[%s11576_s1 + $0x90] sm:$0xff] }
 0x745   : > { %7909 = vmatprep.mubr.msk.f32.mxu1 %vm2931_vm14, %v2923_v21 }
 0x747   : > { %v2912_v22 = vpop.permute.xlu0 %2911 }
 0x748   : > { %v2924_v25 = vsel %vm1737_vm2, %v7844_v58, %v2912_v22  ;;  %v3530_v58 = vld [vmem:[%s11576_s1 + $0x98] sm:$0xff] }
 0x749   : > { %7910 = vmatmul.mubr.msk.f32.gmra.mxu1 %vm2931_vm14, %v2924_v25 }
 0x74a   : > { %7943 = vmatprep.mubr.msk.f32.mxu1 %vm9428_vm0, %v9422_v29 }
 0x74d   : > { %7944 = vmatmul.mubr.msk.f32.vlgmr.msra.gmra.mxu1 %vm3433_vm7, %v3422_v18 }
 0x74e   : > { %7511 = vmatpush3.msra.mxu1 %v3643_v26  ;;  %v3750_v26 = vld [vmem:[%s11578_s10 + $0x60] sm:$0xff] }
 0x74f   : > { %7512 = vmatprep.subr.mxu1 %v3658_v20  ;;  %v3749_v20 = vld [vmem:[%s11578_s10 + $0x58] sm:$0xff] }
 0x750   : > { %7513 = vmatpush3.msra.mxu1 %v3642_v41  ;;  %v3748_v41 = vld [vmem:[%s11578_s10 + $0x50] sm:$0xff] }
 0x7da   : > { %v7905_v62 = vpop.f32.mrf.mxu1 }
 0x7db   : > { %v3022_v45 = vadd.f32 %v7905_v62, %v10349_v50  ;;  %v3657_v62 = vld [vmem:[%s11577_s14 + $0xe8] sm:$0xff] }
 0x7dc   : > { %v3016_v24 = vpop.f32.mrf.mxu1  ;;  %7514 = vmatprep.subr.mxu1 %v3657_v62  ;;  %v3747_v62 = vld [vmem:[%s11578_s10 + $0x48] sm:$0xff] }
 0x7dd   : > { %v3017_v27 = vadd.f32 %v10349_v50, %v3016_v24  ;;  %v3656_v24 = vld [vmem:[%s11577_s14 + $0xe0] sm:$0xff] }
 0x7df   : > { %7928 = vmatprep.mubr.msk.f32.mxu0 %vm2931_vm14, %v3017_v27  ;;  %v3640_v27 = vld [vmem:[%s11577_s14 + $0x60] sm:$0xff] }
 0x7e0   : > { %7929 = vmatmul.mubr.msk.f32.vlgmr.msra.gmra.mxu0 %vm2931_vm14, %v3022_v45  ;;  %v3655_v45 = vld [vmem:[%s11577_s14 + $0xd8] sm:$0xff] }
 0x7e1   : > { %3556 = vmatpush1.msra.mxu0 %v3541_v32  ;;  %v3639_v32 = vld [vmem:[%s11577_s14 + $0x58] sm:$0xff] }
 0x7e2   : > { %3557 = vmatprep.subr.mxu0 %v3540_v38  ;;  %v3654_v38 = vld [vmem:[%s11577_s14 + $0xd0] sm:$0xff] }
 0x7e3   : > { %v7908_v46 = vpop.f32.mrf.mxu1  ;;  %3558 = vmatpush1.msra.mxu0 %v3539_v11  ;;  %v3638_v11 = vld [vmem:[%s11577_s14 + $0x50] sm:$0xff] }
 0x7e4   : > { %3559 = vmatprep.subr.mxu0 %v3538_v13  ;;  %v3032_v35 = vadd.f32 %v7908_v46, %v10349_v50  ;;  %v3653_v13 = vld [vmem:[%s11577_s14 + $0xc8] sm:$0xff]  ;;  %v3652_v46 = vld [vmem:[%s11577_s14 + $0xc0] sm:$0xff] }
 0x7e5   : > { %v3026_v40 = vpop.f32.mrf.mxu1  ;;  %3560 = vmatpush1.msra.mxu0 %v3537_v30  ;;  %v3637_v30 = vld [vmem:[%s11577_s14 + $0x48] sm:$0xff] }
 0x7e6   : > { %v3027_v51 = vadd.f32 %v10349_v50, %v3026_v40  ;;  %3561 = vmatprep.subr.mxu0 %v3536_v17  ;;  %v3636_v17 = vld [vmem:[%s11577_s14 + $0x40] sm:$0xff]  ;;  %v3635_v40 = vld [vmem:[%s11577_s14 + $0x38] sm:$0xff] }
 0x7e7   : > { %3562 = vmatpush1.msra.mxu0 %v3535_v43  ;;  %v3651_v43 = vld [vmem:[%s11577_s14 + $0xb8] sm:$0xff] }
 0x7e8   : > { %7931 = vmatprep.mubr.msk.f32.mxu0 %vm2931_vm14, %v3027_v51  ;;  %3563 = vmatprep.subr.mxu0 %v3534_v47  ;;  %v3650_v47 = vld [vmem:[%s11577_s14 + $0xb0] sm:$0xff] }
 0x7e9   : > { %7932 = vmatmul.mubr.msk.f32.gmra.mxu0 %vm2931_vm14, %v3032_v35  ;;  %v3634_v51 = vld [vmem:[%s11577_s14 + $0x30] sm:$0xff]  ;;  %v3649_v35 = vld [vmem:[%s11577_s14 + $0xa8] sm:$0xff] }
 0x7ea   : > { %3564 = vmatpush1.msra.mxu0 %v3533_v16  ;;  %v3633_v16 = vld [vmem:[%s11577_s14 + $0x28] sm:$0xff] }
 0x7eb   : > { %3565 = vmatprep.subr.mxu0 %v3532_v33  ;;  %v3648_v33 = vld [vmem:[%s11577_s14 + $0xa0] sm:$0xff] }
 0x7ec   : > { %3566 = vmatpush1.msra.mxu0 %v3531_v52  ;;  %v3632_v52 = vld [vmem:[%s11577_s14 + $0x20] sm:$0xff] }
 0x7ed   : > { %3567 = vmatprep.subr.mxu0 %v3530_v58  ;;  %v3647_v58 = vld [vmem:[%s11577_s14 + $0x98] sm:$0xff] }
 0x7ee   : > { %3568 = vmatpush1.msra.mxu0 %v3529_v59  ;;  %v3631_v59 = vld [vmem:[%s11577_s14 + $0x18] sm:$0xff] }
 0x7ef   : > { %3569 = vmatprep.subr.mxu0 %v3528_v34  ;;  %v3646_v34 = vld [vmem:[%s11577_s14 + $0x90] sm:$0xff] }
 0x7f0   : > { %3570 = vmatpush1.msra.mxu0 %v3527_v60  ;;  %v3630_v60 = vld [vmem:[%s11577_s14 + $0x10] sm:$0xff] }
 0x7f1   : > { %3571 = vmatprep.subr.mxu0 %v3526_v37  ;;  %v3645_v37 = vld [vmem:[%s11577_s14 + $0x88] sm:$0xff] }
 0x7f2   : > { %3572 = vmatpush1.msra.mxu0 %v3525_v61  ;;  %v3629_v61 = vld [vmem:[%s11577_s14 + $0x8] sm:$0xff] }
 0x7f3   : > { %3573 = vmatprep.subr.mxu0 %v3524_v36  ;;  %v3644_v36 = vld [vmem:[%s11577_s14 + $0x80] sm:$0xff] }
 0x7f4   : > { %3574 = vmatpush1.msra.mxu0 %v3523_v31  ;;  %v3628_v31 = vld [vmem:[%s11577_s14] sm:$0xff] }
 0x7f5   : > { %3575 = vmatprep.subr.mxu0 %v3522_v14  ;;  %v7242_v14 = vld [vmem:[#allocation17] ss:$0 sm:$0xff] }
 0x7f6   : > { %3576 = vmatpush1.msra.mxu0 %v3521_v39 }
 0x7f7   : > { %3577 = vmatprep.subr.mxu0 %v3520_v63 }
 0x7f8   : > { %3578 = vmatpush1.msra.mxu0 %v3519_v42 }
 0x7f9   : > { %3579 = vmatprep.subr.mxu0 %v3518_v10 }
 0x7fa   : > { %3580 = vmatpush1.msra.mxu0 %v3517_v48 }
 0x7fb   : > { %3581 = vmatprep.subr.mxu0 %v3516_v54 }
 0x7fc   : > { %3582 = vmatpush1.msra.mxu0 %v3515_v49 }
 0x7fd   : > { %3583 = vmatprep.subr.mxu0 %v3514_v55 }
 0x7fe   : > { %3584 = vmatpush1.msra.mxu0 %v3513_v19  ;;  %v3543_v19 = vld [vmem:[#allocation28] sm:$0x3] }
 0x7ff   : > { %3585 = vmatprep.subr.mxu0 %v3512_v56 }
 0x800   : > { %3586 = vmatpush1.msra.mxu0 %v3511_v9 }
 0x801   : > { %7946 = vmatprep.subr.mxu0 %v9422_v29 }
 0x809   : > { %v7911_v44 = vpop.f32.mrf.mxu1 }
 0x80a   : > { %v3042_v53 = vadd.f32 %v7911_v44, %v10349_v50  ;;  %v3548_v44 = vrot.slane %v3543_v19, %v9929_v8 }
 0x80b   : > { %v3036_v57 = vpop.f32.mrf.mxu1 }
 0x80c   : > { %v3037_v15 = vadd.f32 %v10349_v50, %v3036_v57  ;;  %v3641_v50 = vld [vmem:[%s11577_s14 + $0x68] sm:$0xff]  ;;  %v3753_v57 = vld [vmem:[%s11578_s10 + $0x78] sm:$0xff] }
 0x80d   : > { %v3506_v21 = vpop.f32.mrf.mxu1  ;;  %7515 = vmatpush3.msra.mxu1 %v3641_v50 }
 0x80e   : > { %v3507_v22 = vadd.f32 %v7249_v12, %v3506_v21  ;;  %7934 = vmatprep.mubr.msk.f32.mxu0 %vm2931_vm14, %v3037_v15  ;;  %7516 = vmatprep.subr.mxu1 %v3656_v24  ;;  %v3752_v12 = vld [vmem:[%s11578_s10 + $0x70] sm:$0xff]  ;;  %v3746_v24 = vld [vmem:[%s11578_s10 + $0x40] sm:$0xff] }
 0x80f   : > { %7935 = vmatmul.mubr.msk.f32.gmra.mxu0 %vm2931_vm14, %v3042_v53  ;;  %v7945_v25 = vpop.f32.mrf.mxu1  ;;  %7517 = vmatpush3.msra.mxu1 %v3640_v27  ;;  %v3552_v53 = vrot.slane %v3543_v19, %v1825_v28 }
 0x810   : > { %v3510_v18 = vmax.f32 %v3507_v22, 0.0  ;;  %3619 = vmatprep.mubr.f32.mxu0 %v9422_v29  ;;  %7518 = vmatprep.subr.mxu1 %v3655_v45  ;;  %v3751_v22 = vld [vmem:[%s11578_s10 + $0x68] sm:$0xff] }
 0x811   : > { %7519 = vmatpush3.msra.mxu1 %v3639_v32  ;;  %v3745_v32 = vld [vmem:[%s11578_s10 + $0x38] sm:$0xff] }
 0x812   : > { %7520 = vmatprep.subr.mxu1 %v3654_v38 }
 0x813   : > { %3620 = vmatmul.mubr.f32.vlgmr.msra.gmra.mxu0 %v3510_v18  ;;  %7521 = vmatpush3.msra.mxu1 %v3638_v11  ;;  %v3744_v11 = vld [vmem:[%s11578_s10 + $0x30] sm:$0xff] }
 0x814   : > { %7978 = vmatprep.mubr.msk.f32.mxu0 %vm9428_vm0, %v9422_v29  ;;  %7522 = vmatprep.subr.mxu1 %v3653_v13  ;;  %v3743_v13 = vld [vmem:[%s11578_s10 + $0x28] sm:$0xff] }
 0x815   : > { %7523 = vmatpush3.msra.mxu1 %v3637_v30  ;;  %7947 = vmatpush3.msra.mxu0 %v3753_v57  ;;  %v3742_v30 = vld [vmem:[%s11578_s10 + $0x20] sm:$0xff] }
 0x816   : > { %7524 = vmatprep.subr.mxu1 %v3652_v46  ;;  %7948 = vmatprep.subr.mxu0 %v9422_v29 }
 0x817   : > { %7525 = vmatpush3.msra.mxu1 %v3636_v17  ;;  %7949 = vmatpush3.msra.mxu0 %v3752_v12 }
 0x818   : > { %7526 = vmatprep.subr.mxu1 %v3651_v43  ;;  %7950 = vmatprep.subr.mxu0 %v9422_v29  ;;  %v3741_v43 = vld [vmem:[%s11578_s10 + $0x18] sm:$0xff] }
 0x819   : > { %7527 = vmatpush3.msra.mxu1 %v3635_v40  ;;  %7951 = vmatpush3.msra.mxu0 %v3751_v22  ;;  %v3740_v40 = vld [vmem:[%s11578_s10 + $0x10] sm:$0xff] }
 0x81a   : > { %7528 = vmatprep.subr.mxu1 %v3650_v47  ;;  %7952 = vmatprep.subr.mxu0 %v9422_v29 }
 0x81b   : > { %7529 = vmatpush3.msra.mxu1 %v3634_v51  ;;  %7953 = vmatpush3.msra.mxu0 %v3750_v26  ;;  %v3739_v51 = vld [vmem:[%s11578_s10 + $0x8] sm:$0xff] }
 0x81c   : > { %7530 = vmatprep.subr.mxu1 %v3649_v35  ;;  %7954 = vmatprep.subr.mxu0 %v9422_v29 }
 0x81d   : > { %7531 = vmatpush3.msra.mxu1 %v3633_v16  ;;  %7955 = vmatpush3.msra.mxu0 %v3749_v20  ;;  %v3738_v16 = vld [vmem:[%s11578_s10] sm:$0xff] }
 0x81e   : > { %7532 = vmatprep.subr.mxu1 %v3648_v33  ;;  %7956 = vmatprep.subr.mxu0 %v9422_v29 }
 0x81f   : > { %7533 = vmatpush3.msra.mxu1 %v3632_v52  ;;  %7957 = vmatpush3.msra.mxu0 %v3748_v41 }
 0x820   : > { %7534 = vmatprep.subr.mxu1 %v3647_v58  ;;  %7958 = vmatprep.subr.mxu0 %v9422_v29 }
 0x821   : > { %7535 = vmatpush3.msra.mxu1 %v3631_v59  ;;  %7959 = vmatpush3.msra.mxu0 %v3747_v62 }
 0x822   : > { %7536 = vmatprep.subr.mxu1 %v3646_v34  ;;  %7960 = vmatprep.subr.mxu0 %v9422_v29 }
 0x823   : > { %7537 = vmatpush3.msra.mxu1 %v3630_v60  ;;  %7961 = vmatpush3.msra.mxu0 %v3746_v24 }
 0x824   : > { %7538 = vmatprep.subr.mxu1 %v3645_v37  ;;  %7962 = vmatprep.subr.mxu0 %v9422_v29 }
 0x825   : > { %7539 = vmatpush3.msra.mxu1 %v3629_v61  ;;  %7963 = vmatpush3.msra.mxu0 %v3745_v32 }
 0x826   : > { %7540 = vmatprep.subr.mxu1 %v3644_v36  ;;  %7964 = vmatprep.subr.mxu0 %v9422_v29 }
 0x827   : > { %7541 = vmatpush3.msra.mxu1 %v3628_v31  ;;  %7965 = vmatpush3.msra.mxu0 %v3744_v11 }
 0x828   : > { %7981 = vmatprep.subr.mxu1 %v9422_v29  ;;  %7966 = vmatprep.subr.mxu0 %v9422_v29 }
 0x829   : > { %7967 = vmatpush3.msra.mxu0 %v3743_v13 }
 0x82a   : > { %7968 = vmatprep.subr.mxu0 %v9422_v29 }
 0x82b   : > { %7969 = vmatpush3.msra.mxu0 %v3742_v30 }
 0x82c   : > { %7970 = vmatprep.subr.mxu0 %v9422_v29 }
 0x82d   : > { %7971 = vmatpush3.msra.mxu0 %v3741_v43 }
 0x82e   : > { %7972 = vmatprep.subr.mxu0 %v9422_v29 }
 0x82f   : > { %7973 = vmatpush3.msra.mxu0 %v3740_v40 }
 0x830   : > { %7974 = vmatprep.subr.mxu0 %v9422_v29 }
 0x831   : > { %7975 = vmatpush3.msra.mxu0 %v3739_v51  ;;  %v3837_v51 = vld [vmem:[%s11579_s28 + $0x30] sm:$0xff] }
 0x832   : > { %7976 = vmatprep.subr.mxu0 %v9422_v29 }
 0x833   : > { %7977 = vmatpush3.msra.mxu0 %v3738_v16 }
 0x8a0   : > { %v7930_v39 = vpop.f32.mrf.mxu0 }
 0x8a1   : > { %v10431_v63 = vadd.f32 %v7930_v39, %v7242_v14 }
 0x8a2   : > { %v3135_v42 = vpop.f32.mrf.mxu0 }
 0x8a3   : > { %v10433_v10 = vadd.f32 %v7242_v14, %v3135_v42  ;;  %3172 = vrot.lane.b32.xlu1 %v10431_v63, %s9426_s0 }
 0x8a5   : > { %3170 = vrot.lane.b32.xlu0 %v10433_v10, %s9426_s0 }
 0x8a9   : > { %v7933_v48 = vpop.f32.mrf.mxu0 }
 0x8aa   : > { %v10439_v54 = vadd.f32 %v7933_v48, %v7242_v14 }
 0x8ab   : > { %v3145_v49 = vpop.f32.mrf.mxu0 }
 0x8ac   : > { %3176 = vrot.lane.b32.xlu0 %v10439_v54, %s9426_s0  ;;  %v10443_v55 = vadd.f32 %v7242_v14, %v3145_v49 }
 0x8b0   : > { %3174 = vrot.lane.b32.xlu0 %v10443_v55, %s9426_s0 }
 0x8cf   : > { %v7936_v56 = vpop.f32.mrf.mxu0 }
 0x8d0   : > { %v10459_v18 = vadd.f32 %v7936_v56, %v7242_v14 }
 0x8d1   : > { %v3155_v9 = vpop.f32.mrf.mxu0 }
 0x8d2   : > { %v10450_v15 = vadd.f32 %v7242_v14, %v3155_v9 }
 0x8d3   : > { %v3621_v21 = vpop.f32.mrf.mxu0 }
 0x8d4   : > { %3178 = vrot.lane.b32.xlu0 %v10450_v15, %s9426_s0  ;;  %v3622_v25 = vadd.f32 %v3621_v21, %v3548_v44  ;;  %v7252_v44 = vld [vmem:[#allocation29] ss:$0 sm:$0xff] }
 0x8d5   : > { %v3623_v8 = vpop.f32.mrf.mxu0 }
 0x8d6   : > { %v3624_v7 = vadd.f32 %v3623_v8, %v3552_v53  ;;  %v3626_v23 = vmax.f32 %v3622_v25, 0.0 }
 0x8d8   : > { %v3627_v28 = vmax.f32 %v3624_v7, 0.0  ;;  %3180 = vrot.lane.b32.xlu0 %v10459_v18, %s9426_s0 }
 0x8da   : > { %3731 = vmatprep.mubr.f32.mxu1 %v3627_v28 }
 0x8db   : > { %3732 = vmatmul.mubr.f32.vlgmr.msra.gmra.mxu1 %v3626_v23 }
 0x8dc   : > { %7997 = vmatprep.mubr.msk.f32.mxu1 %vm9428_vm0, %v9422_v29 }
 0x915   : > { %v3173_v50 = vpop.permute.xlu1 %3172 }
 0x916   : > { %v10476_v27 = vmax.f32 %v10431_v63, %v3173_v50 }
 0x917   : > { %v3171_v45 = vpop.permute.xlu0 %3170 }
 0x918   : > { %v10481_v38 = vmax.f32 %v10433_v10, %v3171_v45  ;;  %3220 = vrot.lane.b32.xlu0 %v10476_v27, %s9426_s0  ;;  %v3195_v50 = vsub.f32 %v10431_v63, %v10476_v27 }
 0x91a   : > { %3218 = vrot.lane.b32.xlu1 %v10481_v38, %s9426_s0  ;;  %v3194_v62 = vsub.f32 %v10433_v10, %v10481_v38  ;;  %v3202_v11 = vmul.f32 1.442695, %v3195_v50 }
 0x91c   : > { %v3200_v24 = vmul.f32 1.442695, %v3194_v62 }
 0x91e   : > { %v3177_v46 = vpop.permute.xlu0 %3176 }
 0x91f   : > { %v10494_v17 = vmax.f32 %v10439_v54, %v3177_v46 }
 0x921   : > { %3224 = vrot.lane.b32.xlu0 %v10494_v17, %s9426_s0  ;;  %v3197_v13 = vsub.f32 %v10439_v54, %v10494_v17  ;;  %v3838_v17 = vld [vmem:[%s11579_s28 + $0x38] sm:$0xff] }
 0x922   : > { %v3175_v47 = vpop.permute.xlu0 %3174  ;;  %7982 = vmatpush3.msra.mxu1 %v3838_v17 }
 0x923   : > { %v3190_v35 = vmax.f32 %v10443_v55, %v3175_v47  ;;  %v3206_v27 = vmul.f32 1.442695, %v3197_v13  ;;  %7983 = vmatprep.subr.mxu1 %v9422_v29 }
 0x924   : > { %7984 = vmatpush3.msra.mxu1 %v3837_v51 }
 0x925   : > { %3222 = vrot.lane.b32.xlu1 %v3190_v35, %s9426_s0  ;;  %v3196_v45 = vsub.f32 %v10443_v55, %v3190_v35  ;;  %v3836_v35 = vld [vmem:[%s11579_s28 + $0x28] sm:$0xff]  ;;  %7985 = vmatprep.subr.mxu1 %v9422_v29 }
 0x926   : > { %7986 = vmatpush3.msra.mxu1 %v3836_v35 }
 0x927   : > { %v3204_v30 = vmul.f32 1.442695, %v3196_v45  ;;  %7987 = vmatprep.subr.mxu1 %v9422_v29 }
 0x946   : > { %v3179_v33 = vpop.permute.xlu0 %3178 }
 0x947   : > { %v3192_v52 = vmax.f32 %v10450_v15, %v3179_v33  ;;  %v3835_v33 = vld [vmem:[%s11579_s28 + $0x20] sm:$0xff] }
 0x948   : > { %7988 = vmatpush3.msra.mxu1 %v3835_v33 }
 0x949   : > { %3226 = vrot.lane.b32.xlu1 %v3192_v52, %s9426_s0  ;;  %v3198_v46 = vsub.f32 %v10450_v15, %v3192_v52  ;;  %7989 = vmatprep.subr.mxu1 %v9422_v29 }
 0x94a   : > { %v3181_v58 = vpop.permute.xlu0 %3180 }
 0x94b   : > { %v10511_v59 = vmax.f32 %v10459_v18, %v3181_v58  ;;  %v3208_v38 = vmul.f32 1.442695, %v3198_v46  ;;  %v3834_v58 = vld [vmem:[%s11579_s28 + $0x18] sm:$0xff] }
 0x94c   : > { %7990 = vmatpush3.msra.mxu1 %v3834_v58 }
 0x94d   : > { %3228 = vrot.lane.b32.xlu0 %v10511_v59, %s9426_s0  ;;  %v3199_v40 = vsub.f32 %v10459_v18, %v10511_v59  ;;  %7991 = vmatprep.subr.mxu1 %v9422_v29 }
 0x94f   : > { %v3210_v47 = vmul.f32 1.442695, %v3199_v40 }
 0x98a   : > { %v3221_v34 = vpop.permute.xlu0 %3220 }
 0x98b   : > { %v3237_v60 = vsub.f32 %v10431_v63, %v3221_v34  ;;  %v3833_v34 = vld [vmem:[%s11579_s28 + $0x10] sm:$0xff] }
 0x98c   : > { %v3219_v37 = vpop.permute.xlu1 %3218  ;;  %7992 = vmatpush3.msra.mxu1 %v3833_v34 }
 0x98d   : > { %v3244_v61 = vmul.f32 1.442695, %v3237_v60  ;;  %v3236_v36 = vsub.f32 %v10433_v10, %v3219_v37  ;;  %7993 = vmatprep.subr.mxu1 %v9422_v29 }
 0x98f   : > { %8638 = vpow2.f32 %v3244_v61  ;;  %v3242_v31 = vmul.f32 1.442695, %v3236_v36  ;;  %v3832_v61 = vld [vmem:[%s11579_s28 + $0x8] sm:$0xff]  ;;  %v3831_v36 = vld [vmem:[%s11579_s28] sm:$0xff] }
 0x990   : > { %7994 = vmatpush3.msra.mxu1 %v3832_v61 }
 0x991   : > { %8640 = vpow2.f32 %v3242_v31  ;;  %7995 = vmatprep.subr.mxu1 %v9422_v29 }
 0x992   : > { %7996 = vmatpush3.msra.mxu1 %v3831_v36 }
 0x993   : > { %v3225_v14 = vpop.permute.xlu0 %3224 }
 0x994   : > { %v3239_v39 = vsub.f32 %v10439_v54, %v3225_v14 }
 0x996   : > { %v3248_v42 = vmul.f32 1.442695, %v3239_v39 }
 0x997   : > { %v3223_v48 = vpop.permute.xlu1 %3222 }
 0x998   : > { %8642 = vpow2.f32 %v3248_v42  ;;  %v3238_v49 = vsub.f32 %v10443_v55, %v3223_v48 }
 0x99a   : > { %v3246_v19 = vmul.f32 1.442695, %v3238_v49 }
 0x99b   : > { %v7542_v56 = vpop.f32.mrf.mxu1 }
 0x99c   : > { %v8639_v9 = vpop.eup %8638  ;;  %8644 = vpow2.f32 %v3246_v19 }
 0x99d   : > { %3346 = vrot.lane.b32.xlu0 %v8639_v9, %s9426_s0  ;;  %v7543_v57 = vpop.f32.mrf.mxu1 }
 0x99e   : > { %v8641_v12 = vpop.eup %8640  ;;  %v7544_v53 = vadd.f32 %v7543_v57, %v7542_v56 }
 0x99f   : > { %3344 = vrot.lane.b32.xlu1 %v8641_v12, %s9426_s0 }
 0x9a0   : > { %v3734_v21 = vadd.f32 %v7544_v53, %v7252_v44 }
 0x9a2   : > { %v3737_v22 = vmax.f32 %v3734_v21, 0.0 }
 0x9a4   : > { %7979 = vmatmul.mubr.f32.vlgmr.msra.gmra.mxu0 %v3737_v22 }
 0x9a5   : > { %v8643_v25 = vpop.eup %8642 }
 0x9a6   : > { %3350 = vrot.lane.b32.xlu0 %v8643_v25, %s9426_s0 }
 0x9a9   : > { %v8645_v8 = vpop.eup %8644 }
 0x9aa   : > { %3348 = vrot.lane.b32.xlu1 %v8645_v8, %s9426_s0 }
 0x9bb   : > { %v3227_v7 = vpop.permute.xlu1 %3226 }
 0x9bc   : > { %v3240_v28 = vsub.f32 %v10450_v15, %v3227_v7 }
 0x9be   : > { %v3250_v23 = vmul.f32 1.442695, %v3240_v28 }
 0x9bf   : > { %v3229_v26 = vpop.permute.xlu0 %3228 }
 0x9c0   : > { %8646 = vpow2.f32 %v3250_v23  ;;  %v3241_v20 = vsub.f32 %v10459_v18, %v3229_v26 }
 0x9c2   : > { %v3252_v41 = vmul.f32 1.442695, %v3241_v20 }
 0x9c4   : > { %8648 = vpow2.f32 %v3252_v41 }
 0x9c5   : > { %8650 = vpow2.f32 %v3200_v24 }
 0x9c6   : > { %8652 = vpow2.f32 %v3202_v11 }
 0x9c7   : > { %8654 = vpow2.f32 %v3204_v30  ;;  %v7253_v30 = vld [vmem:[#allocation31] ss:$0 sm:$0xff] }
 0x9c8   : > { %8656 = vpow2.f32 %v3206_v27 }
 0x9c9   : > { %8658 = vpow2.f32 %v3208_v38 }
 0x9ca   : > { %8660 = vpow2.f32 %v3210_v47 }
 0x9cd   : > { %v8647_v32 = vpop.eup %8646 }
 0x9ce   : > { %3352 = vrot.lane.b32.xlu1 %v8647_v32, %s9426_s0 }
 0x9d1   : > { %v8649_v43 = vpop.eup %8648 }
 0x9d2   : > { %3290 = vrot.lane.b32.xlu1 %v8641_v12, %s9424_s23  ;;  %3354 = vrot.lane.b32.xlu0 %v8649_v43, %s9426_s0  ;;  %v8651_v16 = vpop.eup %8650 }
 0x9d3   : > { %v8653_v52 = vpop.eup %8652 }
 0x9d4   : > { %v8655_v59 = vpop.eup %8654 }
 0x9d5   : > { %v8657_v60 = vpop.eup %8656 }
 0x9d6   : > { %3294 = vrot.lane.b32.xlu1 %v8645_v8, %s9424_s23  ;;  %3292 = vrot.lane.b32.xlu0 %v8639_v9, %s9424_s23  ;;  %v8659_v37 = vpop.eup %8658 }
 0x9d7   : > { %v8661_v31 = vpop.eup %8660 }
 0x9da   : > { %3298 = vrot.lane.b32.xlu1 %v8647_v32, %s9424_s23  ;;  %3296 = vrot.lane.b32.xlu0 %v8643_v25, %s9424_s23 }
 0x9de   : > { %3260 = vrot.lane.b32.xlu1 %v8651_v16, %s9424_s23  ;;  %3300 = vrot.lane.b32.xlu0 %v8649_v43, %s9424_s23 }
 0x9e2   : > { %3264 = vrot.lane.b32.xlu1 %v8655_v59, %s9424_s23  ;;  %3262 = vrot.lane.b32.xlu0 %v8653_v52, %s9424_s23 }
 0x9e6   : > { %3268 = vrot.lane.b32.xlu1 %v8659_v37, %s9424_s23  ;;  %3266 = vrot.lane.b32.xlu0 %v8657_v60, %s9424_s23 }
 0x9ea   : > { %3270 = vrot.lane.b32.xlu0 %v8661_v31, %s9424_s23 }
 0xa0f   : > { %v3347_v39 = vpop.permute.xlu0 %3346 }
 0xa10   : > { %v3363_v56 = vadd.f32 %v8653_v52, %v3347_v39 }
 0xa11   : > { %v3345_v14 = vpop.permute.xlu1 %3344 }
 0xa12   : > { %v3362_v19 = vadd.f32 %v8651_v16, %v3345_v14 }
 0xa14   : > { %8662 = vrcp.f32 %v3362_v19 }
 0xa15   : > { %8664 = vrcp.f32 %v3363_v56 }
 0xa18   : > { %v3351_v48 = vpop.permute.xlu0 %3350 }
 0xa19   : > { %v3365_v29 = vadd.f32 %v8657_v60, %v3351_v48 }
 0xa1c   : > { %v3349_v42 = vpop.permute.xlu1 %3348 }
 0xa1d   : > { %v3364_v57 = vadd.f32 %v8655_v59, %v3349_v42 }
 0xa1f   : > { %8666 = vrcp.f32 %v3364_v57 }
 0xa20   : > { %8668 = vrcp.f32 %v3365_v29 }
 0xa21   : > { %v8663_v50 = vpop.eup %8662 }
 0xa22   : > { %v8665_v24 = vpop.eup %8664 }
 0xa2c   : > { %v8667_v45 = vpop.eup %8666 }
 0xa2d   : > { %v8669_v32 = vpop.eup %8668 }
 0xa40   : > { %v3353_v49 = vpop.permute.xlu1 %3352 }
 0xa41   : > { %v3366_v22 = vadd.f32 %v8659_v37, %v3353_v49 }
 0xa43   : > { %8670 = vrcp.f32 %v3366_v22  ;;  %v7254_v22 = vld [vmem:[#allocation32] ss:$0 sm:$0xff] }
 0xa44   : > { %v3291_v9 = vpop.permute.xlu1 %3290  ;;  %v3355_v44 = vpop.permute.xlu0 %3354 }
 0xa45   : > { %v3308_v12 = vmul.f32 %v3291_v9, %v10433_v10  ;;  %v3367_v23 = vadd.f32 %v8661_v31, %v3355_v44 }
 0xa47   : > { %3320 = vrot.lane.b32.xlu1 %v3308_v12, %s9426_s0  ;;  %8672 = vrcp.f32 %v3367_v23 }
 0xa48   : > { %v3295_v53 = vpop.permute.xlu1 %3294  ;;  %v3293_v21 = vpop.permute.xlu0 %3292 }
 0xa49   : > { %v3310_v25 = vmul.f32 %v3295_v53, %v10443_v55  ;;  %v3309_v8 = vmul.f32 %v3293_v21, %v10431_v63 }
 0xa4b   : > { %3324 = vrot.lane.b32.xlu1 %v3310_v25, %s9426_s0  ;;  %3322 = vrot.lane.b32.xlu0 %v3309_v8, %s9426_s0 }
 0xa4c   : > { %v3299_v7 = vpop.permute.xlu1 %3298  ;;  %v3297_v28 = vpop.permute.xlu0 %3296 }
 0xa4d   : > { %v3312_v26 = vmul.f32 %v3299_v7, %v10450_v15  ;;  %v3311_v20 = vmul.f32 %v3297_v28, %v10439_v54 }
 0xa4f   : > { %3328 = vrot.lane.b32.xlu1 %v3312_v26, %s9426_s0  ;;  %3326 = vrot.lane.b32.xlu0 %v3311_v20, %s9426_s0 }
 0xa50   : > { %v3301_v41 = vpop.permute.xlu0 %3300  ;;  %v8671_v11 = vpop.eup %8670 }
 0xa51   : > { %v3313_v62 = vmul.f32 %v3301_v41, %v10459_v18  ;;  %v3261_v38 = vpop.permute.xlu1 %3260 }
 0xa52   : > { %v3278_v34 = vmul.f32 %v3261_v38, %v10433_v10 }
 0xa53   : > { %3380 = vrot.lane.b32.xlu1 %v8663_v50, %s9424_s23  ;;  %3330 = vrot.lane.b32.xlu0 %v3313_v62, %s9426_s0 }
 0xa54   : > { %v8673_v13 = vpop.eup %8672  ;;  %v3263_v40 = vpop.permute.xlu0 %3262 }
 0xa55   : > { %v3265_v17 = vpop.permute.xlu1 %3264  ;;  %v3279_v31 = vmul.f32 %v3263_v40, %v10431_v63 }
 0xa56   : > { %v3280_v36 = vmul.f32 %v3265_v17, %v10443_v55 }
 0xa57   : > { %3384 = vrot.lane.b32.xlu1 %v8667_v45, %s9424_s23  ;;  %3382 = vrot.lane.b32.xlu0 %v8665_v24, %s9424_s23 }
 0xa58   : > { %v3267_v47 = vpop.permute.xlu0 %3266 }
 0xa59   : > { %v3269_v51 = vpop.permute.xlu1 %3268  ;;  %v3281_v56 = vmul.f32 %v3267_v47, %v10439_v54 }
 0xa5a   : > { %v3282_v19 = vmul.f32 %v3269_v51, %v10450_v15 }
 0xa5b   : > { %3388 = vrot.lane.b32.xlu1 %v8671_v11, %s9424_s23  ;;  %3386 = vrot.lane.b32.xlu0 %v8669_v32, %s9424_s23 }
 0xa5c   : > { %v3271_v35 = vpop.permute.xlu0 %3270 }
 0xa5d   : > { %v3283_v12 = vmul.f32 %v3271_v35, %v10459_v18 }
 0xa5f   : > { %3390 = vrot.lane.b32.xlu0 %v8673_v13, %s9424_s23 }
 0xa64   : > { %v3827_v46 = vpop.f32.mrf.mxu0 }
 0xa65   : > { %v3828_v43 = vadd.f32 %v7253_v30, %v3827_v46 }
 0xa66   : > { %v7980_v27 = vpop.f32.mrf.mxu0 }
 0xa67   : > { %7998 = vmatmul.mubr.msk.f32.vlgmr.msra.gmra.mxu1 %vm2931_vm14, %v3828_v43 }
 0xab9   : > { %v3321_v16 = vpop.permute.xlu1 %3320 }
 0xaba   : > { %v3338_v60 = vadd.f32 %v3321_v16, %v3278_v34 }
 0xabd   : > { %v3325_v33 = vpop.permute.xlu1 %3324  ;;  %v3323_v52 = vpop.permute.xlu0 %3322 }
 0xabe   : > { %v3340_v39 = vadd.f32 %v3325_v33, %v3280_v36  ;;  %v3339_v42 = vadd.f32 %v3323_v52, %v3279_v31 }
 0xac1   : > { %v3329_v58 = vpop.permute.xlu1 %3328  ;;  %v3327_v59 = vpop.permute.xlu0 %3326 }
 0xac2   : > { %v3342_v44 = vadd.f32 %v3329_v58, %v3282_v19  ;;  %v3341_v57 = vadd.f32 %v3327_v59, %v3281_v56 }
 0xac5   : > { %v3381_v37 = vpop.permute.xlu1 %3380  ;;  %v3331_v61 = vpop.permute.xlu0 %3330 }
 0xac6   : > { %v3398_v14 = vmul.f32 %v3381_v37, %v3338_v60  ;;  %v3343_v21 = vadd.f32 %v3331_v61, %v3283_v12 }
 0xac8   : > { %3404 = vst.msk [vmem:[#allocation3] sm:$0xff] %vm1737_vm2, %v3398_v14 }
 0xac9   : > { %v3385_v48 = vpop.permute.xlu1 %3384  ;;  %v3383_v49 = vpop.permute.xlu0 %3382 }
 0xaca   : > { %v3400_v9 = vmul.f32 %v3385_v48, %v3340_v39  ;;  %v3399_v10 = vmul.f32 %v3383_v49, %v3339_v42 }
 0xacc   : > { %3406 = vst.msk [vmem:[#allocation3 + $0x10] sm:$0xff] %vm1737_vm2, %v3400_v9  ;;  %3405 = vst.msk [vmem:[#allocation3 + $0x8] sm:$0xff] %vm1737_vm2, %v3399_v10 }
 0xacd   : > { %v3389_v63 = vpop.permute.xlu1 %3388  ;;  %v3387_v55 = vpop.permute.xlu0 %3386 }
 0xace   : > { %v3402_v29 = vmul.f32 %v3389_v63, %v3342_v44  ;;  %v3401_v53 = vmul.f32 %v3387_v55, %v3341_v57 }
 0xad0   : > { %3408 = vst.msk [vmem:[#allocation3 + $0x20] sm:$0xff] %vm1737_vm2, %v3402_v29  ;;  %3407 = vst.msk [vmem:[#allocation3 + $0x18] sm:$0xff] %vm1737_vm2, %v3401_v53 }
 0xad1   : > { %v3391_v54 = vpop.permute.xlu0 %3390 }
 0xad2   : > { %v3403_v15 = vmul.f32 %v3391_v54, %v3343_v21 }
 0xad4   : > { %3409 = vst.msk [vmem:[#allocation3 + $0x28] sm:$0xff] %vm1737_vm2, %v3403_v15 }
 0xb27   : > { %v3915_v25 = vpop.f32.mrf.mxu1 }
 0xb28   : > { %v3916_v8 = vadd.f32 %v7254_v22, %v3915_v25 }
 0xb29   : > { %v7999_v7 = vpop.f32.mrf.mxu1 }
 0xb2a   : > { %3920 = vst.msk [vmem:[%s9650_s29] sm:$0x3f] %vm3919_vm8, %v3916_v8 }
 0xb2b PF: > { %s11580_s23 = sld [smem:[#allocation59_spill]]  ;;  %v10597_v18 = vstv %s9668_s18  ;;  %v9429_v23 = vmov 0   ;;  %v9430_v50 = vmov 0.0   ;;  %v4023_v38 = vld [vmem:[#allocation3] sm:$0xff]  ;;  %v4029_v40 = vld [vmem:[#allocation4] sm:$0xff]  ;;  %vm4116_vm15 = vcmask 261120  }
 0xb2c   : > { %8675 = vset.pattern.permute.xlu1 %v9429_v23  ;;  %8674 = vset.pattern.permute.xlu0 %v9429_v23  ;;  %vm4019_vm2 = vcmp.eq.s32.totalorder %v9844_v2, %v10597_v18  ;;  %vm4017_vm9 = vcmp.eq.s32.totalorder %v9838_v0, %v10597_v18  ;;  %vm4020_vm10 = vcmp.eq.s32.totalorder %v9847_v3, %v10597_v18  ;;  %v4024_v51 = vld [vmem:[#allocation3 + $0x8] sm:$0xff]  ;;  %v4030_v35 = vld [vmem:[#allocation4 + $0x8] sm:$0xff]  ;;  %v4025_v52 = vld [vmem:[#allocation3 + $0x10] sm:$0xff]  ;;  %v9431_v9 = vmov 1   ;;  %s11493_s0 = smov 96   ;;  %s11491_s2 = smov 32  }
 0xb2d   : > { %v4037_v20 = vsel %vm4019_vm2, 1, %v9429_v23  ;;  %v4035_v41 = vsel %vm4017_vm9, 1, %v9429_v23  ;;  %vm4018_vm11 = vcmp.eq.s32.totalorder %v9841_v1, %v10597_v18  ;;  %4199 = vmatprep.mubr.f32.mxu0 %v9430_v50  ;;  %v4038_v45 = vsel %vm4020_vm10, 1, %v9429_v23  ;;  %v4031_v58 = vld [vmem:[#allocation4 + $0x10] sm:$0xff]  ;;  %v4026_v37 = vld [vmem:[#allocation3 + $0x18] sm:$0xff]  ;;  %v4032_v61 = vld [vmem:[#allocation4 + $0x18] sm:$0xff] }
 0xb2e   : > { %4048 = vperm.xlu1 %8675, %v4037_v20   ;;  %4042 = vperm.xlu0 %8674, %v4035_v41   ;;  %v4036_v32 = vsel %vm4018_vm11, 1, %v9429_v23  ;;  %vm4022_vm12 = vcmp.eq.s32.totalorder %v9853_v5, %v10597_v18  ;;  %vm4021_vm13 = vcmp.eq.s32.totalorder %v9850_v4, %v10597_v18  ;;  %v4027_v14 = vld [vmem:[#allocation3 + $0x20] sm:$0xff]  ;;  %v4033_v39 = vld [vmem:[#allocation4 + $0x20] sm:$0xff]  ;;  %v4028_v49 = vld [vmem:[#allocation3 + $0x28] sm:$0xff]  ;;  %v3956_v10 = vlaneseq  ;;  %s11593_s1 = sld [smem:[#allocation61_spill]]  ;;  %p7356_p8 = scmp.ne.s32.totalorder %s9668_s18, 7 }
 0xb2f   : > { %v4040_v46 = vsel %vm4022_vm12, 1, %v9429_v23  ;;  %v4039_v43 = vsel %vm4021_vm13, 1, %v9429_v23  ;;  %v4034_v19 = vld [vmem:[#allocation4 + $0x28] sm:$0xff]  ;;  %v4081_v63 = vld [vmem:[#allocation14 + $0x2] sm:$0x3]  ;;  %vm4003_vm0 = vcmp.gt.s32.totalorder %v9856_v6, %v10597_v18  ;;  %s11601_s3 = sld [smem:[#allocation77_spill]] (!%p7356_p8) }
 0xb30   : > { %v10639_v44 = vshrl.u32 %v3956_v10, 7 }
 0xb31   : > { %v7264_v28 = vld [vmem:[%s11580_s23 + $0x78] sm:$0xff]  ;;  %v7263_v26 = vld [vmem:[%s11580_s23 + $0x70] sm:$0xff]  ;;  %v7262_v62 = vld [vmem:[%s11580_s23 + $0x68] sm:$0xff] }
 0xb32   : > { %4159 = vmatprep.subr.mxu0 %v7264_v28  ;;  %v7261_v24 = vld [vmem:[%s11580_s23 + $0x60] sm:$0xff]  ;;  %v7260_v11 = vld [vmem:[%s11580_s23 + $0x58] sm:$0xff]  ;;  %v7259_v13 = vld [vmem:[%s11580_s23 + $0x50] sm:$0xff]  ;;  %4051 = vperm.xlu1 %8675, %v4038_v45   ;;  %v10642_v57 = vsub.s32 0, %v10639_v44 }
 0xb33   : > { %4160 = vmatpush1.msra.mxu0 %v7263_v26  ;;  %4045 = vperm.xlu0 %8674, %v4036_v32   ;;  %v7258_v30 = vld [vmem:[%s11580_s23 + $0x48] sm:$0xff]  ;;  %v7257_v27 = vld [vmem:[%s11580_s23 + $0x40] sm:$0xff]  ;;  %v4112_v32 = vsub.s32 1, %v10639_v44  ;;  %s11495_s23 = smov 64  }
 0xb34   : > { %4161 = vmatprep.subr.mxu0 %v7262_v62  ;;  %v4109_v55 = vrot.slane %v4081_v63, %v10642_v57 }
 0xb35   : > { %4162 = vmatpush1.msra.mxu0 %v7261_v24 }
 0xb36   : > { %4163 = vmatprep.subr.mxu0 %v7260_v11  ;;  %4057 = vperm.xlu1 %8675, %v4040_v46  }
 0xb37   : > { %4164 = vmatpush1.msra.mxu0 %v7259_v13  ;;  %4054 = vperm.xlu0 %8674, %v4039_v43   ;;  %v4113_v13 = vrot.slane %v4081_v63, %v4112_v32 }
 0xb38   : > { %4165 = vmatprep.subr.mxu0 %v7258_v30 }
 0xb39   : > { %4166 = vmatpush1.msra.mxu0 %v7257_v27 }
 0xb3b   : > { %8676 = vset.pattern.permute.xlu0 %v9431_v9 }
 0xba9   : > { %v4043_v17 = vpop.permute.xlu0 %4042  ;;  %v4049_v16 = vpop.permute.xlu1 %4048 }
 0xbaa   : > { %vm4059_vm1 = vcmp.eq.s32.totalorder %v4043_v17, 1  ;;  %vm4061_vm3 = vcmp.eq.s32.totalorder %v4049_v16, 1 }
 0xbab   : > { %v4065_v47 = vsel %vm4059_vm1, %v4023_v38, %v4029_v40  ;;  %v4067_v34 = vsel %vm4061_vm3, %v4025_v52, %v4031_v58 }
 0xbac   : > { %7281 = vmatmul.mubr.msk.f32.vlgmr.msra.gmra.mxu0 %vm4116_vm15, %v4065_v47  ;;  %v7299_v47 = vld [vmem:[#allocation5] ss:$0 sm:$0xff] }
 0xbad   : > { %4205 = vmatprep.mubr.f32.mxu0 %v9430_v50  ;;  %v4052_v60 = vpop.permute.xlu1 %4051 }
 0xbae   : > { %v4046_v33 = vpop.permute.xlu0 %4045  ;;  %vm4062_vm5 = vcmp.eq.s32.totalorder %v4052_v60, 1 }
 0xbaf   : > { %vm4060_vm4 = vcmp.eq.s32.totalorder %v4046_v33, 1  ;;  %v4068_v31 = vsel %vm4062_vm5, %v4026_v37, %v4032_v61 }
 0xbb0   : > { %v4066_v59 = vsel %vm4060_vm4, %v4024_v51, %v4030_v35 }
 0xbb1   : > { %7282 = vmatmul.mubr.msk.f32.gmra.mxu0 %vm4116_vm15, %v4066_v59  ;;  %v4058_v42 = vpop.permute.xlu1 %4057 }
 0xbb2   : > { %4211 = vmatprep.mubr.f32.mxu0 %v9430_v50  ;;  %v4055_v36 = vpop.permute.xlu0 %4054  ;;  %vm4064_vm14 = vcmp.eq.s32.totalorder %v4058_v42, 1 }
 0xbb3   : > { %vm4063_vm6 = vcmp.eq.s32.totalorder %v4055_v36, 1  ;;  %v4070_v56 = vsel %vm4064_vm14, %v4028_v49, %v4034_v19 }
 0xbb4   : > { %v4069_v48 = vsel %vm4063_vm6, %v4027_v14, %v4033_v39 }
 0xbb5   : > { %7283 = vmatmul.mubr.msk.f32.gmra.mxu0 %vm4116_vm15, %v4067_v34 }
 0xbb6   : > { %4217 = vmatprep.mubr.f32.mxu0 %v9430_v50 }
 0xbb9   : > { %7284 = vmatmul.mubr.msk.f32.gmra.mxu0 %vm4116_vm15, %v4068_v31 }
 0xbba   : > { %4223 = vmatprep.mubr.f32.mxu0 %v9430_v50 }
 0xbbd   : > { %7285 = vmatmul.mubr.msk.f32.gmra.mxu0 %vm4116_vm15, %v4069_v48 }
 0xbbe   : > { %4229 = vmatprep.mubr.f32.mxu0 %v9430_v50 }
 0xbc1   : > { %7286 = vmatmul.mubr.msk.f32.gmra.mxu0 %vm4116_vm15, %v4070_v56 }
 0xc6c   : > { %v4201_v12 = vpop.f32.mrf.mxu0 }
 0xc6d   : > { %v4202_v29 = vadd.f32 %v4201_v12, %v4109_v55 }
 0xc6e   : > { %v4203_v53 = vpop.f32.mrf.mxu0 }
 0xc6f   : > { %8012 = vmatprep.mubr.msk.f32.mxu1 %vm4116_vm15, %v4202_v29  ;;  %v10706_v38 = vadd.f32 %v4203_v53, %v4113_v13 }
 0xc71   : > { %v4207_v21 = vpop.f32.mrf.mxu0 }
 0xc72   : > { %v10663_v45 = vadd.f32 %v4207_v21, %v4109_v55 }
 0xc73   : > { %v4209_v54 = vpop.f32.mrf.mxu0 }
 0xc74   : > { %v10708_v40 = vadd.f32 %v4209_v54, %v4113_v13 }
 0xc75   : > { %v4213_v15 = vpop.f32.mrf.mxu0 }
 0xc76   : > { %v10650_v41 = vadd.f32 %v4213_v15, %v4109_v55 }
 0xc77   : > { %v4215_v22 = vpop.f32.mrf.mxu0 }
 0xc78   : > { %v10690_v43 = vadd.f32 %v4215_v22, %v4113_v13 }
 0xc79   : > { %v4219_v25 = vpop.f32.mrf.mxu0 }
 0xc7a   : > { %v10658_v24 = vadd.f32 %v4219_v25, %v4109_v55 }
 0xc7b   : > { %v4221_v8 = vpop.f32.mrf.mxu0 }
 0xc7c   : > { %v10696_v27 = vadd.f32 %v4221_v8, %v4113_v13 }
 0xc7d   : > { %v4225_v7 = vpop.f32.mrf.mxu0 }
 0xc7e   : > { %v10646_v28 = vadd.f32 %v4225_v7, %v4109_v55 }
 0xc7f   : > { %v4227_v26 = vpop.f32.mrf.mxu0 }
 0xc80   : > { %4250 = vrot.lane.b32.xlu1 %v10646_v28, %s11493_s0  ;;  %v10685_v46 = vadd.f32 %v4227_v26, %v4113_v13 }
 0xc81   : > { %v4231_v20 = vpop.f32.mrf.mxu0 }
 0xc82   : > { %v10652_v62 = vadd.f32 %v4231_v20, %v4109_v55 }
 0xc83   : > { %v4233_v11 = vpop.f32.mrf.mxu0 }
 0xc84   : > { %4252 = vrot.lane.b32.xlu0 %v10652_v62, %s11493_s0  ;;  %4246 = vrot.lane.b32.xlu1 %v10650_v41, %s11493_s0  ;;  %v10679_v30 = vadd.f32 %v4233_v11, %v4113_v13 }
 0xc88   : > { %4248 = vrot.lane.b32.xlu0 %v10658_v24, %s11493_s0  ;;  %4242 = vrot.lane.b32.xlu1 %v4202_v29, %s11493_s0 }
 0xc8c   : > { %4244 = vrot.lane.b32.xlu0 %v10663_v45, %s11493_s0  ;;  %4486 = vrot.lane.b32.xlu1 %v10646_v28, %s11491_s2 }
 0xc90   : > { %4488 = vrot.lane.b32.xlu0 %v10652_v62, %s11491_s2  ;;  %4482 = vrot.lane.b32.xlu1 %v10650_v41, %s11491_s2 }
 0xc94   : > { %4484 = vrot.lane.b32.xlu0 %v10658_v24, %s11491_s2  ;;  %4478 = vrot.lane.b32.xlu1 %v4202_v29, %s11491_s2 }
 0xc98   : > { %4480 = vrot.lane.b32.xlu0 %v10663_v45, %s11491_s2  ;;  %4841 = vrot.lane.b32.xlu1 %v10679_v30, %s11495_s23  ;;  %s11581_s2 = sld [smem:[#allocation56_spill]] }
 0xc9c   : > { %4466 = vrot.lane.b32.xlu0 %v4202_v29, %s11495_s23  ;;  %4839 = vrot.lane.b32.xlu1 %v10685_v46, %s11495_s23 }
 0xc9e   : > { %v3921_v17 = vld [vmem:[%s11581_s2] sm:$0xff]  ;;  %v3922_v51 = vld [vmem:[%s11581_s2 + $0x8] sm:$0xff]  ;;  %v3923_v35 = vld [vmem:[%s11581_s2 + $0x10] sm:$0xff] }
 0xc9f   : > { %v3924_v16 = vld [vmem:[%s11581_s2 + $0x18] sm:$0xff]  ;;  %v3925_v33 = vld [vmem:[%s11581_s2 + $0x20] sm:$0xff]  ;;  %v3926_v52 = vld [vmem:[%s11581_s2 + $0x28] sm:$0xff] }
 0xca0   : > { %4468 = vrot.lane.b32.xlu0 %v10663_v45, %s11495_s23  ;;  %4835 = vrot.lane.b32.xlu1 %v10690_v43, %s11495_s23 }
 0xca4   : > { %4837 = vrot.lane.b32.xlu0 %v10696_v27, %s11495_s23  ;;  %4472 = vrot.lane.b32.xlu1 %v10658_v24, %s11495_s23 }
 0xca8   : > { %4470 = vrot.lane.b32.xlu0 %v10650_v41, %s11495_s23  ;;  %4474 = vrot.lane.b32.xlu1 %v10646_v28, %s11495_s23 }
 0xcac   : > { %4833 = vrot.lane.b32.xlu0 %v10708_v40, %s11495_s23  ;;  %4831 = vrot.lane.b32.xlu1 %v10706_v38, %s11495_s23 }
 0xcb0   : > { %4476 = vrot.lane.b32.xlu0 %v10652_v62, %s11495_s23  ;;  %4821 = vrot.lane.b32.xlu1 %v10708_v40, %s11493_s0  ;;  %s11592_s23 = sld [smem:[#allocation60_spill]] }
 0xcb4   : > { %4819 = vrot.lane.b32.xlu0 %v10706_v38, %s11493_s0  ;;  %4825 = vrot.lane.b32.xlu1 %v10696_v27, %s11493_s0 }
 0xcb8   : > { %4823 = vrot.lane.b32.xlu0 %v10690_v43, %s11493_s0  ;;  %4829 = vrot.lane.b32.xlu1 %v10679_v30, %s11493_s0 }
 0xcbc   : > { %4827 = vrot.lane.b32.xlu0 %v10685_v46, %s11493_s0  ;;  %3929 = vperm.xlu1 %8675, %v3921_v17   ;;  %s11582_s0 = sld [smem:[#allocation57_spill]] }
 0xcc0   : > { %4385 = vperm.xlu0 %8676, %v7299_v47   ;;  %3961 = vperm.xlu1 %8675, %v9838_v0  }
 0xcc4   : > { %8677 = vset.pattern.permute.xlu0 %v9429_v23  ;;  %3964 = vperm.xlu1 %8675, %v9841_v1  }
 0xcc5   : > { %3932 = vperm.xlu0 %8677, %v3922_v51  }
 0xcc8   : > { %3935 = vperm.xlu1 %8675, %v3923_v35  }
 0xcc9   : > { %3967 = vperm.xlu0 %8677, %v9844_v2  }
 0xccc   : > { %3938 = vperm.xlu1 %8675, %v3924_v16  }
 0xccd   : > { %3970 = vperm.xlu0 %8677, %v9847_v3  }
 0xcd0   : > { %3941 = vperm.xlu1 %8675, %v3925_v33  }
 0xcd1   : > { %3973 = vperm.xlu0 %8677, %v9850_v4  }
 0xcd4   : > { %3944 = vperm.xlu1 %8675, %v3926_v52  }
 0xcd5   : > { %3976 = vperm.xlu0 %8677, %v9853_v5  }
 0xcf2   : > { %v4251_v58 = vpop.permute.xlu1 %4250 }
 0xcf6   : > { %v4253_v59 = vpop.permute.xlu0 %4252  ;;  %v4247_v34 = vpop.permute.xlu1 %4246 }
 0xcf7   : > { %8000 = vmatprep.subr.msk.mxu1 %vm4116_vm15, %v4253_v59 }
 0xcf8   : > { %8001 = vmatpush3.xpose.msk.msra.mxu1 %vm4116_vm15, %v4253_v59 }
 0xcf9   : > { %8002 = vmatprep.subr.msk.mxu1 %vm4116_vm15, %v4251_v58 }
 0xcfa   : > { %v4249_v60 = vpop.permute.xlu0 %4248  ;;  %v4243_v37 = vpop.permute.xlu1 %4242 }
 0xcfc   : > { %8003 = vmatpush3.xpose.msk.msra.mxu1 %vm4116_vm15, %v4251_v58 }
 0xcfd   : > { %8004 = vmatprep.subr.msk.mxu1 %vm4116_vm15, %v4249_v60 }
 0xcfe   : > { %v4245_v61 = vpop.permute.xlu0 %4244  ;;  %v4487_v36 = vpop.permute.xlu1 %4486 }
 0xd00   : > { %8005 = vmatpush3.xpose.msk.msra.mxu1 %vm4116_vm15, %v4249_v60 }
 0xd01   : > { %8006 = vmatprep.subr.msk.mxu1 %vm4116_vm15, %v4247_v34 }
 0xd02   : > { %v4489_v31 = vpop.permute.xlu0 %4488  ;;  %v4483_v14 = vpop.permute.xlu1 %4482 }
 0xd03   : > { %8021 = vmatprep.subr.msk.mxu0 %vm4116_vm15, %v4489_v31 }
 0xd04   : > { %8007 = vmatpush3.xpose.msk.msra.mxu1 %vm4116_vm15, %v4247_v34  ;;  %8022 = vmatpush3.xpose.msk.msra.mxu0 %vm4116_vm15, %v4489_v31 }
 0xd05   : > { %8008 = vmatprep.subr.msk.mxu1 %vm4116_vm15, %v4245_v61  ;;  %8023 = vmatprep.subr.msk.mxu0 %vm4116_vm15, %v4487_v36 }
 0xd06   : > { %v4485_v39 = vpop.permute.xlu0 %4484  ;;  %v4479_v42 = vpop.permute.xlu1 %4478 }
 0xd08   : > { %8009 = vmatpush3.xpose.msk.msra.mxu1 %vm4116_vm15, %v4245_v61  ;;  %8024 = vmatpush3.xpose.msk.msra.mxu0 %vm4116_vm15, %v4487_v36 }
 0xd09   : > { %8010 = vmatprep.subr.msk.mxu1 %vm4116_vm15, %v4243_v37  ;;  %8025 = vmatprep.subr.msk.mxu0 %vm4116_vm15, %v4485_v39 }
 0xd0a   : > { %v4481_v48 = vpop.permute.xlu0 %4480  ;;  %v4842_v49 = vpop.permute.xlu1 %4841 }
 0xd0c   : > { %8011 = vmatpush3.xpose.msk.msra.mxu1 %vm4116_vm15, %v4243_v37  ;;  %8026 = vmatpush3.xpose.msk.msra.mxu0 %vm4116_vm15, %v4485_v39 }
 0xd0d   : > { %8027 = vmatprep.subr.msk.mxu0 %vm4116_vm15, %v4483_v14  ;;  %8042 = vmatprep.subr.mxu1 %v10679_v30 }
 0xd0e   : > { %v4467_v19 = vpop.permute.xlu0 %4466  ;;  %v4840_v56 = vpop.permute.xlu1 %4839 }
 0xd0f   : > { %8013 = vmatmul.mubr.msk.f32.vlgmr.msra.gmra.mxu1 %vm4116_vm15, %v10663_v45  ;;  %8033 = vmatprep.mubr.msk.f32.mxu0 %vm4116_vm15, %v4467_v19 }
 0xd10   : > { %8015 = vmatprep.mubr.msk.f32.mxu1 %vm4116_vm15, %v10650_v41  ;;  %8028 = vmatpush3.xpose.msk.msra.mxu0 %vm4116_vm15, %v4483_v14 }
 0xd11   : > { %8043 = vmatpush3.msra.mxu1 %v10679_v30  ;;  %8029 = vmatprep.subr.msk.mxu0 %vm4116_vm15, %v4481_v48 }
 0xd12   : > { %8044 = vmatprep.subr.mxu1 %v10685_v46  ;;  %v4469_v9 = vpop.permute.xlu0 %4468  ;;  %v4836_v10 = vpop.permute.xlu1 %4835 }
 0xd13   : > { %8045 = vmatpush3.msra.mxu1 %v10685_v46 }
 0xd14   : > { %8016 = vmatmul.mubr.msk.f32.gmra.mxu1 %vm4116_vm15, %v10658_v24  ;;  %8046 = vmatprep.subr.mxu1 %v10696_v27 }
 0xd15   : > { %8018 = vmatprep.mubr.msk.f32.mxu1 %vm4116_vm15, %v10646_v28  ;;  %8030 = vmatpush3.xpose.msk.msra.mxu0 %vm4116_vm15, %v4481_v48 }
 0xd16   : > { %8047 = vmatpush3.msra.mxu1 %v10696_v27  ;;  %8031 = vmatprep.subr.msk.mxu0 %vm4116_vm15, %v4479_v42  ;;  %v4838_v63 = vpop.permute.xlu0 %4837  ;;  %v4473_v12 = vpop.permute.xlu1 %4472 }
 0xd17   : > { %8048 = vmatprep.subr.mxu1 %v10690_v43 }
 0xd18   : > { %8049 = vmatpush3.msra.mxu1 %v10690_v43 }
 0xd19   : > { %8019 = vmatmul.mubr.msk.f32.gmra.mxu1 %vm4116_vm15, %v10652_v62  ;;  %8050 = vmatprep.subr.mxu1 %v10708_v40 }
 0xd1a   : > { %8032 = vmatpush3.xpose.msk.msra.mxu0 %vm4116_vm15, %v4479_v42  ;;  %8051 = vmatpush3.msra.mxu1 %v10708_v40  ;;  %v4471_v55 = vpop.permute.xlu0 %4470  ;;  %v4475_v53 = vpop.permute.xlu1 %4474 }
 0xd1b   : > { %8052 = vmatprep.subr.mxu1 %v10706_v38  ;;  %8063 = vmatprep.subr.msk.mxu0 %vm4116_vm15, %v4842_v49 }
 0xd1c   : > { %8053 = vmatpush3.msra.mxu1 %v10706_v38 }
 0xd1d   : > { %8034 = vmatmul.mubr.msk.f32.vlgmr.msra.gmra.mxu0 %vm4116_vm15, %v4469_v9 }
 0xd1e   : > { %8036 = vmatprep.mubr.msk.f32.mxu0 %vm4116_vm15, %v4471_v55  ;;  %8064 = vmatpush3.xpose.msk.msra.mxu0 %vm4116_vm15, %v4842_v49  ;;  %v4834_v29 = vpop.permute.xlu0 %4833  ;;  %v4832_v15 = vpop.permute.xlu1 %4831 }
 0xd1f   : > { %8065 = vmatprep.subr.msk.mxu0 %vm4116_vm15, %v4840_v56 }
 0xd21   : > { %8037 = vmatmul.mubr.msk.f32.gmra.mxu0 %vm4116_vm15, %v4473_v12 }
 0xd22   : > { %8039 = vmatprep.mubr.msk.f32.mxu0 %vm4116_vm15, %v4475_v53  ;;  %8066 = vmatpush3.xpose.msk.msra.mxu0 %vm4116_vm15, %v4840_v56  ;;  %v4477_v21 = vpop.permute.xlu0 %4476  ;;  %v4822_v22 = vpop.permute.xlu1 %4821 }
 0xd23   : > { %8067 = vmatprep.subr.msk.mxu0 %vm4116_vm15, %v4838_v63 }
 0xd25   : > { %8040 = vmatmul.mubr.msk.f32.gmra.mxu0 %vm4116_vm15, %v4477_v21 }
 0xd26   : > { %8068 = vmatpush3.xpose.msk.msra.mxu0 %vm4116_vm15, %v4838_v63  ;;  %v4820_v54 = vpop.permute.xlu0 %4819  ;;  %v4826_v8 = vpop.permute.xlu1 %4825 }
 0xd27   : > { %8069 = vmatprep.subr.msk.mxu0 %vm4116_vm15, %v4836_v10  ;;  %8075 = vmatprep.mubr.msk.f32.mxu0 %vm4116_vm15, %v4820_v54 }
 0xd2a   : > { %8070 = vmatpush3.xpose.msk.msra.mxu0 %vm4116_vm15, %v4836_v10  ;;  %v4824_v25 = vpop.permute.xlu0 %4823  ;;  %v4830_v28 = vpop.permute.xlu1 %4829 }
 0xd2b   : > { %8071 = vmatprep.subr.msk.mxu0 %vm4116_vm15, %v4834_v29 }
 0xd2e   : > { %8072 = vmatpush3.xpose.msk.msra.mxu0 %vm4116_vm15, %v4834_v29  ;;  %v4828_v7 = vpop.permute.xlu0 %4827 }
 0xd2f   : > { %8073 = vmatprep.subr.msk.mxu0 %vm4116_vm15, %v4832_v15 }
 0xd32   : > { %8074 = vmatpush3.xpose.msk.msra.mxu0 %vm4116_vm15, %v4832_v15 }
 0xd35   : > { %8076 = vmatmul.mubr.msk.f32.vlgmr.msra.gmra.mxu0 %vm4116_vm15, %v4822_v22 }
 0xd36   : > { %8078 = vmatprep.mubr.msk.f32.mxu0 %vm4116_vm15, %v4824_v25 }
 0xd37   : > { %v10811_v26 = vpop.permute.xlu1 %3929 }
 0xd39   : > { %8079 = vmatmul.mubr.msk.f32.gmra.mxu0 %vm4116_vm15, %v4826_v8 }
 0xd3a   : > { %8081 = vmatprep.mubr.msk.f32.mxu0 %vm4116_vm15, %v4828_v7 }
 0xd3b   : > { %v4386_v62 = vpop.permute.xlu0 %4385  ;;  %v10813_v13 = vpop.permute.xlu1 %3961 }
 0xd3d   : > { %8082 = vmatmul.mubr.msk.f32.gmra.mxu0 %vm4116_vm15, %v4830_v28  ;;  %v3959_v28 = vrot.slane %v9856_v6, %v10642_v57 }
 0xd3f   : > { %v10815_v59 = vpop.permute.xlu1 %3964  ;;  %vm3978_vm7 = vcmp.le.s32.totalorder %v3959_v28, %v10813_v13 }
 0xd40   : > { %v10817_v61 = vpop.permute.xlu0 %3932  ;;  %vm3979_vm2 = vcmp.le.s32.totalorder %v3959_v28, %v10815_v59 }
 0xd43   : > { %v3936_v19 = vpop.permute.xlu1 %3935 }
 0xd44   : > { %v3968_v56 = vpop.permute.xlu0 %3967 }
 0xd45   : > { %vm3980_vm11 = vcmp.le.s32.totalorder %v3959_v28, %v3968_v56 }
 0xd47   : > { %v3939_v29 = vpop.permute.xlu1 %3938 }
 0xd48   : > { %v3971_v53 = vpop.permute.xlu0 %3970 }
 0xd49   : > { %vm3981_vm1 = vcmp.le.s32.totalorder %v3959_v28, %v3971_v53 }
 0xd4b   : > { %v3942_v8 = vpop.permute.xlu1 %3941 }
 0xd4f   : > { %v3945_v6 = vpop.permute.xlu1 %3944 }
 0xdcf   : > { %v8014_v20 = vpop.f32.mrf.mxu1 }
 0xdd0   : > { %v4374_v41 = vmul.f32 0.17677669, %v8014_v20  ;;  %v3974_v20 = vpop.permute.xlu0 %3973 }
 0xdd1   : > { %v4344_v24 = vpop.f32.mrf.mxu1  ;;  %vm3982_vm5 = vcmp.le.s32.totalorder %v3959_v28, %v3974_v20 }
 0xdd2   : > { %v4389_v45 = vadd.f32 %v4386_v62, %v4374_v41  ;;  %v4373_v11 = vmul.f32 0.17677669, %v4344_v24  ;;  %v7256_v24 = vld [vmem:[%s11582_s0] ss:$0 sm:$0xff]  ;;  %s11591_s0 = smov 32  }
 0xdd3   : > { %vm3950_vm8 = vcmp.eq.s32.totalorder %v10811_v26, %v7256_v24  ;;  %vm3951_vm9 = vcmp.eq.s32.totalorder %v10817_v61, %v7256_v24  ;;  %vm3952_vm10 = vcmp.eq.s32.totalorder %v3936_v19, %v7256_v24  ;;  %vm3953_vm13 = vcmp.eq.s32.totalorder %v3939_v29, %v7256_v24 }
 0xdd4   : > { %v7301_v17 = vmul.f32 -1.442695, %v4389_v45  ;;  %v4388_v47 = vadd.f32 %v4386_v62, %v4373_v11  ;;  %v8017_v51 = vpop.f32.mrf.mxu1  ;;  %vm10842_vm12 = vmand %vm3950_vm8, %vm3978_vm7  ;;  %vm3954_vm3 = vcmp.eq.s32.totalorder %v3942_v8, %v7256_v24  ;;  %v9435_v26 = vmov -1e+30  }
 0xdd5   : > { %v4376_v35 = vmul.f32 0.17677669, %v8017_v51  ;;  %vm10850_vm4 = vmand %vm3951_vm9, %vm3979_vm2  ;;  %v4000_v61 = vsel %vm3954_vm3, 0.0, %v9435_v26 }
 0xdd6   : > { %8678 = vpow2.f32 %v7301_v17  ;;  %v7300_v16 = vmul.f32 -1.442695, %v4388_v47  ;;  %v4354_v33 = vpop.f32.mrf.mxu1  ;;  %v4004_v17 = vsel %vm4003_vm0, -1e+30, %v9430_v50  ;;  %vm10860_vm14 = vmand %vm3952_vm10, %vm3980_vm11  ;;  %vm3955_vm0 = vcmp.eq.s32.totalorder %v3945_v6, %v7256_v24 }
 0xdd7   : > { %v4391_v52 = vadd.f32 %v4386_v62, %v4376_v35  ;;  %v4375_v58 = vmul.f32 0.17677669, %v4354_v33  ;;  %v3977_v35 = vpop.permute.xlu0 %3976  ;;  %v10840_v33 = vrot.slane %v4004_v17, %v10642_v57  ;;  %v3991_v56 = vsel %vm10850_vm4, 1.0, %v9430_v50 }
 0xdd8   : > { %8680 = vpow2.f32 %v7300_v16  ;;  %vm3983_vm7 = vcmp.le.s32.totalorder %v3959_v28, %v3977_v35  ;;  %v4001_v20 = vsel %vm3955_vm0, 0.0, %v9435_v26 }
 0xdd9   : > { %v7303_v34 = vmul.f32 -1.442695, %v4391_v52  ;;  %v4390_v60 = vadd.f32 %v4386_v62, %v4375_v58  ;;  %v8020_v37 = vpop.f32.mrf.mxu1  ;;  %v3996_v52 = vsel %vm3950_vm8, 0.0, %v9435_v26  ;;  %vm10867_vm8 = vmand %vm3953_vm13, %vm3981_vm1 }
 0xdda   : > { %v4378_v36 = vmul.f32 0.17677669, %v8020_v37  ;;  %v3997_v37 = vsel %vm3951_vm9, 0.0, %v9435_v26  ;;  %vm3988_vm9 = vmand %vm3954_vm3, %vm3982_vm5  ;;  %v10905_v53 = vsel %vm10867_vm8, 1.0, %v9430_v50  ;;  %vm4633_vm8 = vcmask 392192  }
 0xddb   : > { %8682 = vpow2.f32 %v7303_v34  ;;  %v7302_v31 = vmul.f32 -1.442695, %v4390_v60  ;;  %v4364_v14 = vpop.f32.mrf.mxu1 }
 0xddc   : > { %v4393_v39 = vadd.f32 %v4386_v62, %v4378_v36  ;;  %v4377_v42 = vmul.f32 0.17677669, %v4364_v14  ;;  %v3998_v36 = vsel %vm3952_vm10, 0.0, %v9435_v26  ;;  %vm3989_vm10 = vmand %vm3955_vm0, %vm3983_vm7 }
 0xddd   : > { %8684 = vpow2.f32 %v7302_v31  ;;  %v10819_v55 = vpop.f32.mrf.mxu0  ;;  %v3999_v31 = vsel %vm3953_vm13, 0.0, %v9435_v26 }
 0xdde   : > { %v7305_v48 = vmul.f32 -1.442695, %v4393_v39  ;;  %v4392_v49 = vadd.f32 %v4386_v62, %v4377_v42  ;;  %v10873_v39 = vadd.f32 %v10840_v33, %v3996_v52  ;;  %v3990_v42 = vsel %vm10842_vm12, 1.0, %v9430_v50 }
 0xddf   : > { %v10821_v15 = vpop.f32.mrf.mxu0  ;;  %v10900_v29 = vadd.f32 %v10840_v33, %v3999_v31 }
 0xde0   : > { %8686 = vpow2.f32 %v7305_v48  ;;  %v7304_v9 = vmul.f32 -1.442695, %v4392_v49  ;;  %v4609_v35 = vmul.f32 0.17677669, %v10821_v15 }
 0xde1   : > { %v10825_v41 = vpop.f32.mrf.mxu0 }
 0xde2   : > { %8688 = vpow2.f32 %v7304_v9  ;;  %v10887_v9 = vadd.f32 %v10840_v33, %v3997_v37  ;;  %v4612_v13 = vmul.f32 0.17677669, %v10825_v41 }
 0xde3   : > { %v8679_v10 = vpop.eup %8678  ;;  %v10832_v51 = vpop.f32.mrf.mxu0 }
 0xde4   : > { %v4413_v63 = vadd.f32 1.0, %v8679_v10  ;;  %v10890_v10 = vadd.f32 %v10840_v33, %v3998_v36  ;;  %v4611_v6 = vmul.f32 0.17677669, %v10832_v51 }
 0xde5   : > { %v8681_v12 = vpop.eup %8680  ;;  %v8041_v34 = vpop.f32.mrf.mxu0 }
 0xde6   : > { %8690 = vrcp.f32 %v4413_v63  ;;  %v4412_v21 = vadd.f32 1.0, %v8681_v12  ;;  %v10895_v63 = vsel %vm10860_vm14, 1.0, %v9430_v50 }
 0xde7   : > { %v4600_v12 = vpop.f32.mrf.mxu0 }
 0xde8   : > { %v8683_v54 = vpop.eup %8682  ;;  %8692 = vrcp.f32 %v4412_v21  ;;  %v10908_v21 = vadd.f32 %v10840_v33, %v4000_v61 }
 0xde9   : > { %v4415_v22 = vadd.f32 1.0, %v8683_v54 }
 0xdea   : > { %v8685_v25 = vpop.eup %8684 }
 0xdeb   : > { %8694 = vrcp.f32 %v4415_v22  ;;  %v4414_v7 = vadd.f32 1.0, %v8685_v25  ;;  %v10911_v22 = vsel %vm3988_vm9, 1.0, %v9430_v50 }
 0xded   : > { %v8687_v62 = vpop.eup %8686  ;;  %8696 = vrcp.f32 %v4414_v7 }
 0xdee   : > { %v4417_v45 = vadd.f32 1.0, %v8687_v62  ;;  %v10917_v62 = vsel %vm3989_vm10, 1.0, %v9430_v50  ;;  %v4614_v50 = vmul.f32 0.17677669, %v8041_v34  ;;  %v4613_v34 = vmul.f32 0.17677669, %v4600_v12 }
 0xdef   : > { %v8689_v11 = vpop.eup %8688 }
 0xdf0   : > { %8698 = vrcp.f32 %v4417_v45  ;;  %v4416_v47 = vadd.f32 1.0, %v8689_v11  ;;  %v4610_v45 = vmul.f32 0.17677669, %v10819_v55 }
 0xdf2   : > { %8700 = vrcp.f32 %v4416_v47 }
 0xdf3   : > { %v10837_v16 = vpop.eup %8690 }
 0xdf4   : > { %vm4431_vm6 = vcmp.gt.f32.partialorder %v10837_v16, 0.5  ;;  %vm4449_vm13 = vcmp.le.f32.partialorder %v10837_v16, 0.5 }
 0xdf5   : > { %v8693_v60 = vpop.eup %8692  ;;  %v4437_v48 = vsel %vm4431_vm6, %v10837_v16, 0.0  ;;  %v10913_v28 = vpop.f32.mrf.mxu0  ;;  %v4455_v58 = vsel %vm4449_vm13, %v10837_v16, 0.0 }
 0xdf6   : > { %vm4430_vm2 = vcmp.gt.f32.partialorder %v8693_v60, 0.5  ;;  %v4443_v25 = vmul.f32 %v4437_v48, %v3991_v56  ;;  %vm4448_vm1 = vcmp.le.f32.partialorder %v8693_v60, 0.5  ;;  %v4461_v48 = vmul.f32 %v4455_v58, %v3991_v56 }
 0xdf7   : > { %v4436_v49 = vsel %vm4430_vm2, %v8693_v60, 0.0  ;;  %v4933_v55 = vpop.f32.mrf.mxu0  ;;  %v4454_v37 = vsel %vm4448_vm1, %v8693_v60, 0.0 }
 0xdf8   : > { %v8695_v19 = vpop.eup %8694  ;;  %v4442_v8 = vmul.f32 %v4436_v49, %v3990_v42  ;;  %vm4616_vm3 = vcmp.eq.f32.partialorder %v4443_v25, 0.0  ;;  %v4460_v49 = vmul.f32 %v4454_v37, %v3990_v42  ;;  %vm4969_vm13 = vcmp.eq.f32.partialorder %v4461_v48, 0.0 }
 0xdf9   : > { %vm4433_vm11 = vcmp.gt.f32.partialorder %v8695_v19, 0.5  ;;  %vm4451_vm7 = vcmp.le.f32.partialorder %v8695_v19, 0.5  ;;  %v4622_v41 = vsel %vm4616_vm3, -1e+09, %v4610_v45  ;;  %v8080_v14 = vpop.f32.mrf.mxu0 }
 0xdfa   : > { %v8697_v54 = vpop.eup %8696  ;;  %v4439_v7 = vsel %vm4433_vm11, %v8695_v19, 0.0  ;;  %vm4615_vm4 = vcmp.eq.f32.partialorder %v4442_v8, 0.0  ;;  %v4457_v16 = vsel %vm4451_vm7, %v8695_v19, 0.0  ;;  %v10930_v60 = vadd.f32 %v4622_v41, %v10887_v9 }
 0xdfb   : > { %vm4432_vm12 = vcmp.gt.f32.partialorder %v8697_v54, 0.5  ;;  %v4445_v11 = vmul.f32 %v4439_v7, %v10905_v53  ;;  %v4621_v36 = vsel %vm4615_vm4, -1e+09, %v4609_v35  ;;  %vm4450_vm2 = vcmp.le.f32.partialorder %v8697_v54, 0.5  ;;  %v4943_v12 = vpop.f32.mrf.mxu0 }
 0xdfc   : > { %v4438_v17 = vsel %vm4432_vm12, %v8697_v54, 0.0  ;;  %v10933_v25 = vadd.f32 %v4621_v36, %v10873_v39  ;;  %v4456_v7 = vsel %vm4450_vm2, %v8697_v54, 0.0  ;;  %v4637_v42 = vsel %vm4633_vm8, %v10930_v60, -inf }
 0xdfd   : > { %v8699_v47 = vpop.eup %8698  ;;  %v4444_v24 = vmul.f32 %v4438_v17, %v10895_v63  ;;  %vm4618_vm14 = vcmp.eq.f32.partialorder %v4445_v11, 0.0  ;;  %v4016_v11 = vadd.f32 %v10840_v33, %v4001_v20  ;;  %v4463_v54 = vmul.f32 %v4457_v16, %v10905_v53  ;;  %4638 = vmax.xlane.f32.xlu0 %v4637_v42 }
 0xdfe   : > { %vm4435_vm5 = vcmp.gt.f32.partialorder %v8699_v47, 0.5  ;;  %v4624_v61 = vsel %vm4618_vm14, -1e+09, %v4612_v13  ;;  %vm4453_vm11 = vcmp.le.f32.partialorder %v8699_v47, 0.5  ;;  %v4634_v19 = vsel %vm4633_vm8, %v10933_v25, -inf }
 0xdff   : > { %v8701_v26 = vpop.eup %8700  ;;  %vm4617_vm6 = vcmp.eq.f32.partialorder %v4444_v24, 0.0  ;;  %v4441_v52 = vsel %vm4435_vm5, %v8699_v47, 0.0  ;;  %v10943_v56 = vadd.f32 %v4624_v61, %v10900_v29  ;;  %4635 = vmax.xlane.f32.xlu1 %v4634_v19  ;;  %vm4968_vm1 = vcmp.eq.f32.partialorder %v4460_v49, 0.0 }
 0xe00   : > { %v4447_v15 = vmul.f32 %v4441_v52, %v10917_v62  ;;  %vm4434_vm0 = vcmp.gt.f32.partialorder %v8701_v26, 0.5  ;;  %v4623_v51 = vsel %vm4617_vm6, -1e+09, %v4611_v6  ;;  %vm4452_vm12 = vcmp.le.f32.partialorder %v8701_v26, 0.5 }
 0xe01   : > { %v4440_v59 = vsel %vm4434_vm0, %v8701_v26, 0.0  ;;  %v10936_v45 = vadd.f32 %v4623_v51, %v10890_v10  ;;  %v4462_v35 = vmul.f32 %v4456_v7, %v10895_v63  ;;  %v4963_v6 = vmul.f32 0.17677669, %v10913_v28 }
 0xe02   : > { %v4446_v31 = vmul.f32 %v4440_v59, %v10911_v22  ;;  %vm4620_vm9 = vcmp.eq.f32.partialorder %v4447_v15, 0.0  ;;  %v4962_v52 = vmul.f32 0.17677669, %v4933_v55  ;;  %v4459_v33 = vsel %vm4453_vm11, %v8699_v47, 0.0 }
 0xe03   : > { %v4626_v17 = vsel %vm4620_vm9, -1e+09, %v4614_v50  ;;  %v4640_v13 = vsel %vm4633_vm8, %v10936_v45, -inf  ;;  %v4458_v20 = vsel %vm4452_vm12, %v8701_v26, 0.0  ;;  %v8083_v50 = vpop.f32.mrf.mxu0  ;;  %v4643_v53 = vsel %vm4633_vm8, %v10943_v56, -inf }
 0xe04   : > { %vm4619_vm10 = vcmp.eq.f32.partialorder %v4446_v31, 0.0  ;;  %v10958_v58 = vadd.f32 %v4626_v17, %v4016_v11  ;;  %v4975_v63 = vsel %vm4969_vm13, -1e+09, %v4963_v6  ;;  %v4974_v37 = vsel %vm4968_vm1, -1e+09, %v4962_v52  ;;  %4641 = vmax.xlane.f32.xlu0 %v4640_v13  ;;  %4644 = vmax.xlane.f32.xlu1 %v4643_v53 }
 0xe05   : > { %v4625_v8 = vsel %vm4619_vm10, -1e+09, %v4613_v34  ;;  %vm4971_vm3 = vcmp.eq.f32.partialorder %v4463_v54, 0.0  ;;  %vm4970_vm4 = vcmp.eq.f32.partialorder %v4462_v35, 0.0  ;;  %v4465_v15 = vmul.f32 %v4459_v33, %v10917_v62  ;;  %v4953_v41 = vpop.f32.mrf.mxu0 }
 0xe06   : > { %v10951_v24 = vadd.f32 %v4625_v8, %v10908_v21  ;;  %v4464_v28 = vmul.f32 %v4458_v20, %v10911_v22  ;;  %v4965_v55 = vmul.f32 0.17677669, %v8080_v14  ;;  %v4964_v26 = vmul.f32 0.17677669, %v4943_v12 }
 0xe07   : > { %v4649_v36 = vsel %vm4633_vm8, %v10958_v58, -inf  ;;  %v4980_v59 = vadd.f32 %v4974_v37, %v10873_v39  ;;  %v4981_v51 = vadd.f32 %v4975_v63, %v10887_v9  ;;  %vm4973_vm5 = vcmp.eq.f32.partialorder %v4465_v15, 0.0 }
 0xe08   : > { %v4646_v47 = vsel %vm4633_vm8, %v10951_v24, -inf  ;;  %v4977_v31 = vsel %vm4971_vm3, -1e+09, %v4965_v55  ;;  %v4976_v34 = vsel %vm4970_vm4, -1e+09, %v4964_v26  ;;  %4650 = vmax.xlane.f32.xlu1 %v4649_v36  ;;  %vm4972_vm6 = vcmp.eq.f32.partialorder %v4464_v28, 0.0 }
 0xe09   : > { %4647 = vmax.xlane.f32.xlu0 %v4646_v47  ;;  %v4967_v22 = vmul.f32 0.17677669, %v8083_v50  ;;  %v4966_v62 = vmul.f32 0.17677669, %v4953_v41  ;;  %v4986_v61 = vsel %vm4633_vm8, %v4980_v59, -inf  ;;  %v4989_v14 = vsel %vm4633_vm8, %v4981_v51, -inf }
 0xe0a   : > { %v4982_v48 = vadd.f32 %v4976_v34, %v10890_v10  ;;  %v4983_v49 = vadd.f32 %v4977_v31, %v10900_v29  ;;  %vm5219_vm14 = vcmask 523264   ;;  %vm5692_vm0 = vcmp.le.s32.totalorder %v9838_v0, %v10597_v18 }
 0xe0b   : > { %v4979_v16 = vsel %vm4973_vm5, -1e+09, %v4967_v22  ;;  %v4978_v39 = vsel %vm4972_vm6, -1e+09, %v4966_v62  ;;  %vm5693_vm7 = vcmp.le.s32.totalorder %v9841_v1, %v10597_v18  ;;  %vm5695_vm2 = vcmp.le.s32.totalorder %v9847_v3, %v10597_v18 }
 0xe0c   : > { %4990 = vmax.xlane.f32.xlu1 %v4989_v14  ;;  %v4992_v9 = vsel %vm4633_vm8, %v4982_v48, -inf  ;;  %v4995_v8 = vsel %vm4633_vm8, %v4983_v49, -inf  ;;  %v10975_v7 = vadd.f32 %v4978_v39, %v10908_v21  ;;  %v10977_v12 = vadd.f32 %v4979_v16, %v4016_v11 }
 0xe0d   : > { %4987 = vmax.xlane.f32.xlu0 %v4986_v61  ;;  %vm5696_vm9 = vcmp.le.s32.totalorder %v9850_v4, %v10597_v18  ;;  %v5707_v1 = vsel %vm5695_vm2, 1, %v9429_v23  ;;  %vm5697_vm10 = vcmp.le.s32.totalorder %v9853_v5, %v10597_v18 }
 0xe0e   : > { %v4998_v10 = vsel %vm4633_vm8, %v10975_v7, -inf  ;;  %v5001_v29 = vsel %vm4633_vm8, %v10977_v12, -inf }
 0xe10   : > { %4996 = vmax.xlane.f32.xlu1 %v4995_v8 }
 0xe11   : > { %4993 = vmax.xlane.f32.xlu0 %v4992_v9 }
 0xe14   : > { %5002 = vmax.xlane.f32.xlu1 %v5001_v29 }
 0xe15   : > { %4999 = vmax.xlane.f32.xlu0 %v4998_v10 }
 0xe25   : > { %5060 = vrot.lane.b32.xlu1 %v10685_v46, %s11591_s0 }
 0xe29   : > { %5058 = vrot.lane.b32.xlu1 %v10696_v27, %s11591_s0 }
 0xe2b   : > { %5062 = vrot.lane.b32.xlu0 %v10679_v30, %s11591_s0 }
 0xe2f   : > { %5056 = vrot.lane.b32.xlu0 %v10690_v43, %s11591_s0 }
 0xe86   : > { %v4639_v21 = vpop.xlane.xlu0 %4638 }
 0xe87   : > { %v4653_v19 = vsub.f32 %v10930_v60, %v4639_v21 }
 0xe88   : > { %v4636_v42 = vpop.xlane.xlu1 %4635 }
 0xe89   : > { %v4652_v11 = vsub.f32 %v10933_v25, %v4636_v42  ;;  %v4660_v17 = vmul.f32 1.442695, %v4653_v19 }
 0xe8b   : > { %v4658_v54 = vmul.f32 1.442695, %v4652_v11  ;;  %8702 = vpow2.f32 %v4660_v17 }
 0xe8d   : > { %v4642_v35 = vpop.xlane.xlu0 %4641  ;;  %v4645_v13 = vpop.xlane.xlu1 %4644  ;;  %8704 = vpow2.f32 %v4658_v54 }
 0xe8e   : > { %v4654_v6 = vsub.f32 %v10936_v45, %v4642_v35  ;;  %v4655_v30 = vsub.f32 %v10943_v56, %v4645_v13 }
 0xe90   : > { %v4662_v50 = vmul.f32 1.442695, %v4654_v6  ;;  %v4664_v25 = vmul.f32 1.442695, %v4655_v30 }
 0xe91   : > { %v4651_v27 = vpop.xlane.xlu1 %4650 }
 0xe92   : > { %v4648_v46 = vpop.xlane.xlu0 %4647  ;;  %v4657_v41 = vsub.f32 %v10958_v58, %v4651_v27 }
 0xe93   : > { %v4656_v45 = vsub.f32 %v10951_v24, %v4648_v46 }
 0xe94   : > { %v4668_v24 = vmul.f32 1.442695, %v4657_v41 }
 0xe95   : > { %v4991_v43 = vpop.xlane.xlu1 %4990  ;;  %v4666_v34 = vmul.f32 1.442695, %v4656_v45 }
 0xe96   : > { %v4988_v52 = vpop.xlane.xlu0 %4987  ;;  %v5005_v20 = vsub.f32 %v4981_v51, %v4991_v43 }
 0xe97   : > { %v5004_v33 = vsub.f32 %v4980_v59, %v4988_v52 }
 0xe98   : > { %v5012_v53 = vmul.f32 1.442695, %v5005_v20  ;;  %v10995_v47 = vpop.eup %8702 }
 0xe99   : > { %v5010_v60 = vmul.f32 1.442695, %v5004_v33  ;;  %v4997_v37 = vpop.xlane.xlu1 %4996  ;;  %v4673_v26 = vsel %vm4633_vm8, %v10995_v47, 0.0 }
 0xe9a   : > { %v4994_v63 = vpop.xlane.xlu0 %4993  ;;  %v5007_v28 = vsub.f32 %v4983_v49, %v4997_v37  ;;  %v10997_v55 = vpop.eup %8704  ;;  %4674 = vadd.xlane.f32.xlu1 %v4673_v26 }
 0xe9b   : > { %8706 = vpow2.f32 %v5010_v60  ;;  %v5006_v15 = vsub.f32 %v4982_v48, %v4994_v63  ;;  %v4670_v51 = vsel %vm4633_vm8, %v10997_v55, 0.0 }
 0xe9c   : > { %8708 = vpow2.f32 %v5012_v53  ;;  %v5016_v36 = vmul.f32 1.442695, %v5007_v28  ;;  %4671 = vadd.xlane.f32.xlu0 %v4670_v51 }
 0xe9d   : > { %8710 = vpow2.f32 %v4662_v50  ;;  %v5014_v56 = vmul.f32 1.442695, %v5006_v15  ;;  %v5003_v31 = vpop.xlane.xlu1 %5002 }
 0xe9e   : > { %8712 = vpow2.f32 %v4664_v25  ;;  %v5000_v59 = vpop.xlane.xlu0 %4999  ;;  %v5009_v62 = vsub.f32 %v10977_v12, %v5003_v31 }
 0xe9f   : > { %8714 = vpow2.f32 %v5014_v56  ;;  %v5008_v22 = vsub.f32 %v10975_v7, %v5000_v59 }
 0xea0   : > { %8716 = vpow2.f32 %v5016_v36  ;;  %v5020_v14 = vmul.f32 1.442695, %v5009_v62 }
 0xea1   : > { %8718 = vpow2.f32 %v4666_v34  ;;  %v5018_v58 = vmul.f32 1.442695, %v5008_v22  ;;  %v5061_v6 = vpop.permute.xlu1 %5060 }
 0xea2   : > { %v5063_v61 = vpop.permute.xlu0 %5062  ;;  %8720 = vpow2.f32 %v4668_v24 }
 0xea3   : > { %8084 = vmatprep.subr.mxu1 %v5063_v61  ;;  %8722 = vpow2.f32 %v5018_v58 }
 0xea4   : > { %8724 = vpow2.f32 %v5020_v14 }
 0xea5   : > { %v5059_v30 = vpop.permute.xlu1 %5058 }
 0xea6   : > { %v5057_v52 = vpop.permute.xlu0 %5056 }
 0xea8   : > { %v11007_v48 = vpop.eup %8706 }
 0xea9   : > { %v11009_v49 = vpop.eup %8708  ;;  %v5022_v16 = vsel %vm4633_vm8, %v11007_v48, 0.0 }
 0xeaa   : > { %v11013_v39 = vpop.eup %8710  ;;  %5023 = vadd.xlane.f32.xlu0 %v5022_v16  ;;  %v5025_v9 = vsel %vm4633_vm8, %v11009_v49, 0.0 }
 0xeab   : > { %v11017_v8 = vpop.eup %8712  ;;  %5026 = vadd.xlane.f32.xlu1 %v5025_v9  ;;  %v4676_v7 = vsel %vm4633_vm8, %v11013_v39, 0.0 }
 0xeac   : > { %v11021_v12 = vpop.eup %8714  ;;  %v4679_v10 = vsel %vm4633_vm8, %v11017_v8, 0.0 }
 0xead   : > { %v11025_v29 = vpop.eup %8716  ;;  %v5028_v21 = vsel %vm4633_vm8, %v11021_v12, 0.0 }
 0xeae   : > { %4677 = vadd.xlane.f32.xlu0 %v4676_v7  ;;  %v11029_v42 = vpop.eup %8718  ;;  %v5031_v19 = vsel %vm4633_vm8, %v11025_v29, 0.0 }
 0xeaf   : > { %4680 = vadd.xlane.f32.xlu1 %v4679_v10  ;;  %v11033_v11 = vpop.eup %8720  ;;  %v4682_v17 = vsel %vm4633_vm8, %v11029_v42, 0.0 }
 0xeb0   : > { %v11037_v54 = vpop.eup %8722  ;;  %v4685_v35 = vsel %vm4633_vm8, %v11033_v11, 0.0 }
 0xeb1   : > { %v11041_v13 = vpop.eup %8724  ;;  %v5034_v46 = vsel %vm4633_vm8, %v11037_v54, 0.0 }
 0xeb2   : > { %5029 = vadd.xlane.f32.xlu0 %v5028_v21  ;;  %v5037_v27 = vsel %vm4633_vm8, %v11041_v13, 0.0  ;;  %v7271_v21 = vld [vmem:[%s11592_s23 + $0x70] sm:$0xff] }
 0xeb3   : > { %5032 = vadd.xlane.f32.xlu1 %v5031_v19  ;;  %v7268_v19 = vld [vmem:[%s11592_s23 + $0x58] sm:$0xff] }
 0xeb6   : > { %4683 = vadd.xlane.f32.xlu0 %v4682_v17 }
 0xeb7   : > { %4686 = vadd.xlane.f32.xlu1 %v4685_v35  ;;  %v7266_v35 = vld [vmem:[%s11592_s23 + $0x48] sm:$0xff] }
 0xeba   : > { %5035 = vadd.xlane.f32.xlu0 %v5034_v46  ;;  %v7265_v46 = vld [vmem:[%s11592_s23 + $0x40] sm:$0xff] }
 0xebb   : > { %5038 = vadd.xlane.f32.xlu1 %v5037_v27 }
 0xecc   : > { %5054 = vrot.lane.b32.xlu1 %v10708_v40, %s11591_s0 }
 0xed0   : > { %5052 = vrot.lane.b32.xlu0 %v10706_v38, %s11591_s0 }
 0xf23   : > { %v4675_v43 = vpop.xlane.xlu1 %4674 }
 0xf24   : > { %8726 = vrcp.f32 %v4675_v43  ;;  %v7280_v43 = vld [vmem:[%s11593_s1 + $0x78] sm:$0xff] }
 0xf25   : > { %v4672_v33 = vpop.xlane.xlu0 %4671  ;;  %8130 = vmatprep.subr.mxu0 %v7280_v43 }
 0xf26   : > { %8728 = vrcp.f32 %v4672_v33  ;;  %v7279_v33 = vld [vmem:[%s11593_s1 + $0x70] sm:$0xff]  ;;  %8131 = vmatpush3.msra.mxu0 %v7280_v43 }
 0xf27   : > { %8132 = vmatprep.subr.mxu0 %v7279_v33 }
 0xf28   : > { %8133 = vmatpush3.msra.mxu0 %v7279_v33 }
 0xf31   : > { %v8727_v60 = vpop.eup %8726 }
 0xf32   : > { %v4695_v37 = vmul.f32 %v8727_v60, %v10995_v47 }
 0xf33   : > { %v5024_v20 = vpop.xlane.xlu0 %5023  ;;  %v8729_v53 = vpop.eup %8728 }
 0xf34   : > { %v5027_v50 = vpop.xlane.xlu1 %5026  ;;  %v4694_v63 = vmul.f32 %v8729_v53, %v10997_v55  ;;  %v7277_v53 = vld [vmem:[%s11593_s1 + $0x60] sm:$0xff] }
 0xf36   : > { %8054 = vmatprep.mubr.msk.f32.mxu1 %vm4633_vm8, %v4694_v63  ;;  %v7276_v63 = vld [vmem:[%s11593_s1 + $0x58] sm:$0xff] }
 0xf37   : > { %v4678_v25 = vpop.xlane.xlu0 %4677  ;;  %8055 = vmatmul.mubr.msk.f32.vlgmr.msra.gmra.mxu1 %vm4633_vm8, %v4695_v37 }
 0xf38   : > { %8730 = vrcp.f32 %v4678_v25  ;;  %v4681_v40 = vpop.xlane.xlu1 %4680  ;;  %8085 = vmatpush3.msra.mxu1 %v5063_v61 }
 0xf39   : > { %8732 = vrcp.f32 %v4681_v40  ;;  %8086 = vmatprep.subr.mxu1 %v5061_v6 }
 0xf3a   : > { %8087 = vmatpush3.msra.mxu1 %v5061_v6  ;;  %8734 = vrcp.f32 %v5024_v20 }
 0xf3b   : > { %v5030_v38 = vpop.xlane.xlu0 %5029  ;;  %8088 = vmatprep.subr.mxu1 %v5059_v30 }
 0xf3c   : > { %v5033_v15 = vpop.xlane.xlu1 %5032  ;;  %8089 = vmatpush3.msra.mxu1 %v5059_v30 }
 0xf3d   : > { %8090 = vmatprep.subr.mxu1 %v5057_v52 }
 0xf3e   : > { %8091 = vmatpush3.msra.mxu1 %v5057_v52 }
 0xf3f   : > { %v4684_v28 = vpop.xlane.xlu0 %4683 }
 0xf40   : > { %8736 = vrcp.f32 %v4684_v28  ;;  %v4687_v55 = vpop.xlane.xlu1 %4686 }
 0xf41   : > { %8738 = vrcp.f32 %v4687_v55 }
 0xf42   : > { %8740 = vrcp.f32 %v5027_v50  ;;  %v7278_v50 = vld [vmem:[%s11593_s1 + $0x68] sm:$0xff] }
 0xf43   : > { %8742 = vrcp.f32 %v5030_v38  ;;  %v5036_v47 = vpop.xlane.xlu0 %5035  ;;  %8134 = vmatprep.subr.mxu0 %v7278_v50 }
 0xf44   : > { %v5039_v45 = vpop.xlane.xlu1 %5038  ;;  %8744 = vrcp.f32 %v5033_v15  ;;  %8135 = vmatpush3.msra.mxu0 %v7278_v50 }
 0xf45   : > { %v8731_v56 = vpop.eup %8730  ;;  %8746 = vrcp.f32 %v5036_v47  ;;  %8136 = vmatprep.subr.mxu0 %v7277_v53 }
 0xf46   : > { %v8733_v26 = vpop.eup %8732  ;;  %v4696_v41 = vmul.f32 %v8731_v56, %v11013_v39  ;;  %8748 = vrcp.f32 %v5039_v45  ;;  %8137 = vmatpush3.msra.mxu0 %v7277_v53 }
 0xf47   : > { %v4697_v36 = vmul.f32 %v8733_v26, %v11017_v8  ;;  %v5053_v51 = vpop.permute.xlu0 %5052  ;;  %v8735_v31 = vpop.eup %8734  ;;  %8138 = vmatprep.subr.mxu0 %v7276_v63 }
 0xf48   : > { %v5055_v59 = vpop.permute.xlu1 %5054  ;;  %8057 = vmatprep.mubr.msk.f32.mxu1 %vm4633_vm8, %v4696_v41  ;;  %v5046_v58 = vmul.f32 %v8735_v31, %v11007_v48  ;;  %8139 = vmatpush3.msra.mxu0 %v7276_v63  ;;  %v7275_v31 = vld [vmem:[%s11593_s1 + $0x50] sm:$0xff] }
 0xf49   : > { %8092 = vmatprep.subr.mxu1 %v5055_v59  ;;  %8058 = vmatmul.mubr.msk.f32.gmra.mxu1 %vm4633_vm8, %v4697_v36 }
 0xf4a   : > { %8093 = vmatpush3.msra.mxu1 %v5055_v59  ;;  %8140 = vmatprep.subr.mxu0 %v7275_v31 }
 0xf4b   : > { %8094 = vmatprep.subr.mxu1 %v5053_v51  ;;  %8141 = vmatpush3.msra.mxu0 %v7275_v31 }
 0xf4c   : > { %8095 = vmatpush3.msra.mxu1 %v5053_v51 }
 0xf4d   : > { %v8737_v34 = vpop.eup %8736 }
 0xf4e   : > { %v8739_v22 = vpop.eup %8738  ;;  %v4698_v24 = vmul.f32 %v8737_v34, %v11029_v42  ;;  %v7270_v42 = vld [vmem:[%s11592_s23 + $0x68] sm:$0xff] }
 0xf4f   : > { %v4699_v62 = vmul.f32 %v8739_v22, %v11033_v11  ;;  %v8741_v61 = vpop.eup %8740  ;;  %v7267_v11 = vld [vmem:[%s11592_s23 + $0x50] sm:$0xff]  ;;  %v7274_v34 = vld [vmem:[%s11593_s1 + $0x48] sm:$0xff]  ;;  %v7273_v22 = vld [vmem:[%s11593_s1 + $0x40] sm:$0xff]  ;;  %s11594_s1 = smov 64  }
 0xf50   : > { %8060 = vmatprep.mubr.msk.f32.mxu1 %vm4633_vm8, %v4698_v24  ;;  %v8743_v14 = vpop.eup %8742  ;;  %v5047_v16 = vmul.f32 %v8741_v61, %v11009_v49  ;;  %8142 = vmatprep.subr.mxu0 %v7274_v34 }
 0xf51   : > { %8061 = vmatmul.mubr.msk.f32.gmra.mxu1 %vm4633_vm8, %v4699_v62  ;;  %v8745_v39 = vpop.eup %8744  ;;  %v5048_v9 = vmul.f32 %v8743_v14, %v11021_v12  ;;  %v7272_v12 = vld [vmem:[%s11592_s23 + $0x78] sm:$0xff]  ;;  %8143 = vmatpush3.msra.mxu0 %v7274_v34 }
 0xf52   : > { %8096 = vmatprep.mubr.msk.f32.mxu1 %vm4633_vm8, %v5046_v58  ;;  %v8747_v8 = vpop.eup %8746  ;;  %v5049_v48 = vmul.f32 %v8745_v39, %v11025_v29  ;;  %8105 = vmatprep.subr.mxu1 %v7272_v12  ;;  %v7269_v29 = vld [vmem:[%s11592_s23 + $0x60] sm:$0xff]  ;;  %v7342_v62 = vld [vmem:[#allocation16 + $0x1] ss:$0 sm:$0xff]  ;;  %s11595_s23 = smov 96  }
 0xf53   : > { %v8749_v7 = vpop.eup %8748  ;;  %v5050_v10 = vmul.f32 %v8747_v8, %v11037_v54  ;;  %8144 = vmatprep.subr.mxu0 %v7273_v22 }
 0xf54   : > { %v5051_v49 = vmul.f32 %v8749_v7, %v11041_v13  ;;  %8145 = vmatpush3.msra.mxu0 %v7273_v22 }
 0xf55   : > { %8097 = vmatmul.mubr.msk.f32.vlgmr.msra.gmra.mxu1 %vm4633_vm8, %v5047_v16 }
 0xf56   : > { %8099 = vmatprep.mubr.msk.f32.mxu1 %vm4633_vm8, %v5048_v9  ;;  %8106 = vmatpush3.msra.mxu1 %v7272_v12  ;;  %v7349_v12 = vld [vmem:[#allocation17 + $0x1] ss:$0 sm:$0xff] }
 0xf57   : > { %8107 = vmatprep.subr.mxu1 %v7271_v21 }
 0xf58   : > { %8108 = vmatpush3.msra.mxu1 %v7271_v21 }
 0xf59   : > { %8100 = vmatmul.mubr.msk.f32.gmra.mxu1 %vm4633_vm8, %v5049_v48  ;;  %8109 = vmatprep.subr.mxu1 %v7270_v42 }
 0xf5a   : > { %8102 = vmatprep.mubr.msk.f32.mxu1 %vm4633_vm8, %v5050_v10  ;;  %8110 = vmatpush3.msra.mxu1 %v7270_v42 }
 0xf5b   : > { %8111 = vmatprep.subr.mxu1 %v7269_v29 }
 0xf5c   : > { %8112 = vmatpush3.msra.mxu1 %v7269_v29 }
 0xf5d   : > { %8103 = vmatmul.mubr.msk.f32.gmra.mxu1 %vm4633_vm8, %v5051_v49  ;;  %8113 = vmatprep.subr.mxu1 %v7268_v19  ;;  %vm5694_vm8 = vcmp.le.s32.totalorder %v9844_v2, %v10597_v18  ;;  %v5708_v2 = vsel %vm5696_vm9, 1, %v9429_v23 }
 0xf5e   : > { %8114 = vmatpush3.msra.mxu1 %v7268_v19  ;;  %v5706_v0 = vsel %vm5694_vm8, 1, %v9429_v23 }
 0xf5f   : > { %8115 = vmatprep.subr.mxu1 %v7267_v11 }
 0xf60   : > { %8116 = vmatpush3.msra.mxu1 %v7267_v11 }
 0xf61   : > { %8117 = vmatprep.subr.mxu1 %v7266_v35 }
 0xf62   : > { %8118 = vmatpush3.msra.mxu1 %v7266_v35 }
 0xf63   : > { %8119 = vmatprep.subr.mxu1 %v7265_v46 }
 0xf64   : > { %8120 = vmatpush3.msra.mxu1 %v7265_v46 }
 0xff7   : > { %v8056_v17 = vpop.f32.mrf.mxu1 }
 0xff9   : > { %v4784_v54 = vpop.f32.mrf.mxu1 }
0x1009   : > { %v8059_v13 = vpop.f32.mrf.mxu1 }
0x100b   : > { %v4794_v27 = vpop.f32.mrf.mxu1 }
0x1011   : > { %v8062_v6 = vpop.f32.mrf.mxu1 }
0x1013   : > { %v4804_v30 = vpop.f32.mrf.mxu1 }
0x1015   : > { %v8098_v52 = vpop.f32.mrf.mxu1 }
0x1016   : > { %5191 = vrot.lane.b32.xlu0 %v8098_v52, %s11591_s0 }
0x1017   : > { %v5154_v20 = vpop.f32.mrf.mxu1 }
0x1018   : > { %5189 = vrot.lane.b32.xlu1 %v5154_v20, %s11591_s0 }
0x1019   : > { %v8101_v60 = vpop.f32.mrf.mxu1 }
0x101a   : > { %5195 = vrot.lane.b32.xlu0 %v8101_v60, %s11591_s0 }
0x101b   : > { %v5164_v25 = vpop.f32.mrf.mxu1 }
0x101c   : > { %5193 = vrot.lane.b32.xlu1 %v5164_v25, %s11591_s0 }
0x101d   : > { %v8104_v37 = vpop.f32.mrf.mxu1 }
0x101e   : > { %5199 = vrot.lane.b32.xlu0 %v8104_v37, %s11591_s0 }
0x101f   : > { %v5174_v40 = vpop.f32.mrf.mxu1 }
0x1020   : > { %5197 = vrot.lane.b32.xlu1 %v5174_v40, %s11591_s0  ;;  %s11596_s0 = sld [smem:[#allocation62_spill]] (!%p7356_p8) }
0x1088   : > { %v5192_v38 = vpop.permute.xlu0 %5191 }
0x1089   : > { %v5208_v55 = vsel %vm4116_vm15, %v8056_v17, %v5192_v38 }
0x108a   : > { %v5190_v15 = vpop.permute.xlu1 %5189 }
0x108b   : > { %v5207_v28 = vsel %vm4116_vm15, %v4784_v54, %v5190_v15 }
0x108c   : > { %8121 = vmatprep.mubr.msk.f32.mxu1 %vm5219_vm14, %v5207_v28  ;;  %v5196_v47 = vpop.permute.xlu0 %5195 }
0x108d   : > { %8122 = vmatmul.mubr.msk.f32.vlgmr.msra.gmra.mxu1 %vm5219_vm14, %v5208_v55  ;;  %v5210_v26 = vsel %vm4116_vm15, %v8059_v13, %v5196_v47 }
0x108e   : > { %v5194_v45 = vpop.permute.xlu1 %5193 }
0x108f   : > { %v5209_v56 = vsel %vm4116_vm15, %v4794_v27, %v5194_v45 }
0x1090   : > { %8124 = vmatprep.mubr.msk.f32.mxu1 %vm5219_vm14, %v5209_v56  ;;  %v5200_v41 = vpop.permute.xlu0 %5199 }
0x1091   : > { %8125 = vmatmul.mubr.msk.f32.gmra.mxu1 %vm5219_vm14, %v5210_v26  ;;  %v5212_v51 = vsel %vm4116_vm15, %v8062_v6, %v5200_v41 }
0x1092   : > { %v5198_v36 = vpop.permute.xlu1 %5197 }
0x1093   : > { %v5211_v59 = vsel %vm4116_vm15, %v4804_v30, %v5198_v36 }
0x1094   : > { %8127 = vmatprep.mubr.msk.f32.mxu1 %vm5219_vm14, %v5211_v59 }
0x1095   : > { %8128 = vmatmul.mubr.msk.f32.gmra.mxu1 %vm5219_vm14, %v5212_v51 }
0x114d   : > { %v8123_v24 = vpop.f32.mrf.mxu1 }
0x114e   : > { %v5310_v14 = vadd.f32 %v8123_v24, %v7342_v62 }
0x114f   : > { %v5304_v61 = vpop.f32.mrf.mxu1 }
0x1150   : > { %v5305_v58 = vadd.f32 %v7342_v62, %v5304_v61 }
0x1151   : > { %v8126_v16 = vpop.f32.mrf.mxu1 }
0x1152   : > { %8146 = vmatprep.mubr.msk.f32.mxu0 %vm5219_vm14, %v5305_v58  ;;  %v5320_v8 = vadd.f32 %v8126_v16, %v7342_v62 }
0x1153   : > { %v5314_v39 = vpop.f32.mrf.mxu1  ;;  %8147 = vmatmul.mubr.msk.f32.vlgmr.msra.gmra.mxu0 %vm5219_vm14, %v5310_v14 }
0x1154   : > { %v5315_v9 = vadd.f32 %v7342_v62, %v5314_v39 }
0x1155   : > { %v8129_v48 = vpop.f32.mrf.mxu1 }
0x1156   : > { %8149 = vmatprep.mubr.msk.f32.mxu0 %vm5219_vm14, %v5315_v9  ;;  %v5330_v49 = vadd.f32 %v8129_v48, %v7342_v62 }
0x1157   : > { %v5324_v7 = vpop.f32.mrf.mxu1  ;;  %8150 = vmatmul.mubr.msk.f32.gmra.mxu0 %vm5219_vm14, %v5320_v8 }
0x1158   : > { %v5325_v10 = vadd.f32 %v7342_v62, %v5324_v7 }
0x115a   : > { %8152 = vmatprep.mubr.msk.f32.mxu0 %vm5219_vm14, %v5325_v10 }
0x115b   : > { %8153 = vmatmul.mubr.msk.f32.gmra.mxu0 %vm5219_vm14, %v5330_v49 }
0x1213   : > { %v8148_v21 = vpop.f32.mrf.mxu0 }
0x1214   : > { %v11115_v42 = vadd.f32 %v8148_v21, %v7349_v12 }
0x1215   : > { %v5423_v29 = vpop.f32.mrf.mxu0 }
0x1216   : > { %v11117_v19 = vadd.f32 %v7349_v12, %v5423_v29  ;;  %5460 = vrot.lane.b32.xlu0 %v11115_v42, %s11594_s1 }
0x1217   : > { %v8151_v11 = vpop.f32.mrf.mxu0 }
0x1218   : > { %v11121_v17 = vadd.f32 %v8151_v11, %v7349_v12  ;;  %5458 = vrot.lane.b32.xlu1 %v11117_v19, %s11594_s1 }
0x1219   : > { %v5433_v54 = vpop.f32.mrf.mxu0 }
0x121a   : > { %v11125_v35 = vadd.f32 %v7349_v12, %v5433_v54  ;;  %5464 = vrot.lane.b32.xlu0 %v11121_v17, %s11594_s1 }
0x121b   : > { %v8154_v13 = vpop.f32.mrf.mxu0 }
0x121c   : > { %v11129_v46 = vadd.f32 %v8154_v13, %v7349_v12  ;;  %5462 = vrot.lane.b32.xlu1 %v11125_v35, %s11594_s1 }
0x121d   : > { %v5443_v27 = vpop.f32.mrf.mxu0 }
0x121e   : > { %v11133_v6 = vadd.f32 %v7349_v12, %v5443_v27  ;;  %5468 = vrot.lane.b32.xlu0 %v11129_v46, %s11594_s1 }
0x1220   : > { %5466 = vrot.lane.b32.xlu1 %v11133_v6, %s11594_s1 }
0x1288   : > { %v5461_v30 = vpop.permute.xlu0 %5460 }
0x1289   : > { %v5477_v52 = vmax.f32 %v11115_v42, %v5461_v30 }
0x128a   : > { %v5459_v43 = vpop.permute.xlu1 %5458 }
0x128b   : > { %v5476_v33 = vmax.f32 %v11117_v19, %v5459_v43  ;;  %5508 = vrot.lane.b32.xlu0 %v5477_v52, %s11594_s1  ;;  %v5483_v16 = vsub.f32 %v11115_v42, %v5477_v52 }
0x128c   : > { %v5465_v20 = vpop.permute.xlu0 %5464 }
0x128d   : > { %v5479_v50 = vmax.f32 %v11121_v17, %v5465_v20  ;;  %5506 = vrot.lane.b32.xlu1 %v5476_v33, %s11594_s1  ;;  %v5482_v9 = vsub.f32 %v11117_v19, %v5476_v33  ;;  %v5490_v48 = vmul.f32 1.442695, %v5483_v16 }
0x128e   : > { %v5463_v60 = vpop.permute.xlu1 %5462 }
0x128f   : > { %v5478_v53 = vmax.f32 %v11125_v35, %v5463_v60  ;;  %5512 = vrot.lane.b32.xlu0 %v5479_v50, %s11594_s1  ;;  %v5485_v7 = vsub.f32 %v11121_v17, %v5479_v50  ;;  %v5488_v49 = vmul.f32 1.442695, %v5482_v9 }
0x1290   : > { %v5469_v25 = vpop.permute.xlu0 %5468 }
0x1291   : > { %v5481_v63 = vmax.f32 %v11129_v46, %v5469_v25  ;;  %5510 = vrot.lane.b32.xlu1 %v5478_v53, %s11594_s1  ;;  %v5484_v12 = vsub.f32 %v11125_v35, %v5478_v53  ;;  %v5494_v29 = vmul.f32 1.442695, %v5485_v7  ;;  %v5704_v53 = vsel %vm5692_vm0, 1, %v9429_v23 }
0x1292   : > { %v5467_v37 = vpop.permute.xlu1 %5466  ;;  %v5705_v25 = vsel %vm5693_vm7, 1, %v9429_v23 }
0x1293   : > { %v5480_v40 = vmax.f32 %v11133_v6, %v5467_v37  ;;  %5516 = vrot.lane.b32.xlu0 %v5481_v63, %s11594_s1  ;;  %v5487_v11 = vsub.f32 %v11129_v46, %v5481_v63  ;;  %v5492_v54 = vmul.f32 1.442695, %v5484_v12  ;;  %v5709_v63 = vsel %vm5697_vm10, 1, %v9429_v23 }
0x1295   : > { %5514 = vrot.lane.b32.xlu1 %v5480_v40, %s11594_s1  ;;  %v5486_v13 = vsub.f32 %v11133_v6, %v5480_v40  ;;  %v5498_v27 = vmul.f32 1.442695, %v5487_v11 }
0x1297   : > { %v5496_v30 = vmul.f32 1.442695, %v5486_v13 }
0x12fd   : > { %v5509_v38 = vpop.permute.xlu0 %5508 }
0x12fe   : > { %v5525_v15 = vsub.f32 %v11115_v42, %v5509_v38 }
0x12ff   : > { %v5507_v28 = vpop.permute.xlu1 %5506 }
0x1300   : > { %v5532_v55 = vmul.f32 1.442695, %v5525_v15  ;;  %v5524_v47 = vsub.f32 %v11117_v19, %v5507_v28 }
0x1301   : > { %v5513_v45 = vpop.permute.xlu0 %5512 }
0x1302   : > { %8750 = vpow2.f32 %v5532_v55  ;;  %v5530_v56 = vmul.f32 1.442695, %v5524_v47  ;;  %v5527_v26 = vsub.f32 %v11121_v17, %v5513_v45 }
0x1303   : > { %v5511_v41 = vpop.permute.xlu1 %5510 }
0x1304   : > { %8752 = vpow2.f32 %v5530_v56  ;;  %v5536_v36 = vmul.f32 1.442695, %v5527_v26  ;;  %v5526_v59 = vsub.f32 %v11125_v35, %v5511_v41 }
0x1305   : > { %v5517_v51 = vpop.permute.xlu0 %5516 }
0x1306   : > { %8754 = vpow2.f32 %v5536_v36  ;;  %v5534_v31 = vmul.f32 1.442695, %v5526_v59  ;;  %v5529_v34 = vsub.f32 %v11129_v46, %v5517_v51 }
0x1307   : > { %v5515_v22 = vpop.permute.xlu1 %5514 }
0x1308   : > { %8756 = vpow2.f32 %v5534_v31  ;;  %v5540_v24 = vmul.f32 1.442695, %v5529_v34  ;;  %v5528_v62 = vsub.f32 %v11133_v6, %v5515_v22 }
0x130a   : > { %8758 = vpow2.f32 %v5540_v24  ;;  %v5538_v61 = vmul.f32 1.442695, %v5528_v62 }
0x130c   : > { %8760 = vpow2.f32 %v5538_v61 }
0x130d   : > { %8762 = vpow2.f32 %v5490_v48 }
0x130e   : > { %8764 = vpow2.f32 %v5488_v49 }
0x130f   : > { %v8751_v58 = vpop.eup %8750  ;;  %8766 = vpow2.f32 %v5494_v29 }
0x1310   : > { %5634 = vrot.lane.b32.xlu0 %v8751_v58, %s11594_s1  ;;  %8768 = vpow2.f32 %v5492_v54 }
0x1311   : > { %v8753_v14 = vpop.eup %8752  ;;  %8770 = vpow2.f32 %v5498_v27 }
0x1312   : > { %5632 = vrot.lane.b32.xlu1 %v8753_v14, %s11594_s1  ;;  %8772 = vpow2.f32 %v5496_v30 }
0x1313   : > { %v8755_v39 = vpop.eup %8754 }
0x1314   : > { %5638 = vrot.lane.b32.xlu0 %v8755_v39, %s11594_s1 }
0x1315   : > { %v8757_v8 = vpop.eup %8756 }
0x1316   : > { %5636 = vrot.lane.b32.xlu1 %v8757_v8, %s11594_s1 }
0x1317   : > { %v8759_v10 = vpop.eup %8758 }
0x1318   : > { %5642 = vrot.lane.b32.xlu0 %v8759_v10, %s11594_s1 }
0x1319   : > { %v8761_v21 = vpop.eup %8760 }
0x131a   : > { %5640 = vrot.lane.b32.xlu1 %v8761_v21, %s11594_s1  ;;  %v8763_v52 = vpop.eup %8762 }
0x131b   : > { %v8765_v43 = vpop.eup %8764 }
0x131c   : > { %5580 = vrot.lane.b32.xlu0 %v8751_v58, %s11595_s23  ;;  %v8767_v33 = vpop.eup %8766 }
0x131d   : > { %v8769_v20 = vpop.eup %8768 }
0x131e   : > { %5578 = vrot.lane.b32.xlu1 %v8753_v14, %s11595_s23  ;;  %v8771_v50 = vpop.eup %8770 }
0x131f   : > { %v8773_v60 = vpop.eup %8772 }
0x1320   : > { %5584 = vrot.lane.b32.xlu0 %v8755_v39, %s11595_s23 }
0x1322   : > { %5582 = vrot.lane.b32.xlu1 %v8757_v8, %s11595_s23 }
0x1324   : > { %5588 = vrot.lane.b32.xlu0 %v8759_v10, %s11595_s23 }
0x1326   : > { %5586 = vrot.lane.b32.xlu1 %v8761_v21, %s11595_s23 }
0x1328   : > { %5550 = vrot.lane.b32.xlu0 %v8763_v52, %s11595_s23 }
0x132a   : > { %5548 = vrot.lane.b32.xlu1 %v8765_v43, %s11595_s23 }
0x132c   : > { %5554 = vrot.lane.b32.xlu0 %v8767_v33, %s11595_s23 }
0x132e   : > { %5552 = vrot.lane.b32.xlu1 %v8769_v20, %s11595_s23 }
0x1330   : > { %5558 = vrot.lane.b32.xlu0 %v8771_v50, %s11595_s23 }
0x1332   : > { %5556 = vrot.lane.b32.xlu1 %v8773_v60, %s11595_s23 }
0x1334   : > { %5711 = vperm.xlu0 %8677, %v5704_v53  }
0x1336   : > { %5714 = vperm.xlu1 %8675, %v5705_v25  }
0x1338   : > { %5717 = vperm.xlu0 %8677, %v5706_v0   ;;  %v5699_v0 = vld [vmem:[#allocation4 + $0x8] sm:$0xff] }
0x133a   : > { %5720 = vperm.xlu1 %8675, %v5707_v1  }
0x133c   : > { %5723 = vperm.xlu0 %8677, %v5708_v2  }
0x133e   : > { %5726 = vperm.xlu1 %8675, %v5709_v63  }
0x1382   : > { %v5635_v3 = vpop.permute.xlu0 %5634 }
0x1383   : > { %v5651_v28 = vadd.f32 %v8763_v52, %v5635_v3 }
0x1384   : > { %v5633_v37 = vpop.permute.xlu1 %5632 }
0x1385   : > { %v5650_v55 = vadd.f32 %v8765_v43, %v5633_v37  ;;  %8774 = vrcp.f32 %v5651_v28  ;;  %v5698_v37 = vld [vmem:[#allocation4] sm:$0xff] }
0x1386   : > { %v5639_v40 = vpop.permute.xlu0 %5638 }
0x1387   : > { %v5653_v45 = vadd.f32 %v8767_v33, %v5639_v40  ;;  %8776 = vrcp.f32 %v5650_v55 }
0x1388   : > { %v5637_v38 = vpop.permute.xlu1 %5636 }
0x1389   : > { %v5652_v56 = vadd.f32 %v8769_v20, %v5637_v38  ;;  %8778 = vrcp.f32 %v5653_v45 }
0x138a   : > { %v5643_v15 = vpop.permute.xlu0 %5642 }
0x138b   : > { %v5655_v41 = vadd.f32 %v8771_v50, %v5643_v15  ;;  %8780 = vrcp.f32 %v5652_v56 }
0x138c   : > { %v5641_v4 = vpop.permute.xlu1 %5640 }
0x138d   : > { %v5654_v51 = vadd.f32 %v8773_v60, %v5641_v4  ;;  %8782 = vrcp.f32 %v5655_v41  ;;  %v5703_v41 = vld [vmem:[#allocation4 + $0x28] sm:$0xff] }
0x138e   : > { %v5581_v47 = vpop.permute.xlu0 %5580 }
0x138f   : > { %v5597_v5 = vmul.f32 %v5581_v47, %v11115_v42  ;;  %8784 = vrcp.f32 %v5654_v51 }
0x1390   : > { %v5579_v18 = vpop.permute.xlu1 %5578 }
0x1391   : > { %v5596_v23 = vmul.f32 %v5579_v18, %v11117_v19  ;;  %5610 = vrot.lane.b32.xlu0 %v5597_v5, %s11594_s1  ;;  %v5700_v5 = vld [vmem:[#allocation4 + $0x10] sm:$0xff] }
0x1392   : > { %v5585_v26 = vpop.permute.xlu0 %5584  ;;  %v8775_v61 = vpop.eup %8774 }
0x1393   : > { %v5599_v36 = vmul.f32 %v5585_v26, %v11121_v17  ;;  %5608 = vrot.lane.b32.xlu1 %v5596_v23, %s11594_s1 }
0x1394   : > { %v5583_v59 = vpop.permute.xlu1 %5582  ;;  %v8777_v58 = vpop.eup %8776 }
0x1395   : > { %v5598_v31 = vmul.f32 %v5583_v59, %v11125_v35  ;;  %5614 = vrot.lane.b32.xlu0 %v5599_v36, %s11594_s1 }
0x1396   : > { %v5589_v34 = vpop.permute.xlu0 %5588  ;;  %v8779_v14 = vpop.eup %8778 }
0x1397   : > { %v5601_v22 = vmul.f32 %v5589_v34, %v11129_v46  ;;  %5612 = vrot.lane.b32.xlu1 %v5598_v31, %s11594_s1  ;;  %v5702_v31 = vld [vmem:[#allocation4 + $0x20] sm:$0xff] }
0x1398   : > { %v5587_v24 = vpop.permute.xlu1 %5586  ;;  %v8781_v16 = vpop.eup %8780 }
0x1399   : > { %v5600_v62 = vmul.f32 %v5587_v24, %v11133_v6  ;;  %5618 = vrot.lane.b32.xlu0 %v5601_v22, %s11594_s1 }
0x139a   : > { %v8783_v39 = vpop.eup %8782  ;;  %v5551_v8 = vpop.permute.xlu0 %5550 }
0x139b   : > { %5616 = vrot.lane.b32.xlu1 %v5600_v62, %s11594_s1  ;;  %v5567_v50 = vmul.f32 %v5551_v8, %v11115_v42  ;;  %v5701_v42 = vld [vmem:[#allocation4 + $0x18] sm:$0xff]  ;;  %s11597_s1 = sld [smem:[#allocation63_spill]] (!%p7356_p8) }
0x139c   : > { %v8785_v9 = vpop.eup %8784  ;;  %v5549_v48 = vpop.permute.xlu1 %5548 }
0x139d   : > { %5670 = vrot.lane.b32.xlu0 %v8775_v61, %s11595_s23  ;;  %v5566_v53 = vmul.f32 %v5549_v48, %v11117_v19 }
0x139e   : > { %v5555_v7 = vpop.permute.xlu0 %5554 }
0x139f   : > { %5668 = vrot.lane.b32.xlu1 %v8777_v58, %s11595_s23  ;;  %v5569_v2 = vmul.f32 %v5555_v7, %v11121_v17 }
0x13a0   : > { %v5553_v10 = vpop.permute.xlu1 %5552 }
0x13a1   : > { %5674 = vrot.lane.b32.xlu0 %v8779_v14, %s11595_s23  ;;  %v5568_v38 = vmul.f32 %v5553_v10, %v11125_v35 }
0x13a2   : > { %v5559_v49 = vpop.permute.xlu0 %5558 }
0x13a3   : > { %5672 = vrot.lane.b32.xlu1 %v8781_v16, %s11595_s23  ;;  %v5571_v55 = vmul.f32 %v5559_v49, %v11129_v46 }
0x13a4   : > { %v5557_v12 = vpop.permute.xlu1 %5556 }
0x13a5   : > { %5678 = vrot.lane.b32.xlu0 %v8783_v39, %s11595_s23  ;;  %v5570_v35 = vmul.f32 %v5557_v12, %v11133_v6 }
0x13a7   : > { %5676 = vrot.lane.b32.xlu1 %v8785_v9, %s11595_s23  ;;  %s11598_s23 = sld [smem:[#allocation64_spill]] (!%p7356_p8) }
0x13af   : > { %v5712_v21 = vpop.permute.xlu0 %5711 }
0x13b0   : > { %vm5728_vm12 = vcmp.eq.s32.totalorder %v5712_v21, 1 }
0x13b1   : > { %v5715_v29 = vpop.permute.xlu1 %5714 }
0x13b2   : > { %vm5729_vm11 = vcmp.eq.s32.totalorder %v5715_v29, 1 }
0x13b3   : > { %v5718_v11 = vpop.permute.xlu0 %5717 }
0x13b4   : > { %vm5730_vm1 = vcmp.eq.s32.totalorder %v5718_v11, 1 }
0x13b5   : > { %v5721_v54 = vpop.permute.xlu1 %5720 }
0x13b6   : > { %vm5731_vm13 = vcmp.eq.s32.totalorder %v5721_v54, 1 }
0x13b7   : > { %v5724_v13 = vpop.permute.xlu0 %5723 }
0x13b8   : > { %vm5732_vm4 = vcmp.eq.s32.totalorder %v5724_v13, 1 }
0x13b9   : > { %v5727_v27 = vpop.permute.xlu1 %5726 }
0x13ba   : > { %vm5733_vm3 = vcmp.eq.s32.totalorder %v5727_v27, 1 }
0x1403   : > { %v5611_v30 = vpop.permute.xlu0 %5610 }
0x1404   : > { %v5627_v25 = vadd.f32 %v5611_v30, %v5567_v50 }
0x1405   : > { %v5609_v52 = vpop.permute.xlu1 %5608 }
0x1406   : > { %v5626_v63 = vadd.f32 %v5609_v52, %v5566_v53 }
0x1407   : > { %v5615_v43 = vpop.permute.xlu0 %5614 }
0x1408   : > { %v5629_v15 = vadd.f32 %v5615_v43, %v5569_v2 }
0x1409   : > { %v5613_v33 = vpop.permute.xlu1 %5612 }
0x140a   : > { %v5628_v47 = vadd.f32 %v5613_v33, %v5568_v38 }
0x140b   : > { %v5619_v20 = vpop.permute.xlu0 %5618 }
0x140c   : > { %v5631_v56 = vadd.f32 %v5619_v20, %v5571_v55 }
0x140d   : > { %v5617_v60 = vpop.permute.xlu1 %5616 }
0x140e   : > { %v5630_v59 = vadd.f32 %v5617_v60, %v5570_v35 }
0x140f   : > { %v5671_v1 = vpop.permute.xlu0 %5670 }
0x1410   : > { %v5687_v3 = vmul.f32 %v5671_v1, %v5627_v25 }
0x1411   : > { %v5669_v40 = vpop.permute.xlu1 %5668 }
0x1412   : > { %v5735_v28 = vsel %vm5729_vm11, %v5687_v3, %v5699_v0  ;;  %v5686_v4 = vmul.f32 %v5669_v40, %v5626_v63 }
0x1413   : > { %5741 = vst.msk [vmem:[#allocation4 + $0x8] sm:$0xff] %vm4116_vm15, %v5735_v28  ;;  %v5675_v19 = vpop.permute.xlu0 %5674 }
0x1414   : > { %v5734_v45 = vsel %vm5728_vm12, %v5686_v4, %v5698_v37  ;;  %v5689_v17 = vmul.f32 %v5675_v19, %v5629_v15 }
0x1415   : > { %5740 = vst.msk [vmem:[#allocation4] sm:$0xff] %vm4116_vm15, %v5734_v45  ;;  %v5673_v18 = vpop.permute.xlu1 %5672 }
0x1416   : > { %v5737_v23 = vsel %vm5731_vm13, %v5689_v17, %v5701_v42  ;;  %v5688_v26 = vmul.f32 %v5673_v18, %v5628_v47 }
0x1417   : > { %5743 = vst.msk [vmem:[#allocation4 + $0x18] sm:$0xff] %vm4116_vm15, %v5737_v23  ;;  %v5679_v36 = vpop.permute.xlu0 %5678 }
0x1418   : > { %v5736_v46 = vsel %vm5730_vm1, %v5688_v26, %v5700_v5  ;;  %v5691_v51 = vmul.f32 %v5679_v36, %v5631_v56 }
0x1419   : > { %5742 = vst.msk [vmem:[#allocation4 + $0x10] sm:$0xff] %vm4116_vm15, %v5736_v46  ;;  %v5677_v34 = vpop.permute.xlu1 %5676  ;;  %5749 = sbr.rel (%p7356_p8) target bundleno = 6184 (0x1828), region = 256 }
0x141a   : > { %v5739_v22 = vsel %vm5733_vm3, %v5691_v51, %v5703_v41  ;;  %v5690_v24 = vmul.f32 %v5677_v34, %v5630_v59 }
0x141b   : > { %5745 = vst.msk [vmem:[#allocation4 + $0x28] sm:$0xff] %vm4116_vm15, %v5739_v22 }
0x141c   : > { %v5738_v6 = vsel %vm5732_vm4, %v5690_v24, %v5702_v31 }
0x141d   : > { %5744 = vst.msk [vmem:[#allocation4 + $0x20] sm:$0xff] %vm4116_vm15, %v5738_v6 }
0x141e   : > { %v7360_v62 = vld [vmem:[%s11596_s0 + $0x38] sm:$0xff]  ;;  %v9436_v61 = vmov 0.0   ;;  %v7359_v58 = vld [vmem:[%s11596_s0 + $0x30] sm:$0xff]  ;;  %vm9437_vm5 = vmmov 0   ;;  %v5750_v14 = vld [vmem:[#allocation4] sm:$0xff]  ;;  %vm5779_vm6 = vcmask 1041408  }
0x141f   : > { %8155 = vmatprep.subr.mxu1 %v9436_v61  ;;  %8163 = vmatprep.mubr.msk.f32.mxu1 %vm9437_vm5, %v9436_v61  ;;  %v5751_v16 = vld [vmem:[#allocation4 + $0x8] sm:$0xff]  ;;  %v5756_v39 = vld [vmem:[#allocation2] sm:$0xff]  ;;  %v7366_v10 = vld [vmem:[%s11596_s0 + $0x58] sm:$0xff]  ;;  %vm5933_vm0 = vcmask 1043456  }
0x1420   : > { %8156 = vmatpush3.msra.mxu1 %v7360_v62  ;;  %v5757_v9 = vld [vmem:[#allocation2 + $0x8] sm:$0xff]  ;;  %8177 = vmatprep.subr.mxu0 %v9436_v61  ;;  %v5762_v48 = vadd.f32 %v5756_v39, %v5750_v14  ;;  %v7365_v49 = vld [vmem:[%s11596_s0 + $0x50] sm:$0xff]  ;;  %v7357_v12 = vld [vmem:[%s11596_s0 + $0x20] sm:$0xff] }
0x1421   : > { %8157 = vmatprep.subr.mxu1 %v9436_v61  ;;  %v7358_v8 = vld [vmem:[%s11596_s0 + $0x28] sm:$0xff]  ;;  %v5763_v7 = vadd.f32 %v5757_v9, %v5751_v16  ;;  %8185 = vmatprep.mubr.msk.f32.mxu0 %vm9437_vm5, %v9436_v61  ;;  %v5752_v54 = vld [vmem:[#allocation4 + $0x10] sm:$0xff]  ;;  %v5771_v30 = vld [vmem:[%s11596_s0 + $0x18] sm:$0xff] }
0x1422   : > { %8158 = vmatpush3.msra.mxu1 %v7359_v58  ;;  %8178 = vmatpush3.msra.mxu0 %v7366_v10  ;;  %v5780_v21 = vrot.slane %v5762_v48, 6  ;;  %v7364_v11 = vld [vmem:[%s11596_s0 + $0x48] sm:$0xff]  ;;  %v5758_v13 = vld [vmem:[#allocation2 + $0x10] sm:$0xff]  ;;  %v7363_v20 = vld [vmem:[%s11596_s0 + $0x40] sm:$0xff] }
0x1423   : > { %8159 = vmatprep.subr.mxu1 %v9436_v61  ;;  %v5781_v29 = vrot.slane %v5763_v7, 6  ;;  %8179 = vmatprep.subr.mxu0 %v9436_v61  ;;  %v5764_v52 = vadd.f32 %v5758_v13, %v5752_v54  ;;  %v5934_v43 = vrot.slane %v5763_v7, 4  ;;  %v5770_v33 = vld [vmem:[%s11596_s0 + $0x10] sm:$0xff]  ;;  %v5769_v60 = vld [vmem:[%s11596_s0 + $0x8] sm:$0xff]  ;;  %v7376_v25 = vld [vmem:[%s11596_s0 + $0x98] sm:$0xff] }
0x1424   : > { %8160 = vmatpush3.msra.mxu1 %v7358_v8  ;;  %8180 = vmatpush3.msra.mxu0 %v7365_v49  ;;  %v5768_v0 = vld [vmem:[%s11596_s0] sm:$0xff]  ;;  %v7371_v1 = vld [vmem:[%s11596_s0 + $0x78] sm:$0xff]  ;;  %v7375_v2 = vld [vmem:[%s11596_s0 + $0x90] sm:$0xff] }
0x1425   : > { %8161 = vmatprep.subr.mxu1 %v9436_v61  ;;  %v5782_v27 = vsel %vm5779_vm6, %v5780_v21, %v5781_v29  ;;  %8181 = vmatprep.subr.mxu0 %v9436_v61  ;;  %v5935_v50 = vrot.slane %v5764_v52, 4  ;;  %v7370_v63 = vld [vmem:[%s11596_s0 + $0x70] sm:$0xff]  ;;  %v7369_v3 = vld [vmem:[%s11596_s0 + $0x68] sm:$0xff]  ;;  %v5753_v40 = vld [vmem:[#allocation4 + $0x18] sm:$0xff]  ;;  %v6015_v19 = vrot.slane %v5764_v52, 2 }
0x1426   : > { %8162 = vmatpush3.msra.mxu1 %v7357_v12  ;;  %8182 = vmatpush3.msra.mxu0 %v7364_v11  ;;  %v7374_v37 = vld [vmem:[%s11596_s0 + $0x88] sm:$0xff]  ;;  %v5759_v38 = vld [vmem:[#allocation2 + $0x18] sm:$0xff]  ;;  %v5754_v15 = vld [vmem:[#allocation4 + $0x20] sm:$0xff] }
0x1427   : > { %8164 = vmatmul.mubr.msk.f32.vlgmr.msra.gmra.mxu1 %vm4116_vm15, %v5782_v27  ;;  %8166 = vmatprep.subr.mxu1 %v9436_v61  ;;  %v5936_v53 = vsel %vm5933_vm0, %v5934_v43, %v5935_v50  ;;  %v5760_v28 = vld [vmem:[#allocation2 + $0x20] sm:$0xff]  ;;  %v5765_v55 = vadd.f32 %v5759_v38, %v5753_v40  ;;  %v5755_v45 = vld [vmem:[#allocation4 + $0x28] sm:$0xff]  ;;  %v7381_v5 = vld [vmem:[%s11596_s0 + $0xb8] sm:$0xff] }
0x1428   : > { %8167 = vmatpush3.msra.mxu1 %v5771_v30  ;;  %8174 = vmatprep.mubr.msk.f32.mxu1 %vm9437_vm5, %v9436_v61  ;;  %v7373_v4 = vld [vmem:[%s11596_s0 + $0x80] sm:$0xff]  ;;  %v5766_v47 = vadd.f32 %v5760_v28, %v5754_v15  ;;  %v5761_v17 = vld [vmem:[#allocation2 + $0x28] sm:$0xff]  ;;  %v7380_v18 = vld [vmem:[%s11596_s0 + $0xb0] sm:$0xff] }
0x1429   : > { %8168 = vmatprep.subr.mxu1 %v9436_v61  ;;  %8183 = vmatprep.subr.mxu0 %v9436_v61  ;;  %v7368_v42 = vld [vmem:[%s11596_s0 + $0x60] sm:$0xff]  ;;  %v7386_v35 = vld [vmem:[%s11596_s0 + $0xd8] sm:$0xff]  ;;  %v5767_v56 = vadd.f32 %v5761_v17, %v5755_v45  ;;  %v6174_v23 = vrot.slane %v5765_v55, 6  ;;  %v7379_v41 = vld [vmem:[%s11596_s0 + $0xa8] sm:$0xff] }
0x142a   : > { %8169 = vmatpush3.msra.mxu1 %v5770_v33  ;;  %8184 = vmatpush3.msra.mxu0 %v7363_v20  ;;  %v6175_v26 = vrot.slane %v5766_v47, 6  ;;  %v7385_v36 = vld [vmem:[%s11596_s0 + $0xd0] sm:$0xff]  ;;  %v7378_v59 = vld [vmem:[%s11596_s0 + $0xa0] sm:$0xff]  ;;  %v6256_v46 = vrot.slane %v5766_v47, 4  ;;  %v7384_v31 = vld [vmem:[%s11596_s0 + $0xc8] sm:$0xff] }
0x142b   : > { %8170 = vmatprep.subr.mxu1 %v9436_v61  ;;  %8186 = vmatmul.mubr.msk.f32.vlgmr.msra.gmra.mxu0 %vm4116_vm15, %v5936_v53  ;;  %v6257_v51 = vrot.slane %v5767_v56, 4  ;;  %v7383_v22 = vld [vmem:[%s11596_s0 + $0xc0] sm:$0xff]  ;;  %v7391_v24 = vld [vmem:[%s11596_s0 + $0xf8] sm:$0xff]  ;;  %v7390_v62 = vld [vmem:[%s11596_s0 + $0xf0] sm:$0xff]  ;;  %v6337_v16 = vrot.slane %v5767_v56, 2 }
0x142c   : > { %8171 = vmatpush3.msra.mxu1 %v5769_v60  ;;  %8199 = vmatprep.subr.mxu0 %v9436_v61  ;;  %v6176_v34 = vsel %vm5779_vm6, %v6174_v23, %v6175_v26  ;;  %v7389_v58 = vld [vmem:[%s11596_s0 + $0xe8] sm:$0xff]  ;;  %v7388_v14 = vld [vmem:[%s11596_s0 + $0xe0] sm:$0xff]  ;;  %v6451_v39 = vld [vmem:[%s11597_s1 + $0xf8] sm:$0xff]  ;;  %s11599_s0 = sld [smem:[#allocation65_spill]] }
0x142d   : > { %8172 = vmatprep.subr.mxu1 %v9436_v61  ;;  %8200 = vmatpush3.msra.mxu0 %v7376_v25  ;;  %v6258_v6 = vsel %vm5933_vm0, %v6256_v46, %v6257_v51  ;;  %v6450_v9 = vld [vmem:[%s11597_s1 + $0xf0] sm:$0xff]  ;;  %v6449_v8 = vld [vmem:[%s11597_s1 + $0xe8] sm:$0xff]  ;;  %v6447_v7 = vld [vmem:[%s11597_s1 + $0xd8] sm:$0xff] }
0x142e   : > { %8173 = vmatpush3.msra.mxu1 %v5768_v0  ;;  %8201 = vmatprep.subr.mxu0 %v9436_v61  ;;  %v6446_v10 = vld [vmem:[%s11597_s1 + $0xd0] sm:$0xff]  ;;  %v6445_v49 = vld [vmem:[%s11597_s1 + $0xc8] sm:$0xff]  ;;  %v6444_v12 = vld [vmem:[%s11597_s1 + $0xc0] sm:$0xff] }
0x142f   : > { %8175 = vmatmul.mubr.msk.f32.vlgmr.msra.gmra.mxu1 %vm4116_vm15, %v5762_v48  ;;  %8188 = vmatprep.subr.mxu1 %v9436_v61  ;;  %v6448_v48 = vld [vmem:[%s11597_s1 + $0xe0] sm:$0xff]  ;;  %v6443_v21 = vld [vmem:[%s11597_s1 + $0xb8] sm:$0xff]  ;;  %v6442_v29 = vld [vmem:[%s11597_s1 + $0xb0] sm:$0xff] }
0x1430   : > { %8189 = vmatpush3.msra.mxu1 %v7371_v1  ;;  %8202 = vmatpush3.msra.mxu0 %v7375_v2  ;;  %v6441_v11 = vld [vmem:[%s11597_s1 + $0xa8] sm:$0xff]  ;;  %v6440_v54 = vld [vmem:[%s11597_s1 + $0xa0] sm:$0xff]  ;;  %v6439_v13 = vld [vmem:[%s11597_s1 + $0x98] sm:$0xff] }
0x1431   : > { %8190 = vmatprep.subr.mxu1 %v9436_v61  ;;  %8203 = vmatprep.subr.mxu0 %v9436_v61  ;;  %v6438_v27 = vld [vmem:[%s11597_s1 + $0x90] sm:$0xff]  ;;  %v6437_v30 = vld [vmem:[%s11597_s1 + $0x88] sm:$0xff]  ;;  %v6436_v52 = vld [vmem:[%s11597_s1 + $0x80] sm:$0xff] }
0x1432   : > { %8191 = vmatpush3.msra.mxu1 %v7370_v63  ;;  %8196 = vmatprep.mubr.msk.f32.mxu1 %vm9437_vm5, %v9436_v61  ;;  %v6435_v43 = vld [vmem:[%s11597_s1 + $0x78] sm:$0xff]  ;;  %v6434_v33 = vld [vmem:[%s11597_s1 + $0x70] sm:$0xff]  ;;  %v6433_v20 = vld [vmem:[%s11597_s1 + $0x68] sm:$0xff] }
0x1433   : > { %8192 = vmatprep.subr.mxu1 %v9436_v61  ;;  %8204 = vmatpush3.msra.mxu0 %v7374_v37  ;;  %v6432_v50 = vld [vmem:[%s11597_s1 + $0x60] sm:$0xff]  ;;  %v6431_v60 = vld [vmem:[%s11597_s1 + $0x58] sm:$0xff]  ;;  %v6430_v53 = vld [vmem:[%s11597_s1 + $0x50] sm:$0xff] }
0x1434   : > { %8193 = vmatpush3.msra.mxu1 %v7369_v3  ;;  %8205 = vmatprep.subr.mxu0 %v9436_v61  ;;  %v6429_v25 = vld [vmem:[%s11597_s1 + $0x48] sm:$0xff]  ;;  %v6428_v0 = vld [vmem:[%s11597_s1 + $0x40] sm:$0xff]  ;;  %v6427_v1 = vld [vmem:[%s11597_s1 + $0x38] sm:$0xff] }
0x1435   : > { %8194 = vmatprep.subr.mxu1 %v9436_v61  ;;  %8206 = vmatpush3.msra.mxu0 %v7373_v4  ;;  %v6426_v2 = vld [vmem:[%s11597_s1 + $0x30] sm:$0xff]  ;;  %v6425_v63 = vld [vmem:[%s11597_s1 + $0x28] sm:$0xff]  ;;  %v6424_v3 = vld [vmem:[%s11597_s1 + $0x20] sm:$0xff] }
0x1436   : > { %8195 = vmatpush3.msra.mxu1 %v7368_v42  ;;  %8207 = vmatprep.mubr.msk.f32.mxu0 %vm9437_vm5, %v9436_v61  ;;  %v6423_v37 = vld [vmem:[%s11597_s1 + $0x18] sm:$0xff]  ;;  %v6422_v40 = vld [vmem:[%s11597_s1 + $0x10] sm:$0xff]  ;;  %v6421_v38 = vld [vmem:[%s11597_s1 + $0x8] sm:$0xff] }
0x1437   : > { %8197 = vmatmul.mubr.msk.f32.vlgmr.msra.gmra.mxu1 %vm4116_vm15, %v6015_v19  ;;  %8210 = vmatprep.subr.mxu1 %v9436_v61  ;;  %v6420_v15 = vld [vmem:[%s11597_s1] sm:$0xff]  ;;  %v6568_v28 = vld [vmem:[%s11598_s23 + $0xf8] sm:$0xff]  ;;  %v6567_v42 = vld [vmem:[%s11598_s23 + $0xf0] sm:$0xff]  ;;  %s11600_s1 = sld [smem:[#allocation67_spill]] }
0x1438   : > { %8211 = vmatpush3.msra.mxu1 %v7381_v5  ;;  %8208 = vmatmul.mubr.msk.f32.vlgmr.msra.gmra.mxu0 %vm4116_vm15, %v5765_v55  ;;  %v6552_v4 = vld [vmem:[%s11598_s23 + $0x78] sm:$0xff]  ;;  %v6551_v19 = vld [vmem:[%s11598_s23 + $0x70] sm:$0xff]  ;;  %v6566_v55 = vld [vmem:[%s11598_s23 + $0xe8] sm:$0xff] }
0x1439   : > { %8212 = vmatprep.subr.mxu1 %v9436_v61  ;;  %8221 = vmatprep.subr.mxu0 %v9436_v61  ;;  %v6550_v47 = vld [vmem:[%s11598_s23 + $0x68] sm:$0xff]  ;;  %v6565_v45 = vld [vmem:[%s11598_s23 + $0xe0] sm:$0xff]  ;;  %v6564_v5 = vld [vmem:[%s11598_s23 + $0xd8] sm:$0xff] }
0x143a   : > { %8213 = vmatpush3.msra.mxu1 %v7380_v18  ;;  %8222 = vmatpush3.msra.mxu0 %v7386_v35  ;;  %v6549_v17 = vld [vmem:[%s11598_s23 + $0x60] sm:$0xff]  ;;  %v6548_v18 = vld [vmem:[%s11598_s23 + $0x58] sm:$0xff]  ;;  %v6563_v35 = vld [vmem:[%s11598_s23 + $0xd0] sm:$0xff] }
0x143b   : > { %8214 = vmatprep.subr.mxu1 %v9436_v61  ;;  %8223 = vmatprep.subr.mxu0 %v9436_v61  ;;  %v6547_v56 = vld [vmem:[%s11598_s23 + $0x50] sm:$0xff]  ;;  %v6562_v23 = vld [vmem:[%s11598_s23 + $0xc8] sm:$0xff]  ;;  %v6544_v46 = vld [vmem:[%s11598_s23 + $0x38] sm:$0xff] }
0x143c   : > { %8215 = vmatpush3.msra.mxu1 %v7379_v41  ;;  %8224 = vmatpush3.msra.mxu0 %v7385_v36  ;;  %v6546_v26 = vld [vmem:[%s11598_s23 + $0x48] sm:$0xff]  ;;  %v6561_v41 = vld [vmem:[%s11598_s23 + $0xc0] sm:$0xff]  ;;  %v6559_v51 = vld [vmem:[%s11598_s23 + $0xb0] sm:$0xff] }
0x143d   : > { %8216 = vmatprep.subr.mxu1 %v9436_v61  ;;  %8225 = vmatprep.subr.mxu0 %v9436_v61  ;;  %v6545_v36 = vld [vmem:[%s11598_s23 + $0x40] sm:$0xff]  ;;  %v6650_v44 = vld [vmem:[%s11599_s0 + $0x18] sm:$0xff] }
0x143e   : > { %8217 = vmatpush3.msra.mxu1 %v7378_v59  ;;  %8218 = vmatprep.mubr.msk.f32.mxu1 %vm9437_vm5, %v9436_v61  ;;  %v6560_v59 = vld [vmem:[%s11598_s23 + $0xb8] sm:$0xff] }
0x143f   : > { %8226 = vmatpush3.msra.mxu0 %v7384_v31  ;;  %8219 = vmatmul.mubr.msk.f32.vlgmr.msra.gmra.mxu1 %vm4116_vm15, %v6176_v34  ;;  %v6543_v31 = vld [vmem:[%s11598_s23 + $0x30] sm:$0xff]  ;;  %v6558_v34 = vld [vmem:[%s11598_s23 + $0xa8] sm:$0xff] }
0x1440   : > { %8227 = vmatprep.subr.mxu0 %v9436_v61  ;;  %8232 = vmatprep.subr.mxu1 %v9436_v61 }
0x1441   : > { %8228 = vmatpush3.msra.mxu0 %v7383_v22  ;;  %8229 = vmatprep.mubr.msk.f32.mxu0 %vm9437_vm5, %v9436_v61  ;;  %v6542_v22 = vld [vmem:[%s11598_s23 + $0x28] sm:$0xff] }
0x1442   : > { %8233 = vmatpush3.msra.mxu1 %v7391_v24  ;;  %8230 = vmatmul.mubr.msk.f32.vlgmr.msra.gmra.mxu0 %vm4116_vm15, %v6258_v6  ;;  %v6557_v24 = vld [vmem:[%s11598_s23 + $0xa0] sm:$0xff] }
0x1443   : > { %8234 = vmatprep.subr.mxu1 %v9436_v61  ;;  %8240 = vmatprep.mubr.msk.f32.mxu1 %vm9437_vm5, %v9436_v61  ;;  %v6541_v6 = vld [vmem:[%s11598_s23 + $0x20] sm:$0xff] }
0x1444   : > { %8235 = vmatpush3.msra.mxu1 %v7390_v62  ;;  %6528 = vmatprep.mubr.f32.mxu0 %v9436_v61 }
0x1445   : > { %8236 = vmatprep.subr.mxu1 %v9436_v61  ;;  %6464 = vmatprep.subr.mxu0 %v6451_v39 }
0x1446   : > { %8237 = vmatpush3.msra.mxu1 %v7389_v58  ;;  %6465 = vmatpush1.msra.mxu0 %v6450_v9 }
0x1447   : > { %8238 = vmatprep.subr.mxu1 %v9436_v61  ;;  %6466 = vmatprep.subr.mxu0 %v6449_v8 }
0x1448   : > { %8239 = vmatpush3.msra.mxu1 %v7388_v14  ;;  %6467 = vmatpush1.msra.mxu0 %v6448_v48 }
0x1449   : > { %8241 = vmatmul.mubr.msk.f32.vlgmr.msra.gmra.mxu1 %vm4116_vm15, %v6337_v16  ;;  %6468 = vmatprep.subr.mxu0 %v6447_v7  ;;  %vm6828_vm15 = vcmask 816128  }
0x144a   : > { %6469 = vmatpush1.msra.mxu0 %v6446_v10  ;;  %7699 = vmatprep.subr.mxu1 %v6568_v28  ;;  %v6660_v28 = vld [vmem:[%s11599_s0 + $0x68] sm:$0xff] }
0x144b   : > { %6470 = vmatprep.subr.mxu0 %v6445_v49  ;;  %7700 = vmatpush3.msra.mxu1 %v6552_v4  ;;  %v6659_v4 = vld [vmem:[%s11599_s0 + $0x60] sm:$0xff] }
0x144c   : > { %6471 = vmatpush1.msra.mxu0 %v6444_v12  ;;  %7701 = vmatprep.subr.mxu1 %v6567_v42  ;;  %v6658_v42 = vld [vmem:[%s11599_s0 + $0x58] sm:$0xff] }
0x144d   : > { %6472 = vmatprep.subr.mxu0 %v6443_v21  ;;  %7702 = vmatpush3.msra.mxu1 %v6551_v19  ;;  %v6657_v19 = vld [vmem:[%s11599_s0 + $0x50] sm:$0xff] }
0x144e   : > { %6473 = vmatpush1.msra.mxu0 %v6442_v29  ;;  %7703 = vmatprep.subr.mxu1 %v6566_v55  ;;  %v6656_v55 = vld [vmem:[%s11599_s0 + $0x48] sm:$0xff] }
0x144f   : > { %6474 = vmatprep.subr.mxu0 %v6441_v11  ;;  %7704 = vmatpush3.msra.mxu1 %v6550_v47  ;;  %v6655_v47 = vld [vmem:[%s11599_s0 + $0x40] sm:$0xff] }
0x1450   : > { %6475 = vmatpush1.msra.mxu0 %v6440_v54  ;;  %7705 = vmatprep.subr.mxu1 %v6565_v45  ;;  %v6654_v45 = vld [vmem:[%s11599_s0 + $0x38] sm:$0xff] }
0x1451   : > { %6476 = vmatprep.subr.mxu0 %v6439_v13  ;;  %7706 = vmatpush3.msra.mxu1 %v6549_v17  ;;  %v6653_v17 = vld [vmem:[%s11599_s0 + $0x30] sm:$0xff] }
0x1452   : > { %6477 = vmatpush1.msra.mxu0 %v6438_v27  ;;  %7707 = vmatprep.subr.mxu1 %v6564_v5  ;;  %v6652_v5 = vld [vmem:[%s11599_s0 + $0x28] sm:$0xff] }
0x1453   : > { %6478 = vmatprep.subr.mxu0 %v6437_v30  ;;  %7708 = vmatpush3.msra.mxu1 %v6548_v18  ;;  %v6452_v18 = vld [vmem:[#allocation20] sm:$0x3] }
0x1454   : > { %6479 = vmatpush1.msra.mxu0 %v6436_v52  ;;  %7709 = vmatprep.subr.mxu1 %v6563_v35  ;;  %v6457_v35 = vrot.slane %v6452_v18, %v10642_v57  ;;  %v6651_v57 = vld [vmem:[%s11599_s0 + $0x20] sm:$0xff] }
0x1455   : > { %6480 = vmatprep.subr.mxu0 %v6435_v43  ;;  %7710 = vmatpush3.msra.mxu1 %v6547_v56  ;;  %v6461_v56 = vrot.slane %v6452_v18, %v4112_v32  ;;  %v6649_v32 = vld [vmem:[%s11599_s0 + $0x10] sm:$0xff] }
0x1456   : > { %6481 = vmatpush1.msra.mxu0 %v6434_v33  ;;  %7711 = vmatprep.subr.mxu1 %v6562_v23  ;;  %v7393_v33 = vld [vmem:[#allocation19] ss:$0 sm:$0xff] }
0x1457   : > { %6482 = vmatprep.subr.mxu0 %v6433_v20  ;;  %7712 = vmatpush3.msra.mxu1 %v6546_v26 }
0x1458   : > { %6483 = vmatpush1.msra.mxu0 %v6432_v50  ;;  %7713 = vmatprep.subr.mxu1 %v6561_v41 }
0x1459   : > { %6484 = vmatprep.subr.mxu0 %v6431_v60  ;;  %7714 = vmatpush3.msra.mxu1 %v6545_v36 }
0x145a   : > { %6485 = vmatpush1.msra.mxu0 %v6430_v53  ;;  %7715 = vmatprep.subr.mxu1 %v6560_v59 }
0x145b   : > { %6486 = vmatprep.subr.mxu0 %v6429_v25  ;;  %7716 = vmatpush3.msra.mxu1 %v6544_v46  ;;  %v6556_v25 = vld [vmem:[%s11598_s23 + $0x98] sm:$0xff] }
0x145c   : > { %6487 = vmatpush1.msra.mxu0 %v6428_v0  ;;  %7717 = vmatprep.subr.mxu1 %v6559_v51  ;;  %v6540_v0 = vld [vmem:[%s11598_s23 + $0x18] sm:$0xff]  ;;  %v6648_v51 = vld [vmem:[%s11599_s0 + $0x8] sm:$0xff] }
0x145d   : > { %6488 = vmatprep.subr.mxu0 %v6427_v1  ;;  %7718 = vmatpush3.msra.mxu1 %v6543_v31  ;;  %v6555_v1 = vld [vmem:[%s11598_s23 + $0x90] sm:$0xff]  ;;  %v6647_v31 = vld [vmem:[%s11599_s0] sm:$0xff] }
0x145e   : > { %6489 = vmatpush1.msra.mxu0 %v6426_v2  ;;  %7719 = vmatprep.subr.mxu1 %v6558_v34  ;;  %v6539_v2 = vld [vmem:[%s11598_s23 + $0x10] sm:$0xff]  ;;  %v6747_v34 = vld [vmem:[%s11600_s1 + $0x38] sm:$0xff] }
0x145f   : > { %6490 = vmatprep.subr.mxu0 %v6425_v63  ;;  %7720 = vmatpush3.msra.mxu1 %v6542_v22  ;;  %v6554_v63 = vld [vmem:[%s11598_s23 + $0x88] sm:$0xff]  ;;  %v6746_v22 = vld [vmem:[%s11600_s1 + $0x30] sm:$0xff] }
0x1460   : > { %6491 = vmatpush1.msra.mxu0 %v6424_v3  ;;  %7721 = vmatprep.subr.mxu1 %v6557_v24  ;;  %v6538_v3 = vld [vmem:[%s11598_s23 + $0x8] sm:$0xff] }
0x1461   : > { %6492 = vmatprep.subr.mxu0 %v6423_v37  ;;  %7722 = vmatpush3.msra.mxu1 %v6541_v6  ;;  %v6553_v37 = vld [vmem:[%s11598_s23 + $0x80] sm:$0xff]  ;;  %v6745_v24 = vld [vmem:[%s11600_s1 + $0x28] sm:$0xff] }
0x1462   : > { %6493 = vmatpush1.msra.mxu0 %v6422_v40  ;;  %7723 = vmatprep.subr.mxu1 %v6556_v25  ;;  %v6537_v40 = vld [vmem:[%s11598_s23] sm:$0xff] }
0x1463   : > { %6494 = vmatprep.subr.mxu0 %v6421_v38  ;;  %7724 = vmatpush3.msra.mxu1 %v6540_v0  ;;  %v6662_v38 = vld [vmem:[%s11599_s0 + $0x78] sm:$0xff]  ;;  %v6744_v6 = vld [vmem:[%s11600_s1 + $0x20] sm:$0xff] }
0x1464   : > { %6495 = vmatpush1.msra.mxu0 %v6420_v15  ;;  %7725 = vmatprep.subr.mxu1 %v6555_v1  ;;  %v6661_v15 = vld [vmem:[%s11599_s0 + $0x70] sm:$0xff] }
0x1465   : > { %8243 = vmatprep.subr.mxu0 %v9436_v61  ;;  %7726 = vmatpush3.msra.mxu1 %v6539_v2 }
0x1466   : > { %7727 = vmatprep.subr.mxu1 %v6554_v63 }
0x1467   : > { %7728 = vmatpush3.msra.mxu1 %v6538_v3 }
0x1468   : > { %7729 = vmatprep.subr.mxu1 %v6553_v37 }
0x1469   : > { %7730 = vmatpush3.msra.mxu1 %v6537_v40 }
0x146a   : > { %8278 = vmatprep.subr.mxu1 %v9436_v61 }
0x14e7   : > { %v5851_v62 = vpop.f32.mrf.mxu1 }
0x14e9   : > { %v8165_v58 = vpop.f32.mrf.mxu1 }
0x14ea   : > { %v6742_v58 = vld [vmem:[%s11600_s1 + $0x10] sm:$0xff] }
0x14eb   : > { %v6005_v14 = vpop.f32.mrf.mxu0 }
0x14ed   : > { %v8187_v16 = vpop.f32.mrf.mxu0 }
0x14ee   : > { %v7394_v16 = vld [vmem:[#allocation22] ss:$0 sm:$0xff] }
0x14ef   : > { %v5923_v39 = vpop.f32.mrf.mxu1 }
0x14f0   : > { %v5924_v48 = vadd.f32 %v5923_v39, %v5851_v62  ;;  %v6743_v62 = vld [vmem:[%s11600_s1 + $0x18] sm:$0xff] }
0x14f1   : > { %v8176_v9 = vpop.f32.mrf.mxu1 }
0x14f2   : > { %v6009_v12 = vadd.f32 %v6005_v14, %v5924_v48 }
0x14f7   : > { %v6084_v8 = vpop.f32.mrf.mxu1 }
0x14f8   : > { %v6163_v7 = vpop.f32.mrf.mxu0  ;;  %v6088_v21 = vadd.f32 %v6084_v8, %v6009_v12 }
0x14f9   : > { %v8198_v10 = vpop.f32.mrf.mxu1 }
0x14fa   : > { %v8209_v49 = vpop.f32.mrf.mxu0  ;;  %v6167_v54 = vadd.f32 %v6163_v7, %v6088_v21  ;;  %v6741_v7 = vld [vmem:[%s11600_s1 + $0x8] sm:$0xff]  ;;  %v6740_v10 = vld [vmem:[%s11600_s1] sm:$0xff] }
0x14fb   : > { %v7395_v49 = vld [vmem:[#allocation23] ss:$0 sm:$0xff] }
0x14ff   : > { %v6245_v29 = vpop.f32.mrf.mxu1 }
0x1500   : > { %v6249_v27 = vadd.f32 %v6245_v29, %v6167_v54 }
0x1501   : > { %v8220_v11 = vpop.f32.mrf.mxu1 }
0x1502   : > { %v6327_v13 = vpop.f32.mrf.mxu0  ;;  %v7396_v11 = vld [vmem:[#allocation25] ss:$0 sm:$0xff] }
0x1503   : > { %v6331_v52 = vadd.f32 %v6327_v13, %v6249_v27 }
0x1504   : > { %v8231_v30 = vpop.f32.mrf.mxu0 }
0x1509   : > { %v6406_v43 = vpop.f32.mrf.mxu1 }
0x150a   : > { %v6410_v20 = vadd.f32 %v6406_v43, %v6331_v52 }
0x150b   : > { %v8242_v50 = vpop.f32.mrf.mxu1 }
0x150c   : > { %v6418_v60 = vadd.f32 %v7393_v33, %v6410_v20 }
0x150e   : > { %v6419_v53 = vmax.f32 %v6418_v60, 0.0 }
0x1510   : > { %6529 = vmatmul.mubr.f32.vlgmr.msra.gmra.mxu0 %v6419_v53 }
0x1511   : > { %8275 = vmatprep.mubr.msk.f32.mxu0 %vm9437_vm5, %v9436_v61  ;;  %8244 = vmatpush3.msra.mxu0 %v6662_v38 }
0x1512   : > { %8245 = vmatprep.subr.mxu0 %v9436_v61 }
0x1513   : > { %8246 = vmatpush3.msra.mxu0 %v6661_v15 }
0x1514   : > { %8247 = vmatprep.subr.mxu0 %v9436_v61 }
0x1515   : > { %8248 = vmatpush3.msra.mxu0 %v6660_v28 }
0x1516   : > { %8249 = vmatprep.subr.mxu0 %v9436_v61 }
0x1517   : > { %8250 = vmatpush3.msra.mxu0 %v6659_v4 }
0x1518   : > { %8251 = vmatprep.subr.mxu0 %v9436_v61 }
0x1519   : > { %8252 = vmatpush3.msra.mxu0 %v6658_v42 }
0x151a   : > { %8253 = vmatprep.subr.mxu0 %v9436_v61 }
0x151b   : > { %8254 = vmatpush3.msra.mxu0 %v6657_v19 }
0x151c   : > { %8255 = vmatprep.subr.mxu0 %v9436_v61 }
0x151d   : > { %8256 = vmatpush3.msra.mxu0 %v6656_v55 }
0x151e   : > { %8257 = vmatprep.subr.mxu0 %v9436_v61 }
0x151f   : > { %8258 = vmatpush3.msra.mxu0 %v6655_v47 }
0x1520   : > { %8259 = vmatprep.subr.mxu0 %v9436_v61 }
0x1521   : > { %8260 = vmatpush3.msra.mxu0 %v6654_v45 }
0x1522   : > { %8261 = vmatprep.subr.mxu0 %v9436_v61 }
0x1523   : > { %8262 = vmatpush3.msra.mxu0 %v6653_v17 }
0x1524   : > { %8263 = vmatprep.subr.mxu0 %v9436_v61 }
0x1525   : > { %8264 = vmatpush3.msra.mxu0 %v6652_v5 }
0x1526   : > { %8265 = vmatprep.subr.mxu0 %v9436_v61 }
0x1527   : > { %8266 = vmatpush3.msra.mxu0 %v6651_v57 }
0x1528   : > { %8267 = vmatprep.subr.mxu0 %v9436_v61 }
0x1529   : > { %8268 = vmatpush3.msra.mxu0 %v6650_v44 }
0x152a   : > { %8269 = vmatprep.subr.mxu0 %v9436_v61 }
0x152b   : > { %8270 = vmatpush3.msra.mxu0 %v6649_v32 }
0x152c   : > { %8271 = vmatprep.subr.mxu0 %v9436_v61 }
0x152d   : > { %8272 = vmatpush3.msra.mxu0 %v6648_v51 }
0x152e   : > { %8273 = vmatprep.subr.mxu0 %v9436_v61 }
0x152f   : > { %8274 = vmatpush3.msra.mxu0 %v6647_v31 }
0x15d0   : > { %v6530_v23 = vpop.f32.mrf.mxu0 }
0x15d1   : > { %v6531_v26 = vadd.f32 %v6530_v23, %v6457_v35 }
0x15d2   : > { %v6532_v41 = vpop.f32.mrf.mxu0 }
0x15d3   : > { %v6533_v36 = vadd.f32 %v6532_v41, %v6461_v56  ;;  %v6535_v46 = vmax.f32 %v6531_v26, 0.0 }
0x15d5   : > { %v6536_v59 = vmax.f32 %v6533_v36, 0.0 }
0x15d7   : > { %6640 = vmatprep.mubr.f32.mxu1 %v6536_v59 }
0x15d8   : > { %6641 = vmatmul.mubr.f32.vlgmr.msra.gmra.mxu1 %v6535_v46 }
0x15d9   : > { %8294 = vmatprep.mubr.msk.f32.mxu1 %vm9437_vm5, %v9436_v61  ;;  %8279 = vmatpush3.msra.mxu1 %v6747_v34 }
0x15da   : > { %8280 = vmatprep.subr.mxu1 %v9436_v61 }
0x15db   : > { %8281 = vmatpush3.msra.mxu1 %v6746_v22 }
0x15dc   : > { %8282 = vmatprep.subr.mxu1 %v9436_v61 }
0x15dd   : > { %8283 = vmatpush3.msra.mxu1 %v6745_v24 }
0x15de   : > { %8284 = vmatprep.subr.mxu1 %v9436_v61 }
0x15df   : > { %8285 = vmatpush3.msra.mxu1 %v6744_v6 }
0x15e0   : > { %8286 = vmatprep.subr.mxu1 %v9436_v61 }
0x15e1   : > { %8287 = vmatpush3.msra.mxu1 %v6743_v62 }
0x15e2   : > { %8288 = vmatprep.subr.mxu1 %v9436_v61 }
0x15e3   : > { %8289 = vmatpush3.msra.mxu1 %v6742_v58 }
0x15e4   : > { %8290 = vmatprep.subr.mxu1 %v9436_v61 }
0x15e5   : > { %8291 = vmatpush3.msra.mxu1 %v6741_v7 }
0x15e6   : > { %8292 = vmatprep.subr.mxu1 %v9436_v61 }
0x15e7   : > { %8293 = vmatpush3.msra.mxu1 %v6740_v10 }
0x1698   : > { %v7731_v14 = vpop.f32.mrf.mxu1 }
0x169a   : > { %v7732_v39 = vpop.f32.mrf.mxu1 }
0x169b   : > { %v7733_v9 = vadd.f32 %v7732_v39, %v7731_v14 }
0x169d   : > { %v6643_v8 = vadd.f32 %v7733_v9, %v7394_v16 }
0x169f   : > { %v6646_v48 = vmax.f32 %v6643_v8, 0.0 }
0x16a1   : > { %8276 = vmatmul.mubr.f32.vlgmr.msra.gmra.mxu0 %v6646_v48 }
0x1761   : > { %v6736_v12 = vpop.f32.mrf.mxu0 }
0x1762   : > { %v6737_v21 = vadd.f32 %v7395_v49, %v6736_v12 }
0x1763   : > { %v8277_v29 = vpop.f32.mrf.mxu0 }
0x1764   : > { %8295 = vmatmul.mubr.msk.f32.vlgmr.msra.gmra.mxu1 %vm5219_vm14, %v6737_v21 }
0x1824   : > { %v6824_v54 = vpop.f32.mrf.mxu1 }
0x1825   : > { %v6825_v13 = vadd.f32 %v7396_v11, %v6824_v54 }
0x1826   : > { %v8296_v27 = vpop.f32.mrf.mxu1 }
0x1827   : > { %6829 = vst.msk [vmem:[%s11601_s3] sm:$0x3f] %vm6828_vm15, %v6825_v13 }
0x1828 PF: > { %p8468_p9 = scmp.eq.s32.totalorder %s9668_s18, 7  ;;  %s9438_s0 = smov [#allocation34]  }
0x1829   : > { %s6842_s2 = sshll.u32 %s9438_s0, 4  ;;  %s6843_s2 = int_to_ptr.vmem [resolvable:$true] %s6842_s2 }
0x182a   : > { %s9254_s1 = scalar_lea.vmem %s6843_s2, 768  ;;  %p9261_p13 = scmp.lt.s32.totalorder %s6843_s2, %s6843_s2 }
0x182b   : > { %p9255_p10 = scmp.ne.s32.totalorder %s6843_s2, %s9254_s1  ;;  %p9262_p0 = scmp.lt.s32.totalorder %s9254_s1, %s9254_s1 }
0x182d   : > { %p9256_p11 = pnand %p9255_p10, %p8468_p9  ;;  %p9263_p1 = por %p9262_p0, %p9261_p13 }
0x182f   : > { %p9257_p12 = pneg %p9256_p11 }
0x1831   : > { %p9264_p3 = pnand %p9263_p1, %p9257_p12 }
0x1833   : > { %9267 = shalt.err (!%p9264_p3)
}
0x1834   : > { %s9439_s5 = smov 128   ;;  %s9440_s3 = smov 8  }
0x1835   : > { %8370 = dma.vmem_to_hbm [thread:$0]  (%p8468_p9), %s6843_s2, 768, %s9655_s4, [#allocation7], %s9439_s5, %s9439_s5, %s9440_s3  }
0x1836   : > { %s9441_s6 = smov [#allocation35]  }
0x1837   : > { %s6855_s0 = sshll.u32 %s9441_s6, 4  ;;  %s6856_s0 = int_to_ptr.vmem [resolvable:$true] %s6855_s0 }
0x1838   : > { %s9278_s7 = scalar_lea.vmem %s6856_s0, 768  ;;  %p9285_p6 = scmp.lt.s32.totalorder %s6856_s0, %s6856_s0 }
0x1839   : > { %p9279_p7 = scmp.ne.s32.totalorder %s6856_s0, %s9278_s7  ;;  %p9286_p5 = scmp.lt.s32.totalorder %s9278_s7, %s9278_s7 }
0x183b   : > { %p9280_p2 = pnand %p9279_p7, %p8468_p9  ;;  %p9287_p8 = por %p9286_p5, %p9285_p6 }
0x183d   : > { %p9281_p4 = pneg %p9280_p2 }
0x183f   : > { %p9288_p10 = pnand %p9287_p8, %p9281_p4 }
0x1841   : > { %9291 = shalt.err (!%p9288_p10)
}
0x1842   : > { %8372 = dma.vmem_to_hbm [thread:$0]  (%p8468_p9), %s6856_s0, 768, %s9660_s13, [#allocation36], %s9439_s5, %s9439_s5, %s9440_s3  }
0x1843   : > { %9347 = dma.done.wait (%p8468_p9), [#allocation7], 768  }
0x1844   : > { %9349 = vsyncadd (%p8468_p9), [#allocation7], 4294966528 }
0x1845   : > { %9351 = dma.done.wait (%p8468_p9), [#allocation36], 768  }
0x1846   : > { %9353 = vsyncadd (%p8468_p9), [#allocation36], 4294966528 }
0x1847 PF: > { %s108_s15 = sadd.s32 1, %s9356_s15  }
0x1848   : > { %p105_p11 = scmp.ge.s32.totalorder %s108_s15, 10  }
0x184a   :  { %107 = sbr.rel (!%p105_p11) target bundleno = 87 (0x57), region = 360 }
0x184f   :  { %6881 = vsyncpa [#allocation6], 1 }
0x1850   :  { %6883 = vsyncpa [#allocation6 + $0x1], 1 }
0x1851   :  { %6884 = vsyncpa [#allocation9], 1 }
0x1852   :  { %6885 = vsyncpa [#allocation12], 1 }
0x1853   :  { %6886 = vsyncpa [#allocation15], 1 }
0x1854   :  { %6887 = vsyncpa [#allocation18], 1 }
0x1855   :  { %6888 = vsyncpa [#allocation21], 1 }
0x1856   :  { %6889 = vsyncpa [#allocation24], 1 }
0x1857   :  { %6890 = vsyncpa [#allocation27], 1 }
0x1858   :  { %6891 = vsyncpa [#allocation30], 1 }
0x1859   :  { %6892 = vsyncpa [#allocation33], 1 }
0x185a   :  { %6893 = vsyncpa [#allocation7], 1 }
0x185b   :  { %6895 = vsyncpa [#allocation7 + $0x1], 1 }
0x185c   :  { %6896 = vsyncpa [#allocation36], 1 }

</bundles_post_ra>
